<compile_context>
chip_gen: v6e
topology: v6e:2x2x1
jax: 0.10.0
libtpu: 0.0.40
codegen_flags: <defaults>
</compile_context>

<pallas_src>
import functools

import jax
import jax.numpy as jnp
from jax.experimental import pallas as pl
from jax.experimental.pallas import tpu as pltpu


def _round_up(x, m):
    return ((x + m - 1) // m) * m


# ----------------------------------------------------------------------------
# Pallas kernels
# ----------------------------------------------------------------------------

def matmul_bias_relu_kernel(x_ref, w_ref, b_ref, o_ref):
    """o = relu(x @ w + b) -- conv body layers via im2col matmul."""
    acc = jnp.dot(x_ref[...], w_ref[...], preferred_element_type=jnp.float32)
    o_ref[...] = jnp.maximum(acc + b_ref[...], 0.0)


def gru_head_kernel(feats_ref, hx_ref, wih_ref, bih_ref, whh_ref, bhh_ref,
                    whead_ref, bhead_ref, probs_ref, hfin_ref,
                    gi_scr, out_scr, *, seq, batch_p, hidden_p, atoms,
                    num_actions):
    """Fused GRU (1 layer, batch_first) + dueling categorical heads.

    Shapes (already padded lane/sublane-dense by the wrapper):
      feats_ref : (S*Bp, Fp)     time-major flattened conv features
      hx_ref    : (1, Bp, Hp)    initial hidden
      wih_ref   : (Fp, 3*Hp)     fused [r|z|n] input weights
      whh_ref   : (Hp, 3*Hp)     fused [r|z|n] hidden weights
      whead_ref : (Hp, K + A*K)  fused [val | adv_0..adv_{A-1}] head weights
      probs_ref : (S*Bp, A*K)    per-action atom distributions (lane-dense)
      hfin_ref  : (1, Bp, Hp)    final hidden
    """
    Hp, K, A, Bp = hidden_p, atoms, num_actions, batch_p

    # (1) Hoisted input projection: ONE matmul for all time steps and gates.
    gi_scr[...] = (jnp.dot(feats_ref[...], wih_ref[...],
                           preferred_element_type=jnp.float32) + bih_ref[...])

    whh = whh_ref[...]
    bhh = bhh_ref[...]

    # (2) Sequential recurrence (fully unrolled): only h @ W_hh stays serial.
    #     Gate order follows PyTorch nn.GRU: [r, z, n].
    h = hx_ref[0]                                              # (Bp, Hp)
    for t in range(seq):
        lo = t * Bp                                            # sublane-aligned
        gi_t = gi_scr[lo:lo + Bp, :]                           # (Bp, 3Hp)
        gh = jnp.dot(h, whh, preferred_element_type=jnp.float32) + bhh
        r = jax.nn.sigmoid(gi_t[:, :Hp] + gh[:, :Hp])
        z = jax.nn.sigmoid(gi_t[:, Hp:2 * Hp] + gh[:, Hp:2 * Hp])
        n = jnp.tanh(gi_t[:, 2 * Hp:] + r * gh[:, 2 * Hp:])
        h = (1.0 - z) * n + z * h
        out_scr[lo:lo + Bp, :] = h
    hfin_ref[0] = h                     # final hidden written exactly once

    # (3) Dueling categorical heads: one fused matmul + vectorized softmax.
    zh = jnp.dot(out_scr[...], whead_ref[...],
                 preferred_element_type=jnp.float32) + bhead_ref[...]
    val = zh[:, :K]
    advs = [zh[:, K + a * K:K + (a + 1) * K] for a in range(A)]
    adv_mean = advs[0]
    for a in range(1, A):
        adv_mean = adv_mean + advs[a]
    adv_mean = adv_mean * (1.0 / float(A))

    for a in range(A):
        logits = val + advs[a] - adv_mean
        m = jnp.max(logits, axis=-1, keepdims=True)
        e = jnp.exp(logits - m)
        inv = pl.reciprocal(jnp.sum(e, axis=-1, keepdims=True), approx=True)
        probs_ref[:, a * K:(a + 1) * K] = e * inv


# ----------------------------------------------------------------------------
# Wrappers (glue: reshapes / im2col / weight re-layout)
# ----------------------------------------------------------------------------

def conv_layer_nhwc(x, w, b, stride):
    """Conv2d(valid, OIHW weights) + ReLU via im2col + Pallas matmul.

    x is NHWC and the output stays NHWC (no per-layer layout ping-pong)."""
    n, h, wd, cin = x.shape
    cout, _, kh, kw = w.shape
    oh = (h - kh) // stride + 1
    ow = (wd - kw) // stride + 1

    patches = []
    for i in range(kh):
        for j in range(kw):
            patches.append(x[:, i:i + stride * (oh - 1) + 1:stride,
                              j:j + stride * (ow - 1) + 1:stride, :])
    p = jnp.stack(patches, axis=3)                       # (n, oh, ow, kh*kw, cin)
    p = p.reshape(n * oh * ow, kh * kw * cin)

    w2 = w.transpose(2, 3, 1, 0).reshape(kh * kw * cin, cout)   # (kh,kw,cin)->rows
    b2 = b.reshape(1, cout)

    # Small enough for a single whole-array block; for larger images add a row
    # grid with dimension_semantics=("parallel",) (shards across v7x's 2 TCs).
    out = pl.pallas_call(
        matmul_bias_relu_kernel,
        out_shape=jax.ShapeDtypeStruct((n * oh * ow, cout), jnp.float32),
    )(p, w2, b2)
    return out.reshape(n, oh, ow, cout)


def gru_dueling_forward(feats, hx, w_ih, w_hh, b_ih, b_hh,
                        w_adv, b_adv, w_val, b_val):
    """feats: (B, S, F) conv features (NHWC-flattened; w_ih already permuted).

    Returns (probs (B, S, A, K), hidden (1, B, H))."""
    B, S, F = feats.shape
    H = w_hh.shape[1]
    K = w_val.shape[0]
    A = w_adv.shape[0] // K

    Hp = _round_up(H, 128)        # lane-dense hidden; zero-padding is exact
    Fp = _round_up(F, 128)
    Bp = _round_up(B, 8)          # sublane granularity

    # Time-major, batch/feature-padded input rows: (S*Bp, Fp).
    feats_t = jnp.transpose(feats, (1, 0, 2))
    feats_t = jnp.pad(feats_t, ((0, 0), (0, Bp - B), (0, Fp - F)))
    feats_t = feats_t.reshape(S * Bp, Fp)

    # Fused + padded gate weights; columns ordered gate-major [r | z | n].
    def gate_pad(w, in_dim, in_pad):
        w3 = w.reshape(3, H, in_dim)
        w3p = jnp.zeros((3, Hp, in_pad), jnp.float32).at[:, :H, :in_dim].set(w3)
        return w3p.transpose(2, 0, 1).reshape(in_pad, 3 * Hp)

    def bias_pad(bvec):
        b3 = bvec.reshape(3, H)
        return jnp.zeros((3, Hp), jnp.float32).at[:, :H].set(b3).reshape(1, 3 * Hp)

    wih_p = gate_pad(w_ih, F, Fp)
    whh_p = gate_pad(w_hh, H, Hp)
    bih_p = bias_pad(b_ih)
    bhh_p = bias_pad(b_hh)

    # Fused dueling head weights: columns = [val(K) | adv(A*K)].
    w_head = jnp.zeros((Hp, K + A * K), jnp.float32).at[:H, :].set(
        jnp.concatenate([w_val.T, w_adv.T], axis=1))
    b_head = jnp.concatenate([b_val, b_adv]).reshape(1, K + A * K)

    if hx is None:
        hx_p = jnp.zeros((1, Bp, Hp), jnp.float32)          # init_hidden
    else:
        hx_p = jnp.zeros((1, Bp, Hp), jnp.float32).at[:, :B, :H].set(hx)

    kernel = functools.partial(gru_head_kernel, seq=S, batch_p=Bp, hidden_p=Hp,
                               atoms=K, num_actions=A)

    probs_flat, hfin_p = pl.pallas_call(
        kernel,
        out_shape=(jax.ShapeDtypeStruct((S * Bp, A * K), jnp.float32),
                   jax.ShapeDtypeStruct((1, Bp, Hp), jnp.float32)),
        scratch_shapes=[pltpu.VMEM((S * Bp, 3 * Hp), jnp.float32),   # gi
                        pltpu.VMEM((S * Bp, Hp), jnp.float32)],      # GRU out
    )(feats_t, hx_p, wih_p, bih_p, whh_p, bhh_p, w_head, b_head)

    probs = probs_flat.reshape(S, Bp, A, K)[:, :B].transpose(1, 0, 2, 3)
    return probs, hfin_p[:, :B, :H]


def categorical_dueling_drqn_forward(input_seq, params, hx=None):
    """input_seq: (B, S, C, H, W) float32. Returns (probs (B,S,A,K), hidden (1,B,H))."""
    B, S = input_seq.shape[:2]
    x = input_seq.reshape((B * S,) + input_seq.shape[2:])      # (-1,) + inputShape
    x = jnp.transpose(x, (0, 2, 3, 1))                         # NHWC internally

    f = conv_layer_nhwc(x, params['conv1_w'], params['conv1_b'], stride=1)
    f = conv_layer_nhwc(f, params['conv2_w'], params['conv2_b'], stride=2)
    f = conv_layer_nhwc(f, params['conv3_w'], params['conv3_b'], stride=2)
    n, oh, ow, cc = f.shape
    feats = f.reshape(B, S, oh * ow * cc)                      # NHWC flatten

    # Fold the PyTorch NCHW-flatten -> NHWC-flatten layout change into the GRU
    # input weight (tiny, done once) instead of transposing activations.
    H = params['gru_w_hh'].shape[1]
    w_ih = params['gru_w_ih'].reshape(3 * H, cc, oh, ow)
    w_ih = w_ih.transpose(0, 2, 3, 1).reshape(3 * H, oh * ow * cc)

    return gru_dueling_forward(
        feats, hx, w_ih, params['gru_w_hh'], params['gru_b_ih'],
        params['gru_b_hh'], params['adv_w'], params['adv_b'],
        params['val_w'], params['val_b'])


# ----------------------------------------------------------------------------
# Deterministic parameter init (PyTorch-style uniform fan-in scaling)
# ----------------------------------------------------------------------------

def _conv_out(n, k, s):
    return (n - k) // s + 1


def init_params(key, in_channels, img_hw, hidden, num_actions, atoms):
    h, w = img_hw
    keys = jax.random.split(key, 14)

    def u(k, shape, fan_in):
        bound = 1.0 / float(fan_in) ** 0.5
        return jax.random.uniform(k, shape, jnp.float32, -bound, bound)

    p = {}
    p['conv1_w'] = u(keys[0], (16, in_channels, 3, 3), in_channels * 9)
    p['conv1_b'] = u(keys[1], (16,), in_channels * 9)
    p['conv2_w'] = u(keys[2], (32, 16, 3, 3), 16 * 9)
    p['conv2_b'] = u(keys[3], (32,), 16 * 9)
    p['conv3_w'] = u(keys[4], (32, 32, 3, 3), 32 * 9)
    p['conv3_b'] = u(keys[5], (32,), 32 * 9)

    oh = _conv_out(_conv_out(_conv_out(h, 3, 1), 3, 2), 3, 2)
    ow = _conv_out(_conv_out(_conv_out(w, 3, 1), 3, 2), 3, 2)
    feat = 32 * oh * ow                                   # body.feature_size()

    p['gru_w_ih'] = u(keys[6], (3 * hidden, feat), hidden)
    p['gru_w_hh'] = u(keys[7], (3 * hidden, hidden), hidden)
    p['gru_b_ih'] = u(keys[8], (3 * hidden,), hidden)
    p['gru_b_hh'] = u(keys[9], (3 * hidden,), hidden)

    p['adv_w'] = u(keys[10], (num_actions * atoms, hidden), hidden)
    p['adv_b'] = u(keys[11], (num_actions * atoms,), hidden)
    p['val_w'] = u(keys[12], (atoms, hidden), hidden)
    p['val_b'] = u(keys[13], (atoms,), hidden)
    return p, feat


# ----------------------------------------------------------------------------
# Pure-JAX reference (for numerical verification of the Pallas path)
# ----------------------------------------------------------------------------

def reference_forward(input_seq, params, hx):
    B, S = input_seq.shape[:2]
    x = input_seq.reshape((B * S,) + input_seq.shape[2:])
    hp = jax.lax.Precision.HIGHEST

    def conv(xc, w, b, stride):
        y = jax.lax.conv_general_dilated(
            xc, w, window_strides=(stride, stride), padding='VALID',
            dimension_numbers=('NCHW', 'OIHW', 'NCHW'), precision=hp)
        return jnp.maximum(y + b[None, :, None, None], 0.0)

    f = conv(x, params['conv1_w'], params['conv1_b'], 1)
    f = conv(f, params['conv2_w'], params['conv2_b'], 2)
    f = conv(f, params['conv3_w'], params['conv3_b'], 2)
    feats = f.reshape(B, S, -1)

    H = params['gru_w_hh'].shape[1]
    wih, whh = params['gru_w_ih'], params['gru_w_hh']
    bih, bhh = params['gru_b_ih'], params['gru_b_hh']

    def step(h, x_t):
        gi = jnp.dot(x_t, wih.T, precision=hp) + bih
        gh = jnp.dot(h, whh.T, precision=hp) + bhh
        r = jax.nn.sigmoid(gi[:, :H] + gh[:, :H])
        z = jax.nn.sigmoid(gi[:, H:2 * H] + gh[:, H:2 * H])
        n = jnp.tanh(gi[:, 2 * H:] + r * gh[:, 2 * H:])
        h_new = (1.0 - z) * n + z * h
        return h_new, h_new

    h_last, outs = jax.lax.scan(step, hx[0], feats.transpose(1, 0, 2))
    out_flat = outs.transpose(1, 0, 2).reshape(B * S, H)

    K = params['val_w'].shape[0]
    A = params['adv_w'].shape[0] // K
    adv = jnp.dot(out_flat, params['adv_w'].T, precision=hp) + params['adv_b']
    val = jnp.dot(out_flat, params['val_w'].T, precision=hp) + params['val_b']
    adv3 = adv.reshape(-1, A, K)
    final = val.reshape(-1, 1, K) + adv3 - adv3.mean(axis=1, keepdims=True)
    probs = jax.nn.softmax(final, axis=2)
    return probs.reshape(B, S, A, K), h_last[None]


# ----------------------------------------------------------------------------

if __name__ == "__main__":
    B, S = 2, 8                     # batch, sequence length
    C, Himg, Wimg = 4, 16, 16       # inputShape (per-frame, NCHW)
    hidden = 32                     # hiddenDimensions
    num_actions = 4
    atoms = 16

    key = jax.random.PRNGKey(0)
    kx, kp = jax.random.split(key)
    x = jax.random.normal(kx, (B, S, C, Himg, Wimg), jnp.float32)
    params, feat_size = init_params(kp, C, (Himg, Wimg), hidden, num_actions, atoms)

    fwd = jax.jit(categorical_dueling_drqn_forward)
    probs, hid = fwd(x, params)
    probs = jax.block_until_ready(probs)
    hid = jax.block_until_ready(hid)

    assert probs.shape == (B, S, num_actions, atoms)
    assert hid.shape == (1, B, hidden)
    # approx-reciprocal softmax: per-row sums are 1 to within ~1e-3
    assert bool(jnp.allclose(jnp.sum(probs, axis=-1), 1.0, atol=1e-2))

    ref_probs, ref_hid = reference_forward(
        x, params, jnp.zeros((1, B, hidden), jnp.float32))
    assert bool(jnp.allclose(probs, ref_probs, atol=2e-2, rtol=2e-2))
    assert bool(jnp.allclose(hid, ref_hid, atol=2e-2, rtol=2e-2))

    print("KERNEL_OK")
</pallas_src>

<mosaic_0001>
module attributes {stable_mosaic.version = 11 : i64} {
  func.func @matmul_bias_relu_kernel(%arg0: memref<3136x36xf32, #tpu.memory_space<vmem>>, %arg1: memref<36x16xf32, #tpu.memory_space<vmem>>, %arg2: memref<1x16xf32, #tpu.memory_space<vmem>>, %arg3: memref<3136x16xf32, #tpu.memory_space<vmem>>) attributes {dimension_semantics = [], scalar_prefetch = 0 : i64, scratch_operands = 0 : i64, tpu.core_type = #tpu.core_type<tc>} {
    %c0 = arith.constant 0 : index
    %c0_0 = arith.constant 0 : index
    %0 = vector.load %arg0[%c0, %c0_0] : memref<3136x36xf32, #tpu.memory_space<vmem>>, vector<3136x36xf32>
    %c0_1 = arith.constant 0 : index
    %c0_2 = arith.constant 0 : index
    %1 = vector.load %arg1[%c0_1, %c0_2] : memref<36x16xf32, #tpu.memory_space<vmem>>, vector<36x16xf32>
    %cst = arith.constant dense<0.000000e+00> : vector<3136x16xf32>
    %2 = tpu.matmul %0, %1, %cst {dimension_numbers = #tpu.dot_dimension_numbers<[1], [0], [0], [1], [0, 0, 1, 1], [], []>} : vector<3136x36xf32>, vector<36x16xf32>, vector<3136x16xf32> -> vector<3136x16xf32>
    %c0_3 = arith.constant 0 : index
    %c0_4 = arith.constant 0 : index
    %3 = vector.load %arg2[%c0_3, %c0_4] : memref<1x16xf32, #tpu.memory_space<vmem>>, vector<1x16xf32>
    %4 = vector.broadcast %3 : vector<1x16xf32> to vector<3136x16xf32>
    %5 = arith.addf %2, %4 : vector<3136x16xf32>
    %cst_5 = arith.constant 0.000000e+00 : f32
    %6 = vector.broadcast %cst_5 : f32 to vector<3136x16xf32>
    %7 = arith.maximumf %5, %6 : vector<3136x16xf32>
    %c0_6 = arith.constant 0 : index
    %c0_7 = arith.constant 0 : index
    %8 = vector.load %arg3[%c0_6, %c0_7] : memref<3136x16xf32, #tpu.memory_space<vmem>>, vector<3136x16xf32>
    tpu.vector_store %arg3[%c0_6, %c0_7], %7 {strides = array<i32>} : memref<3136x16xf32, #tpu.memory_space<vmem>>, vector<3136x16xf32>,
    return
  }
}

module attributes {stable_mosaic.version = 11 : i64} {
  func.func @matmul_bias_relu_kernel(%arg0: memref<576x144xf32, #tpu.memory_space<vmem>>, %arg1: memref<144x32xf32, #tpu.memory_space<vmem>>, %arg2: memref<1x32xf32, #tpu.memory_space<vmem>>, %arg3: memref<576x32xf32, #tpu.memory_space<vmem>>) attributes {dimension_semantics = [], scalar_prefetch = 0 : i64, scratch_operands = 0 : i64, tpu.core_type = #tpu.core_type<tc>} {
    %c0 = arith.constant 0 : index
    %c0_0 = arith.constant 0 : index
    %0 = vector.load %arg0[%c0, %c0_0] : memref<576x144xf32, #tpu.memory_space<vmem>>, vector<576x144xf32>
    %c0_1 = arith.constant 0 : index
    %c0_2 = arith.constant 0 : index
    %1 = vector.load %arg1[%c0_1, %c0_2] : memref<144x32xf32, #tpu.memory_space<vmem>>, vector<144x32xf32>
    %cst = arith.constant dense<0.000000e+00> : vector<576x32xf32>
    %2 = tpu.matmul %0, %1, %cst {dimension_numbers = #tpu.dot_dimension_numbers<[1], [0], [0], [1], [0, 0, 1, 1], [], []>} : vector<576x144xf32>, vector<144x32xf32>, vector<576x32xf32> -> vector<576x32xf32>
    %c0_3 = arith.constant 0 : index
    %c0_4 = arith.constant 0 : index
    %3 = vector.load %arg2[%c0_3, %c0_4] : memref<1x32xf32, #tpu.memory_space<vmem>>, vector<1x32xf32>
    %4 = vector.broadcast %3 : vector<1x32xf32> to vector<576x32xf32>
    %5 = arith.addf %2, %4 : vector<576x32xf32>
    %cst_5 = arith.constant 0.000000e+00 : f32
    %6 = vector.broadcast %cst_5 : f32 to vector<576x32xf32>
    %7 = arith.maximumf %5, %6 : vector<576x32xf32>
    %c0_6 = arith.constant 0 : index
    %c0_7 = arith.constant 0 : index
    %8 = vector.load %arg3[%c0_6, %c0_7] : memref<576x32xf32, #tpu.memory_space<vmem>>, vector<576x32xf32>
    tpu.vector_store %arg3[%c0_6, %c0_7], %7 {strides = array<i32>} : memref<576x32xf32, #tpu.memory_space<vmem>>, vector<576x32xf32>,
    return
  }
}

module attributes {stable_mosaic.version = 11 : i64} {
  func.func @matmul_bias_relu_kernel(%arg0: memref<64x288xf32, #tpu.memory_space<vmem>>, %arg1: memref<288x32xf32, #tpu.memory_space<vmem>>, %arg2: memref<1x32xf32, #tpu.memory_space<vmem>>, %arg3: memref<64x32xf32, #tpu.memory_space<vmem>>) attributes {dimension_semantics = [], scalar_prefetch = 0 : i64, scratch_operands = 0 : i64, tpu.core_type = #tpu.core_type<tc>} {
    %c0 = arith.constant 0 : index
    %c0_0 = arith.constant 0 : index
    %0 = vector.load %arg0[%c0, %c0_0] : memref<64x288xf32, #tpu.memory_space<vmem>>, vector<64x288xf32>
    %c0_1 = arith.constant 0 : index
    %c0_2 = arith.constant 0 : index
    %1 = vector.load %arg1[%c0_1, %c0_2] : memref<288x32xf32, #tpu.memory_space<vmem>>, vector<288x32xf32>
    %cst = arith.constant dense<0.000000e+00> : vector<64x32xf32>
    %2 = tpu.matmul %0, %1, %cst {dimension_numbers = #tpu.dot_dimension_numbers<[1], [0], [0], [1], [0, 0, 1, 1], [], []>} : vector<64x288xf32>, vector<288x32xf32>, vector<64x32xf32> -> vector<64x32xf32>
    %c0_3 = arith.constant 0 : index
    %c0_4 = arith.constant 0 : index
    %3 = vector.load %arg2[%c0_3, %c0_4] : memref<1x32xf32, #tpu.memory_space<vmem>>, vector<1x32xf32>
    %4 = vector.broadcast %3 : vector<1x32xf32> to vector<64x32xf32>
    %5 = arith.addf %2, %4 : vector<64x32xf32>
    %cst_5 = arith.constant 0.000000e+00 : f32
    %6 = vector.broadcast %cst_5 : f32 to vector<64x32xf32>
    %7 = arith.maximumf %5, %6 : vector<64x32xf32>
    %c0_6 = arith.constant 0 : index
    %c0_7 = arith.constant 0 : index
    %8 = vector.load %arg3[%c0_6, %c0_7] : memref<64x32xf32, #tpu.memory_space<vmem>>, vector<64x32xf32>
    tpu.vector_store %arg3[%c0_6, %c0_7], %7 {strides = array<i32>} : memref<64x32xf32, #tpu.memory_space<vmem>>, vector<64x32xf32>,
    return
  }
}

module attributes {stable_mosaic.version = 11 : i64} {
  func.func @gru_head_kernel(%arg0: memref<64x128xf32, #tpu.memory_space<vmem>>, %arg1: memref<1x8x128xf32, #tpu.memory_space<vmem>>, %arg2: memref<128x384xf32, #tpu.memory_space<vmem>>, %arg3: memref<1x384xf32, #tpu.memory_space<vmem>>, %arg4: memref<128x384xf32, #tpu.memory_space<vmem>>, %arg5: memref<1x384xf32, #tpu.memory_space<vmem>>, %arg6: memref<128x80xf32, #tpu.memory_space<vmem>>, %arg7: memref<1x80xf32, #tpu.memory_space<vmem>>, %arg8: memref<64x64xf32, #tpu.memory_space<vmem>>, %arg9: memref<1x8x128xf32, #tpu.memory_space<vmem>>, %arg10: memref<64x384xf32, #tpu.memory_space<vmem>>, %arg11: memref<64x128xf32, #tpu.memory_space<vmem>>) attributes {dimension_semantics = [], scalar_prefetch = 0 : i64, scratch_operands = 2 : i64, tpu.core_type = #tpu.core_type<tc>} {
    %c0 = arith.constant 0 : index
    %c0_0 = arith.constant 0 : index
    %0 = vector.load %arg0[%c0, %c0_0] : memref<64x128xf32, #tpu.memory_space<vmem>>, vector<64x128xf32>
    %c0_1 = arith.constant 0 : index
    %c0_2 = arith.constant 0 : index
    %1 = vector.load %arg2[%c0_1, %c0_2] : memref<128x384xf32, #tpu.memory_space<vmem>>, vector<128x384xf32>
    %cst = arith.constant dense<0.000000e+00> : vector<64x384xf32>
    %2 = tpu.matmul %0, %1, %cst {dimension_numbers = #tpu.dot_dimension_numbers<[1], [0], [0], [1], [0, 0, 1, 1], [], []>} : vector<64x128xf32>, vector<128x384xf32>, vector<64x384xf32> -> vector<64x384xf32>
    %c0_3 = arith.constant 0 : index
    %c0_4 = arith.constant 0 : index
    %3 = vector.load %arg3[%c0_3, %c0_4] : memref<1x384xf32, #tpu.memory_space<vmem>>, vector<1x384xf32>
    %4 = vector.broadcast %3 : vector<1x384xf32> to vector<64x384xf32>
    %5 = arith.addf %2, %4 : vector<64x384xf32>
    %c0_5 = arith.constant 0 : index
    %c0_6 = arith.constant 0 : index
    %6 = vector.load %arg10[%c0_5, %c0_6] : memref<64x384xf32, #tpu.memory_space<vmem>>, vector<64x384xf32>
    tpu.vector_store %arg10[%c0_5, %c0_6], %5 {strides = array<i32>} : memref<64x384xf32, #tpu.memory_space<vmem>>, vector<64x384xf32>,
    %c0_7 = arith.constant 0 : index
    %c0_8 = arith.constant 0 : index
    %7 = vector.load %arg4[%c0_7, %c0_8] : memref<128x384xf32, #tpu.memory_space<vmem>>, vector<128x384xf32>
    %c0_9 = arith.constant 0 : index
    %c0_10 = arith.constant 0 : index
    %8 = vector.load %arg5[%c0_9, %c0_10] : memref<1x384xf32, #tpu.memory_space<vmem>>, vector<1x384xf32>
    %c0_11 = arith.constant 0 : index
    %c0_12 = arith.constant 0 : index
    %c0_13 = arith.constant 0 : index
    %9 = vector.load %arg1[%c0_11, %c0_12, %c0_13] : memref<1x8x128xf32, #tpu.memory_space<vmem>>, vector<1x8x128xf32>
    %10 = vector.shape_cast %9 : vector<1x8x128xf32> to vector<8x128xf32>
    %c0_14 = arith.constant 0 : index
    %c0_15 = arith.constant 0 : index
    %11 = vector.load %arg10[%c0_14, %c0_15] : memref<64x384xf32, #tpu.memory_space<vmem>>, vector<8x384xf32>
    %cst_16 = arith.constant dense<0.000000e+00> : vector<8x384xf32>
    %12 = tpu.matmul %10, %7, %cst_16 {dimension_numbers = #tpu.dot_dimension_numbers<[1], [0], [0], [1], [0, 0, 1, 1], [], []>} : vector<8x128xf32>, vector<128x384xf32>, vector<8x384xf32> -> vector<8x384xf32>
    %13 = vector.broadcast %8 : vector<1x384xf32> to vector<8x384xf32>
    %14 = arith.addf %12, %13 : vector<8x384xf32>
    %15 = vector.extract_strided_slice %11 {offsets = [0, 0], sizes = [8, 128], strides = [1, 1]} : vector<8x384xf32> to vector<8x128xf32>
    %16 = vector.extract_strided_slice %14 {offsets = [0, 0], sizes = [8, 128], strides = [1, 1]} : vector<8x384xf32> to vector<8x128xf32>
    %17 = arith.addf %15, %16 : vector<8x128xf32>
    %18 = arith.negf %17 : vector<8x128xf32>
    %19 = math.exp %18 : vector<8x128xf32>
    %cst_17 = arith.constant 1.000000e+00 : f32
    %20 = vector.broadcast %cst_17 : f32 to vector<8x128xf32>
    %21 = arith.addf %20, %19 : vector<8x128xf32>
    %22 = arith.divf %20, %21 : vector<8x128xf32>
    %23 = vector.extract_strided_slice %11 {offsets = [0, 128], sizes = [8, 128], strides = [1, 1]} : vector<8x384xf32> to vector<8x128xf32>
    %24 = vector.extract_strided_slice %14 {offsets = [0, 128], sizes = [8, 128], strides = [1, 1]} : vector<8x384xf32> to vector<8x128xf32>
    %25 = arith.addf %23, %24 : vector<8x128xf32>
    %26 = arith.negf %25 : vector<8x128xf32>
    %27 = math.exp %26 : vector<8x128xf32>
    %cst_18 = arith.constant 1.000000e+00 : f32
    %28 = vector.broadcast %cst_18 : f32 to vector<8x128xf32>
    %29 = arith.addf %28, %27 : vector<8x128xf32>
    %30 = arith.divf %28, %29 : vector<8x128xf32>
    %31 = vector.extract_strided_slice %11 {offsets = [0, 256], sizes = [8, 128], strides = [1, 1]} : vector<8x384xf32> to vector<8x128xf32>
    %32 = vector.extract_strided_slice %14 {offsets = [0, 256], sizes = [8, 128], strides = [1, 1]} : vector<8x384xf32> to vector<8x128xf32>
    %33 = arith.mulf %22, %32 : vector<8x128xf32>
    %34 = arith.addf %31, %33 : vector<8x128xf32>
    %35 = math.tanh %34 : vector<8x128xf32>
    %cst_19 = arith.constant 1.000000e+00 : f32
    %36 = vector.broadcast %cst_19 : f32 to vector<8x128xf32>
    %37 = arith.subf %36, %30 : vector<8x128xf32>
    %38 = arith.mulf %37, %35 : vector<8x128xf32>
    %39 = arith.mulf %30, %10 : vector<8x128xf32>
    %40 = arith.addf %38, %39 : vector<8x128xf32>
    %c0_20 = arith.constant 0 : index
    %c0_21 = arith.constant 0 : index
    %41 = vector.load %arg11[%c0_20, %c0_21] : memref<64x128xf32, #tpu.memory_space<vmem>>, vector<8x128xf32>
    tpu.vector_store %arg11[%c0_20, %c0_21], %40 {strides = array<i32>} : memref<64x128xf32, #tpu.memory_space<vmem>>, vector<8x128xf32>,
    %c8 = arith.constant 8 : index
    %c0_22 = arith.constant 0 : index
    %42 = vector.load %arg10[%c8, %c0_22] : memref<64x384xf32, #tpu.memory_space<vmem>>, vector<8x384xf32>
    %cst_23 = arith.constant dense<0.000000e+00> : vector<8x384xf32>
    %43 = tpu.matmul %40, %7, %cst_23 {dimension_numbers = #tpu.dot_dimension_numbers<[1], [0], [0], [1], [0, 0, 1, 1], [], []>} : vector<8x128xf32>, vector<128x384xf32>, vector<8x384xf32> -> vector<8x384xf32>
    %44 = vector.broadcast %8 : vector<1x384xf32> to vector<8x384xf32>
    %45 = arith.addf %43, %44 : vector<8x384xf32>
    %46 = vector.extract_strided_slice %42 {offsets = [0, 0], sizes = [8, 128], strides = [1, 1]} : vector<8x384xf32> to vector<8x128xf32>
    %47 = vector.extract_strided_slice %45 {offsets = [0, 0], sizes = [8, 128], strides = [1, 1]} : vector<8x384xf32> to vector<8x128xf32>
    %48 = arith.addf %46, %47 : vector<8x128xf32>
    %49 = arith.negf %48 : vector<8x128xf32>
    %50 = math.exp %49 : vector<8x128xf32>
    %cst_24 = arith.constant 1.000000e+00 : f32
    %51 = vector.broadcast %cst_24 : f32 to vector<8x128xf32>
    %52 = arith.addf %51, %50 : vector<8x128xf32>
    %53 = arith.divf %51, %52 : vector<8x128xf32>
    %54 = vector.extract_strided_slice %42 {offsets = [0, 128], sizes = [8, 128], strides = [1, 1]} : vector<8x384xf32> to vector<8x128xf32>
    %55 = vector.extract_strided_slice %45 {offsets = [0, 128], sizes = [8, 128], strides = [1, 1]} : vector<8x384xf32> to vector<8x128xf32>
    %56 = arith.addf %54, %55 : vector<8x128xf32>
    %57 = arith.negf %56 : vector<8x128xf32>
    %58 = math.exp %57 : vector<8x128xf32>
    %cst_25 = arith.constant 1.000000e+00 : f32
    %59 = vector.broadcast %cst_25 : f32 to vector<8x128xf32>
    %60 = arith.addf %59, %58 : vector<8x128xf32>
    %61 = arith.divf %59, %60 : vector<8x128xf32>
    %62 = vector.extract_strided_slice %42 {offsets = [0, 256], sizes = [8, 128], strides = [1, 1]} : vector<8x384xf32> to vector<8x128xf32>
    %63 = vector.extract_strided_slice %45 {offsets = [0, 256], sizes = [8, 128], strides = [1, 1]} : vector<8x384xf32> to vector<8x128xf32>
    %64 = arith.mulf %53, %63 : vector<8x128xf32>
    %65 = arith.addf %62, %64 : vector<8x128xf32>
    %66 = math.tanh %65 : vector<8x128xf32>
    %cst_26 = arith.constant 1.000000e+00 : f32
    %67 = vector.broadcast %cst_26 : f32 to vector<8x128xf32>
    %68 = arith.subf %67, %61 : vector<8x128xf32>
    %69 = arith.mulf %68, %66 : vector<8x128xf32>
    %70 = arith.mulf %61, %40 : vector<8x128xf32>
    %71 = arith.addf %69, %70 : vector<8x128xf32>
    %c8_27 = arith.constant 8 : index
    %c0_28 = arith.constant 0 : index
    %72 = vector.load %arg11[%c8_27, %c0_28] : memref<64x128xf32, #tpu.memory_space<vmem>>, vector<8x128xf32>
    tpu.vector_store %arg11[%c8_27, %c0_28], %71 {strides = array<i32>} : memref<64x128xf32, #tpu.memory_space<vmem>>, vector<8x128xf32>,
    %c16 = arith.constant 16 : index
    %c0_29 = arith.constant 0 : index
    %73 = vector.load %arg10[%c16, %c0_29] : memref<64x384xf32, #tpu.memory_space<vmem>>, vector<8x384xf32>
    %cst_30 = arith.constant dense<0.000000e+00> : vector<8x384xf32>
    %74 = tpu.matmul %71, %7, %cst_30 {dimension_numbers = #tpu.dot_dimension_numbers<[1], [0], [0], [1], [0, 0, 1, 1], [], []>} : vector<8x128xf32>, vector<128x384xf32>, vector<8x384xf32> -> vector<8x384xf32>
    %75 = vector.broadcast %8 : vector<1x384xf32> to vector<8x384xf32>
    %76 = arith.addf %74, %75 : vector<8x384xf32>
    %77 = vector.extract_strided_slice %73 {offsets = [0, 0], sizes = [8, 128], strides = [1, 1]} : vector<8x384xf32> to vector<8x128xf32>
    %78 = vector.extract_strided_slice %76 {offsets = [0, 0], sizes = [8, 128], strides = [1, 1]} : vector<8x384xf32> to vector<8x128xf32>
    %79 = arith.addf %77, %78 : vector<8x128xf32>
    %80 = arith.negf %79 : vector<8x128xf32>
    %81 = math.exp %80 : vector<8x128xf32>
    %cst_31 = arith.constant 1.000000e+00 : f32
    %82 = vector.broadcast %cst_31 : f32 to vector<8x128xf32>
    %83 = arith.addf %82, %81 : vector<8x128xf32>
    %84 = arith.divf %82, %83 : vector<8x128xf32>
    %85 = vector.extract_strided_slice %73 {offsets = [0, 128], sizes = [8, 128], strides = [1, 1]} : vector<8x384xf32> to vector<8x128xf32>
    %86 = vector.extract_strided_slice %76 {offsets = [0, 128], sizes = [8, 128], strides = [1, 1]} : vector<8x384xf32> to vector<8x128xf32>
    %87 = arith.addf %85, %86 : vector<8x128xf32>
    %88 = arith.negf %87 : vector<8x128xf32>
    %89 = math.exp %88 : vector<8x128xf32>
    %cst_32 = arith.constant 1.000000e+00 : f32
    %90 = vector.broadcast %cst_32 : f32 to vector<8x128xf32>
    %91 = arith.addf %90, %89 : vector<8x128xf32>
    %92 = arith.divf %90, %91 : vector<8x128xf32>
    %93 = vector.extract_strided_slice %73 {offsets = [0, 256], sizes = [8, 128], strides = [1, 1]} : vector<8x384xf32> to vector<8x128xf32>
    %94 = vector.extract_strided_slice %76 {offsets = [0, 256], sizes = [8, 128], strides = [1, 1]} : vector<8x384xf32> to vector<8x128xf32>
    %95 = arith.mulf %84, %94 : vector<8x128xf32>
    %96 = arith.addf %93, %95 : vector<8x128xf32>
    %97 = math.tanh %96 : vector<8x128xf32>
    %cst_33 = arith.constant 1.000000e+00 : f32
    %98 = vector.broadcast %cst_33 : f32 to vector<8x128xf32>
    %99 = arith.subf %98, %92 : vector<8x128xf32>
    %100 = arith.mulf %99, %97 : vector<8x128xf32>
    %101 = arith.mulf %92, %71 : vector<8x128xf32>
    %102 = arith.addf %100, %101 : vector<8x128xf32>
    %c16_34 = arith.constant 16 : index
    %c0_35 = arith.constant 0 : index
    %103 = vector.load %arg11[%c16_34, %c0_35] : memref<64x128xf32, #tpu.memory_space<vmem>>, vector<8x128xf32>
    tpu.vector_store %arg11[%c16_34, %c0_35], %102 {strides = array<i32>} : memref<64x128xf32, #tpu.memory_space<vmem>>, vector<8x128xf32>,
    %c24 = arith.constant 24 : index
    %c0_36 = arith.constant 0 : index
    %104 = vector.load %arg10[%c24, %c0_36] : memref<64x384xf32, #tpu.memory_space<vmem>>, vector<8x384xf32>
    %cst_37 = arith.constant dense<0.000000e+00> : vector<8x384xf32>
    %105 = tpu.matmul %102, %7, %cst_37 {dimension_numbers = #tpu.dot_dimension_numbers<[1], [0], [0], [1], [0, 0, 1, 1], [], []>} : vector<8x128xf32>, vector<128x384xf32>, vector<8x384xf32> -> vector<8x384xf32>
    %106 = vector.broadcast %8 : vector<1x384xf32> to vector<8x384xf32>
    %107 = arith.addf %105, %106 : vector<8x384xf32>
    %108 = vector.extract_strided_slice %104 {offsets = [0, 0], sizes = [8, 128], strides = [1, 1]} : vector<8x384xf32> to vector<8x128xf32>
    %109 = vector.extract_strided_slice %107 {offsets = [0, 0], sizes = [8, 128], strides = [1, 1]} : vector<8x384xf32> to vector<8x128xf32>
    %110 = arith.addf %108, %109 : vector<8x128xf32>
    %111 = arith.negf %110 : vector<8x128xf32>
    %112 = math.exp %111 : vector<8x128xf32>
    %cst_38 = arith.constant 1.000000e+00 : f32
    %113 = vector.broadcast %cst_38 : f32 to vector<8x128xf32>
    %114 = arith.addf %113, %112 : vector<8x128xf32>
    %115 = arith.divf %113, %114 : vector<8x128xf32>
    %116 = vector.extract_strided_slice %104 {offsets = [0, 128], sizes = [8, 128], strides = [1, 1]} : vector<8x384xf32> to vector<8x128xf32>
    %117 = vector.extract_strided_slice %107 {offsets = [0, 128], sizes = [8, 128], strides = [1, 1]} : vector<8x384xf32> to vector<8x128xf32>
    %118 = arith.addf %116, %117 : vector<8x128xf32>
    %119 = arith.negf %118 : vector<8x128xf32>
    %120 = math.exp %119 : vector<8x128xf32>
    %cst_39 = arith.constant 1.000000e+00 : f32
    %121 = vector.broadcast %cst_39 : f32 to vector<8x128xf32>
    %122 = arith.addf %121, %120 : vector<8x128xf32>
    %123 = arith.divf %121, %122 : vector<8x128xf32>
    %124 = vector.extract_strided_slice %104 {offsets = [0, 256], sizes = [8, 128], strides = [1, 1]} : vector<8x384xf32> to vector<8x128xf32>
    %125 = vector.extract_strided_slice %107 {offsets = [0, 256], sizes = [8, 128], strides = [1, 1]} : vector<8x384xf32> to vector<8x128xf32>
    %126 = arith.mulf %115, %125 : vector<8x128xf32>
    %127 = arith.addf %124, %126 : vector<8x128xf32>
    %128 = math.tanh %127 : vector<8x128xf32>
    %cst_40 = arith.constant 1.000000e+00 : f32
    %129 = vector.broadcast %cst_40 : f32 to vector<8x128xf32>
    %130 = arith.subf %129, %123 : vector<8x128xf32>
    %131 = arith.mulf %130, %128 : vector<8x128xf32>
    %132 = arith.mulf %123, %102 : vector<8x128xf32>
    %133 = arith.addf %131, %132 : vector<8x128xf32>
    %c24_41 = arith.constant 24 : index
    %c0_42 = arith.constant 0 : index
    %134 = vector.load %arg11[%c24_41, %c0_42] : memref<64x128xf32, #tpu.memory_space<vmem>>, vector<8x128xf32>
    tpu.vector_store %arg11[%c24_41, %c0_42], %133 {strides = array<i32>} : memref<64x128xf32, #tpu.memory_space<vmem>>, vector<8x128xf32>,
    %c32 = arith.constant 32 : index
    %c0_43 = arith.constant 0 : index
    %135 = vector.load %arg10[%c32, %c0_43] : memref<64x384xf32, #tpu.memory_space<vmem>>, vector<8x384xf32>
    %cst_44 = arith.constant dense<0.000000e+00> : vector<8x384xf32>
    %136 = tpu.matmul %133, %7, %cst_44 {dimension_numbers = #tpu.dot_dimension_numbers<[1], [0], [0], [1], [0, 0, 1, 1], [], []>} : vector<8x128xf32>, vector<128x384xf32>, vector<8x384xf32> -> vector<8x384xf32>
    %137 = vector.broadcast %8 : vector<1x384xf32> to vector<8x384xf32>
    %138 = arith.addf %136, %137 : vector<8x384xf32>
    %139 = vector.extract_strided_slice %135 {offsets = [0, 0], sizes = [8, 128], strides = [1, 1]} : vector<8x384xf32> to vector<8x128xf32>
    %140 = vector.extract_strided_slice %138 {offsets = [0, 0], sizes = [8, 128], strides = [1, 1]} : vector<8x384xf32> to vector<8x128xf32>
    %141 = arith.addf %139, %140 : vector<8x128xf32>
    %142 = arith.negf %141 : vector<8x128xf32>
    %143 = math.exp %142 : vector<8x128xf32>
    %cst_45 = arith.constant 1.000000e+00 : f32
    %144 = vector.broadcast %cst_45 : f32 to vector<8x128xf32>
    %145 = arith.addf %144, %143 : vector<8x128xf32>
    %146 = arith.divf %144, %145 : vector<8x128xf32>
    %147 = vector.extract_strided_slice %135 {offsets = [0, 128], sizes = [8, 128], strides = [1, 1]} : vector<8x384xf32> to vector<8x128xf32>
    %148 = vector.extract_strided_slice %138 {offsets = [0, 128], sizes = [8, 128], strides = [1, 1]} : vector<8x384xf32> to vector<8x128xf32>
    %149 = arith.addf %147, %148 : vector<8x128xf32>
    %150 = arith.negf %149 : vector<8x128xf32>
    %151 = math.exp %150 : vector<8x128xf32>
    %cst_46 = arith.constant 1.000000e+00 : f32
    %152 = vector.broadcast %cst_46 : f32 to vector<8x128xf32>
    %153 = arith.addf %152, %151 : vector<8x128xf32>
    %154 = arith.divf %152, %153 : vector<8x128xf32>
    %155 = vector.extract_strided_slice %135 {offsets = [0, 256], sizes = [8, 128], strides = [1, 1]} : vector<8x384xf32> to vector<8x128xf32>
    %156 = vector.extract_strided_slice %138 {offsets = [0, 256], sizes = [8, 128], strides = [1, 1]} : vector<8x384xf32> to vector<8x128xf32>
    %157 = arith.mulf %146, %156 : vector<8x128xf32>
    %158 = arith.addf %155, %157 : vector<8x128xf32>
    %159 = math.tanh %158 : vector<8x128xf32>
    %cst_47 = arith.constant 1.000000e+00 : f32
    %160 = vector.broadcast %cst_47 : f32 to vector<8x128xf32>
    %161 = arith.subf %160, %154 : vector<8x128xf32>
    %162 = arith.mulf %161, %159 : vector<8x128xf32>
    %163 = arith.mulf %154, %133 : vector<8x128xf32>
    %164 = arith.addf %162, %163 : vector<8x128xf32>
    %c32_48 = arith.constant 32 : index
    %c0_49 = arith.constant 0 : index
    %165 = vector.load %arg11[%c32_48, %c0_49] : memref<64x128xf32, #tpu.memory_space<vmem>>, vector<8x128xf32>
    tpu.vector_store %arg11[%c32_48, %c0_49], %164 {strides = array<i32>} : memref<64x128xf32, #tpu.memory_space<vmem>>, vector<8x128xf32>,
    %c40 = arith.constant 40 : index
    %c0_50 = arith.constant 0 : index
    %166 = vector.load %arg10[%c40, %c0_50] : memref<64x384xf32, #tpu.memory_space<vmem>>, vector<8x384xf32>
    %cst_51 = arith.constant dense<0.000000e+00> : vector<8x384xf32>
    %167 = tpu.matmul %164, %7, %cst_51 {dimension_numbers = #tpu.dot_dimension_numbers<[1], [0], [0], [1], [0, 0, 1, 1], [], []>} : vector<8x128xf32>, vector<128x384xf32>, vector<8x384xf32> -> vector<8x384xf32>
    %168 = vector.broadcast %8 : vector<1x384xf32> to vector<8x384xf32>
    %169 = arith.addf %167, %168 : vector<8x384xf32>
    %170 = vector.extract_strided_slice %166 {offsets = [0, 0], sizes = [8, 128], strides = [1, 1]} : vector<8x384xf32> to vector<8x128xf32>
    %171 = vector.extract_strided_slice %169 {offsets = [0, 0], sizes = [8, 128], strides = [1, 1]} : vector<8x384xf32> to vector<8x128xf32>
    %172 = arith.addf %170, %171 : vector<8x128xf32>
    %173 = arith.negf %172 : vector<8x128xf32>
    %174 = math.exp %173 : vector<8x128xf32>
    %cst_52 = arith.constant 1.000000e+00 : f32
    %175 = vector.broadcast %cst_52 : f32 to vector<8x128xf32>
    %176 = arith.addf %175, %174 : vector<8x128xf32>
    %177 = arith.divf %175, %176 : vector<8x128xf32>
    %178 = vector.extract_strided_slice %166 {offsets = [0, 128], sizes = [8, 128], strides = [1, 1]} : vector<8x384xf32> to vector<8x128xf32>
    %179 = vector.extract_strided_slice %169 {offsets = [0, 128], sizes = [8, 128], strides = [1, 1]} : vector<8x384xf32> to vector<8x128xf32>
    %180 = arith.addf %178, %179 : vector<8x128xf32>
    %181 = arith.negf %180 : vector<8x128xf32>
    %182 = math.exp %181 : vector<8x128xf32>
    %cst_53 = arith.constant 1.000000e+00 : f32
    %183 = vector.broadcast %cst_53 : f32 to vector<8x128xf32>
    %184 = arith.addf %183, %182 : vector<8x128xf32>
    %185 = arith.divf %183, %184 : vector<8x128xf32>
    %186 = vector.extract_strided_slice %166 {offsets = [0, 256], sizes = [8, 128], strides = [1, 1]} : vector<8x384xf32> to vector<8x128xf32>
    %187 = vector.extract_strided_slice %169 {offsets = [0, 256], sizes = [8, 128], strides = [1, 1]} : vector<8x384xf32> to vector<8x128xf32>
    %188 = arith.mulf %177, %187 : vector<8x128xf32>
    %189 = arith.addf %186, %188 : vector<8x128xf32>
    %190 = math.tanh %189 : vector<8x128xf32>
    %cst_54 = arith.constant 1.000000e+00 : f32
    %191 = vector.broadcast %cst_54 : f32 to vector<8x128xf32>
    %192 = arith.subf %191, %185 : vector<8x128xf32>
    %193 = arith.mulf %192, %190 : vector<8x128xf32>
    %194 = arith.mulf %185, %164 : vector<8x128xf32>
    %195 = arith.addf %193, %194 : vector<8x128xf32>
    %c40_55 = arith.constant 40 : index
    %c0_56 = arith.constant 0 : index
    %196 = vector.load %arg11[%c40_55, %c0_56] : memref<64x128xf32, #tpu.memory_space<vmem>>, vector<8x128xf32>
    tpu.vector_store %arg11[%c40_55, %c0_56], %195 {strides = array<i32>} : memref<64x128xf32, #tpu.memory_space<vmem>>, vector<8x128xf32>,
    %c48 = arith.constant 48 : index
    %c0_57 = arith.constant 0 : index
    %197 = vector.load %arg10[%c48, %c0_57] : memref<64x384xf32, #tpu.memory_space<vmem>>, vector<8x384xf32>
    %cst_58 = arith.constant dense<0.000000e+00> : vector<8x384xf32>
    %198 = tpu.matmul %195, %7, %cst_58 {dimension_numbers = #tpu.dot_dimension_numbers<[1], [0], [0], [1], [0, 0, 1, 1], [], []>} : vector<8x128xf32>, vector<128x384xf32>, vector<8x384xf32> -> vector<8x384xf32>
    %199 = vector.broadcast %8 : vector<1x384xf32> to vector<8x384xf32>
    %200 = arith.addf %198, %199 : vector<8x384xf32>
    %201 = vector.extract_strided_slice %197 {offsets = [0, 0], sizes = [8, 128], strides = [1, 1]} : vector<8x384xf32> to vector<8x128xf32>
    %202 = vector.extract_strided_slice %200 {offsets = [0, 0], sizes = [8, 128], strides = [1, 1]} : vector<8x384xf32> to vector<8x128xf32>
    %203 = arith.addf %201, %202 : vector<8x128xf32>
    %204 = arith.negf %203 : vector<8x128xf32>
    %205 = math.exp %204 : vector<8x128xf32>
    %cst_59 = arith.constant 1.000000e+00 : f32
    %206 = vector.broadcast %cst_59 : f32 to vector<8x128xf32>
    %207 = arith.addf %206, %205 : vector<8x128xf32>
    %208 = arith.divf %206, %207 : vector<8x128xf32>
    %209 = vector.extract_strided_slice %197 {offsets = [0, 128], sizes = [8, 128], strides = [1, 1]} : vector<8x384xf32> to vector<8x128xf32>
    %210 = vector.extract_strided_slice %200 {offsets = [0, 128], sizes = [8, 128], strides = [1, 1]} : vector<8x384xf32> to vector<8x128xf32>
    %211 = arith.addf %209, %210 : vector<8x128xf32>
    %212 = arith.negf %211 : vector<8x128xf32>
    %213 = math.exp %212 : vector<8x128xf32>
    %cst_60 = arith.constant 1.000000e+00 : f32
    %214 = vector.broadcast %cst_60 : f32 to vector<8x128xf32>
    %215 = arith.addf %214, %213 : vector<8x128xf32>
    %216 = arith.divf %214, %215 : vector<8x128xf32>
    %217 = vector.extract_strided_slice %197 {offsets = [0, 256], sizes = [8, 128], strides = [1, 1]} : vector<8x384xf32> to vector<8x128xf32>
    %218 = vector.extract_strided_slice %200 {offsets = [0, 256], sizes = [8, 128], strides = [1, 1]} : vector<8x384xf32> to vector<8x128xf32>
    %219 = arith.mulf %208, %218 : vector<8x128xf32>
    %220 = arith.addf %217, %219 : vector<8x128xf32>
    %221 = math.tanh %220 : vector<8x128xf32>
    %cst_61 = arith.constant 1.000000e+00 : f32
    %222 = vector.broadcast %cst_61 : f32 to vector<8x128xf32>
    %223 = arith.subf %222, %216 : vector<8x128xf32>
    %224 = arith.mulf %223, %221 : vector<8x128xf32>
    %225 = arith.mulf %216, %195 : vector<8x128xf32>
    %226 = arith.addf %224, %225 : vector<8x128xf32>
    %c48_62 = arith.constant 48 : index
    %c0_63 = arith.constant 0 : index
    %227 = vector.load %arg11[%c48_62, %c0_63] : memref<64x128xf32, #tpu.memory_space<vmem>>, vector<8x128xf32>
    tpu.vector_store %arg11[%c48_62, %c0_63], %226 {strides = array<i32>} : memref<64x128xf32, #tpu.memory_space<vmem>>, vector<8x128xf32>,
    %c56 = arith.constant 56 : index
    %c0_64 = arith.constant 0 : index
    %228 = vector.load %arg10[%c56, %c0_64] : memref<64x384xf32, #tpu.memory_space<vmem>>, vector<8x384xf32>
    %cst_65 = arith.constant dense<0.000000e+00> : vector<8x384xf32>
    %229 = tpu.matmul %226, %7, %cst_65 {dimension_numbers = #tpu.dot_dimension_numbers<[1], [0], [0], [1], [0, 0, 1, 1], [], []>} : vector<8x128xf32>, vector<128x384xf32>, vector<8x384xf32> -> vector<8x384xf32>
    %230 = vector.broadcast %8 : vector<1x384xf32> to vector<8x384xf32>
    %231 = arith.addf %229, %230 : vector<8x384xf32>
    %232 = vector.extract_strided_slice %228 {offsets = [0, 0], sizes = [8, 128], strides = [1, 1]} : vector<8x384xf32> to vector<8x128xf32>
    %233 = vector.extract_strided_slice %231 {offsets = [0, 0], sizes = [8, 128], strides = [1, 1]} : vector<8x384xf32> to vector<8x128xf32>
    %234 = arith.addf %232, %233 : vector<8x128xf32>
    %235 = arith.negf %234 : vector<8x128xf32>
    %236 = math.exp %235 : vector<8x128xf32>
    %cst_66 = arith.constant 1.000000e+00 : f32
    %237 = vector.broadcast %cst_66 : f32 to vector<8x128xf32>
    %238 = arith.addf %237, %236 : vector<8x128xf32>
    %239 = arith.divf %237, %238 : vector<8x128xf32>
    %240 = vector.extract_strided_slice %228 {offsets = [0, 128], sizes = [8, 128], strides = [1, 1]} : vector<8x384xf32> to vector<8x128xf32>
    %241 = vector.extract_strided_slice %231 {offsets = [0, 128], sizes = [8, 128], strides = [1, 1]} : vector<8x384xf32> to vector<8x128xf32>
    %242 = arith.addf %240, %241 : vector<8x128xf32>
    %243 = arith.negf %242 : vector<8x128xf32>
    %244 = math.exp %243 : vector<8x128xf32>
    %cst_67 = arith.constant 1.000000e+00 : f32
    %245 = vector.broadcast %cst_67 : f32 to vector<8x128xf32>
    %246 = arith.addf %245, %244 : vector<8x128xf32>
    %247 = arith.divf %245, %246 : vector<8x128xf32>
    %248 = vector.extract_strided_slice %228 {offsets = [0, 256], sizes = [8, 128], strides = [1, 1]} : vector<8x384xf32> to vector<8x128xf32>
    %249 = vector.extract_strided_slice %231 {offsets = [0, 256], sizes = [8, 128], strides = [1, 1]} : vector<8x384xf32> to vector<8x128xf32>
    %250 = arith.mulf %239, %249 : vector<8x128xf32>
    %251 = arith.addf %248, %250 : vector<8x128xf32>
    %252 = math.tanh %251 : vector<8x128xf32>
    %cst_68 = arith.constant 1.000000e+00 : f32
    %253 = vector.broadcast %cst_68 : f32 to vector<8x128xf32>
    %254 = arith.subf %253, %247 : vector<8x128xf32>
    %255 = arith.mulf %254, %252 : vector<8x128xf32>
    %256 = arith.mulf %247, %226 : vector<8x128xf32>
    %257 = arith.addf %255, %256 : vector<8x128xf32>
    %c56_69 = arith.constant 56 : index
    %c0_70 = arith.constant 0 : index
    %258 = vector.load %arg11[%c56_69, %c0_70] : memref<64x128xf32, #tpu.memory_space<vmem>>, vector<8x128xf32>
    tpu.vector_store %arg11[%c56_69, %c0_70], %257 {strides = array<i32>} : memref<64x128xf32, #tpu.memory_space<vmem>>, vector<8x128xf32>,
    %c0_71 = arith.constant 0 : index
    %c0_72 = arith.constant 0 : index
    %c0_73 = arith.constant 0 : index
    %259 = vector.load %arg9[%c0_71, %c0_72, %c0_73] : memref<1x8x128xf32, #tpu.memory_space<vmem>>, vector<1x8x128xf32>
    %260 = vector.shape_cast %259 : vector<1x8x128xf32> to vector<8x128xf32>
    %261 = vector.shape_cast %257 : vector<8x128xf32> to vector<1x8x128xf32>
    tpu.vector_store %arg9[%c0_71, %c0_72, %c0_73], %261 {strides = array<i32>} : memref<1x8x128xf32, #tpu.memory_space<vmem>>, vector<1x8x128xf32>,
    %c0_74 = arith.constant 0 : index
    %c0_75 = arith.constant 0 : index
    %262 = vector.load %arg11[%c0_74, %c0_75] : memref<64x128xf32, #tpu.memory_space<vmem>>, vector<64x128xf32>
    %c0_76 = arith.constant 0 : index
    %c0_77 = arith.constant 0 : index
    %263 = vector.load %arg6[%c0_76, %c0_77] : memref<128x80xf32, #tpu.memory_space<vmem>>, vector<128x80xf32>
    %cst_78 = arith.constant dense<0.000000e+00> : vector<64x80xf32>
    %264 = tpu.matmul %262, %263, %cst_78 {dimension_numbers = #tpu.dot_dimension_numbers<[1], [0], [0], [1], [0, 0, 1, 1], [], []>} : vector<64x128xf32>, vector<128x80xf32>, vector<64x80xf32> -> vector<64x80xf32>
    %c0_79 = arith.constant 0 : index
    %c0_80 = arith.constant 0 : index
    %265 = vector.load %arg7[%c0_79, %c0_80] : memref<1x80xf32, #tpu.memory_space<vmem>>, vector<1x80xf32>
    %266 = vector.broadcast %265 : vector<1x80xf32> to vector<64x80xf32>
    %267 = arith.addf %264, %266 : vector<64x80xf32>
    %268 = vector.extract_strided_slice %267 {offsets = [0, 0], sizes = [64, 16], strides = [1, 1]} : vector<64x80xf32> to vector<64x16xf32>
    %269 = vector.extract_strided_slice %267 {offsets = [0, 16], sizes = [64, 16], strides = [1, 1]} : vector<64x80xf32> to vector<64x16xf32>
    %270 = vector.extract_strided_slice %267 {offsets = [0, 32], sizes = [64, 16], strides = [1, 1]} : vector<64x80xf32> to vector<64x16xf32>
    %271 = vector.extract_strided_slice %267 {offsets = [0, 48], sizes = [64, 16], strides = [1, 1]} : vector<64x80xf32> to vector<64x16xf32>
    %272 = vector.extract_strided_slice %267 {offsets = [0, 64], sizes = [64, 16], strides = [1, 1]} : vector<64x80xf32> to vector<64x16xf32>
    %273 = arith.addf %269, %270 : vector<64x16xf32>
    %274 = arith.addf %273, %271 : vector<64x16xf32>
    %275 = arith.addf %274, %272 : vector<64x16xf32>
    %cst_81 = arith.constant 2.500000e-01 : f32
    %276 = vector.broadcast %cst_81 : f32 to vector<64x16xf32>
    %277 = arith.mulf %275, %276 : vector<64x16xf32>
    %278 = arith.addf %268, %269 : vector<64x16xf32>
    %279 = arith.subf %278, %277 : vector<64x16xf32>
    %cst_82 = arith.constant dense<0xFF800000> : vector<64xf32>
    %280 = vector.multi_reduction <maximumf>, %279, %cst_82 [1] : vector<64x16xf32> to vector<64xf32>
    %281 = vector.shape_cast %280 : vector<64xf32> to vector<64x1xf32>
    %282 = vector.broadcast %281 : vector<64x1xf32> to vector<64x16xf32>
    %283 = arith.subf %279, %282 : vector<64x16xf32>
    %284 = math.exp %283 : vector<64x16xf32>
    %cst_83 = arith.constant dense<0.000000e+00> : vector<64xf32>
    %285 = vector.multi_reduction <add>, %284, %cst_83 [1] : vector<64x16xf32> to vector<64xf32>
    %286 = vector.shape_cast %285 : vector<64xf32> to vector<64x1xf32>
    %287 = tpu.reciprocal %286 {approx = true} : vector<64x1xf32> -> vector<64x1xf32>
    %288 = vector.broadcast %287 : vector<64x1xf32> to vector<64x16xf32>
    %289 = arith.mulf %284, %288 : vector<64x16xf32>
    %c0_84 = arith.constant 0 : index
    %c0_85 = arith.constant 0 : index
    %290 = vector.load %arg8[%c0_84, %c0_85] : memref<64x64xf32, #tpu.memory_space<vmem>>, vector<64x16xf32>
    tpu.vector_store %arg8[%c0_84, %c0_85], %289 {strides = array<i32>} : memref<64x64xf32, #tpu.memory_space<vmem>>, vector<64x16xf32>,
    %291 = arith.addf %268, %270 : vector<64x16xf32>
    %292 = arith.subf %291, %277 : vector<64x16xf32>
    %cst_86 = arith.constant dense<0xFF800000> : vector<64xf32>
    %293 = vector.multi_reduction <maximumf>, %292, %cst_86 [1] : vector<64x16xf32> to vector<64xf32>
    %294 = vector.shape_cast %293 : vector<64xf32> to vector<64x1xf32>
    %295 = vector.broadcast %294 : vector<64x1xf32> to vector<64x16xf32>
    %296 = arith.subf %292, %295 : vector<64x16xf32>
    %297 = math.exp %296 : vector<64x16xf32>
    %cst_87 = arith.constant dense<0.000000e+00> : vector<64xf32>
    %298 = vector.multi_reduction <add>, %297, %cst_87 [1] : vector<64x16xf32> to vector<64xf32>
    %299 = vector.shape_cast %298 : vector<64xf32> to vector<64x1xf32>
    %300 = tpu.reciprocal %299 {approx = true} : vector<64x1xf32> -> vector<64x1xf32>
    %301 = vector.broadcast %300 : vector<64x1xf32> to vector<64x16xf32>
    %302 = arith.mulf %297, %301 : vector<64x16xf32>
    %c0_88 = arith.constant 0 : index
    %c16_89 = arith.constant 16 : index
    %303 = vector.load %arg8[%c0_88, %c16_89] : memref<64x64xf32, #tpu.memory_space<vmem>>, vector<64x16xf32>
    tpu.vector_store %arg8[%c0_88, %c16_89], %302 {strides = array<i32>} : memref<64x64xf32, #tpu.memory_space<vmem>>, vector<64x16xf32>,
    %304 = arith.addf %268, %271 : vector<64x16xf32>
    %305 = arith.subf %304, %277 : vector<64x16xf32>
    %cst_90 = arith.constant dense<0xFF800000> : vector<64xf32>
    %306 = vector.multi_reduction <maximumf>, %305, %cst_90 [1] : vector<64x16xf32> to vector<64xf32>
    %307 = vector.shape_cast %306 : vector<64xf32> to vector<64x1xf32>
    %308 = vector.broadcast %307 : vector<64x1xf32> to vector<64x16xf32>
    %309 = arith.subf %305, %308 : vector<64x16xf32>
    %310 = math.exp %309 : vector<64x16xf32>
    %cst_91 = arith.constant dense<0.000000e+00> : vector<64xf32>
    %311 = vector.multi_reduction <add>, %310, %cst_91 [1] : vector<64x16xf32> to vector<64xf32>
    %312 = vector.shape_cast %311 : vector<64xf32> to vector<64x1xf32>
    %313 = tpu.reciprocal %312 {approx = true} : vector<64x1xf32> -> vector<64x1xf32>
    %314 = vector.broadcast %313 : vector<64x1xf32> to vector<64x16xf32>
    %315 = arith.mulf %310, %314 : vector<64x16xf32>
    %c0_92 = arith.constant 0 : index
    %c32_93 = arith.constant 32 : index
    %316 = vector.load %arg8[%c0_92, %c32_93] : memref<64x64xf32, #tpu.memory_space<vmem>>, vector<64x16xf32>
    tpu.vector_store %arg8[%c0_92, %c32_93], %315 {strides = array<i32>} : memref<64x64xf32, #tpu.memory_space<vmem>>, vector<64x16xf32>,
    %317 = arith.addf %268, %272 : vector<64x16xf32>
    %318 = arith.subf %317, %277 : vector<64x16xf32>
    %cst_94 = arith.constant dense<0xFF800000> : vector<64xf32>
    %319 = vector.multi_reduction <maximumf>, %318, %cst_94 [1] : vector<64x16xf32> to vector<64xf32>
    %320 = vector.shape_cast %319 : vector<64xf32> to vector<64x1xf32>
    %321 = vector.broadcast %320 : vector<64x1xf32> to vector<64x16xf32>
    %322 = arith.subf %318, %321 : vector<64x16xf32>
    %323 = math.exp %322 : vector<64x16xf32>
    %cst_95 = arith.constant dense<0.000000e+00> : vector<64xf32>
    %324 = vector.multi_reduction <add>, %323, %cst_95 [1] : vector<64x16xf32> to vector<64xf32>
    %325 = vector.shape_cast %324 : vector<64xf32> to vector<64x1xf32>
    %326 = tpu.reciprocal %325 {approx = true} : vector<64x1xf32> -> vector<64x1xf32>
    %327 = vector.broadcast %326 : vector<64x1xf32> to vector<64x16xf32>
    %328 = arith.mulf %323, %327 : vector<64x16xf32>
    %c0_96 = arith.constant 0 : index
    %c48_97 = arith.constant 48 : index
    %329 = vector.load %arg8[%c0_96, %c48_97] : memref<64x64xf32, #tpu.memory_space<vmem>>, vector<64x16xf32>
    tpu.vector_store %arg8[%c0_96, %c48_97], %328 {strides = array<i32>} : memref<64x64xf32, #tpu.memory_space<vmem>>, vector<64x16xf32>,
    return
  }
}

</mosaic_0001>

<bundles_post_ra>
// kernel: categorical_dueling_drqn_forward.4
= control target key start
LH: loop header
LB: loop body
LE: loop exit
PB: predicated region body
PF: predicated region fallthrough
CT: control target
= control target key end

     0   :  { %vm1595_vm0 = vcmask 1043456   ;;  %vm418_vm1 = vcmask 293888   ;;  %vm4016_vm2 = vcmask 130048   ;;  %s9398_s1 = inlined_call_operand.vmem [shape: f32[36,16], index: 1, kind: input, shape index: {}]   ;;  %s9399_s0 = inlined_call_operand.vmem [shape: f32[3136,36], index: 0, kind: input, shape index: {}]   ;;  %s9400_s2 = inlined_call_operand.vmem [shape: f32[1,16], index: 2, kind: input, shape index: {}]   ;;  %s9401_s3 = inlined_call_operand.vmem [shape: f32[3136,16], index: 3, kind: output, shape index: {}]  }
   0x1   :  { %v410_v0 = vld [vmem:[%s9398_s1 + $0x20] sm:$0xf]  ;;  %v409_v1 = vld [vmem:[%s9398_s1 + $0x18] sm:$0xff]  ;;  %v408_v2 = vld [vmem:[%s9398_s1 + $0x10] sm:$0xff] }
   0x2   :  { %5204 = vmatprep.subr.msk.mxu0 %vm1595_vm0, %v410_v0  ;;  %5802 = vmatprep.subr.msk.mxu1 %vm1595_vm0, %v410_v0  ;;  %v407_v3 = vld [vmem:[%s9398_s1 + $0x8] sm:$0xff]  ;;  %v406_v4 = vld [vmem:[%s9398_s1] sm:$0xff]  ;;  %v16_v9 = vld [vmem:[%s9399_s0 + $0x10] sm:$0xff] }
   0x3   :  { %5205 = vmatpush3.msk.msra.mxu0 %vm1595_vm0, %v410_v0  ;;  %5807 = vmatpush3.msk.msra.mxu1 %vm1595_vm0, %v410_v0  ;;  %v14_v5 = vld [vmem:[%s9399_s0] sm:$0xff]  ;;  %v15_v7 = vld [vmem:[%s9399_s0 + $0x8] sm:$0xff]  ;;  %v212_v10 = vld [vmem:[%s9399_s0 + $0x630] sm:$0xff] }
   0x4   :  { %5206 = vmatprep.subr.mxu0 %v409_v1  ;;  %5803 = vmatprep.subr.mxu1 %v409_v1  ;;  %v210_v6 = vld [vmem:[%s9399_s0 + $0x620] sm:$0xff]  ;;  %v211_v8 = vld [vmem:[%s9399_s0 + $0x628] sm:$0xff]  ;;  %v17_v11 = vld [vmem:[%s9399_s0 + $0x18] sm:$0xff] }
   0x5   :  { %5207 = vmatpush3.msra.mxu0 %v409_v1  ;;  %5808 = vmatpush3.msra.mxu1 %v409_v1  ;;  %v213_v12 = vld [vmem:[%s9399_s0 + $0x638] sm:$0xff]  ;;  %v18_v13 = vld [vmem:[%s9399_s0 + $0x20] sm:$0xff]  ;;  %v19_v15 = vld [vmem:[%s9399_s0 + $0x28] sm:$0xff] }
   0x6   :  { %5208 = vmatprep.subr.mxu0 %v408_v2  ;;  %5804 = vmatprep.subr.mxu1 %v408_v2  ;;  %v214_v14 = vld [vmem:[%s9399_s0 + $0x640] sm:$0xff]  ;;  %v215_v16 = vld [vmem:[%s9399_s0 + $0x648] sm:$0xff]  ;;  %v20_v17 = vld [vmem:[%s9399_s0 + $0x30] sm:$0xff] }
   0x7   :  { %5209 = vmatpush3.msra.mxu0 %v408_v2  ;;  %5809 = vmatpush3.msra.mxu1 %v408_v2  ;;  %v216_v18 = vld [vmem:[%s9399_s0 + $0x650] sm:$0xff]  ;;  %v21_v19 = vld [vmem:[%s9399_s0 + $0x38] sm:$0xff]  ;;  %v22_v21 = vld [vmem:[%s9399_s0 + $0x40] sm:$0xff] }
   0x8   :  { %5210 = vmatprep.subr.mxu0 %v407_v3  ;;  %5805 = vmatprep.subr.mxu1 %v407_v3  ;;  %v217_v20 = vld [vmem:[%s9399_s0 + $0x658] sm:$0xff]  ;;  %v218_v22 = vld [vmem:[%s9399_s0 + $0x660] sm:$0xff]  ;;  %v23_v23 = vld [vmem:[%s9399_s0 + $0x48] sm:$0xff] }
   0x9   :  { %5211 = vmatpush3.msra.mxu0 %v407_v3  ;;  %5810 = vmatpush3.msra.mxu1 %v407_v3  ;;  %v219_v24 = vld [vmem:[%s9399_s0 + $0x668] sm:$0xff]  ;;  %v24_v25 = vld [vmem:[%s9399_s0 + $0x50] sm:$0xff]  ;;  %v25_v27 = vld [vmem:[%s9399_s0 + $0x58] sm:$0xff] }
   0xa   :  { %5212 = vmatprep.subr.mxu0 %v406_v4  ;;  %5806 = vmatprep.subr.mxu1 %v406_v4  ;;  %v220_v26 = vld [vmem:[%s9399_s0 + $0x670] sm:$0xff]  ;;  %v221_v28 = vld [vmem:[%s9399_s0 + $0x678] sm:$0xff]  ;;  %v26_v29 = vld [vmem:[%s9399_s0 + $0x60] sm:$0xff] }
   0xb   :  { %5213 = vmatpush3.msra.mxu0 %v406_v4  ;;  %5811 = vmatpush3.msra.mxu1 %v406_v4  ;;  %v222_v30 = vld [vmem:[%s9399_s0 + $0x680] sm:$0xff]  ;;  %v27_v31 = vld [vmem:[%s9399_s0 + $0x68] sm:$0xff]  ;;  %v28_v33 = vld [vmem:[%s9399_s0 + $0x70] sm:$0xff] }
   0xc   :  { %5214 = vmatprep.mubr.msk.f32.mxu0 %vm418_vm1, %v14_v5  ;;  %5508 = vmatprep.mubr.msk.f32.mxu1 %vm418_vm1, %v210_v6  ;;  %v223_v32 = vld [vmem:[%s9399_s0 + $0x688] sm:$0xff]  ;;  %v224_v34 = vld [vmem:[%s9399_s0 + $0x690] sm:$0xff]  ;;  %v29_v35 = vld [vmem:[%s9399_s0 + $0x78] sm:$0xff] }
   0xd   :  { %5215 = vmatmul.mubr.msk.f32.vlgmr.msra.gmra.mxu0 %vm418_vm1, %v15_v7  ;;  %5509 = vmatmul.mubr.msk.f32.vlgmr.msra.gmra.mxu1 %vm418_vm1, %v211_v8  ;;  %v225_v36 = vld [vmem:[%s9399_s0 + $0x698] sm:$0xff]  ;;  %v30_v37 = vld [vmem:[%s9399_s0 + $0x80] sm:$0xff]  ;;  %v31_v39 = vld [vmem:[%s9399_s0 + $0x88] sm:$0xff] }
   0xe   :  { %5217 = vmatprep.mubr.msk.f32.mxu0 %vm418_vm1, %v16_v9  ;;  %5511 = vmatprep.mubr.msk.f32.mxu1 %vm418_vm1, %v212_v10  ;;  %v226_v38 = vld [vmem:[%s9399_s0 + $0x6a0] sm:$0xff]  ;;  %v227_v40 = vld [vmem:[%s9399_s0 + $0x6a8] sm:$0xff]  ;;  %v32_v41 = vld [vmem:[%s9399_s0 + $0x90] sm:$0xff] }
   0xf   :  { %v228_v42 = vld [vmem:[%s9399_s0 + $0x6b0] sm:$0xff]  ;;  %v33_v43 = vld [vmem:[%s9399_s0 + $0x98] sm:$0xff]  ;;  %v34_v45 = vld [vmem:[%s9399_s0 + $0xa0] sm:$0xff] }
  0x10   :  { %v229_v44 = vld [vmem:[%s9399_s0 + $0x6b8] sm:$0xff]  ;;  %v230_v46 = vld [vmem:[%s9399_s0 + $0x6c0] sm:$0xff]  ;;  %v35_v47 = vld [vmem:[%s9399_s0 + $0xa8] sm:$0xff] }
  0x11   :  { %5218 = vmatmul.mubr.msk.f32.gmra.mxu0 %vm418_vm1, %v17_v11  ;;  %5512 = vmatmul.mubr.msk.f32.gmra.mxu1 %vm418_vm1, %v213_v12  ;;  %v231_v48 = vld [vmem:[%s9399_s0 + $0x6c8] sm:$0xff]  ;;  %v36_v49 = vld [vmem:[%s9399_s0 + $0xb0] sm:$0xff]  ;;  %v37_v51 = vld [vmem:[%s9399_s0 + $0xb8] sm:$0xff] }
  0x12   :  { %5220 = vmatprep.mubr.msk.f32.mxu0 %vm418_vm1, %v18_v13  ;;  %5514 = vmatprep.mubr.msk.f32.mxu1 %vm418_vm1, %v214_v14  ;;  %v232_v50 = vld [vmem:[%s9399_s0 + $0x6d0] sm:$0xff]  ;;  %v233_v52 = vld [vmem:[%s9399_s0 + $0x6d8] sm:$0xff]  ;;  %v38_v53 = vld [vmem:[%s9399_s0 + $0xc0] sm:$0xff] }
  0x13   :  { %v234_v54 = vld [vmem:[%s9399_s0 + $0x6e0] sm:$0xff]  ;;  %v39_v55 = vld [vmem:[%s9399_s0 + $0xc8] sm:$0xff]  ;;  %v40_v57 = vld [vmem:[%s9399_s0 + $0xd0] sm:$0xff] }
  0x14   :  { %v235_v56 = vld [vmem:[%s9399_s0 + $0x6e8] sm:$0xff]  ;;  %v236_v58 = vld [vmem:[%s9399_s0 + $0x6f0] sm:$0xff]  ;;  %v41_v59 = vld [vmem:[%s9399_s0 + $0xd8] sm:$0xff] }
  0x15   :  { %5221 = vmatmul.mubr.msk.f32.gmra.mxu0 %vm418_vm1, %v19_v15  ;;  %5515 = vmatmul.mubr.msk.f32.gmra.mxu1 %vm418_vm1, %v215_v16  ;;  %v237_v60 = vld [vmem:[%s9399_s0 + $0x6f8] sm:$0xff]  ;;  %v42_v61 = vld [vmem:[%s9399_s0 + $0xe0] sm:$0xff]  ;;  %v43_v63 = vld [vmem:[%s9399_s0 + $0xe8] sm:$0xff] }
  0x16   :  { %5223 = vmatprep.mubr.msk.f32.mxu0 %vm418_vm1, %v20_v17  ;;  %5517 = vmatprep.mubr.msk.f32.mxu1 %vm418_vm1, %v216_v18  ;;  %v238_v62 = vld [vmem:[%s9399_s0 + $0x700] sm:$0xff]  ;;  %v239_v0 = vld [vmem:[%s9399_s0 + $0x708] sm:$0xff]  ;;  %v44_v1 = vld [vmem:[%s9399_s0 + $0xf0] sm:$0xff] }
  0x17   :  { %v240_v2 = vld [vmem:[%s9399_s0 + $0x710] sm:$0xff]  ;;  %v45_v3 = vld [vmem:[%s9399_s0 + $0xf8] sm:$0xff]  ;;  %v46_v5 = vld [vmem:[%s9399_s0 + $0x100] sm:$0xff] }
  0x18   :  { %v241_v4 = vld [vmem:[%s9399_s0 + $0x718] sm:$0xff]  ;;  %v242_v6 = vld [vmem:[%s9399_s0 + $0x720] sm:$0xff]  ;;  %v47_v7 = vld [vmem:[%s9399_s0 + $0x108] sm:$0xff] }
  0x19   :  { %5224 = vmatmul.mubr.msk.f32.gmra.mxu0 %vm418_vm1, %v21_v19  ;;  %5518 = vmatmul.mubr.msk.f32.gmra.mxu1 %vm418_vm1, %v217_v20  ;;  %v243_v8 = vld [vmem:[%s9399_s0 + $0x728] sm:$0xff]  ;;  %v48_v9 = vld [vmem:[%s9399_s0 + $0x110] sm:$0xff]  ;;  %v49_v11 = vld [vmem:[%s9399_s0 + $0x118] sm:$0xff] }
  0x1a   :  { %5226 = vmatprep.mubr.msk.f32.mxu0 %vm418_vm1, %v22_v21  ;;  %5520 = vmatprep.mubr.msk.f32.mxu1 %vm418_vm1, %v218_v22  ;;  %v244_v10 = vld [vmem:[%s9399_s0 + $0x730] sm:$0xff]  ;;  %v245_v12 = vld [vmem:[%s9399_s0 + $0x738] sm:$0xff]  ;;  %v50_v13 = vld [vmem:[%s9399_s0 + $0x120] sm:$0xff] }
  0x1b   :  { %v246_v14 = vld [vmem:[%s9399_s0 + $0x740] sm:$0xff]  ;;  %v51_v15 = vld [vmem:[%s9399_s0 + $0x128] sm:$0xff]  ;;  %v52_v17 = vld [vmem:[%s9399_s0 + $0x130] sm:$0xff] }
  0x1c   :  { %v247_v16 = vld [vmem:[%s9399_s0 + $0x748] sm:$0xff]  ;;  %v248_v18 = vld [vmem:[%s9399_s0 + $0x750] sm:$0xff]  ;;  %v53_v19 = vld [vmem:[%s9399_s0 + $0x138] sm:$0xff] }
  0x1d   :  { %5227 = vmatmul.mubr.msk.f32.gmra.mxu0 %vm418_vm1, %v23_v23  ;;  %5521 = vmatmul.mubr.msk.f32.gmra.mxu1 %vm418_vm1, %v219_v24  ;;  %v249_v20 = vld [vmem:[%s9399_s0 + $0x758] sm:$0xff]  ;;  %v54_v21 = vld [vmem:[%s9399_s0 + $0x140] sm:$0xff]  ;;  %v55_v23 = vld [vmem:[%s9399_s0 + $0x148] sm:$0xff] }
  0x1e   :  { %5229 = vmatprep.mubr.msk.f32.mxu0 %vm418_vm1, %v24_v25  ;;  %5523 = vmatprep.mubr.msk.f32.mxu1 %vm418_vm1, %v220_v26  ;;  %v250_v22 = vld [vmem:[%s9399_s0 + $0x760] sm:$0xff]  ;;  %v251_v24 = vld [vmem:[%s9399_s0 + $0x768] sm:$0xff]  ;;  %v56_v25 = vld [vmem:[%s9399_s0 + $0x150] sm:$0xff] }
  0x1f   :  { %v252_v26 = vld [vmem:[%s9399_s0 + $0x770] sm:$0xff] }
  0x21   :  { %5230 = vmatmul.mubr.msk.f32.gmra.mxu0 %vm418_vm1, %v25_v27  ;;  %5524 = vmatmul.mubr.msk.f32.gmra.mxu1 %vm418_vm1, %v221_v28  ;;  %v57_v27 = vld [vmem:[%s9399_s0 + $0x158] sm:$0xff] }
  0x22   :  { %5232 = vmatprep.mubr.msk.f32.mxu0 %vm418_vm1, %v26_v29  ;;  %5526 = vmatprep.mubr.msk.f32.mxu1 %vm418_vm1, %v222_v30  ;;  %v253_v28 = vld [vmem:[%s9399_s0 + $0x778] sm:$0xff]  ;;  %v58_v29 = vld [vmem:[%s9399_s0 + $0x160] sm:$0xff] }
  0x23   :  { %v254_v30 = vld [vmem:[%s9399_s0 + $0x780] sm:$0xff] }
  0x25   :  { %5233 = vmatmul.mubr.msk.f32.gmra.mxu0 %vm418_vm1, %v27_v31  ;;  %5527 = vmatmul.mubr.msk.f32.gmra.mxu1 %vm418_vm1, %v223_v32  ;;  %v59_v31 = vld [vmem:[%s9399_s0 + $0x168] sm:$0xff] }
  0x26   :  { %5235 = vmatprep.mubr.msk.f32.mxu0 %vm418_vm1, %v28_v33  ;;  %5529 = vmatprep.mubr.msk.f32.mxu1 %vm418_vm1, %v224_v34  ;;  %v255_v32 = vld [vmem:[%s9399_s0 + $0x788] sm:$0xff]  ;;  %v60_v33 = vld [vmem:[%s9399_s0 + $0x170] sm:$0xff] }
  0x27   :  { %v256_v34 = vld [vmem:[%s9399_s0 + $0x790] sm:$0xff] }
  0x29   :  { %5236 = vmatmul.mubr.msk.f32.gmra.mxu0 %vm418_vm1, %v29_v35  ;;  %5530 = vmatmul.mubr.msk.f32.gmra.mxu1 %vm418_vm1, %v225_v36  ;;  %v61_v35 = vld [vmem:[%s9399_s0 + $0x178] sm:$0xff] }
  0x2a   :  { %5238 = vmatprep.mubr.msk.f32.mxu0 %vm418_vm1, %v30_v37  ;;  %5532 = vmatprep.mubr.msk.f32.mxu1 %vm418_vm1, %v226_v38  ;;  %v257_v36 = vld [vmem:[%s9399_s0 + $0x798] sm:$0xff]  ;;  %v62_v37 = vld [vmem:[%s9399_s0 + $0x180] sm:$0xff] }
  0x2b   :  { %v258_v38 = vld [vmem:[%s9399_s0 + $0x7a0] sm:$0xff] }
  0x2d   :  { %5239 = vmatmul.mubr.msk.f32.gmra.mxu0 %vm418_vm1, %v31_v39  ;;  %5533 = vmatmul.mubr.msk.f32.gmra.mxu1 %vm418_vm1, %v227_v40  ;;  %v63_v39 = vld [vmem:[%s9399_s0 + $0x188] sm:$0xff] }
  0x2e   :  { %5241 = vmatprep.mubr.msk.f32.mxu0 %vm418_vm1, %v32_v41  ;;  %5535 = vmatprep.mubr.msk.f32.mxu1 %vm418_vm1, %v228_v42  ;;  %v259_v40 = vld [vmem:[%s9399_s0 + $0x7a8] sm:$0xff]  ;;  %v64_v41 = vld [vmem:[%s9399_s0 + $0x190] sm:$0xff] }
  0x2f   :  { %v260_v42 = vld [vmem:[%s9399_s0 + $0x7b0] sm:$0xff] }
  0x31   :  { %5242 = vmatmul.mubr.msk.f32.gmra.mxu0 %vm418_vm1, %v33_v43  ;;  %5536 = vmatmul.mubr.msk.f32.gmra.mxu1 %vm418_vm1, %v229_v44  ;;  %v65_v43 = vld [vmem:[%s9399_s0 + $0x198] sm:$0xff] }
  0x32   :  { %5244 = vmatprep.mubr.msk.f32.mxu0 %vm418_vm1, %v34_v45  ;;  %5538 = vmatprep.mubr.msk.f32.mxu1 %vm418_vm1, %v230_v46  ;;  %v261_v44 = vld [vmem:[%s9399_s0 + $0x7b8] sm:$0xff]  ;;  %v66_v45 = vld [vmem:[%s9399_s0 + $0x1a0] sm:$0xff] }
  0x33   :  { %v262_v46 = vld [vmem:[%s9399_s0 + $0x7c0] sm:$0xff] }
  0x35   :  { %5245 = vmatmul.mubr.msk.f32.gmra.mxu0 %vm418_vm1, %v35_v47  ;;  %5539 = vmatmul.mubr.msk.f32.gmra.mxu1 %vm418_vm1, %v231_v48  ;;  %v67_v47 = vld [vmem:[%s9399_s0 + $0x1a8] sm:$0xff] }
  0x36   :  { %5247 = vmatprep.mubr.msk.f32.mxu0 %vm418_vm1, %v36_v49  ;;  %5541 = vmatprep.mubr.msk.f32.mxu1 %vm418_vm1, %v232_v50  ;;  %v263_v48 = vld [vmem:[%s9399_s0 + $0x7c8] sm:$0xff]  ;;  %v68_v49 = vld [vmem:[%s9399_s0 + $0x1b0] sm:$0xff] }
  0x37   :  { %v264_v50 = vld [vmem:[%s9399_s0 + $0x7d0] sm:$0xff] }
  0x39   :  { %5248 = vmatmul.mubr.msk.f32.gmra.mxu0 %vm418_vm1, %v37_v51  ;;  %5542 = vmatmul.mubr.msk.f32.gmra.mxu1 %vm418_vm1, %v233_v52  ;;  %v69_v51 = vld [vmem:[%s9399_s0 + $0x1b8] sm:$0xff] }
  0x3a   :  { %5250 = vmatprep.mubr.msk.f32.mxu0 %vm418_vm1, %v38_v53  ;;  %5544 = vmatprep.mubr.msk.f32.mxu1 %vm418_vm1, %v234_v54  ;;  %v265_v52 = vld [vmem:[%s9399_s0 + $0x7d8] sm:$0xff]  ;;  %v70_v53 = vld [vmem:[%s9399_s0 + $0x1c0] sm:$0xff] }
  0x3b   :  { %v266_v54 = vld [vmem:[%s9399_s0 + $0x7e0] sm:$0xff] }
  0x3d   :  { %5251 = vmatmul.mubr.msk.f32.gmra.mxu0 %vm418_vm1, %v39_v55  ;;  %5545 = vmatmul.mubr.msk.f32.gmra.mxu1 %vm418_vm1, %v235_v56  ;;  %v71_v55 = vld [vmem:[%s9399_s0 + $0x1c8] sm:$0xff] }
  0x3e   :  { %5253 = vmatprep.mubr.msk.f32.mxu0 %vm418_vm1, %v40_v57  ;;  %5547 = vmatprep.mubr.msk.f32.mxu1 %vm418_vm1, %v236_v58  ;;  %v267_v56 = vld [vmem:[%s9399_s0 + $0x7e8] sm:$0xff]  ;;  %v72_v57 = vld [vmem:[%s9399_s0 + $0x1d0] sm:$0xff] }
  0x3f   :  { %v268_v58 = vld [vmem:[%s9399_s0 + $0x7f0] sm:$0xff] }
  0x41   :  { %5254 = vmatmul.mubr.msk.f32.gmra.mxu0 %vm418_vm1, %v41_v59  ;;  %5548 = vmatmul.mubr.msk.f32.gmra.mxu1 %vm418_vm1, %v237_v60  ;;  %v73_v59 = vld [vmem:[%s9399_s0 + $0x1d8] sm:$0xff] }
  0x42   :  { %5256 = vmatprep.mubr.msk.f32.mxu0 %vm418_vm1, %v42_v61  ;;  %5550 = vmatprep.mubr.msk.f32.mxu1 %vm418_vm1, %v238_v62  ;;  %v269_v60 = vld [vmem:[%s9399_s0 + $0x7f8] sm:$0xff]  ;;  %v74_v61 = vld [vmem:[%s9399_s0 + $0x1e0] sm:$0xff] }
  0x43   :  { %v270_v62 = vld [vmem:[%s9399_s0 + $0x800] sm:$0xff] }
  0x45   :  { %5257 = vmatmul.mubr.msk.f32.gmra.mxu0 %vm418_vm1, %v43_v63  ;;  %5551 = vmatmul.mubr.msk.f32.gmra.mxu1 %vm418_vm1, %v239_v0  ;;  %v75_v63 = vld [vmem:[%s9399_s0 + $0x1e8] sm:$0xff] }
  0x46   :  { %5259 = vmatprep.mubr.msk.f32.mxu0 %vm418_vm1, %v44_v1  ;;  %5553 = vmatprep.mubr.msk.f32.mxu1 %vm418_vm1, %v240_v2  ;;  %v271_v0 = vld [vmem:[%s9399_s0 + $0x808] sm:$0xff]  ;;  %v76_v1 = vld [vmem:[%s9399_s0 + $0x1f0] sm:$0xff] }
  0x47   :  { %v272_v2 = vld [vmem:[%s9399_s0 + $0x810] sm:$0xff] }
  0x49   :  { %5260 = vmatmul.mubr.msk.f32.gmra.mxu0 %vm418_vm1, %v45_v3  ;;  %5554 = vmatmul.mubr.msk.f32.gmra.mxu1 %vm418_vm1, %v241_v4  ;;  %v77_v3 = vld [vmem:[%s9399_s0 + $0x1f8] sm:$0xff] }
  0x4a   :  { %5262 = vmatprep.mubr.msk.f32.mxu0 %vm418_vm1, %v46_v5  ;;  %5556 = vmatprep.mubr.msk.f32.mxu1 %vm418_vm1, %v242_v6  ;;  %v273_v4 = vld [vmem:[%s9399_s0 + $0x818] sm:$0xff]  ;;  %v78_v5 = vld [vmem:[%s9399_s0 + $0x200] sm:$0xff] }
  0x4b   :  { %v274_v6 = vld [vmem:[%s9399_s0 + $0x820] sm:$0xff] }
  0x4d   :  { %5263 = vmatmul.mubr.msk.f32.gmra.mxu0 %vm418_vm1, %v47_v7  ;;  %5557 = vmatmul.mubr.msk.f32.gmra.mxu1 %vm418_vm1, %v243_v8  ;;  %v79_v7 = vld [vmem:[%s9399_s0 + $0x208] sm:$0xff] }
  0x4e   :  { %5265 = vmatprep.mubr.msk.f32.mxu0 %vm418_vm1, %v48_v9  ;;  %5559 = vmatprep.mubr.msk.f32.mxu1 %vm418_vm1, %v244_v10  ;;  %v275_v8 = vld [vmem:[%s9399_s0 + $0x828] sm:$0xff]  ;;  %v80_v9 = vld [vmem:[%s9399_s0 + $0x210] sm:$0xff] }
  0x4f   :  { %v276_v10 = vld [vmem:[%s9399_s0 + $0x830] sm:$0xff] }
  0x51   :  { %5266 = vmatmul.mubr.msk.f32.gmra.mxu0 %vm418_vm1, %v49_v11  ;;  %5560 = vmatmul.mubr.msk.f32.gmra.mxu1 %vm418_vm1, %v245_v12  ;;  %v81_v11 = vld [vmem:[%s9399_s0 + $0x218] sm:$0xff] }
  0x52   :  { %5268 = vmatprep.mubr.msk.f32.mxu0 %vm418_vm1, %v50_v13  ;;  %5562 = vmatprep.mubr.msk.f32.mxu1 %vm418_vm1, %v246_v14  ;;  %v277_v12 = vld [vmem:[%s9399_s0 + $0x838] sm:$0xff]  ;;  %v82_v13 = vld [vmem:[%s9399_s0 + $0x220] sm:$0xff] }
  0x53   :  { %v278_v14 = vld [vmem:[%s9399_s0 + $0x840] sm:$0xff] }
  0x55   :  { %5269 = vmatmul.mubr.msk.f32.gmra.mxu0 %vm418_vm1, %v51_v15  ;;  %5563 = vmatmul.mubr.msk.f32.gmra.mxu1 %vm418_vm1, %v247_v16  ;;  %v83_v15 = vld [vmem:[%s9399_s0 + $0x228] sm:$0xff] }
  0x56   :  { %5271 = vmatprep.mubr.msk.f32.mxu0 %vm418_vm1, %v52_v17  ;;  %5565 = vmatprep.mubr.msk.f32.mxu1 %vm418_vm1, %v248_v18  ;;  %v279_v16 = vld [vmem:[%s9399_s0 + $0x848] sm:$0xff]  ;;  %v84_v17 = vld [vmem:[%s9399_s0 + $0x230] sm:$0xff] }
  0x57   :  { %v280_v18 = vld [vmem:[%s9399_s0 + $0x850] sm:$0xff] }
  0x59   :  { %5272 = vmatmul.mubr.msk.f32.gmra.mxu0 %vm418_vm1, %v53_v19  ;;  %5566 = vmatmul.mubr.msk.f32.gmra.mxu1 %vm418_vm1, %v249_v20  ;;  %v85_v19 = vld [vmem:[%s9399_s0 + $0x238] sm:$0xff] }
  0x5a   :  { %5274 = vmatprep.mubr.msk.f32.mxu0 %vm418_vm1, %v54_v21  ;;  %5568 = vmatprep.mubr.msk.f32.mxu1 %vm418_vm1, %v250_v22  ;;  %v281_v20 = vld [vmem:[%s9399_s0 + $0x858] sm:$0xff]  ;;  %v86_v21 = vld [vmem:[%s9399_s0 + $0x240] sm:$0xff] }
  0x5b   :  { %v282_v22 = vld [vmem:[%s9399_s0 + $0x860] sm:$0xff] }
  0x5d   :  { %5275 = vmatmul.mubr.msk.f32.gmra.mxu0 %vm418_vm1, %v55_v23  ;;  %5569 = vmatmul.mubr.msk.f32.gmra.mxu1 %vm418_vm1, %v251_v24  ;;  %v87_v23 = vld [vmem:[%s9399_s0 + $0x248] sm:$0xff] }
  0x5e   :  { %5277 = vmatprep.mubr.msk.f32.mxu0 %vm418_vm1, %v56_v25  ;;  %5571 = vmatprep.mubr.msk.f32.mxu1 %vm418_vm1, %v252_v26  ;;  %v283_v24 = vld [vmem:[%s9399_s0 + $0x868] sm:$0xff]  ;;  %v88_v25 = vld [vmem:[%s9399_s0 + $0x250] sm:$0xff] }
  0x5f   :  { %v284_v26 = vld [vmem:[%s9399_s0 + $0x870] sm:$0xff] }
  0x61   :  { %5278 = vmatmul.mubr.msk.f32.gmra.mxu0 %vm418_vm1, %v57_v27  ;;  %5572 = vmatmul.mubr.msk.f32.gmra.mxu1 %vm418_vm1, %v253_v28  ;;  %v89_v27 = vld [vmem:[%s9399_s0 + $0x258] sm:$0xff] }
  0x62   :  { %5280 = vmatprep.mubr.msk.f32.mxu0 %vm418_vm1, %v58_v29  ;;  %5574 = vmatprep.mubr.msk.f32.mxu1 %vm418_vm1, %v254_v30  ;;  %v285_v28 = vld [vmem:[%s9399_s0 + $0x878] sm:$0xff]  ;;  %v90_v29 = vld [vmem:[%s9399_s0 + $0x260] sm:$0xff] }
  0x63   :  { %v286_v30 = vld [vmem:[%s9399_s0 + $0x880] sm:$0xff] }
  0x65   :  { %5281 = vmatmul.mubr.msk.f32.gmra.mxu0 %vm418_vm1, %v59_v31  ;;  %5575 = vmatmul.mubr.msk.f32.gmra.mxu1 %vm418_vm1, %v255_v32  ;;  %v91_v31 = vld [vmem:[%s9399_s0 + $0x268] sm:$0xff] }
  0x66   :  { %5283 = vmatprep.mubr.msk.f32.mxu0 %vm418_vm1, %v60_v33  ;;  %5577 = vmatprep.mubr.msk.f32.mxu1 %vm418_vm1, %v256_v34  ;;  %v287_v32 = vld [vmem:[%s9399_s0 + $0x888] sm:$0xff]  ;;  %v92_v33 = vld [vmem:[%s9399_s0 + $0x270] sm:$0xff] }
  0x67   :  { %v288_v34 = vld [vmem:[%s9399_s0 + $0x890] sm:$0xff] }
  0x69   :  { %5284 = vmatmul.mubr.msk.f32.gmra.mxu0 %vm418_vm1, %v61_v35  ;;  %5578 = vmatmul.mubr.msk.f32.gmra.mxu1 %vm418_vm1, %v257_v36  ;;  %v93_v35 = vld [vmem:[%s9399_s0 + $0x278] sm:$0xff] }
  0x6a   :  { %5286 = vmatprep.mubr.msk.f32.mxu0 %vm418_vm1, %v62_v37  ;;  %5580 = vmatprep.mubr.msk.f32.mxu1 %vm418_vm1, %v258_v38  ;;  %v289_v36 = vld [vmem:[%s9399_s0 + $0x898] sm:$0xff]  ;;  %v94_v37 = vld [vmem:[%s9399_s0 + $0x280] sm:$0xff] }
  0x6b   :  { %v290_v38 = vld [vmem:[%s9399_s0 + $0x8a0] sm:$0xff] }
  0x6d   :  { %5287 = vmatmul.mubr.msk.f32.gmra.mxu0 %vm418_vm1, %v63_v39  ;;  %5581 = vmatmul.mubr.msk.f32.gmra.mxu1 %vm418_vm1, %v259_v40  ;;  %v95_v39 = vld [vmem:[%s9399_s0 + $0x288] sm:$0xff] }
  0x6e   :  { %5289 = vmatprep.mubr.msk.f32.mxu0 %vm418_vm1, %v64_v41  ;;  %5583 = vmatprep.mubr.msk.f32.mxu1 %vm418_vm1, %v260_v42  ;;  %v291_v40 = vld [vmem:[%s9399_s0 + $0x8a8] sm:$0xff]  ;;  %v96_v41 = vld [vmem:[%s9399_s0 + $0x290] sm:$0xff] }
  0x6f   :  { %v292_v42 = vld [vmem:[%s9399_s0 + $0x8b0] sm:$0xff] }
  0x71   :  { %5290 = vmatmul.mubr.msk.f32.gmra.mxu0 %vm418_vm1, %v65_v43  ;;  %5584 = vmatmul.mubr.msk.f32.gmra.mxu1 %vm418_vm1, %v261_v44  ;;  %v97_v43 = vld [vmem:[%s9399_s0 + $0x298] sm:$0xff] }
  0x72   :  { %5292 = vmatprep.mubr.msk.f32.mxu0 %vm418_vm1, %v66_v45  ;;  %5586 = vmatprep.mubr.msk.f32.mxu1 %vm418_vm1, %v262_v46  ;;  %v293_v44 = vld [vmem:[%s9399_s0 + $0x8b8] sm:$0xff]  ;;  %v98_v45 = vld [vmem:[%s9399_s0 + $0x2a0] sm:$0xff] }
  0x73   :  { %v294_v46 = vld [vmem:[%s9399_s0 + $0x8c0] sm:$0xff] }
  0x75   :  { %5293 = vmatmul.mubr.msk.f32.gmra.mxu0 %vm418_vm1, %v67_v47  ;;  %5587 = vmatmul.mubr.msk.f32.gmra.mxu1 %vm418_vm1, %v263_v48  ;;  %v99_v47 = vld [vmem:[%s9399_s0 + $0x2a8] sm:$0xff] }
  0x76   :  { %5295 = vmatprep.mubr.msk.f32.mxu0 %vm418_vm1, %v68_v49  ;;  %5589 = vmatprep.mubr.msk.f32.mxu1 %vm418_vm1, %v264_v50  ;;  %v295_v48 = vld [vmem:[%s9399_s0 + $0x8c8] sm:$0xff]  ;;  %v100_v49 = vld [vmem:[%s9399_s0 + $0x2b0] sm:$0xff] }
  0x77   :  { %v296_v50 = vld [vmem:[%s9399_s0 + $0x8d0] sm:$0xff] }
  0x79   :  { %5296 = vmatmul.mubr.msk.f32.gmra.mxu0 %vm418_vm1, %v69_v51  ;;  %5590 = vmatmul.mubr.msk.f32.gmra.mxu1 %vm418_vm1, %v265_v52  ;;  %v101_v51 = vld [vmem:[%s9399_s0 + $0x2b8] sm:$0xff] }
  0x7a   :  { %5298 = vmatprep.mubr.msk.f32.mxu0 %vm418_vm1, %v70_v53  ;;  %5592 = vmatprep.mubr.msk.f32.mxu1 %vm418_vm1, %v266_v54  ;;  %v297_v52 = vld [vmem:[%s9399_s0 + $0x8d8] sm:$0xff]  ;;  %v102_v53 = vld [vmem:[%s9399_s0 + $0x2c0] sm:$0xff] }
  0x7b   :  { %v298_v54 = vld [vmem:[%s9399_s0 + $0x8e0] sm:$0xff] }
  0x7d   :  { %5299 = vmatmul.mubr.msk.f32.gmra.mxu0 %vm418_vm1, %v71_v55  ;;  %5593 = vmatmul.mubr.msk.f32.gmra.mxu1 %vm418_vm1, %v267_v56  ;;  %v103_v55 = vld [vmem:[%s9399_s0 + $0x2c8] sm:$0xff] }
  0x7e   :  { %5301 = vmatprep.mubr.msk.f32.mxu0 %vm418_vm1, %v72_v57  ;;  %5595 = vmatprep.mubr.msk.f32.mxu1 %vm418_vm1, %v268_v58  ;;  %v299_v56 = vld [vmem:[%s9399_s0 + $0x8e8] sm:$0xff]  ;;  %v104_v57 = vld [vmem:[%s9399_s0 + $0x2d0] sm:$0xff] }
  0x7f   :  { %v300_v58 = vld [vmem:[%s9399_s0 + $0x8f0] sm:$0xff] }
  0x81   :  { %5302 = vmatmul.mubr.msk.f32.gmra.mxu0 %vm418_vm1, %v73_v59  ;;  %5596 = vmatmul.mubr.msk.f32.gmra.mxu1 %vm418_vm1, %v269_v60  ;;  %v105_v59 = vld [vmem:[%s9399_s0 + $0x2d8] sm:$0xff] }
  0x82   :  { %5304 = vmatprep.mubr.msk.f32.mxu0 %vm418_vm1, %v74_v61  ;;  %5598 = vmatprep.mubr.msk.f32.mxu1 %vm418_vm1, %v270_v62  ;;  %v301_v60 = vld [vmem:[%s9399_s0 + $0x8f8] sm:$0xff]  ;;  %v106_v61 = vld [vmem:[%s9399_s0 + $0x2e0] sm:$0xff] }
  0x83   :  { %v302_v62 = vld [vmem:[%s9399_s0 + $0x900] sm:$0xff] }
  0x85   :  { %5305 = vmatmul.mubr.msk.f32.gmra.mxu0 %vm418_vm1, %v75_v63  ;;  %5599 = vmatmul.mubr.msk.f32.gmra.mxu1 %vm418_vm1, %v271_v0  ;;  %v107_v63 = vld [vmem:[%s9399_s0 + $0x2e8] sm:$0xff] }
  0x86   :  { %5307 = vmatprep.mubr.msk.f32.mxu0 %vm418_vm1, %v76_v1  ;;  %5601 = vmatprep.mubr.msk.f32.mxu1 %vm418_vm1, %v272_v2  ;;  %v303_v0 = vld [vmem:[%s9399_s0 + $0x908] sm:$0xff]  ;;  %v108_v1 = vld [vmem:[%s9399_s0 + $0x2f0] sm:$0xff] }
  0x87   :  { %v304_v2 = vld [vmem:[%s9399_s0 + $0x910] sm:$0xff] }
  0x89   :  { %5308 = vmatmul.mubr.msk.f32.gmra.mxu0 %vm418_vm1, %v77_v3  ;;  %5602 = vmatmul.mubr.msk.f32.gmra.mxu1 %vm418_vm1, %v273_v4  ;;  %v109_v3 = vld [vmem:[%s9399_s0 + $0x2f8] sm:$0xff] }
  0x8a   :  { %5310 = vmatprep.mubr.msk.f32.mxu0 %vm418_vm1, %v78_v5  ;;  %5604 = vmatprep.mubr.msk.f32.mxu1 %vm418_vm1, %v274_v6  ;;  %v305_v4 = vld [vmem:[%s9399_s0 + $0x918] sm:$0xff]  ;;  %v110_v5 = vld [vmem:[%s9399_s0 + $0x300] sm:$0xff] }
  0x8b   :  { %v306_v6 = vld [vmem:[%s9399_s0 + $0x920] sm:$0xff] }
  0x8d   :  { %5311 = vmatmul.mubr.msk.f32.gmra.mxu0 %vm418_vm1, %v79_v7  ;;  %5605 = vmatmul.mubr.msk.f32.gmra.mxu1 %vm418_vm1, %v275_v8  ;;  %v111_v7 = vld [vmem:[%s9399_s0 + $0x308] sm:$0xff] }
  0x8e   :  { %5313 = vmatprep.mubr.msk.f32.mxu0 %vm418_vm1, %v80_v9  ;;  %5607 = vmatprep.mubr.msk.f32.mxu1 %vm418_vm1, %v276_v10  ;;  %v307_v8 = vld [vmem:[%s9399_s0 + $0x928] sm:$0xff]  ;;  %v6635_v9 = vld [vmem:[%s9400_s2] ss:$0 sm:$0xff]  ;;  %v112_v10 = vld [vmem:[%s9399_s0 + $0x310] sm:$0xff] }
  0x91   :  { %5314 = vmatmul.mubr.msk.f32.gmra.mxu0 %vm418_vm1, %v81_v11  ;;  %5608 = vmatmul.mubr.msk.f32.gmra.mxu1 %vm418_vm1, %v277_v12  ;;  %v308_v11 = vld [vmem:[%s9399_s0 + $0x930] sm:$0xff] }
  0x92   :  { %5316 = vmatprep.mubr.msk.f32.mxu0 %vm418_vm1, %v82_v13  ;;  %5610 = vmatprep.mubr.msk.f32.mxu1 %vm418_vm1, %v278_v14 }
  0x95   :  { %5317 = vmatmul.mubr.msk.f32.gmra.mxu0 %vm418_vm1, %v83_v15  ;;  %5611 = vmatmul.mubr.msk.f32.gmra.mxu1 %vm418_vm1, %v279_v16  ;;  %v113_v16 = vld [vmem:[%s9399_s0 + $0x318] sm:$0xff] }
  0x96   :  { %5319 = vmatprep.mubr.msk.f32.mxu0 %vm418_vm1, %v84_v17  ;;  %5613 = vmatprep.mubr.msk.f32.mxu1 %vm418_vm1, %v280_v18  ;;  %v309_v17 = vld [vmem:[%s9399_s0 + $0x938] sm:$0xff] }
  0x99   :  { %5320 = vmatmul.mubr.msk.f32.gmra.mxu0 %vm418_vm1, %v85_v19  ;;  %5614 = vmatmul.mubr.msk.f32.gmra.mxu1 %vm418_vm1, %v281_v20  ;;  %v114_v20 = vld [vmem:[%s9399_s0 + $0x320] sm:$0xff] }
  0x9a   :  { %5322 = vmatprep.mubr.msk.f32.mxu0 %vm418_vm1, %v86_v21  ;;  %5616 = vmatprep.mubr.msk.f32.mxu1 %vm418_vm1, %v282_v22  ;;  %v310_v21 = vld [vmem:[%s9399_s0 + $0x940] sm:$0xff] }
  0x9d   :  { %5323 = vmatmul.mubr.msk.f32.gmra.mxu0 %vm418_vm1, %v87_v23  ;;  %5617 = vmatmul.mubr.msk.f32.gmra.mxu1 %vm418_vm1, %v283_v24 }
  0x9e   :  { %5325 = vmatprep.mubr.msk.f32.mxu0 %vm418_vm1, %v88_v25  ;;  %5619 = vmatprep.mubr.msk.f32.mxu1 %vm418_vm1, %v284_v26 }
  0xa1   :  { %5326 = vmatmul.mubr.msk.f32.gmra.mxu0 %vm418_vm1, %v89_v27  ;;  %5620 = vmatmul.mubr.msk.f32.gmra.mxu1 %vm418_vm1, %v285_v28 }
  0xa2   :  { %5328 = vmatprep.mubr.msk.f32.mxu0 %vm418_vm1, %v90_v29  ;;  %5622 = vmatprep.mubr.msk.f32.mxu1 %vm418_vm1, %v286_v30 }
  0xa5   :  { %5329 = vmatmul.mubr.msk.f32.gmra.mxu0 %vm418_vm1, %v91_v31  ;;  %5623 = vmatmul.mubr.msk.f32.gmra.mxu1 %vm418_vm1, %v287_v32  ;;  %v115_v32 = vld [vmem:[%s9399_s0 + $0x328] sm:$0xff] }
  0xa6   :  { %5331 = vmatprep.mubr.msk.f32.mxu0 %vm418_vm1, %v92_v33  ;;  %5625 = vmatprep.mubr.msk.f32.mxu1 %vm418_vm1, %v288_v34  ;;  %v311_v33 = vld [vmem:[%s9399_s0 + $0x948] sm:$0xff] }
  0xa9   :  { %5332 = vmatmul.mubr.msk.f32.gmra.mxu0 %vm418_vm1, %v93_v35  ;;  %5626 = vmatmul.mubr.msk.f32.gmra.mxu1 %vm418_vm1, %v289_v36  ;;  %v116_v36 = vld [vmem:[%s9399_s0 + $0x330] sm:$0xff] }
  0xaa   :  { %5334 = vmatprep.mubr.msk.f32.mxu0 %vm418_vm1, %v94_v37  ;;  %5628 = vmatprep.mubr.msk.f32.mxu1 %vm418_vm1, %v290_v38  ;;  %v312_v37 = vld [vmem:[%s9399_s0 + $0x950] sm:$0xff] }
  0xad   :  { %5335 = vmatmul.mubr.msk.f32.gmra.mxu0 %vm418_vm1, %v95_v39  ;;  %5629 = vmatmul.mubr.msk.f32.gmra.mxu1 %vm418_vm1, %v291_v40 }
  0xae   :  { %5337 = vmatprep.mubr.msk.f32.mxu0 %vm418_vm1, %v96_v41  ;;  %5631 = vmatprep.mubr.msk.f32.mxu1 %vm418_vm1, %v292_v42 }
  0xb1   :  { %5338 = vmatmul.mubr.msk.f32.gmra.mxu0 %vm418_vm1, %v97_v43  ;;  %5632 = vmatmul.mubr.msk.f32.gmra.mxu1 %vm418_vm1, %v293_v44 }
  0xb2   :  { %5340 = vmatprep.mubr.msk.f32.mxu0 %vm418_vm1, %v98_v45  ;;  %5634 = vmatprep.mubr.msk.f32.mxu1 %vm418_vm1, %v294_v46 }
  0xb5   :  { %5341 = vmatmul.mubr.msk.f32.gmra.mxu0 %vm418_vm1, %v99_v47  ;;  %5635 = vmatmul.mubr.msk.f32.gmra.mxu1 %vm418_vm1, %v295_v48  ;;  %v117_v48 = vld [vmem:[%s9399_s0 + $0x338] sm:$0xff] }
  0xb6   :  { %5343 = vmatprep.mubr.msk.f32.mxu0 %vm418_vm1, %v100_v49  ;;  %5637 = vmatprep.mubr.msk.f32.mxu1 %vm418_vm1, %v296_v50  ;;  %v313_v49 = vld [vmem:[%s9399_s0 + $0x958] sm:$0xff] }
  0xb9   :  { %5344 = vmatmul.mubr.msk.f32.gmra.mxu0 %vm418_vm1, %v101_v51  ;;  %5638 = vmatmul.mubr.msk.f32.gmra.mxu1 %vm418_vm1, %v297_v52  ;;  %v118_v52 = vld [vmem:[%s9399_s0 + $0x340] sm:$0xff] }
  0xba   :  { %5346 = vmatprep.mubr.msk.f32.mxu0 %vm418_vm1, %v102_v53  ;;  %5640 = vmatprep.mubr.msk.f32.mxu1 %vm418_vm1, %v298_v54  ;;  %v314_v53 = vld [vmem:[%s9399_s0 + $0x960] sm:$0xff] }
  0xbd   :  { %5347 = vmatmul.mubr.msk.f32.gmra.mxu0 %vm418_vm1, %v103_v55  ;;  %5641 = vmatmul.mubr.msk.f32.gmra.mxu1 %vm418_vm1, %v299_v56 }
  0xbe   :  { %5349 = vmatprep.mubr.msk.f32.mxu0 %vm418_vm1, %v104_v57  ;;  %5643 = vmatprep.mubr.msk.f32.mxu1 %vm418_vm1, %v300_v58 }
  0xc1   :  { %5350 = vmatmul.mubr.msk.f32.gmra.mxu0 %vm418_vm1, %v105_v59  ;;  %5644 = vmatmul.mubr.msk.f32.gmra.mxu1 %vm418_vm1, %v301_v60 }
  0xc2   :  { %5352 = vmatprep.mubr.msk.f32.mxu0 %vm418_vm1, %v106_v61  ;;  %5646 = vmatprep.mubr.msk.f32.mxu1 %vm418_vm1, %v302_v62 }
  0xc5   :  { %5353 = vmatmul.mubr.msk.f32.gmra.mxu0 %vm418_vm1, %v107_v63  ;;  %5647 = vmatmul.mubr.msk.f32.gmra.mxu1 %vm418_vm1, %v303_v0  ;;  %v119_v0 = vld [vmem:[%s9399_s0 + $0x348] sm:$0xff] }
  0xc6   :  { %5355 = vmatprep.mubr.msk.f32.mxu0 %vm418_vm1, %v108_v1  ;;  %5649 = vmatprep.mubr.msk.f32.mxu1 %vm418_vm1, %v304_v2  ;;  %v315_v1 = vld [vmem:[%s9399_s0 + $0x968] sm:$0xff] }
  0xc9   :  { %5356 = vmatmul.mubr.msk.f32.gmra.mxu0 %vm418_vm1, %v109_v3  ;;  %5650 = vmatmul.mubr.msk.f32.gmra.mxu1 %vm418_vm1, %v305_v4  ;;  %v120_v4 = vld [vmem:[%s9399_s0 + $0x350] sm:$0xff] }
  0xca   :  { %5358 = vmatprep.mubr.msk.f32.mxu0 %vm418_vm1, %v110_v5  ;;  %5652 = vmatprep.mubr.msk.f32.mxu1 %vm418_vm1, %v306_v6  ;;  %v316_v5 = vld [vmem:[%s9399_s0 + $0x970] sm:$0xff] }
  0xcd   :  { %v5216_v12 = vpop.f32.mrf.mxu0  ;;  %5359 = vmatmul.mubr.msk.f32.gmra.mxu0 %vm418_vm1, %v111_v7  ;;  %v5510_v13 = vpop.f32.mrf.mxu1  ;;  %5653 = vmatmul.mubr.msk.f32.gmra.mxu1 %vm418_vm1, %v307_v8 }
  0xce   :  { %v1671_v14 = vadd.f32 %v5216_v12, %v6635_v9  ;;  %v2651_v15 = vadd.f32 %v5510_v13, %v6635_v9  ;;  %5361 = vmatprep.mubr.msk.f32.mxu0 %vm418_vm1, %v112_v10  ;;  %5655 = vmatprep.mubr.msk.f32.mxu1 %vm418_vm1, %v308_v11 }
  0xcf   :  { %v1665_v18 = vpop.f32.mrf.mxu0  ;;  %v2645_v19 = vpop.f32.mrf.mxu1 }
  0xd0   :  { %v3625_v22 = vmax.f32 %v1671_v14, 0.0  ;;  %v3821_v23 = vmax.f32 %v2651_v15, 0.0  ;;  %v1666_v24 = vadd.f32 %v6635_v9, %v1665_v18  ;;  %v2646_v25 = vadd.f32 %v6635_v9, %v2645_v19  ;;  %v317_v18 = vld [vmem:[%s9399_s0 + $0x978] sm:$0xff] }
  0xd1   :  { %v5219_v26 = vpop.f32.mrf.mxu0  ;;  %5362 = vmatmul.mubr.msk.f32.gmra.mxu0 %vm418_vm1, %v113_v16  ;;  %v5513_v27 = vpop.f32.mrf.mxu1  ;;  %5656 = vmatmul.mubr.msk.f32.gmra.mxu1 %vm418_vm1, %v309_v17  ;;  %v121_v17 = vld [vmem:[%s9399_s0 + $0x358] sm:$0xff] }
  0xd2   :  { %4018 = vst.msk [vmem:[%s9401_s3 + $0x8] sm:$0xff] %vm4016_vm2, %v3625_v22  ;;  %4214 = vst.msk [vmem:[%s9401_s3 + $0x628] sm:$0xff] %vm4016_vm2, %v3821_v23  ;;  %v3624_v28 = vmax.f32 %v1666_v24, 0.0  ;;  %v3820_v29 = vmax.f32 %v2646_v25, 0.0  ;;  %v1681_v30 = vadd.f32 %v5219_v26, %v6635_v9  ;;  %v2661_v31 = vadd.f32 %v5513_v27, %v6635_v9  ;;  %5364 = vmatprep.mubr.msk.f32.mxu0 %vm418_vm1, %v114_v20  ;;  %v318_v22 = vld [vmem:[%s9399_s0 + $0x980] sm:$0xff] }
  0xd3   :  { %5658 = vmatprep.mubr.msk.f32.mxu1 %vm418_vm1, %v310_v21  ;;  %v1675_v34 = vpop.f32.mrf.mxu0  ;;  %v2655_v35 = vpop.f32.mrf.mxu1  ;;  %v122_v21 = vld [vmem:[%s9399_s0 + $0x360] sm:$0xff] }
  0xd4   :  { %4017 = vst.msk [vmem:[%s9401_s3] sm:$0xff] %vm4016_vm2, %v3624_v28  ;;  %4213 = vst.msk [vmem:[%s9401_s3 + $0x620] sm:$0xff] %vm4016_vm2, %v3820_v29  ;;  %v3627_v38 = vmax.f32 %v1681_v30, 0.0  ;;  %v3823_v39 = vmax.f32 %v2661_v31, 0.0  ;;  %v1676_v40 = vadd.f32 %v6635_v9, %v1675_v34  ;;  %v2656_v41 = vadd.f32 %v6635_v9, %v2655_v35  ;;  %v319_v34 = vld [vmem:[%s9399_s0 + $0x988] sm:$0xff] }
  0xd5   :  { %v5222_v42 = vpop.f32.mrf.mxu0  ;;  %5365 = vmatmul.mubr.msk.f32.gmra.mxu0 %vm418_vm1, %v115_v32  ;;  %v5516_v43 = vpop.f32.mrf.mxu1  ;;  %5659 = vmatmul.mubr.msk.f32.gmra.mxu1 %vm418_vm1, %v311_v33  ;;  %v123_v33 = vld [vmem:[%s9399_s0 + $0x368] sm:$0xff] }
  0xd6   :  { %4020 = vst.msk [vmem:[%s9401_s3 + $0x18] sm:$0xff] %vm4016_vm2, %v3627_v38  ;;  %4216 = vst.msk [vmem:[%s9401_s3 + $0x638] sm:$0xff] %vm4016_vm2, %v3823_v39  ;;  %v3626_v44 = vmax.f32 %v1676_v40, 0.0  ;;  %v3822_v45 = vmax.f32 %v2656_v41, 0.0  ;;  %v1691_v46 = vadd.f32 %v5222_v42, %v6635_v9  ;;  %v2671_v47 = vadd.f32 %v5516_v43, %v6635_v9  ;;  %5367 = vmatprep.mubr.msk.f32.mxu0 %vm418_vm1, %v116_v36  ;;  %v320_v38 = vld [vmem:[%s9399_s0 + $0x990] sm:$0xff] }
  0xd7   :  { %5661 = vmatprep.mubr.msk.f32.mxu1 %vm418_vm1, %v312_v37  ;;  %v1685_v50 = vpop.f32.mrf.mxu0  ;;  %v2665_v51 = vpop.f32.mrf.mxu1  ;;  %v124_v37 = vld [vmem:[%s9399_s0 + $0x370] sm:$0xff] }
  0xd8   :  { %4019 = vst.msk [vmem:[%s9401_s3 + $0x10] sm:$0xff] %vm4016_vm2, %v3626_v44  ;;  %4215 = vst.msk [vmem:[%s9401_s3 + $0x630] sm:$0xff] %vm4016_vm2, %v3822_v45  ;;  %v3629_v54 = vmax.f32 %v1691_v46, 0.0  ;;  %v3825_v55 = vmax.f32 %v2671_v47, 0.0  ;;  %v1686_v56 = vadd.f32 %v6635_v9, %v1685_v50  ;;  %v2666_v57 = vadd.f32 %v6635_v9, %v2665_v51  ;;  %v321_v50 = vld [vmem:[%s9399_s0 + $0x998] sm:$0xff] }
  0xd9   :  { %v5225_v58 = vpop.f32.mrf.mxu0  ;;  %5368 = vmatmul.mubr.msk.f32.gmra.mxu0 %vm418_vm1, %v117_v48  ;;  %v5519_v59 = vpop.f32.mrf.mxu1  ;;  %5662 = vmatmul.mubr.msk.f32.gmra.mxu1 %vm418_vm1, %v313_v49  ;;  %v125_v49 = vld [vmem:[%s9399_s0 + $0x378] sm:$0xff] }
  0xda   :  { %4022 = vst.msk [vmem:[%s9401_s3 + $0x28] sm:$0xff] %vm4016_vm2, %v3629_v54  ;;  %4218 = vst.msk [vmem:[%s9401_s3 + $0x648] sm:$0xff] %vm4016_vm2, %v3825_v55  ;;  %v3628_v60 = vmax.f32 %v1686_v56, 0.0  ;;  %v3824_v61 = vmax.f32 %v2666_v57, 0.0  ;;  %v1701_v62 = vadd.f32 %v5225_v58, %v6635_v9  ;;  %v2681_v63 = vadd.f32 %v5519_v59, %v6635_v9  ;;  %5370 = vmatprep.mubr.msk.f32.mxu0 %vm418_vm1, %v118_v52  ;;  %v322_v54 = vld [vmem:[%s9399_s0 + $0x9a0] sm:$0xff] }
  0xdb   :  { %5664 = vmatprep.mubr.msk.f32.mxu1 %vm418_vm1, %v314_v53  ;;  %v1695_v2 = vpop.f32.mrf.mxu0  ;;  %v2675_v3 = vpop.f32.mrf.mxu1  ;;  %v126_v53 = vld [vmem:[%s9399_s0 + $0x380] sm:$0xff] }
  0xdc   :  { %4021 = vst.msk [vmem:[%s9401_s3 + $0x20] sm:$0xff] %vm4016_vm2, %v3628_v60  ;;  %4217 = vst.msk [vmem:[%s9401_s3 + $0x640] sm:$0xff] %vm4016_vm2, %v3824_v61  ;;  %v3631_v6 = vmax.f32 %v1701_v62, 0.0  ;;  %v3827_v7 = vmax.f32 %v2681_v63, 0.0  ;;  %v1696_v8 = vadd.f32 %v6635_v9, %v1695_v2  ;;  %v2676_v10 = vadd.f32 %v6635_v9, %v2675_v3  ;;  %v323_v2 = vld [vmem:[%s9399_s0 + $0x9a8] sm:$0xff] }
  0xdd   :  { %v5228_v11 = vpop.f32.mrf.mxu0  ;;  %5371 = vmatmul.mubr.msk.f32.gmra.mxu0 %vm418_vm1, %v119_v0  ;;  %v5522_v12 = vpop.f32.mrf.mxu1  ;;  %5665 = vmatmul.mubr.msk.f32.gmra.mxu1 %vm418_vm1, %v315_v1  ;;  %v127_v1 = vld [vmem:[%s9399_s0 + $0x388] sm:$0xff] }
  0xde   :  { %4024 = vst.msk [vmem:[%s9401_s3 + $0x38] sm:$0xff] %vm4016_vm2, %v3631_v6  ;;  %4220 = vst.msk [vmem:[%s9401_s3 + $0x658] sm:$0xff] %vm4016_vm2, %v3827_v7  ;;  %v3630_v13 = vmax.f32 %v1696_v8, 0.0  ;;  %v3826_v14 = vmax.f32 %v2676_v10, 0.0  ;;  %v1711_v15 = vadd.f32 %v5228_v11, %v6635_v9  ;;  %v2691_v16 = vadd.f32 %v5522_v12, %v6635_v9  ;;  %5373 = vmatprep.mubr.msk.f32.mxu0 %vm418_vm1, %v120_v4  ;;  %v324_v6 = vld [vmem:[%s9399_s0 + $0x9b0] sm:$0xff] }
  0xdf   :  { %5667 = vmatprep.mubr.msk.f32.mxu1 %vm418_vm1, %v316_v5  ;;  %v1705_v19 = vpop.f32.mrf.mxu0  ;;  %v2685_v20 = vpop.f32.mrf.mxu1  ;;  %v128_v5 = vld [vmem:[%s9399_s0 + $0x390] sm:$0xff] }
  0xe0   :  { %4023 = vst.msk [vmem:[%s9401_s3 + $0x30] sm:$0xff] %vm4016_vm2, %v3630_v13  ;;  %4219 = vst.msk [vmem:[%s9401_s3 + $0x650] sm:$0xff] %vm4016_vm2, %v3826_v14  ;;  %v3633_v23 = vmax.f32 %v1711_v15, 0.0  ;;  %v3829_v24 = vmax.f32 %v2691_v16, 0.0  ;;  %v1706_v25 = vadd.f32 %v6635_v9, %v1705_v19  ;;  %v2686_v26 = vadd.f32 %v6635_v9, %v2685_v20  ;;  %v325_v19 = vld [vmem:[%s9399_s0 + $0x9b8] sm:$0xff] }
  0xe1   :  { %v5231_v27 = vpop.f32.mrf.mxu0  ;;  %5374 = vmatmul.mubr.msk.f32.gmra.mxu0 %vm418_vm1, %v121_v17  ;;  %v5525_v28 = vpop.f32.mrf.mxu1  ;;  %5668 = vmatmul.mubr.msk.f32.gmra.mxu1 %vm418_vm1, %v317_v18  ;;  %v129_v18 = vld [vmem:[%s9399_s0 + $0x398] sm:$0xff] }
  0xe2   :  { %4026 = vst.msk [vmem:[%s9401_s3 + $0x48] sm:$0xff] %vm4016_vm2, %v3633_v23  ;;  %4222 = vst.msk [vmem:[%s9401_s3 + $0x668] sm:$0xff] %vm4016_vm2, %v3829_v24  ;;  %v3632_v29 = vmax.f32 %v1706_v25, 0.0  ;;  %v3828_v30 = vmax.f32 %v2686_v26, 0.0  ;;  %v1721_v31 = vadd.f32 %v5231_v27, %v6635_v9  ;;  %v2701_v32 = vadd.f32 %v5525_v28, %v6635_v9  ;;  %5376 = vmatprep.mubr.msk.f32.mxu0 %vm418_vm1, %v122_v21  ;;  %v326_v23 = vld [vmem:[%s9399_s0 + $0x9c0] sm:$0xff] }
  0xe3   :  { %5670 = vmatprep.mubr.msk.f32.mxu1 %vm418_vm1, %v318_v22  ;;  %v1715_v35 = vpop.f32.mrf.mxu0  ;;  %v2695_v36 = vpop.f32.mrf.mxu1  ;;  %v130_v22 = vld [vmem:[%s9399_s0 + $0x3a0] sm:$0xff] }
  0xe4   :  { %4025 = vst.msk [vmem:[%s9401_s3 + $0x40] sm:$0xff] %vm4016_vm2, %v3632_v29  ;;  %4221 = vst.msk [vmem:[%s9401_s3 + $0x660] sm:$0xff] %vm4016_vm2, %v3828_v30  ;;  %v3635_v39 = vmax.f32 %v1721_v31, 0.0  ;;  %v3831_v40 = vmax.f32 %v2701_v32, 0.0  ;;  %v1716_v41 = vadd.f32 %v6635_v9, %v1715_v35  ;;  %v2696_v42 = vadd.f32 %v6635_v9, %v2695_v36  ;;  %v327_v35 = vld [vmem:[%s9399_s0 + $0x9c8] sm:$0xff] }
  0xe5   :  { %v5234_v43 = vpop.f32.mrf.mxu0  ;;  %5377 = vmatmul.mubr.msk.f32.gmra.mxu0 %vm418_vm1, %v123_v33  ;;  %v5528_v44 = vpop.f32.mrf.mxu1  ;;  %5671 = vmatmul.mubr.msk.f32.gmra.mxu1 %vm418_vm1, %v319_v34  ;;  %v131_v34 = vld [vmem:[%s9399_s0 + $0x3a8] sm:$0xff] }
  0xe6   :  { %4028 = vst.msk [vmem:[%s9401_s3 + $0x58] sm:$0xff] %vm4016_vm2, %v3635_v39  ;;  %4224 = vst.msk [vmem:[%s9401_s3 + $0x678] sm:$0xff] %vm4016_vm2, %v3831_v40  ;;  %v3634_v45 = vmax.f32 %v1716_v41, 0.0  ;;  %v3830_v46 = vmax.f32 %v2696_v42, 0.0  ;;  %v1731_v47 = vadd.f32 %v5234_v43, %v6635_v9  ;;  %v2711_v48 = vadd.f32 %v5528_v44, %v6635_v9  ;;  %5379 = vmatprep.mubr.msk.f32.mxu0 %vm418_vm1, %v124_v37  ;;  %v328_v39 = vld [vmem:[%s9399_s0 + $0x9d0] sm:$0xff] }
  0xe7   :  { %5673 = vmatprep.mubr.msk.f32.mxu1 %vm418_vm1, %v320_v38  ;;  %v1725_v51 = vpop.f32.mrf.mxu0  ;;  %v2705_v52 = vpop.f32.mrf.mxu1  ;;  %v132_v38 = vld [vmem:[%s9399_s0 + $0x3b0] sm:$0xff] }
  0xe8   :  { %4027 = vst.msk [vmem:[%s9401_s3 + $0x50] sm:$0xff] %vm4016_vm2, %v3634_v45  ;;  %4223 = vst.msk [vmem:[%s9401_s3 + $0x670] sm:$0xff] %vm4016_vm2, %v3830_v46  ;;  %v3637_v55 = vmax.f32 %v1731_v47, 0.0  ;;  %v3833_v56 = vmax.f32 %v2711_v48, 0.0  ;;  %v1726_v57 = vadd.f32 %v6635_v9, %v1725_v51  ;;  %v2706_v58 = vadd.f32 %v6635_v9, %v2705_v52  ;;  %v329_v51 = vld [vmem:[%s9399_s0 + $0x9d8] sm:$0xff] }
  0xe9   :  { %v5237_v59 = vpop.f32.mrf.mxu0  ;;  %5380 = vmatmul.mubr.msk.f32.gmra.mxu0 %vm418_vm1, %v125_v49  ;;  %v5531_v60 = vpop.f32.mrf.mxu1  ;;  %5674 = vmatmul.mubr.msk.f32.gmra.mxu1 %vm418_vm1, %v321_v50  ;;  %v133_v50 = vld [vmem:[%s9399_s0 + $0x3b8] sm:$0xff] }
  0xea   :  { %4030 = vst.msk [vmem:[%s9401_s3 + $0x68] sm:$0xff] %vm4016_vm2, %v3637_v55  ;;  %4226 = vst.msk [vmem:[%s9401_s3 + $0x688] sm:$0xff] %vm4016_vm2, %v3833_v56  ;;  %v3636_v61 = vmax.f32 %v1726_v57, 0.0  ;;  %v3832_v62 = vmax.f32 %v2706_v58, 0.0  ;;  %v1741_v63 = vadd.f32 %v5237_v59, %v6635_v9  ;;  %v2721_v0 = vadd.f32 %v5531_v60, %v6635_v9  ;;  %5382 = vmatprep.mubr.msk.f32.mxu0 %vm418_vm1, %v126_v53  ;;  %v330_v55 = vld [vmem:[%s9399_s0 + $0x9e0] sm:$0xff] }
  0xeb   :  { %5676 = vmatprep.mubr.msk.f32.mxu1 %vm418_vm1, %v322_v54  ;;  %v1735_v3 = vpop.f32.mrf.mxu0  ;;  %v2715_v4 = vpop.f32.mrf.mxu1  ;;  %v134_v54 = vld [vmem:[%s9399_s0 + $0x3c0] sm:$0xff] }
  0xec   :  { %4029 = vst.msk [vmem:[%s9401_s3 + $0x60] sm:$0xff] %vm4016_vm2, %v3636_v61  ;;  %4225 = vst.msk [vmem:[%s9401_s3 + $0x680] sm:$0xff] %vm4016_vm2, %v3832_v62  ;;  %v3639_v7 = vmax.f32 %v1741_v63, 0.0  ;;  %v3835_v8 = vmax.f32 %v2721_v0, 0.0  ;;  %v1736_v10 = vadd.f32 %v6635_v9, %v1735_v3  ;;  %v2716_v11 = vadd.f32 %v6635_v9, %v2715_v4  ;;  %v331_v3 = vld [vmem:[%s9399_s0 + $0x9e8] sm:$0xff] }
  0xed   :  { %v5240_v12 = vpop.f32.mrf.mxu0  ;;  %5383 = vmatmul.mubr.msk.f32.gmra.mxu0 %vm418_vm1, %v127_v1  ;;  %v5534_v13 = vpop.f32.mrf.mxu1  ;;  %5677 = vmatmul.mubr.msk.f32.gmra.mxu1 %vm418_vm1, %v323_v2  ;;  %v135_v2 = vld [vmem:[%s9399_s0 + $0x3c8] sm:$0xff] }
  0xee   :  { %4032 = vst.msk [vmem:[%s9401_s3 + $0x78] sm:$0xff] %vm4016_vm2, %v3639_v7  ;;  %4228 = vst.msk [vmem:[%s9401_s3 + $0x698] sm:$0xff] %vm4016_vm2, %v3835_v8  ;;  %v3638_v14 = vmax.f32 %v1736_v10, 0.0  ;;  %v3834_v15 = vmax.f32 %v2716_v11, 0.0  ;;  %v1751_v16 = vadd.f32 %v5240_v12, %v6635_v9  ;;  %v2731_v17 = vadd.f32 %v5534_v13, %v6635_v9  ;;  %5385 = vmatprep.mubr.msk.f32.mxu0 %vm418_vm1, %v128_v5  ;;  %v332_v7 = vld [vmem:[%s9399_s0 + $0x9f0] sm:$0xff] }
  0xef   :  { %5679 = vmatprep.mubr.msk.f32.mxu1 %vm418_vm1, %v324_v6  ;;  %v1745_v20 = vpop.f32.mrf.mxu0  ;;  %v2725_v21 = vpop.f32.mrf.mxu1  ;;  %v136_v6 = vld [vmem:[%s9399_s0 + $0x3d0] sm:$0xff] }
  0xf0   :  { %4031 = vst.msk [vmem:[%s9401_s3 + $0x70] sm:$0xff] %vm4016_vm2, %v3638_v14  ;;  %4227 = vst.msk [vmem:[%s9401_s3 + $0x690] sm:$0xff] %vm4016_vm2, %v3834_v15  ;;  %v3641_v24 = vmax.f32 %v1751_v16, 0.0  ;;  %v3837_v25 = vmax.f32 %v2731_v17, 0.0  ;;  %v1746_v26 = vadd.f32 %v6635_v9, %v1745_v20  ;;  %v2726_v27 = vadd.f32 %v6635_v9, %v2725_v21  ;;  %v333_v20 = vld [vmem:[%s9399_s0 + $0x9f8] sm:$0xff] }
  0xf1   :  { %v5243_v28 = vpop.f32.mrf.mxu0  ;;  %5386 = vmatmul.mubr.msk.f32.gmra.mxu0 %vm418_vm1, %v129_v18  ;;  %v5537_v29 = vpop.f32.mrf.mxu1  ;;  %5680 = vmatmul.mubr.msk.f32.gmra.mxu1 %vm418_vm1, %v325_v19  ;;  %v137_v19 = vld [vmem:[%s9399_s0 + $0x3d8] sm:$0xff] }
  0xf2   :  { %4034 = vst.msk [vmem:[%s9401_s3 + $0x88] sm:$0xff] %vm4016_vm2, %v3641_v24  ;;  %4230 = vst.msk [vmem:[%s9401_s3 + $0x6a8] sm:$0xff] %vm4016_vm2, %v3837_v25  ;;  %v3640_v30 = vmax.f32 %v1746_v26, 0.0  ;;  %v3836_v31 = vmax.f32 %v2726_v27, 0.0  ;;  %v1761_v32 = vadd.f32 %v5243_v28, %v6635_v9  ;;  %v2741_v33 = vadd.f32 %v5537_v29, %v6635_v9  ;;  %5388 = vmatprep.mubr.msk.f32.mxu0 %vm418_vm1, %v130_v22  ;;  %v334_v24 = vld [vmem:[%s9399_s0 + $0xa00] sm:$0xff] }
  0xf3   :  { %5682 = vmatprep.mubr.msk.f32.mxu1 %vm418_vm1, %v326_v23  ;;  %v1755_v36 = vpop.f32.mrf.mxu0  ;;  %v2735_v37 = vpop.f32.mrf.mxu1  ;;  %v138_v23 = vld [vmem:[%s9399_s0 + $0x3e0] sm:$0xff] }
  0xf4   :  { %4033 = vst.msk [vmem:[%s9401_s3 + $0x80] sm:$0xff] %vm4016_vm2, %v3640_v30  ;;  %4229 = vst.msk [vmem:[%s9401_s3 + $0x6a0] sm:$0xff] %vm4016_vm2, %v3836_v31  ;;  %v3643_v40 = vmax.f32 %v1761_v32, 0.0  ;;  %v3839_v41 = vmax.f32 %v2741_v33, 0.0  ;;  %v1756_v42 = vadd.f32 %v6635_v9, %v1755_v36  ;;  %v2736_v43 = vadd.f32 %v6635_v9, %v2735_v37  ;;  %v335_v36 = vld [vmem:[%s9399_s0 + $0xa08] sm:$0xff] }
  0xf5   :  { %v5246_v44 = vpop.f32.mrf.mxu0  ;;  %5389 = vmatmul.mubr.msk.f32.gmra.mxu0 %vm418_vm1, %v131_v34  ;;  %v5540_v45 = vpop.f32.mrf.mxu1  ;;  %5683 = vmatmul.mubr.msk.f32.gmra.mxu1 %vm418_vm1, %v327_v35  ;;  %v139_v35 = vld [vmem:[%s9399_s0 + $0x3e8] sm:$0xff] }
  0xf6   :  { %4036 = vst.msk [vmem:[%s9401_s3 + $0x98] sm:$0xff] %vm4016_vm2, %v3643_v40  ;;  %4232 = vst.msk [vmem:[%s9401_s3 + $0x6b8] sm:$0xff] %vm4016_vm2, %v3839_v41  ;;  %v3642_v46 = vmax.f32 %v1756_v42, 0.0  ;;  %v3838_v47 = vmax.f32 %v2736_v43, 0.0  ;;  %v1771_v48 = vadd.f32 %v5246_v44, %v6635_v9  ;;  %v2751_v49 = vadd.f32 %v5540_v45, %v6635_v9  ;;  %5391 = vmatprep.mubr.msk.f32.mxu0 %vm418_vm1, %v132_v38  ;;  %v336_v40 = vld [vmem:[%s9399_s0 + $0xa10] sm:$0xff] }
  0xf7   :  { %5685 = vmatprep.mubr.msk.f32.mxu1 %vm418_vm1, %v328_v39  ;;  %v1765_v52 = vpop.f32.mrf.mxu0  ;;  %v2745_v53 = vpop.f32.mrf.mxu1  ;;  %v140_v39 = vld [vmem:[%s9399_s0 + $0x3f0] sm:$0xff] }
  0xf8   :  { %4035 = vst.msk [vmem:[%s9401_s3 + $0x90] sm:$0xff] %vm4016_vm2, %v3642_v46  ;;  %4231 = vst.msk [vmem:[%s9401_s3 + $0x6b0] sm:$0xff] %vm4016_vm2, %v3838_v47  ;;  %v3645_v56 = vmax.f32 %v1771_v48, 0.0  ;;  %v3841_v57 = vmax.f32 %v2751_v49, 0.0  ;;  %v1766_v58 = vadd.f32 %v6635_v9, %v1765_v52  ;;  %v2746_v59 = vadd.f32 %v6635_v9, %v2745_v53  ;;  %v337_v52 = vld [vmem:[%s9399_s0 + $0xa18] sm:$0xff] }
  0xf9   :  { %v5249_v60 = vpop.f32.mrf.mxu0  ;;  %5392 = vmatmul.mubr.msk.f32.gmra.mxu0 %vm418_vm1, %v133_v50  ;;  %v5543_v61 = vpop.f32.mrf.mxu1  ;;  %5686 = vmatmul.mubr.msk.f32.gmra.mxu1 %vm418_vm1, %v329_v51  ;;  %v141_v51 = vld [vmem:[%s9399_s0 + $0x3f8] sm:$0xff] }
  0xfa   :  { %4038 = vst.msk [vmem:[%s9401_s3 + $0xa8] sm:$0xff] %vm4016_vm2, %v3645_v56  ;;  %4234 = vst.msk [vmem:[%s9401_s3 + $0x6c8] sm:$0xff] %vm4016_vm2, %v3841_v57  ;;  %v3644_v62 = vmax.f32 %v1766_v58, 0.0  ;;  %v3840_v63 = vmax.f32 %v2746_v59, 0.0  ;;  %v1781_v0 = vadd.f32 %v5249_v60, %v6635_v9  ;;  %v2761_v1 = vadd.f32 %v5543_v61, %v6635_v9  ;;  %5394 = vmatprep.mubr.msk.f32.mxu0 %vm418_vm1, %v134_v54  ;;  %v338_v56 = vld [vmem:[%s9399_s0 + $0xa20] sm:$0xff] }
  0xfb   :  { %5688 = vmatprep.mubr.msk.f32.mxu1 %vm418_vm1, %v330_v55  ;;  %v1775_v4 = vpop.f32.mrf.mxu0  ;;  %v2755_v5 = vpop.f32.mrf.mxu1  ;;  %v142_v55 = vld [vmem:[%s9399_s0 + $0x400] sm:$0xff] }
  0xfc   :  { %4037 = vst.msk [vmem:[%s9401_s3 + $0xa0] sm:$0xff] %vm4016_vm2, %v3644_v62  ;;  %4233 = vst.msk [vmem:[%s9401_s3 + $0x6c0] sm:$0xff] %vm4016_vm2, %v3840_v63  ;;  %v3647_v8 = vmax.f32 %v1781_v0, 0.0  ;;  %v3843_v10 = vmax.f32 %v2761_v1, 0.0  ;;  %v1776_v11 = vadd.f32 %v6635_v9, %v1775_v4  ;;  %v2756_v12 = vadd.f32 %v6635_v9, %v2755_v5  ;;  %v339_v4 = vld [vmem:[%s9399_s0 + $0xa28] sm:$0xff] }
  0xfd   :  { %v5252_v13 = vpop.f32.mrf.mxu0  ;;  %5395 = vmatmul.mubr.msk.f32.gmra.mxu0 %vm418_vm1, %v135_v2  ;;  %v5546_v14 = vpop.f32.mrf.mxu1  ;;  %5689 = vmatmul.mubr.msk.f32.gmra.mxu1 %vm418_vm1, %v331_v3  ;;  %v143_v3 = vld [vmem:[%s9399_s0 + $0x408] sm:$0xff] }
  0xfe   :  { %4040 = vst.msk [vmem:[%s9401_s3 + $0xb8] sm:$0xff] %vm4016_vm2, %v3647_v8  ;;  %4236 = vst.msk [vmem:[%s9401_s3 + $0x6d8] sm:$0xff] %vm4016_vm2, %v3843_v10  ;;  %v3646_v15 = vmax.f32 %v1776_v11, 0.0  ;;  %v3842_v16 = vmax.f32 %v2756_v12, 0.0  ;;  %v1791_v17 = vadd.f32 %v5252_v13, %v6635_v9  ;;  %v2771_v18 = vadd.f32 %v5546_v14, %v6635_v9  ;;  %5397 = vmatprep.mubr.msk.f32.mxu0 %vm418_vm1, %v136_v6  ;;  %v340_v8 = vld [vmem:[%s9399_s0 + $0xa30] sm:$0xff] }
  0xff   :  { %5691 = vmatprep.mubr.msk.f32.mxu1 %vm418_vm1, %v332_v7  ;;  %v1785_v21 = vpop.f32.mrf.mxu0  ;;  %v2765_v22 = vpop.f32.mrf.mxu1  ;;  %v144_v7 = vld [vmem:[%s9399_s0 + $0x410] sm:$0xff] }
 0x100   :  { %4039 = vst.msk [vmem:[%s9401_s3 + $0xb0] sm:$0xff] %vm4016_vm2, %v3646_v15  ;;  %4235 = vst.msk [vmem:[%s9401_s3 + $0x6d0] sm:$0xff] %vm4016_vm2, %v3842_v16  ;;  %v3649_v25 = vmax.f32 %v1791_v17, 0.0  ;;  %v3845_v26 = vmax.f32 %v2771_v18, 0.0  ;;  %v1786_v27 = vadd.f32 %v6635_v9, %v1785_v21  ;;  %v2766_v28 = vadd.f32 %v6635_v9, %v2765_v22  ;;  %v341_v21 = vld [vmem:[%s9399_s0 + $0xa38] sm:$0xff] }
 0x101   :  { %v5255_v29 = vpop.f32.mrf.mxu0  ;;  %5398 = vmatmul.mubr.msk.f32.gmra.mxu0 %vm418_vm1, %v137_v19  ;;  %v5549_v30 = vpop.f32.mrf.mxu1  ;;  %5692 = vmatmul.mubr.msk.f32.gmra.mxu1 %vm418_vm1, %v333_v20  ;;  %v145_v20 = vld [vmem:[%s9399_s0 + $0x418] sm:$0xff] }
 0x102   :  { %4042 = vst.msk [vmem:[%s9401_s3 + $0xc8] sm:$0xff] %vm4016_vm2, %v3649_v25  ;;  %4238 = vst.msk [vmem:[%s9401_s3 + $0x6e8] sm:$0xff] %vm4016_vm2, %v3845_v26  ;;  %v3648_v31 = vmax.f32 %v1786_v27, 0.0  ;;  %v3844_v32 = vmax.f32 %v2766_v28, 0.0  ;;  %v1801_v33 = vadd.f32 %v5255_v29, %v6635_v9  ;;  %v2781_v34 = vadd.f32 %v5549_v30, %v6635_v9  ;;  %5400 = vmatprep.mubr.msk.f32.mxu0 %vm418_vm1, %v138_v23  ;;  %v342_v25 = vld [vmem:[%s9399_s0 + $0xa40] sm:$0xff] }
 0x103   :  { %5694 = vmatprep.mubr.msk.f32.mxu1 %vm418_vm1, %v334_v24  ;;  %v1795_v37 = vpop.f32.mrf.mxu0  ;;  %v2775_v38 = vpop.f32.mrf.mxu1  ;;  %v146_v24 = vld [vmem:[%s9399_s0 + $0x420] sm:$0xff] }
 0x104   :  { %4041 = vst.msk [vmem:[%s9401_s3 + $0xc0] sm:$0xff] %vm4016_vm2, %v3648_v31  ;;  %4237 = vst.msk [vmem:[%s9401_s3 + $0x6e0] sm:$0xff] %vm4016_vm2, %v3844_v32  ;;  %v3651_v41 = vmax.f32 %v1801_v33, 0.0  ;;  %v3847_v42 = vmax.f32 %v2781_v34, 0.0  ;;  %v1796_v43 = vadd.f32 %v6635_v9, %v1795_v37  ;;  %v2776_v44 = vadd.f32 %v6635_v9, %v2775_v38  ;;  %v343_v37 = vld [vmem:[%s9399_s0 + $0xa48] sm:$0xff] }
 0x105   :  { %v5258_v45 = vpop.f32.mrf.mxu0  ;;  %5401 = vmatmul.mubr.msk.f32.gmra.mxu0 %vm418_vm1, %v139_v35  ;;  %v5552_v46 = vpop.f32.mrf.mxu1  ;;  %5695 = vmatmul.mubr.msk.f32.gmra.mxu1 %vm418_vm1, %v335_v36  ;;  %v147_v36 = vld [vmem:[%s9399_s0 + $0x428] sm:$0xff] }
 0x106   :  { %4044 = vst.msk [vmem:[%s9401_s3 + $0xd8] sm:$0xff] %vm4016_vm2, %v3651_v41  ;;  %4240 = vst.msk [vmem:[%s9401_s3 + $0x6f8] sm:$0xff] %vm4016_vm2, %v3847_v42  ;;  %v3650_v47 = vmax.f32 %v1796_v43, 0.0  ;;  %v3846_v48 = vmax.f32 %v2776_v44, 0.0  ;;  %v1811_v49 = vadd.f32 %v5258_v45, %v6635_v9  ;;  %v2791_v50 = vadd.f32 %v5552_v46, %v6635_v9  ;;  %5403 = vmatprep.mubr.msk.f32.mxu0 %vm418_vm1, %v140_v39  ;;  %v344_v41 = vld [vmem:[%s9399_s0 + $0xa50] sm:$0xff] }
 0x107   :  { %5697 = vmatprep.mubr.msk.f32.mxu1 %vm418_vm1, %v336_v40  ;;  %v1805_v53 = vpop.f32.mrf.mxu0  ;;  %v2785_v54 = vpop.f32.mrf.mxu1  ;;  %v148_v40 = vld [vmem:[%s9399_s0 + $0x430] sm:$0xff] }
 0x108   :  { %4043 = vst.msk [vmem:[%s9401_s3 + $0xd0] sm:$0xff] %vm4016_vm2, %v3650_v47  ;;  %4239 = vst.msk [vmem:[%s9401_s3 + $0x6f0] sm:$0xff] %vm4016_vm2, %v3846_v48  ;;  %v3653_v57 = vmax.f32 %v1811_v49, 0.0  ;;  %v3849_v58 = vmax.f32 %v2791_v50, 0.0  ;;  %v1806_v59 = vadd.f32 %v6635_v9, %v1805_v53  ;;  %v2786_v60 = vadd.f32 %v6635_v9, %v2785_v54  ;;  %v345_v53 = vld [vmem:[%s9399_s0 + $0xa58] sm:$0xff] }
 0x109   :  { %v5261_v61 = vpop.f32.mrf.mxu0  ;;  %5404 = vmatmul.mubr.msk.f32.gmra.mxu0 %vm418_vm1, %v141_v51  ;;  %v5555_v62 = vpop.f32.mrf.mxu1  ;;  %5698 = vmatmul.mubr.msk.f32.gmra.mxu1 %vm418_vm1, %v337_v52  ;;  %v149_v52 = vld [vmem:[%s9399_s0 + $0x438] sm:$0xff] }
 0x10a   :  { %4046 = vst.msk [vmem:[%s9401_s3 + $0xe8] sm:$0xff] %vm4016_vm2, %v3653_v57  ;;  %4242 = vst.msk [vmem:[%s9401_s3 + $0x708] sm:$0xff] %vm4016_vm2, %v3849_v58  ;;  %v3652_v63 = vmax.f32 %v1806_v59, 0.0  ;;  %v3848_v0 = vmax.f32 %v2786_v60, 0.0  ;;  %v1821_v1 = vadd.f32 %v5261_v61, %v6635_v9  ;;  %v2801_v2 = vadd.f32 %v5555_v62, %v6635_v9  ;;  %5406 = vmatprep.mubr.msk.f32.mxu0 %vm418_vm1, %v142_v55  ;;  %v346_v57 = vld [vmem:[%s9399_s0 + $0xa60] sm:$0xff] }
 0x10b   :  { %5700 = vmatprep.mubr.msk.f32.mxu1 %vm418_vm1, %v338_v56  ;;  %v1815_v5 = vpop.f32.mrf.mxu0  ;;  %v2795_v6 = vpop.f32.mrf.mxu1  ;;  %v150_v56 = vld [vmem:[%s9399_s0 + $0x440] sm:$0xff] }
 0x10c   :  { %4045 = vst.msk [vmem:[%s9401_s3 + $0xe0] sm:$0xff] %vm4016_vm2, %v3652_v63  ;;  %4241 = vst.msk [vmem:[%s9401_s3 + $0x700] sm:$0xff] %vm4016_vm2, %v3848_v0  ;;  %v3655_v10 = vmax.f32 %v1821_v1, 0.0  ;;  %v3851_v11 = vmax.f32 %v2801_v2, 0.0  ;;  %v1816_v12 = vadd.f32 %v6635_v9, %v1815_v5  ;;  %v2796_v13 = vadd.f32 %v6635_v9, %v2795_v6  ;;  %v347_v5 = vld [vmem:[%s9399_s0 + $0xa68] sm:$0xff] }
 0x10d   :  { %v5264_v14 = vpop.f32.mrf.mxu0  ;;  %5407 = vmatmul.mubr.msk.f32.gmra.mxu0 %vm418_vm1, %v143_v3  ;;  %v5558_v15 = vpop.f32.mrf.mxu1  ;;  %5701 = vmatmul.mubr.msk.f32.gmra.mxu1 %vm418_vm1, %v339_v4  ;;  %v151_v4 = vld [vmem:[%s9399_s0 + $0x448] sm:$0xff] }
 0x10e   :  { %4048 = vst.msk [vmem:[%s9401_s3 + $0xf8] sm:$0xff] %vm4016_vm2, %v3655_v10  ;;  %4244 = vst.msk [vmem:[%s9401_s3 + $0x718] sm:$0xff] %vm4016_vm2, %v3851_v11  ;;  %v3654_v16 = vmax.f32 %v1816_v12, 0.0  ;;  %v3850_v17 = vmax.f32 %v2796_v13, 0.0  ;;  %v1831_v18 = vadd.f32 %v5264_v14, %v6635_v9  ;;  %v2811_v19 = vadd.f32 %v5558_v15, %v6635_v9  ;;  %5409 = vmatprep.mubr.msk.f32.mxu0 %vm418_vm1, %v144_v7  ;;  %v348_v10 = vld [vmem:[%s9399_s0 + $0xa70] sm:$0xff] }
 0x10f   :  { %5703 = vmatprep.mubr.msk.f32.mxu1 %vm418_vm1, %v340_v8  ;;  %v1825_v22 = vpop.f32.mrf.mxu0  ;;  %v2805_v23 = vpop.f32.mrf.mxu1  ;;  %v152_v8 = vld [vmem:[%s9399_s0 + $0x450] sm:$0xff] }
 0x110   :  { %4047 = vst.msk [vmem:[%s9401_s3 + $0xf0] sm:$0xff] %vm4016_vm2, %v3654_v16  ;;  %4243 = vst.msk [vmem:[%s9401_s3 + $0x710] sm:$0xff] %vm4016_vm2, %v3850_v17  ;;  %v3657_v26 = vmax.f32 %v1831_v18, 0.0  ;;  %v3853_v27 = vmax.f32 %v2811_v19, 0.0  ;;  %v1826_v28 = vadd.f32 %v6635_v9, %v1825_v22  ;;  %v2806_v29 = vadd.f32 %v6635_v9, %v2805_v23  ;;  %v349_v22 = vld [vmem:[%s9399_s0 + $0xa78] sm:$0xff] }
 0x111   :  { %v5267_v30 = vpop.f32.mrf.mxu0  ;;  %5410 = vmatmul.mubr.msk.f32.gmra.mxu0 %vm418_vm1, %v145_v20  ;;  %v5561_v31 = vpop.f32.mrf.mxu1  ;;  %5704 = vmatmul.mubr.msk.f32.gmra.mxu1 %vm418_vm1, %v341_v21  ;;  %v153_v21 = vld [vmem:[%s9399_s0 + $0x458] sm:$0xff] }
 0x112   :  { %4050 = vst.msk [vmem:[%s9401_s3 + $0x108] sm:$0xff] %vm4016_vm2, %v3657_v26  ;;  %4246 = vst.msk [vmem:[%s9401_s3 + $0x728] sm:$0xff] %vm4016_vm2, %v3853_v27  ;;  %v3656_v32 = vmax.f32 %v1826_v28, 0.0  ;;  %v3852_v33 = vmax.f32 %v2806_v29, 0.0  ;;  %v1841_v34 = vadd.f32 %v5267_v30, %v6635_v9  ;;  %v2821_v35 = vadd.f32 %v5561_v31, %v6635_v9  ;;  %5412 = vmatprep.mubr.msk.f32.mxu0 %vm418_vm1, %v146_v24  ;;  %v350_v26 = vld [vmem:[%s9399_s0 + $0xa80] sm:$0xff] }
 0x113   :  { %5706 = vmatprep.mubr.msk.f32.mxu1 %vm418_vm1, %v342_v25  ;;  %v1835_v38 = vpop.f32.mrf.mxu0  ;;  %v2815_v39 = vpop.f32.mrf.mxu1  ;;  %v154_v25 = vld [vmem:[%s9399_s0 + $0x460] sm:$0xff] }
 0x114   :  { %4049 = vst.msk [vmem:[%s9401_s3 + $0x100] sm:$0xff] %vm4016_vm2, %v3656_v32  ;;  %4245 = vst.msk [vmem:[%s9401_s3 + $0x720] sm:$0xff] %vm4016_vm2, %v3852_v33  ;;  %v3659_v42 = vmax.f32 %v1841_v34, 0.0  ;;  %v3855_v43 = vmax.f32 %v2821_v35, 0.0  ;;  %v1836_v44 = vadd.f32 %v6635_v9, %v1835_v38  ;;  %v2816_v45 = vadd.f32 %v6635_v9, %v2815_v39  ;;  %v155_v38 = vld [vmem:[%s9399_s0 + $0x468] sm:$0xff] }
 0x115   :  { %v5270_v46 = vpop.f32.mrf.mxu0  ;;  %5413 = vmatmul.mubr.msk.f32.gmra.mxu0 %vm418_vm1, %v147_v36  ;;  %v5564_v47 = vpop.f32.mrf.mxu1  ;;  %5707 = vmatmul.mubr.msk.f32.gmra.mxu1 %vm418_vm1, %v343_v37  ;;  %v7397_v36 = vld [vmem:[%s9400_s2] ss:$0 sm:$0xff]  ;;  %v351_v39 = vld [vmem:[%s9399_s0 + $0xa88] sm:$0xff] }
 0x116   :  { %4052 = vst.msk [vmem:[%s9401_s3 + $0x118] sm:$0xff] %vm4016_vm2, %v3659_v42  ;;  %4248 = vst.msk [vmem:[%s9401_s3 + $0x738] sm:$0xff] %vm4016_vm2, %v3855_v43  ;;  %v3658_v48 = vmax.f32 %v1836_v44, 0.0  ;;  %v3854_v49 = vmax.f32 %v2816_v45, 0.0  ;;  %v1851_v50 = vadd.f32 %v5270_v46, %v6635_v9  ;;  %v2831_v51 = vadd.f32 %v5564_v47, %v6635_v9  ;;  %5415 = vmatprep.mubr.msk.f32.mxu0 %vm418_vm1, %v148_v40  ;;  %v352_v42 = vld [vmem:[%s9399_s0 + $0xa90] sm:$0xff] }
 0x117   :  { %5709 = vmatprep.mubr.msk.f32.mxu1 %vm418_vm1, %v344_v41  ;;  %v1845_v54 = vpop.f32.mrf.mxu0  ;;  %v2825_v55 = vpop.f32.mrf.mxu1  ;;  %v156_v41 = vld [vmem:[%s9399_s0 + $0x470] sm:$0xff] }
 0x118   :  { %4051 = vst.msk [vmem:[%s9401_s3 + $0x110] sm:$0xff] %vm4016_vm2, %v3658_v48  ;;  %4247 = vst.msk [vmem:[%s9401_s3 + $0x730] sm:$0xff] %vm4016_vm2, %v3854_v49  ;;  %v3661_v58 = vmax.f32 %v1851_v50, 0.0  ;;  %v3857_v59 = vmax.f32 %v2831_v51, 0.0  ;;  %v1846_v60 = vadd.f32 %v6635_v9, %v1845_v54  ;;  %v2826_v61 = vadd.f32 %v6635_v9, %v2825_v55  ;;  %v353_v54 = vld [vmem:[%s9399_s0 + $0xa98] sm:$0xff] }
 0x119   :  { %v5273_v62 = vpop.f32.mrf.mxu0  ;;  %5416 = vmatmul.mubr.msk.f32.gmra.mxu0 %vm418_vm1, %v149_v52  ;;  %v5567_v63 = vpop.f32.mrf.mxu1  ;;  %5710 = vmatmul.mubr.msk.f32.gmra.mxu1 %vm418_vm1, %v345_v53  ;;  %v157_v53 = vld [vmem:[%s9399_s0 + $0x478] sm:$0xff] }
 0x11a   :  { %4054 = vst.msk [vmem:[%s9401_s3 + $0x128] sm:$0xff] %vm4016_vm2, %v3661_v58  ;;  %4250 = vst.msk [vmem:[%s9401_s3 + $0x748] sm:$0xff] %vm4016_vm2, %v3857_v59  ;;  %v3660_v0 = vmax.f32 %v1846_v60, 0.0  ;;  %v3856_v1 = vmax.f32 %v2826_v61, 0.0  ;;  %v1861_v2 = vadd.f32 %v5273_v62, %v6635_v9  ;;  %v2841_v3 = vadd.f32 %v5567_v63, %v6635_v9  ;;  %5418 = vmatprep.mubr.msk.f32.mxu0 %vm418_vm1, %v150_v56  ;;  %v354_v58 = vld [vmem:[%s9399_s0 + $0xaa0] sm:$0xff] }
 0x11b   :  { %5712 = vmatprep.mubr.msk.f32.mxu1 %vm418_vm1, %v346_v57  ;;  %v1855_v6 = vpop.f32.mrf.mxu0  ;;  %v2835_v7 = vpop.f32.mrf.mxu1  ;;  %v158_v57 = vld [vmem:[%s9399_s0 + $0x480] sm:$0xff] }
 0x11c   :  { %4053 = vst.msk [vmem:[%s9401_s3 + $0x120] sm:$0xff] %vm4016_vm2, %v3660_v0  ;;  %4249 = vst.msk [vmem:[%s9401_s3 + $0x740] sm:$0xff] %vm4016_vm2, %v3856_v1  ;;  %v3663_v11 = vmax.f32 %v1861_v2, 0.0  ;;  %v3859_v12 = vmax.f32 %v2841_v3, 0.0  ;;  %v1856_v13 = vadd.f32 %v6635_v9, %v1855_v6  ;;  %v2836_v14 = vadd.f32 %v6635_v9, %v2835_v7  ;;  %v355_v6 = vld [vmem:[%s9399_s0 + $0xaa8] sm:$0xff] }
 0x11d   :  { %v5276_v15 = vpop.f32.mrf.mxu0  ;;  %5419 = vmatmul.mubr.msk.f32.gmra.mxu0 %vm418_vm1, %v151_v4  ;;  %v5570_v16 = vpop.f32.mrf.mxu1  ;;  %5713 = vmatmul.mubr.msk.f32.gmra.mxu1 %vm418_vm1, %v347_v5  ;;  %v159_v5 = vld [vmem:[%s9399_s0 + $0x488] sm:$0xff] }
 0x11e   :  { %4056 = vst.msk [vmem:[%s9401_s3 + $0x138] sm:$0xff] %vm4016_vm2, %v3663_v11  ;;  %4252 = vst.msk [vmem:[%s9401_s3 + $0x758] sm:$0xff] %vm4016_vm2, %v3859_v12  ;;  %v3662_v17 = vmax.f32 %v1856_v13, 0.0  ;;  %v3858_v18 = vmax.f32 %v2836_v14, 0.0  ;;  %v1871_v19 = vadd.f32 %v5276_v15, %v6635_v9  ;;  %v2851_v20 = vadd.f32 %v5570_v16, %v6635_v9  ;;  %5421 = vmatprep.mubr.msk.f32.mxu0 %vm418_vm1, %v152_v8  ;;  %v356_v11 = vld [vmem:[%s9399_s0 + $0xab0] sm:$0xff] }
 0x11f   :  { %5715 = vmatprep.mubr.msk.f32.mxu1 %vm418_vm1, %v348_v10  ;;  %v1865_v23 = vpop.f32.mrf.mxu0  ;;  %v2845_v24 = vpop.f32.mrf.mxu1  ;;  %v160_v10 = vld [vmem:[%s9399_s0 + $0x490] sm:$0xff] }
 0x120   :  { %4055 = vst.msk [vmem:[%s9401_s3 + $0x130] sm:$0xff] %vm4016_vm2, %v3662_v17  ;;  %4251 = vst.msk [vmem:[%s9401_s3 + $0x750] sm:$0xff] %vm4016_vm2, %v3858_v18  ;;  %v3665_v27 = vmax.f32 %v1871_v19, 0.0  ;;  %v3861_v28 = vmax.f32 %v2851_v20, 0.0  ;;  %v1866_v29 = vadd.f32 %v6635_v9, %v1865_v23  ;;  %v2846_v30 = vadd.f32 %v6635_v9, %v2845_v24  ;;  %v357_v23 = vld [vmem:[%s9399_s0 + $0xab8] sm:$0xff] }
 0x121   :  { %v5279_v31 = vpop.f32.mrf.mxu0  ;;  %5422 = vmatmul.mubr.msk.f32.gmra.mxu0 %vm418_vm1, %v153_v21  ;;  %v5573_v32 = vpop.f32.mrf.mxu1  ;;  %5716 = vmatmul.mubr.msk.f32.gmra.mxu1 %vm418_vm1, %v349_v22  ;;  %v161_v22 = vld [vmem:[%s9399_s0 + $0x498] sm:$0xff] }
 0x122   :  { %4058 = vst.msk [vmem:[%s9401_s3 + $0x148] sm:$0xff] %vm4016_vm2, %v3665_v27  ;;  %4254 = vst.msk [vmem:[%s9401_s3 + $0x768] sm:$0xff] %vm4016_vm2, %v3861_v28  ;;  %v3664_v33 = vmax.f32 %v1866_v29, 0.0  ;;  %v3860_v34 = vmax.f32 %v2846_v30, 0.0  ;;  %v1881_v35 = vadd.f32 %v5279_v31, %v6635_v9  ;;  %v2861_v37 = vadd.f32 %v7397_v36, %v5573_v32  ;;  %5424 = vmatprep.mubr.msk.f32.mxu0 %vm418_vm1, %v154_v25  ;;  %v358_v27 = vld [vmem:[%s9399_s0 + $0xac0] sm:$0xff] }
 0x123   :  { %5718 = vmatprep.mubr.msk.f32.mxu1 %vm418_vm1, %v350_v26  ;;  %v1875_v9 = vpop.f32.mrf.mxu0  ;;  %v2855_v40 = vpop.f32.mrf.mxu1  ;;  %v162_v26 = vld [vmem:[%s9399_s0 + $0x4a0] sm:$0xff] }
 0x124   :  { %4057 = vst.msk [vmem:[%s9401_s3 + $0x140] sm:$0xff] %vm4016_vm2, %v3664_v33  ;;  %4253 = vst.msk [vmem:[%s9401_s3 + $0x760] sm:$0xff] %vm4016_vm2, %v3860_v34  ;;  %v3667_v43 = vmax.f32 %v1881_v35, 0.0  ;;  %v3863_v44 = vmax.f32 %v2861_v37, 0.0  ;;  %v1876_v45 = vadd.f32 %v7397_v36, %v1875_v9  ;;  %v2856_v46 = vadd.f32 %v7397_v36, %v2855_v40  ;;  %v359_v9 = vld [vmem:[%s9399_s0 + $0xac8] sm:$0xff] }
 0x125   :  { %v5282_v47 = vpop.f32.mrf.mxu0  ;;  %5425 = vmatmul.mubr.msk.f32.gmra.mxu0 %vm418_vm1, %v155_v38  ;;  %v5576_v48 = vpop.f32.mrf.mxu1  ;;  %5719 = vmatmul.mubr.msk.f32.gmra.mxu1 %vm418_vm1, %v351_v39  ;;  %v163_v39 = vld [vmem:[%s9399_s0 + $0x4a8] sm:$0xff] }
 0x126   :  { %4060 = vst.msk [vmem:[%s9401_s3 + $0x158] sm:$0xff] %vm4016_vm2, %v3667_v43  ;;  %4256 = vst.msk [vmem:[%s9401_s3 + $0x778] sm:$0xff] %vm4016_vm2, %v3863_v44  ;;  %v3666_v49 = vmax.f32 %v1876_v45, 0.0  ;;  %v3862_v50 = vmax.f32 %v2856_v46, 0.0  ;;  %v1891_v51 = vadd.f32 %v7397_v36, %v5282_v47  ;;  %v2871_v52 = vadd.f32 %v7397_v36, %v5576_v48  ;;  %5427 = vmatprep.mubr.msk.f32.mxu0 %vm418_vm1, %v156_v41  ;;  %v360_v43 = vld [vmem:[%s9399_s0 + $0xad0] sm:$0xff] }
 0x127   :  { %5721 = vmatprep.mubr.msk.f32.mxu1 %vm418_vm1, %v352_v42  ;;  %v1885_v55 = vpop.f32.mrf.mxu0  ;;  %v2865_v56 = vpop.f32.mrf.mxu1  ;;  %v164_v42 = vld [vmem:[%s9399_s0 + $0x4b0] sm:$0xff] }
 0x128   :  { %4059 = vst.msk [vmem:[%s9401_s3 + $0x150] sm:$0xff] %vm4016_vm2, %v3666_v49  ;;  %4255 = vst.msk [vmem:[%s9401_s3 + $0x770] sm:$0xff] %vm4016_vm2, %v3862_v50  ;;  %v3669_v59 = vmax.f32 %v1891_v51, 0.0  ;;  %v3865_v60 = vmax.f32 %v2871_v52, 0.0  ;;  %v1886_v61 = vadd.f32 %v7397_v36, %v1885_v55  ;;  %v2866_v62 = vadd.f32 %v7397_v36, %v2865_v56  ;;  %v361_v55 = vld [vmem:[%s9399_s0 + $0xad8] sm:$0xff] }
 0x129   :  { %v5285_v63 = vpop.f32.mrf.mxu0  ;;  %5428 = vmatmul.mubr.msk.f32.gmra.mxu0 %vm418_vm1, %v157_v53  ;;  %v5579_v0 = vpop.f32.mrf.mxu1  ;;  %5722 = vmatmul.mubr.msk.f32.gmra.mxu1 %vm418_vm1, %v353_v54  ;;  %v165_v54 = vld [vmem:[%s9399_s0 + $0x4b8] sm:$0xff] }
 0x12a   :  { %4062 = vst.msk [vmem:[%s9401_s3 + $0x168] sm:$0xff] %vm4016_vm2, %v3669_v59  ;;  %4258 = vst.msk [vmem:[%s9401_s3 + $0x788] sm:$0xff] %vm4016_vm2, %v3865_v60  ;;  %v3668_v1 = vmax.f32 %v1886_v61, 0.0  ;;  %v3864_v2 = vmax.f32 %v2866_v62, 0.0  ;;  %v1901_v3 = vadd.f32 %v7397_v36, %v5285_v63  ;;  %v2881_v4 = vadd.f32 %v7397_v36, %v5579_v0  ;;  %5430 = vmatprep.mubr.msk.f32.mxu0 %vm418_vm1, %v158_v57  ;;  %v362_v59 = vld [vmem:[%s9399_s0 + $0xae0] sm:$0xff] }
 0x12b   :  { %5724 = vmatprep.mubr.msk.f32.mxu1 %vm418_vm1, %v354_v58  ;;  %v1895_v7 = vpop.f32.mrf.mxu0  ;;  %v2875_v8 = vpop.f32.mrf.mxu1  ;;  %v166_v58 = vld [vmem:[%s9399_s0 + $0x4c0] sm:$0xff] }
 0x12c   :  { %4061 = vst.msk [vmem:[%s9401_s3 + $0x160] sm:$0xff] %vm4016_vm2, %v3668_v1  ;;  %4257 = vst.msk [vmem:[%s9401_s3 + $0x780] sm:$0xff] %vm4016_vm2, %v3864_v2  ;;  %v3671_v12 = vmax.f32 %v1901_v3, 0.0  ;;  %v3867_v13 = vmax.f32 %v2881_v4, 0.0  ;;  %v1896_v14 = vadd.f32 %v7397_v36, %v1895_v7  ;;  %v2876_v15 = vadd.f32 %v7397_v36, %v2875_v8  ;;  %v363_v7 = vld [vmem:[%s9399_s0 + $0xae8] sm:$0xff] }
 0x12d   :  { %v5288_v16 = vpop.f32.mrf.mxu0  ;;  %5431 = vmatmul.mubr.msk.f32.gmra.mxu0 %vm418_vm1, %v159_v5  ;;  %v5582_v17 = vpop.f32.mrf.mxu1  ;;  %5725 = vmatmul.mubr.msk.f32.gmra.mxu1 %vm418_vm1, %v355_v6  ;;  %v167_v6 = vld [vmem:[%s9399_s0 + $0x4c8] sm:$0xff] }
 0x12e   :  { %4064 = vst.msk [vmem:[%s9401_s3 + $0x178] sm:$0xff] %vm4016_vm2, %v3671_v12  ;;  %4260 = vst.msk [vmem:[%s9401_s3 + $0x798] sm:$0xff] %vm4016_vm2, %v3867_v13  ;;  %v3670_v18 = vmax.f32 %v1896_v14, 0.0  ;;  %v3866_v19 = vmax.f32 %v2876_v15, 0.0  ;;  %v1911_v20 = vadd.f32 %v7397_v36, %v5288_v16  ;;  %v2891_v21 = vadd.f32 %v7397_v36, %v5582_v17  ;;  %5433 = vmatprep.mubr.msk.f32.mxu0 %vm418_vm1, %v160_v10  ;;  %v364_v12 = vld [vmem:[%s9399_s0 + $0xaf0] sm:$0xff] }
 0x12f   :  { %5727 = vmatprep.mubr.msk.f32.mxu1 %vm418_vm1, %v356_v11  ;;  %v1905_v24 = vpop.f32.mrf.mxu0  ;;  %v2885_v25 = vpop.f32.mrf.mxu1  ;;  %v168_v11 = vld [vmem:[%s9399_s0 + $0x4d0] sm:$0xff] }
 0x130   :  { %4063 = vst.msk [vmem:[%s9401_s3 + $0x170] sm:$0xff] %vm4016_vm2, %v3670_v18  ;;  %4259 = vst.msk [vmem:[%s9401_s3 + $0x790] sm:$0xff] %vm4016_vm2, %v3866_v19  ;;  %v3673_v28 = vmax.f32 %v1911_v20, 0.0  ;;  %v3869_v29 = vmax.f32 %v2891_v21, 0.0  ;;  %v1906_v30 = vadd.f32 %v7397_v36, %v1905_v24  ;;  %v2886_v31 = vadd.f32 %v7397_v36, %v2885_v25  ;;  %v365_v24 = vld [vmem:[%s9399_s0 + $0xaf8] sm:$0xff] }
 0x131   :  { %v5291_v32 = vpop.f32.mrf.mxu0  ;;  %5434 = vmatmul.mubr.msk.f32.gmra.mxu0 %vm418_vm1, %v161_v22  ;;  %v5585_v33 = vpop.f32.mrf.mxu1  ;;  %5728 = vmatmul.mubr.msk.f32.gmra.mxu1 %vm418_vm1, %v357_v23  ;;  %v169_v23 = vld [vmem:[%s9399_s0 + $0x4d8] sm:$0xff] }
 0x132   :  { %4066 = vst.msk [vmem:[%s9401_s3 + $0x188] sm:$0xff] %vm4016_vm2, %v3673_v28  ;;  %4262 = vst.msk [vmem:[%s9401_s3 + $0x7a8] sm:$0xff] %vm4016_vm2, %v3869_v29  ;;  %v3672_v34 = vmax.f32 %v1906_v30, 0.0  ;;  %v3868_v35 = vmax.f32 %v2886_v31, 0.0  ;;  %v1921_v37 = vadd.f32 %v7397_v36, %v5291_v32  ;;  %v2901_v38 = vadd.f32 %v7397_v36, %v5585_v33  ;;  %5436 = vmatprep.mubr.msk.f32.mxu0 %vm418_vm1, %v162_v26  ;;  %v366_v28 = vld [vmem:[%s9399_s0 + $0xb00] sm:$0xff] }
 0x133   :  { %5730 = vmatprep.mubr.msk.f32.mxu1 %vm418_vm1, %v358_v27  ;;  %v1915_v40 = vpop.f32.mrf.mxu0  ;;  %v2895_v41 = vpop.f32.mrf.mxu1  ;;  %v170_v27 = vld [vmem:[%s9399_s0 + $0x4e0] sm:$0xff] }
 0x134   :  { %4065 = vst.msk [vmem:[%s9401_s3 + $0x180] sm:$0xff] %vm4016_vm2, %v3672_v34  ;;  %4261 = vst.msk [vmem:[%s9401_s3 + $0x7a0] sm:$0xff] %vm4016_vm2, %v3868_v35  ;;  %v3675_v44 = vmax.f32 %v1921_v37, 0.0  ;;  %v3871_v45 = vmax.f32 %v2901_v38, 0.0  ;;  %v1916_v46 = vadd.f32 %v7397_v36, %v1915_v40  ;;  %v2896_v47 = vadd.f32 %v7397_v36, %v2895_v41  ;;  %v367_v40 = vld [vmem:[%s9399_s0 + $0xb08] sm:$0xff] }
 0x135   :  { %v5294_v48 = vpop.f32.mrf.mxu0  ;;  %5437 = vmatmul.mubr.msk.f32.gmra.mxu0 %vm418_vm1, %v163_v39  ;;  %v5588_v49 = vpop.f32.mrf.mxu1  ;;  %5731 = vmatmul.mubr.msk.f32.gmra.mxu1 %vm418_vm1, %v359_v9  ;;  %v171_v9 = vld [vmem:[%s9399_s0 + $0x4e8] sm:$0xff] }
 0x136   :  { %4068 = vst.msk [vmem:[%s9401_s3 + $0x198] sm:$0xff] %vm4016_vm2, %v3675_v44  ;;  %4264 = vst.msk [vmem:[%s9401_s3 + $0x7b8] sm:$0xff] %vm4016_vm2, %v3871_v45  ;;  %v3674_v50 = vmax.f32 %v1916_v46, 0.0  ;;  %v3870_v51 = vmax.f32 %v2896_v47, 0.0  ;;  %v1931_v52 = vadd.f32 %v7397_v36, %v5294_v48  ;;  %v2911_v53 = vadd.f32 %v7397_v36, %v5588_v49  ;;  %5439 = vmatprep.mubr.msk.f32.mxu0 %vm418_vm1, %v164_v42  ;;  %v368_v44 = vld [vmem:[%s9399_s0 + $0xb10] sm:$0xff] }
 0x137   :  { %5733 = vmatprep.mubr.msk.f32.mxu1 %vm418_vm1, %v360_v43  ;;  %v1925_v56 = vpop.f32.mrf.mxu0  ;;  %v2905_v57 = vpop.f32.mrf.mxu1  ;;  %v172_v43 = vld [vmem:[%s9399_s0 + $0x4f0] sm:$0xff] }
 0x138   :  { %4067 = vst.msk [vmem:[%s9401_s3 + $0x190] sm:$0xff] %vm4016_vm2, %v3674_v50  ;;  %4263 = vst.msk [vmem:[%s9401_s3 + $0x7b0] sm:$0xff] %vm4016_vm2, %v3870_v51  ;;  %v3677_v60 = vmax.f32 %v1931_v52, 0.0  ;;  %v3873_v61 = vmax.f32 %v2911_v53, 0.0  ;;  %v1926_v62 = vadd.f32 %v7397_v36, %v1925_v56  ;;  %v2906_v63 = vadd.f32 %v7397_v36, %v2905_v57  ;;  %v369_v56 = vld [vmem:[%s9399_s0 + $0xb18] sm:$0xff] }
 0x139   :  { %v5297_v0 = vpop.f32.mrf.mxu0  ;;  %5440 = vmatmul.mubr.msk.f32.gmra.mxu0 %vm418_vm1, %v165_v54  ;;  %v5591_v1 = vpop.f32.mrf.mxu1  ;;  %5734 = vmatmul.mubr.msk.f32.gmra.mxu1 %vm418_vm1, %v361_v55  ;;  %v173_v55 = vld [vmem:[%s9399_s0 + $0x4f8] sm:$0xff] }
 0x13a   :  { %4070 = vst.msk [vmem:[%s9401_s3 + $0x1a8] sm:$0xff] %vm4016_vm2, %v3677_v60  ;;  %4266 = vst.msk [vmem:[%s9401_s3 + $0x7c8] sm:$0xff] %vm4016_vm2, %v3873_v61  ;;  %v3676_v2 = vmax.f32 %v1926_v62, 0.0  ;;  %v3872_v3 = vmax.f32 %v2906_v63, 0.0  ;;  %v1941_v4 = vadd.f32 %v7397_v36, %v5297_v0  ;;  %v2921_v5 = vadd.f32 %v7397_v36, %v5591_v1  ;;  %5442 = vmatprep.mubr.msk.f32.mxu0 %vm418_vm1, %v166_v58  ;;  %v370_v60 = vld [vmem:[%s9399_s0 + $0xb20] sm:$0xff] }
 0x13b   :  { %5736 = vmatprep.mubr.msk.f32.mxu1 %vm418_vm1, %v362_v59  ;;  %v1935_v8 = vpop.f32.mrf.mxu0  ;;  %v2915_v10 = vpop.f32.mrf.mxu1  ;;  %v174_v59 = vld [vmem:[%s9399_s0 + $0x500] sm:$0xff] }
 0x13c   :  { %4069 = vst.msk [vmem:[%s9401_s3 + $0x1a0] sm:$0xff] %vm4016_vm2, %v3676_v2  ;;  %4265 = vst.msk [vmem:[%s9401_s3 + $0x7c0] sm:$0xff] %vm4016_vm2, %v3872_v3  ;;  %v3679_v13 = vmax.f32 %v1941_v4, 0.0  ;;  %v3875_v14 = vmax.f32 %v2921_v5, 0.0  ;;  %v1936_v15 = vadd.f32 %v7397_v36, %v1935_v8  ;;  %v2916_v16 = vadd.f32 %v7397_v36, %v2915_v10  ;;  %v371_v8 = vld [vmem:[%s9399_s0 + $0xb28] sm:$0xff] }
 0x13d   :  { %v5300_v17 = vpop.f32.mrf.mxu0  ;;  %5443 = vmatmul.mubr.msk.f32.gmra.mxu0 %vm418_vm1, %v167_v6  ;;  %v5594_v18 = vpop.f32.mrf.mxu1  ;;  %5737 = vmatmul.mubr.msk.f32.gmra.mxu1 %vm418_vm1, %v363_v7  ;;  %v175_v7 = vld [vmem:[%s9399_s0 + $0x508] sm:$0xff] }
 0x13e   :  { %4072 = vst.msk [vmem:[%s9401_s3 + $0x1b8] sm:$0xff] %vm4016_vm2, %v3679_v13  ;;  %4268 = vst.msk [vmem:[%s9401_s3 + $0x7d8] sm:$0xff] %vm4016_vm2, %v3875_v14  ;;  %v3678_v19 = vmax.f32 %v1936_v15, 0.0  ;;  %v3874_v20 = vmax.f32 %v2916_v16, 0.0  ;;  %v1951_v21 = vadd.f32 %v7397_v36, %v5300_v17  ;;  %v2931_v22 = vadd.f32 %v7397_v36, %v5594_v18  ;;  %5445 = vmatprep.mubr.msk.f32.mxu0 %vm418_vm1, %v168_v11  ;;  %v372_v13 = vld [vmem:[%s9399_s0 + $0xb30] sm:$0xff] }
 0x13f   :  { %5739 = vmatprep.mubr.msk.f32.mxu1 %vm418_vm1, %v364_v12  ;;  %v1945_v25 = vpop.f32.mrf.mxu0  ;;  %v2925_v26 = vpop.f32.mrf.mxu1  ;;  %v176_v12 = vld [vmem:[%s9399_s0 + $0x510] sm:$0xff] }
 0x140   :  { %4071 = vst.msk [vmem:[%s9401_s3 + $0x1b0] sm:$0xff] %vm4016_vm2, %v3678_v19  ;;  %4267 = vst.msk [vmem:[%s9401_s3 + $0x7d0] sm:$0xff] %vm4016_vm2, %v3874_v20  ;;  %v3681_v29 = vmax.f32 %v1951_v21, 0.0  ;;  %v3877_v30 = vmax.f32 %v2931_v22, 0.0  ;;  %v1946_v31 = vadd.f32 %v7397_v36, %v1945_v25  ;;  %v2926_v32 = vadd.f32 %v7397_v36, %v2925_v26  ;;  %v373_v25 = vld [vmem:[%s9399_s0 + $0xb38] sm:$0xff] }
 0x141   :  { %v5303_v33 = vpop.f32.mrf.mxu0  ;;  %5446 = vmatmul.mubr.msk.f32.gmra.mxu0 %vm418_vm1, %v169_v23  ;;  %v5597_v34 = vpop.f32.mrf.mxu1  ;;  %5740 = vmatmul.mubr.msk.f32.gmra.mxu1 %vm418_vm1, %v365_v24  ;;  %v177_v24 = vld [vmem:[%s9399_s0 + $0x518] sm:$0xff] }
 0x142   :  { %4074 = vst.msk [vmem:[%s9401_s3 + $0x1c8] sm:$0xff] %vm4016_vm2, %v3681_v29  ;;  %4270 = vst.msk [vmem:[%s9401_s3 + $0x7e8] sm:$0xff] %vm4016_vm2, %v3877_v30  ;;  %v3680_v35 = vmax.f32 %v1946_v31, 0.0  ;;  %v3876_v37 = vmax.f32 %v2926_v32, 0.0  ;;  %v1961_v38 = vadd.f32 %v7397_v36, %v5303_v33  ;;  %v2941_v39 = vadd.f32 %v7397_v36, %v5597_v34  ;;  %5448 = vmatprep.mubr.msk.f32.mxu0 %vm418_vm1, %v170_v27  ;;  %v374_v29 = vld [vmem:[%s9399_s0 + $0xb40] sm:$0xff] }
 0x143   :  { %5742 = vmatprep.mubr.msk.f32.mxu1 %vm418_vm1, %v366_v28  ;;  %v1955_v41 = vpop.f32.mrf.mxu0  ;;  %v2935_v42 = vpop.f32.mrf.mxu1  ;;  %v178_v28 = vld [vmem:[%s9399_s0 + $0x520] sm:$0xff] }
 0x144   :  { %4073 = vst.msk [vmem:[%s9401_s3 + $0x1c0] sm:$0xff] %vm4016_vm2, %v3680_v35  ;;  %4269 = vst.msk [vmem:[%s9401_s3 + $0x7e0] sm:$0xff] %vm4016_vm2, %v3876_v37  ;;  %v3683_v45 = vmax.f32 %v1961_v38, 0.0  ;;  %v3879_v46 = vmax.f32 %v2941_v39, 0.0  ;;  %v1956_v47 = vadd.f32 %v7397_v36, %v1955_v41  ;;  %v2936_v48 = vadd.f32 %v7397_v36, %v2935_v42  ;;  %v375_v41 = vld [vmem:[%s9399_s0 + $0xb48] sm:$0xff] }
 0x145   :  { %v5306_v49 = vpop.f32.mrf.mxu0  ;;  %5449 = vmatmul.mubr.msk.f32.gmra.mxu0 %vm418_vm1, %v171_v9  ;;  %v5600_v50 = vpop.f32.mrf.mxu1  ;;  %5743 = vmatmul.mubr.msk.f32.gmra.mxu1 %vm418_vm1, %v367_v40  ;;  %v179_v40 = vld [vmem:[%s9399_s0 + $0x528] sm:$0xff] }
 0x146   :  { %4076 = vst.msk [vmem:[%s9401_s3 + $0x1d8] sm:$0xff] %vm4016_vm2, %v3683_v45  ;;  %4272 = vst.msk [vmem:[%s9401_s3 + $0x7f8] sm:$0xff] %vm4016_vm2, %v3879_v46  ;;  %v3682_v51 = vmax.f32 %v1956_v47, 0.0  ;;  %v3878_v52 = vmax.f32 %v2936_v48, 0.0  ;;  %v1971_v53 = vadd.f32 %v7397_v36, %v5306_v49  ;;  %v2951_v54 = vadd.f32 %v7397_v36, %v5600_v50  ;;  %5451 = vmatprep.mubr.msk.f32.mxu0 %vm418_vm1, %v172_v43  ;;  %v376_v45 = vld [vmem:[%s9399_s0 + $0xb50] sm:$0xff] }
 0x147   :  { %5745 = vmatprep.mubr.msk.f32.mxu1 %vm418_vm1, %v368_v44  ;;  %v1965_v57 = vpop.f32.mrf.mxu0  ;;  %v2945_v58 = vpop.f32.mrf.mxu1  ;;  %v180_v44 = vld [vmem:[%s9399_s0 + $0x530] sm:$0xff] }
 0x148   :  { %4075 = vst.msk [vmem:[%s9401_s3 + $0x1d0] sm:$0xff] %vm4016_vm2, %v3682_v51  ;;  %4271 = vst.msk [vmem:[%s9401_s3 + $0x7f0] sm:$0xff] %vm4016_vm2, %v3878_v52  ;;  %v3685_v61 = vmax.f32 %v1971_v53, 0.0  ;;  %v3881_v62 = vmax.f32 %v2951_v54, 0.0  ;;  %v1966_v63 = vadd.f32 %v7397_v36, %v1965_v57  ;;  %v2946_v0 = vadd.f32 %v7397_v36, %v2945_v58  ;;  %v377_v57 = vld [vmem:[%s9399_s0 + $0xb58] sm:$0xff] }
 0x149   :  { %v5309_v1 = vpop.f32.mrf.mxu0  ;;  %5452 = vmatmul.mubr.msk.f32.gmra.mxu0 %vm418_vm1, %v173_v55  ;;  %v5603_v2 = vpop.f32.mrf.mxu1  ;;  %5746 = vmatmul.mubr.msk.f32.gmra.mxu1 %vm418_vm1, %v369_v56  ;;  %v181_v56 = vld [vmem:[%s9399_s0 + $0x538] sm:$0xff] }
 0x14a   :  { %4078 = vst.msk [vmem:[%s9401_s3 + $0x1e8] sm:$0xff] %vm4016_vm2, %v3685_v61  ;;  %4274 = vst.msk [vmem:[%s9401_s3 + $0x808] sm:$0xff] %vm4016_vm2, %v3881_v62  ;;  %v3684_v3 = vmax.f32 %v1966_v63, 0.0  ;;  %v3880_v4 = vmax.f32 %v2946_v0, 0.0  ;;  %v1981_v5 = vadd.f32 %v7397_v36, %v5309_v1  ;;  %v2961_v6 = vadd.f32 %v7397_v36, %v5603_v2  ;;  %5454 = vmatprep.mubr.msk.f32.mxu0 %vm418_vm1, %v174_v59  ;;  %v378_v61 = vld [vmem:[%s9399_s0 + $0xb60] sm:$0xff] }
 0x14b   :  { %5748 = vmatprep.mubr.msk.f32.mxu1 %vm418_vm1, %v370_v60  ;;  %v1975_v10 = vpop.f32.mrf.mxu0  ;;  %v2955_v11 = vpop.f32.mrf.mxu1  ;;  %v182_v60 = vld [vmem:[%s9399_s0 + $0x540] sm:$0xff] }
 0x14c   :  { %4077 = vst.msk [vmem:[%s9401_s3 + $0x1e0] sm:$0xff] %vm4016_vm2, %v3684_v3  ;;  %4273 = vst.msk [vmem:[%s9401_s3 + $0x800] sm:$0xff] %vm4016_vm2, %v3880_v4  ;;  %v3687_v14 = vmax.f32 %v1981_v5, 0.0  ;;  %v3883_v15 = vmax.f32 %v2961_v6, 0.0  ;;  %v1976_v16 = vadd.f32 %v7397_v36, %v1975_v10  ;;  %v2956_v17 = vadd.f32 %v7397_v36, %v2955_v11  ;;  %v379_v10 = vld [vmem:[%s9399_s0 + $0xb68] sm:$0xff] }
 0x14d   :  { %v5312_v18 = vpop.f32.mrf.mxu0  ;;  %5455 = vmatmul.mubr.msk.f32.gmra.mxu0 %vm418_vm1, %v175_v7  ;;  %v5606_v19 = vpop.f32.mrf.mxu1  ;;  %5749 = vmatmul.mubr.msk.f32.gmra.mxu1 %vm418_vm1, %v371_v8  ;;  %v183_v8 = vld [vmem:[%s9399_s0 + $0x548] sm:$0xff] }
 0x14e   :  { %4080 = vst.msk [vmem:[%s9401_s3 + $0x1f8] sm:$0xff] %vm4016_vm2, %v3687_v14  ;;  %4276 = vst.msk [vmem:[%s9401_s3 + $0x818] sm:$0xff] %vm4016_vm2, %v3883_v15  ;;  %v3686_v20 = vmax.f32 %v1976_v16, 0.0  ;;  %v3882_v21 = vmax.f32 %v2956_v17, 0.0  ;;  %v1991_v22 = vadd.f32 %v7397_v36, %v5312_v18  ;;  %v2971_v23 = vadd.f32 %v7397_v36, %v5606_v19  ;;  %5457 = vmatprep.mubr.msk.f32.mxu0 %vm418_vm1, %v176_v12  ;;  %v380_v14 = vld [vmem:[%s9399_s0 + $0xb70] sm:$0xff] }
 0x14f   :  { %5751 = vmatprep.mubr.msk.f32.mxu1 %vm418_vm1, %v372_v13  ;;  %v1985_v26 = vpop.f32.mrf.mxu0  ;;  %v2965_v27 = vpop.f32.mrf.mxu1  ;;  %v184_v13 = vld [vmem:[%s9399_s0 + $0x550] sm:$0xff] }
 0x150   :  { %4079 = vst.msk [vmem:[%s9401_s3 + $0x1f0] sm:$0xff] %vm4016_vm2, %v3686_v20  ;;  %4275 = vst.msk [vmem:[%s9401_s3 + $0x810] sm:$0xff] %vm4016_vm2, %v3882_v21  ;;  %v3689_v30 = vmax.f32 %v1991_v22, 0.0  ;;  %v3885_v31 = vmax.f32 %v2971_v23, 0.0  ;;  %v1986_v32 = vadd.f32 %v7397_v36, %v1985_v26  ;;  %v2966_v33 = vadd.f32 %v7397_v36, %v2965_v27  ;;  %v381_v26 = vld [vmem:[%s9399_s0 + $0xb78] sm:$0xff] }
 0x151   :  { %v5315_v34 = vpop.f32.mrf.mxu0  ;;  %5458 = vmatmul.mubr.msk.f32.gmra.mxu0 %vm418_vm1, %v177_v24  ;;  %v5609_v35 = vpop.f32.mrf.mxu1  ;;  %5752 = vmatmul.mubr.msk.f32.gmra.mxu1 %vm418_vm1, %v373_v25  ;;  %v185_v25 = vld [vmem:[%s9399_s0 + $0x558] sm:$0xff] }
 0x152   :  { %4082 = vst.msk [vmem:[%s9401_s3 + $0x208] sm:$0xff] %vm4016_vm2, %v3689_v30  ;;  %4278 = vst.msk [vmem:[%s9401_s3 + $0x828] sm:$0xff] %vm4016_vm2, %v3885_v31  ;;  %v3688_v37 = vmax.f32 %v1986_v32, 0.0  ;;  %v3884_v38 = vmax.f32 %v2966_v33, 0.0  ;;  %v2001_v39 = vadd.f32 %v7397_v36, %v5315_v34  ;;  %v2981_v9 = vadd.f32 %v7397_v36, %v5609_v35  ;;  %5460 = vmatprep.mubr.msk.f32.mxu0 %vm418_vm1, %v178_v28  ;;  %v382_v30 = vld [vmem:[%s9399_s0 + $0xb80] sm:$0xff] }
 0x153   :  { %5754 = vmatprep.mubr.msk.f32.mxu1 %vm418_vm1, %v374_v29  ;;  %v1995_v42 = vpop.f32.mrf.mxu0  ;;  %v2975_v43 = vpop.f32.mrf.mxu1  ;;  %v186_v29 = vld [vmem:[%s9399_s0 + $0x560] sm:$0xff] }
 0x154   :  { %4081 = vst.msk [vmem:[%s9401_s3 + $0x200] sm:$0xff] %vm4016_vm2, %v3688_v37  ;;  %4277 = vst.msk [vmem:[%s9401_s3 + $0x820] sm:$0xff] %vm4016_vm2, %v3884_v38  ;;  %v3691_v46 = vmax.f32 %v2001_v39, 0.0  ;;  %v3887_v47 = vmax.f32 %v2981_v9, 0.0  ;;  %v1996_v48 = vadd.f32 %v7397_v36, %v1995_v42  ;;  %v2976_v49 = vadd.f32 %v7397_v36, %v2975_v43  ;;  %v383_v42 = vld [vmem:[%s9399_s0 + $0xb88] sm:$0xff] }
 0x155   :  { %v5318_v50 = vpop.f32.mrf.mxu0  ;;  %5461 = vmatmul.mubr.msk.f32.gmra.mxu0 %vm418_vm1, %v179_v40  ;;  %v5612_v51 = vpop.f32.mrf.mxu1  ;;  %5755 = vmatmul.mubr.msk.f32.gmra.mxu1 %vm418_vm1, %v375_v41  ;;  %v187_v41 = vld [vmem:[%s9399_s0 + $0x568] sm:$0xff] }
 0x156   :  { %4084 = vst.msk [vmem:[%s9401_s3 + $0x218] sm:$0xff] %vm4016_vm2, %v3691_v46  ;;  %4280 = vst.msk [vmem:[%s9401_s3 + $0x838] sm:$0xff] %vm4016_vm2, %v3887_v47  ;;  %v3690_v52 = vmax.f32 %v1996_v48, 0.0  ;;  %v3886_v53 = vmax.f32 %v2976_v49, 0.0  ;;  %v2011_v54 = vadd.f32 %v7397_v36, %v5318_v50  ;;  %v2991_v55 = vadd.f32 %v7397_v36, %v5612_v51  ;;  %5463 = vmatprep.mubr.msk.f32.mxu0 %vm418_vm1, %v180_v44  ;;  %v384_v46 = vld [vmem:[%s9399_s0 + $0xb90] sm:$0xff] }
 0x157   :  { %5757 = vmatprep.mubr.msk.f32.mxu1 %vm418_vm1, %v376_v45  ;;  %v2005_v58 = vpop.f32.mrf.mxu0  ;;  %v2985_v59 = vpop.f32.mrf.mxu1  ;;  %v188_v45 = vld [vmem:[%s9399_s0 + $0x570] sm:$0xff] }
 0x158   :  { %4083 = vst.msk [vmem:[%s9401_s3 + $0x210] sm:$0xff] %vm4016_vm2, %v3690_v52  ;;  %4279 = vst.msk [vmem:[%s9401_s3 + $0x830] sm:$0xff] %vm4016_vm2, %v3886_v53  ;;  %v3693_v62 = vmax.f32 %v2011_v54, 0.0  ;;  %v3889_v63 = vmax.f32 %v2991_v55, 0.0  ;;  %v2006_v0 = vadd.f32 %v7397_v36, %v2005_v58  ;;  %v2986_v1 = vadd.f32 %v7397_v36, %v2985_v59  ;;  %v385_v58 = vld [vmem:[%s9399_s0 + $0xb98] sm:$0xff] }
 0x159   :  { %v5321_v2 = vpop.f32.mrf.mxu0  ;;  %5464 = vmatmul.mubr.msk.f32.gmra.mxu0 %vm418_vm1, %v181_v56  ;;  %v5615_v3 = vpop.f32.mrf.mxu1  ;;  %5758 = vmatmul.mubr.msk.f32.gmra.mxu1 %vm418_vm1, %v377_v57  ;;  %v189_v57 = vld [vmem:[%s9399_s0 + $0x578] sm:$0xff] }
 0x15a   :  { %4086 = vst.msk [vmem:[%s9401_s3 + $0x228] sm:$0xff] %vm4016_vm2, %v3693_v62  ;;  %4282 = vst.msk [vmem:[%s9401_s3 + $0x848] sm:$0xff] %vm4016_vm2, %v3889_v63  ;;  %v3692_v4 = vmax.f32 %v2006_v0, 0.0  ;;  %v3888_v5 = vmax.f32 %v2986_v1, 0.0  ;;  %v2021_v6 = vadd.f32 %v7397_v36, %v5321_v2  ;;  %v3001_v7 = vadd.f32 %v7397_v36, %v5615_v3  ;;  %5466 = vmatprep.mubr.msk.f32.mxu0 %vm418_vm1, %v182_v60  ;;  %v386_v62 = vld [vmem:[%s9399_s0 + $0xba0] sm:$0xff] }
 0x15b   :  { %5760 = vmatprep.mubr.msk.f32.mxu1 %vm418_vm1, %v378_v61  ;;  %v2015_v11 = vpop.f32.mrf.mxu0  ;;  %v2995_v12 = vpop.f32.mrf.mxu1  ;;  %v190_v61 = vld [vmem:[%s9399_s0 + $0x580] sm:$0xff] }
 0x15c   :  { %4085 = vst.msk [vmem:[%s9401_s3 + $0x220] sm:$0xff] %vm4016_vm2, %v3692_v4  ;;  %4281 = vst.msk [vmem:[%s9401_s3 + $0x840] sm:$0xff] %vm4016_vm2, %v3888_v5  ;;  %v3695_v15 = vmax.f32 %v2021_v6, 0.0  ;;  %v3891_v16 = vmax.f32 %v3001_v7, 0.0  ;;  %v2016_v17 = vadd.f32 %v7397_v36, %v2015_v11  ;;  %v2996_v18 = vadd.f32 %v7397_v36, %v2995_v12  ;;  %v387_v11 = vld [vmem:[%s9399_s0 + $0xba8] sm:$0xff] }
 0x15d   :  { %v5324_v19 = vpop.f32.mrf.mxu0  ;;  %5467 = vmatmul.mubr.msk.f32.gmra.mxu0 %vm418_vm1, %v183_v8  ;;  %v5618_v20 = vpop.f32.mrf.mxu1  ;;  %5761 = vmatmul.mubr.msk.f32.gmra.mxu1 %vm418_vm1, %v379_v10  ;;  %v191_v10 = vld [vmem:[%s9399_s0 + $0x588] sm:$0xff] }
 0x15e   :  { %4088 = vst.msk [vmem:[%s9401_s3 + $0x238] sm:$0xff] %vm4016_vm2, %v3695_v15  ;;  %4284 = vst.msk [vmem:[%s9401_s3 + $0x858] sm:$0xff] %vm4016_vm2, %v3891_v16  ;;  %v3694_v21 = vmax.f32 %v2016_v17, 0.0  ;;  %v3890_v22 = vmax.f32 %v2996_v18, 0.0  ;;  %v2031_v23 = vadd.f32 %v7397_v36, %v5324_v19  ;;  %v3011_v24 = vadd.f32 %v7397_v36, %v5618_v20  ;;  %5469 = vmatprep.mubr.msk.f32.mxu0 %vm418_vm1, %v184_v13  ;;  %v388_v15 = vld [vmem:[%s9399_s0 + $0xbb0] sm:$0xff] }
 0x15f   :  { %5763 = vmatprep.mubr.msk.f32.mxu1 %vm418_vm1, %v380_v14  ;;  %v2025_v27 = vpop.f32.mrf.mxu0  ;;  %v3005_v28 = vpop.f32.mrf.mxu1  ;;  %v192_v14 = vld [vmem:[%s9399_s0 + $0x590] sm:$0xff] }
 0x160   :  { %4087 = vst.msk [vmem:[%s9401_s3 + $0x230] sm:$0xff] %vm4016_vm2, %v3694_v21  ;;  %4283 = vst.msk [vmem:[%s9401_s3 + $0x850] sm:$0xff] %vm4016_vm2, %v3890_v22  ;;  %v3697_v31 = vmax.f32 %v2031_v23, 0.0  ;;  %v3893_v32 = vmax.f32 %v3011_v24, 0.0  ;;  %v2026_v33 = vadd.f32 %v7397_v36, %v2025_v27  ;;  %v3006_v34 = vadd.f32 %v7397_v36, %v3005_v28  ;;  %v389_v27 = vld [vmem:[%s9399_s0 + $0xbb8] sm:$0xff] }
 0x161   :  { %v5327_v35 = vpop.f32.mrf.mxu0  ;;  %5470 = vmatmul.mubr.msk.f32.gmra.mxu0 %vm418_vm1, %v185_v25  ;;  %v5621_v37 = vpop.f32.mrf.mxu1  ;;  %5764 = vmatmul.mubr.msk.f32.gmra.mxu1 %vm418_vm1, %v381_v26  ;;  %v193_v26 = vld [vmem:[%s9399_s0 + $0x598] sm:$0xff] }
 0x162   :  { %4090 = vst.msk [vmem:[%s9401_s3 + $0x248] sm:$0xff] %vm4016_vm2, %v3697_v31  ;;  %4286 = vst.msk [vmem:[%s9401_s3 + $0x868] sm:$0xff] %vm4016_vm2, %v3893_v32  ;;  %v3696_v38 = vmax.f32 %v2026_v33, 0.0  ;;  %v3892_v39 = vmax.f32 %v3006_v34, 0.0  ;;  %v2041_v9 = vadd.f32 %v7397_v36, %v5327_v35  ;;  %v3021_v40 = vadd.f32 %v7397_v36, %v5621_v37  ;;  %5472 = vmatprep.mubr.msk.f32.mxu0 %vm418_vm1, %v186_v29  ;;  %v390_v31 = vld [vmem:[%s9399_s0 + $0xbc0] sm:$0xff] }
 0x163   :  { %5766 = vmatprep.mubr.msk.f32.mxu1 %vm418_vm1, %v382_v30  ;;  %v2035_v43 = vpop.f32.mrf.mxu0  ;;  %v3015_v44 = vpop.f32.mrf.mxu1  ;;  %v194_v30 = vld [vmem:[%s9399_s0 + $0x5a0] sm:$0xff] }
 0x164   :  { %4089 = vst.msk [vmem:[%s9401_s3 + $0x240] sm:$0xff] %vm4016_vm2, %v3696_v38  ;;  %4285 = vst.msk [vmem:[%s9401_s3 + $0x860] sm:$0xff] %vm4016_vm2, %v3892_v39  ;;  %v3699_v47 = vmax.f32 %v2041_v9, 0.0  ;;  %v3895_v48 = vmax.f32 %v3021_v40, 0.0  ;;  %v2036_v49 = vadd.f32 %v7397_v36, %v2035_v43  ;;  %v3016_v50 = vadd.f32 %v7397_v36, %v3015_v44  ;;  %v391_v43 = vld [vmem:[%s9399_s0 + $0xbc8] sm:$0xff] }
 0x165   :  { %v5330_v51 = vpop.f32.mrf.mxu0  ;;  %5473 = vmatmul.mubr.msk.f32.gmra.mxu0 %vm418_vm1, %v187_v41  ;;  %v5624_v52 = vpop.f32.mrf.mxu1  ;;  %5767 = vmatmul.mubr.msk.f32.gmra.mxu1 %vm418_vm1, %v383_v42  ;;  %v195_v42 = vld [vmem:[%s9399_s0 + $0x5a8] sm:$0xff] }
 0x166   :  { %4092 = vst.msk [vmem:[%s9401_s3 + $0x258] sm:$0xff] %vm4016_vm2, %v3699_v47  ;;  %4288 = vst.msk [vmem:[%s9401_s3 + $0x878] sm:$0xff] %vm4016_vm2, %v3895_v48  ;;  %v3698_v53 = vmax.f32 %v2036_v49, 0.0  ;;  %v3894_v54 = vmax.f32 %v3016_v50, 0.0  ;;  %v2051_v55 = vadd.f32 %v7397_v36, %v5330_v51  ;;  %v3031_v56 = vadd.f32 %v7397_v36, %v5624_v52  ;;  %5475 = vmatprep.mubr.msk.f32.mxu0 %vm418_vm1, %v188_v45  ;;  %v392_v47 = vld [vmem:[%s9399_s0 + $0xbd0] sm:$0xff] }
 0x167   :  { %5769 = vmatprep.mubr.msk.f32.mxu1 %vm418_vm1, %v384_v46  ;;  %v2045_v59 = vpop.f32.mrf.mxu0  ;;  %v3025_v60 = vpop.f32.mrf.mxu1  ;;  %v196_v46 = vld [vmem:[%s9399_s0 + $0x5b0] sm:$0xff] }
 0x168   :  { %4091 = vst.msk [vmem:[%s9401_s3 + $0x250] sm:$0xff] %vm4016_vm2, %v3698_v53  ;;  %4287 = vst.msk [vmem:[%s9401_s3 + $0x870] sm:$0xff] %vm4016_vm2, %v3894_v54  ;;  %v3701_v63 = vmax.f32 %v2051_v55, 0.0  ;;  %v3897_v0 = vmax.f32 %v3031_v56, 0.0  ;;  %v2046_v1 = vadd.f32 %v7397_v36, %v2045_v59  ;;  %v3026_v2 = vadd.f32 %v7397_v36, %v3025_v60  ;;  %v393_v59 = vld [vmem:[%s9399_s0 + $0xbd8] sm:$0xff] }
 0x169   :  { %v5333_v3 = vpop.f32.mrf.mxu0  ;;  %5476 = vmatmul.mubr.msk.f32.gmra.mxu0 %vm418_vm1, %v189_v57  ;;  %v5627_v4 = vpop.f32.mrf.mxu1  ;;  %5770 = vmatmul.mubr.msk.f32.gmra.mxu1 %vm418_vm1, %v385_v58  ;;  %v197_v58 = vld [vmem:[%s9399_s0 + $0x5b8] sm:$0xff] }
 0x16a   :  { %4094 = vst.msk [vmem:[%s9401_s3 + $0x268] sm:$0xff] %vm4016_vm2, %v3701_v63  ;;  %4290 = vst.msk [vmem:[%s9401_s3 + $0x888] sm:$0xff] %vm4016_vm2, %v3897_v0  ;;  %v3700_v5 = vmax.f32 %v2046_v1, 0.0  ;;  %v3896_v6 = vmax.f32 %v3026_v2, 0.0  ;;  %v2061_v7 = vadd.f32 %v7397_v36, %v5333_v3  ;;  %v3041_v8 = vadd.f32 %v7397_v36, %v5627_v4  ;;  %5478 = vmatprep.mubr.msk.f32.mxu0 %vm418_vm1, %v190_v61  ;;  %v8181_v1 = vld [vmem:[%s9400_s2] ss:$0 sm:$0xff] }
 0x16b   :  { %5772 = vmatprep.mubr.msk.f32.mxu1 %vm418_vm1, %v386_v62  ;;  %v2055_v12 = vpop.f32.mrf.mxu0  ;;  %v3035_v13 = vpop.f32.mrf.mxu1  ;;  %v198_v62 = vld [vmem:[%s9399_s0 + $0x5c0] sm:$0xff] }
 0x16c   :  { %4093 = vst.msk [vmem:[%s9401_s3 + $0x260] sm:$0xff] %vm4016_vm2, %v3700_v5  ;;  %4289 = vst.msk [vmem:[%s9401_s3 + $0x880] sm:$0xff] %vm4016_vm2, %v3896_v6  ;;  %v3703_v16 = vmax.f32 %v2061_v7, 0.0  ;;  %v3899_v17 = vmax.f32 %v3041_v8, 0.0  ;;  %v2056_v18 = vadd.f32 %v7397_v36, %v2055_v12  ;;  %v3036_v19 = vadd.f32 %v7397_v36, %v3035_v13  ;;  %v395_v12 = vld [vmem:[%s9399_s0 + $0xbe8] sm:$0xff] }
 0x16d   :  { %v5336_v20 = vpop.f32.mrf.mxu0  ;;  %5479 = vmatmul.mubr.msk.f32.gmra.mxu0 %vm418_vm1, %v191_v10  ;;  %v5630_v21 = vpop.f32.mrf.mxu1  ;;  %5773 = vmatmul.mubr.msk.f32.gmra.mxu1 %vm418_vm1, %v387_v11  ;;  %v199_v11 = vld [vmem:[%s9399_s0 + $0x5c8] sm:$0xff] }
 0x16e   :  { %4096 = vst.msk [vmem:[%s9401_s3 + $0x278] sm:$0xff] %vm4016_vm2, %v3703_v16  ;;  %4292 = vst.msk [vmem:[%s9401_s3 + $0x898] sm:$0xff] %vm4016_vm2, %v3899_v17  ;;  %v3702_v22 = vmax.f32 %v2056_v18, 0.0  ;;  %v3898_v23 = vmax.f32 %v3036_v19, 0.0  ;;  %v2071_v24 = vadd.f32 %v7397_v36, %v5336_v20  ;;  %v3051_v25 = vadd.f32 %v7397_v36, %v5630_v21  ;;  %5481 = vmatprep.mubr.msk.f32.mxu0 %vm418_vm1, %v192_v14  ;;  %v396_v16 = vld [vmem:[%s9399_s0 + $0xbf0] sm:$0xff] }
 0x16f   :  { %5775 = vmatprep.mubr.msk.f32.mxu1 %vm418_vm1, %v388_v15  ;;  %v2065_v28 = vpop.f32.mrf.mxu0  ;;  %v3045_v29 = vpop.f32.mrf.mxu1  ;;  %v200_v15 = vld [vmem:[%s9399_s0 + $0x5d0] sm:$0xff] }
 0x170   :  { %4095 = vst.msk [vmem:[%s9401_s3 + $0x270] sm:$0xff] %vm4016_vm2, %v3702_v22  ;;  %4291 = vst.msk [vmem:[%s9401_s3 + $0x890] sm:$0xff] %vm4016_vm2, %v3898_v23  ;;  %v3705_v32 = vmax.f32 %v2071_v24, 0.0  ;;  %v3901_v33 = vmax.f32 %v3051_v25, 0.0  ;;  %v2066_v34 = vadd.f32 %v7397_v36, %v2065_v28  ;;  %v3046_v35 = vadd.f32 %v7397_v36, %v3045_v29  ;;  %v397_v28 = vld [vmem:[%s9399_s0 + $0xbf8] sm:$0xff] }
 0x171   :  { %v5339_v37 = vpop.f32.mrf.mxu0  ;;  %5482 = vmatmul.mubr.msk.f32.gmra.mxu0 %vm418_vm1, %v193_v26  ;;  %v5633_v38 = vpop.f32.mrf.mxu1  ;;  %5776 = vmatmul.mubr.msk.f32.gmra.mxu1 %vm418_vm1, %v389_v27  ;;  %v201_v27 = vld [vmem:[%s9399_s0 + $0x5d8] sm:$0xff] }
 0x172   :  { %4098 = vst.msk [vmem:[%s9401_s3 + $0x288] sm:$0xff] %vm4016_vm2, %v3705_v32  ;;  %4294 = vst.msk [vmem:[%s9401_s3 + $0x8a8] sm:$0xff] %vm4016_vm2, %v3901_v33  ;;  %v3704_v39 = vmax.f32 %v2066_v34, 0.0  ;;  %v3900_v9 = vmax.f32 %v3046_v35, 0.0  ;;  %v2081_v40 = vadd.f32 %v7397_v36, %v5339_v37  ;;  %v3061_v41 = vadd.f32 %v7397_v36, %v5633_v38  ;;  %5484 = vmatprep.mubr.msk.f32.mxu0 %vm418_vm1, %v194_v30  ;;  %v398_v32 = vld [vmem:[%s9399_s0 + $0xc00] sm:$0xff] }
 0x173   :  { %5778 = vmatprep.mubr.msk.f32.mxu1 %vm418_vm1, %v390_v31  ;;  %v2075_v44 = vpop.f32.mrf.mxu0  ;;  %v3055_v45 = vpop.f32.mrf.mxu1  ;;  %v202_v31 = vld [vmem:[%s9399_s0 + $0x5e0] sm:$0xff] }
 0x174   :  { %4097 = vst.msk [vmem:[%s9401_s3 + $0x280] sm:$0xff] %vm4016_vm2, %v3704_v39  ;;  %4293 = vst.msk [vmem:[%s9401_s3 + $0x8a0] sm:$0xff] %vm4016_vm2, %v3900_v9  ;;  %v3707_v48 = vmax.f32 %v2081_v40, 0.0  ;;  %v3903_v49 = vmax.f32 %v3061_v41, 0.0  ;;  %v2076_v50 = vadd.f32 %v7397_v36, %v2075_v44  ;;  %v3056_v51 = vadd.f32 %v7397_v36, %v3055_v45  ;;  %v399_v44 = vld [vmem:[%s9399_s0 + $0xc08] sm:$0xff] }
 0x175   :  { %v5342_v52 = vpop.f32.mrf.mxu0  ;;  %5485 = vmatmul.mubr.msk.f32.gmra.mxu0 %vm418_vm1, %v195_v42  ;;  %v5636_v53 = vpop.f32.mrf.mxu1  ;;  %5779 = vmatmul.mubr.msk.f32.gmra.mxu1 %vm418_vm1, %v391_v43  ;;  %v203_v43 = vld [vmem:[%s9399_s0 + $0x5e8] sm:$0xff] }
 0x176   :  { %4100 = vst.msk [vmem:[%s9401_s3 + $0x298] sm:$0xff] %vm4016_vm2, %v3707_v48  ;;  %4296 = vst.msk [vmem:[%s9401_s3 + $0x8b8] sm:$0xff] %vm4016_vm2, %v3903_v49  ;;  %v3706_v54 = vmax.f32 %v2076_v50, 0.0  ;;  %v3902_v55 = vmax.f32 %v3056_v51, 0.0  ;;  %v2091_v56 = vadd.f32 %v7397_v36, %v5342_v52  ;;  %v3071_v57 = vadd.f32 %v7397_v36, %v5636_v53  ;;  %5487 = vmatprep.mubr.msk.f32.mxu0 %vm418_vm1, %v196_v46  ;;  %v394_v36 = vld [vmem:[%s9399_s0 + $0xbe0] sm:$0xff]  ;;  %v400_v48 = vld [vmem:[%s9399_s0 + $0xc10] sm:$0xff] }
 0x177   :  { %5781 = vmatprep.mubr.msk.f32.mxu1 %vm418_vm1, %v392_v47  ;;  %v2085_v60 = vpop.f32.mrf.mxu0  ;;  %v3065_v61 = vpop.f32.mrf.mxu1  ;;  %v204_v47 = vld [vmem:[%s9399_s0 + $0x5f0] sm:$0xff] }
 0x178   :  { %4099 = vst.msk [vmem:[%s9401_s3 + $0x290] sm:$0xff] %vm4016_vm2, %v3706_v54  ;;  %4295 = vst.msk [vmem:[%s9401_s3 + $0x8b0] sm:$0xff] %vm4016_vm2, %v3902_v55  ;;  %v3709_v63 = vmax.f32 %v2091_v56, 0.0  ;;  %v3905_v0 = vmax.f32 %v3071_v57, 0.0  ;;  %v2086_v2 = vadd.f32 %v8181_v1, %v2085_v60  ;;  %v3066_v3 = vadd.f32 %v8181_v1, %v3065_v61  ;;  %v401_v60 = vld [vmem:[%s9399_s0 + $0xc18] sm:$0xff] }
 0x179   :  { %v5345_v4 = vpop.f32.mrf.mxu0  ;;  %5488 = vmatmul.mubr.msk.f32.gmra.mxu0 %vm418_vm1, %v197_v58  ;;  %v5639_v5 = vpop.f32.mrf.mxu1  ;;  %5782 = vmatmul.mubr.msk.f32.gmra.mxu1 %vm418_vm1, %v393_v59  ;;  %v205_v59 = vld [vmem:[%s9399_s0 + $0x5f8] sm:$0xff] }
 0x17a   :  { %4102 = vst.msk [vmem:[%s9401_s3 + $0x2a8] sm:$0xff] %vm4016_vm2, %v3709_v63  ;;  %4298 = vst.msk [vmem:[%s9401_s3 + $0x8c8] sm:$0xff] %vm4016_vm2, %v3905_v0  ;;  %v3708_v6 = vmax.f32 %v2086_v2, 0.0  ;;  %v3904_v7 = vmax.f32 %v3066_v3, 0.0  ;;  %v2101_v8 = vadd.f32 %v8181_v1, %v5345_v4  ;;  %v3081_v10 = vadd.f32 %v8181_v1, %v5639_v5  ;;  %5490 = vmatprep.mubr.msk.f32.mxu0 %vm418_vm1, %v198_v62  ;;  %v402_v63 = vld [vmem:[%s9399_s0 + $0xc20] sm:$0xff] }
 0x17b   :  { %5784 = vmatprep.mubr.msk.f32.mxu1 %vm418_vm1, %v394_v36  ;;  %v2095_v13 = vpop.f32.mrf.mxu0  ;;  %v3075_v14 = vpop.f32.mrf.mxu1  ;;  %v206_v36 = vld [vmem:[%s9399_s0 + $0x600] sm:$0xff] }
 0x17c   :  { %4101 = vst.msk [vmem:[%s9401_s3 + $0x2a0] sm:$0xff] %vm4016_vm2, %v3708_v6  ;;  %4297 = vst.msk [vmem:[%s9401_s3 + $0x8c0] sm:$0xff] %vm4016_vm2, %v3904_v7  ;;  %v3711_v17 = vmax.f32 %v2101_v8, 0.0  ;;  %v3907_v18 = vmax.f32 %v3081_v10, 0.0  ;;  %v2096_v19 = vadd.f32 %v8181_v1, %v2095_v13  ;;  %v3076_v20 = vadd.f32 %v8181_v1, %v3075_v14  ;;  %v403_v13 = vld [vmem:[%s9399_s0 + $0xc28] sm:$0xff] }
 0x17d   :  { %v5348_v21 = vpop.f32.mrf.mxu0  ;;  %5491 = vmatmul.mubr.msk.f32.gmra.mxu0 %vm418_vm1, %v199_v11  ;;  %v5642_v22 = vpop.f32.mrf.mxu1  ;;  %5785 = vmatmul.mubr.msk.f32.gmra.mxu1 %vm418_vm1, %v395_v12  ;;  %v207_v12 = vld [vmem:[%s9399_s0 + $0x608] sm:$0xff] }
 0x17e   :  { %4104 = vst.msk [vmem:[%s9401_s3 + $0x2b8] sm:$0xff] %vm4016_vm2, %v3711_v17  ;;  %4300 = vst.msk [vmem:[%s9401_s3 + $0x8d8] sm:$0xff] %vm4016_vm2, %v3907_v18  ;;  %v3710_v23 = vmax.f32 %v2096_v19, 0.0  ;;  %v3906_v24 = vmax.f32 %v3076_v20, 0.0  ;;  %v2111_v25 = vadd.f32 %v8181_v1, %v5348_v21  ;;  %v3091_v26 = vadd.f32 %v8181_v1, %v5642_v22  ;;  %5493 = vmatprep.mubr.msk.f32.mxu0 %vm418_vm1, %v200_v15  ;;  %v404_v17 = vld [vmem:[%s9399_s0 + $0xc30] sm:$0xff] }
 0x17f   :  { %5787 = vmatprep.mubr.msk.f32.mxu1 %vm418_vm1, %v396_v16  ;;  %v2105_v29 = vpop.f32.mrf.mxu0  ;;  %v3085_v30 = vpop.f32.mrf.mxu1  ;;  %v208_v16 = vld [vmem:[%s9399_s0 + $0x610] sm:$0xff] }
 0x180   :  { %4103 = vst.msk [vmem:[%s9401_s3 + $0x2b0] sm:$0xff] %vm4016_vm2, %v3710_v23  ;;  %4299 = vst.msk [vmem:[%s9401_s3 + $0x8d0] sm:$0xff] %vm4016_vm2, %v3906_v24  ;;  %v3713_v33 = vmax.f32 %v2111_v25, 0.0  ;;  %v3909_v34 = vmax.f32 %v3091_v26, 0.0  ;;  %v2106_v35 = vadd.f32 %v8181_v1, %v2105_v29  ;;  %v3086_v37 = vadd.f32 %v8181_v1, %v3085_v30  ;;  %v405_v29 = vld [vmem:[%s9399_s0 + $0xc38] sm:$0xff] }
 0x181   :  { %v5351_v38 = vpop.f32.mrf.mxu0  ;;  %5494 = vmatmul.mubr.msk.f32.gmra.mxu0 %vm418_vm1, %v201_v27  ;;  %v5645_v39 = vpop.f32.mrf.mxu1  ;;  %5788 = vmatmul.mubr.msk.f32.gmra.mxu1 %vm418_vm1, %v397_v28  ;;  %v209_v28 = vld [vmem:[%s9399_s0 + $0x618] sm:$0xff] }
 0x182   :  { %4106 = vst.msk [vmem:[%s9401_s3 + $0x2c8] sm:$0xff] %vm4016_vm2, %v3713_v33  ;;  %4302 = vst.msk [vmem:[%s9401_s3 + $0x8e8] sm:$0xff] %vm4016_vm2, %v3909_v34  ;;  %v3712_v9 = vmax.f32 %v2106_v35, 0.0  ;;  %v3908_v40 = vmax.f32 %v3086_v37, 0.0  ;;  %v2121_v41 = vadd.f32 %v8181_v1, %v5351_v38  ;;  %v3101_v42 = vadd.f32 %v8181_v1, %v5645_v39  ;;  %5496 = vmatprep.mubr.msk.f32.mxu0 %vm418_vm1, %v202_v31 }
 0x183   :  { %5790 = vmatprep.mubr.msk.f32.mxu1 %vm418_vm1, %v398_v32  ;;  %v2115_v45 = vpop.f32.mrf.mxu0  ;;  %v3095_v46 = vpop.f32.mrf.mxu1 }
 0x184   :  { %4105 = vst.msk [vmem:[%s9401_s3 + $0x2c0] sm:$0xff] %vm4016_vm2, %v3712_v9  ;;  %4301 = vst.msk [vmem:[%s9401_s3 + $0x8e0] sm:$0xff] %vm4016_vm2, %v3908_v40  ;;  %v3715_v49 = vmax.f32 %v2121_v41, 0.0  ;;  %v3911_v50 = vmax.f32 %v3101_v42, 0.0  ;;  %v2116_v51 = vadd.f32 %v8181_v1, %v2115_v45  ;;  %v3096_v52 = vadd.f32 %v8181_v1, %v3095_v46 }
 0x185   :  { %v5354_v53 = vpop.f32.mrf.mxu0  ;;  %5497 = vmatmul.mubr.msk.f32.gmra.mxu0 %vm418_vm1, %v203_v43  ;;  %v5648_v54 = vpop.f32.mrf.mxu1  ;;  %5791 = vmatmul.mubr.msk.f32.gmra.mxu1 %vm418_vm1, %v399_v44 }
 0x186   :  { %4108 = vst.msk [vmem:[%s9401_s3 + $0x2d8] sm:$0xff] %vm4016_vm2, %v3715_v49  ;;  %4304 = vst.msk [vmem:[%s9401_s3 + $0x8f8] sm:$0xff] %vm4016_vm2, %v3911_v50  ;;  %v3714_v55 = vmax.f32 %v2116_v51, 0.0  ;;  %v3910_v56 = vmax.f32 %v3096_v52, 0.0  ;;  %v2131_v57 = vadd.f32 %v8181_v1, %v5354_v53  ;;  %v3111_v58 = vadd.f32 %v8181_v1, %v5648_v54  ;;  %5499 = vmatprep.mubr.msk.f32.mxu0 %vm418_vm1, %v204_v47 }
 0x187   :  { %5793 = vmatprep.mubr.msk.f32.mxu1 %vm418_vm1, %v400_v48  ;;  %v2125_v61 = vpop.f32.mrf.mxu0  ;;  %v3105_v62 = vpop.f32.mrf.mxu1 }
 0x188   :  { %4107 = vst.msk [vmem:[%s9401_s3 + $0x2d0] sm:$0xff] %vm4016_vm2, %v3714_v55  ;;  %4303 = vst.msk [vmem:[%s9401_s3 + $0x8f0] sm:$0xff] %vm4016_vm2, %v3910_v56  ;;  %v3717_v0 = vmax.f32 %v2131_v57, 0.0  ;;  %v3913_v2 = vmax.f32 %v3111_v58, 0.0  ;;  %v2126_v3 = vadd.f32 %v8181_v1, %v2125_v61  ;;  %v3106_v4 = vadd.f32 %v8181_v1, %v3105_v62 }
 0x189   :  { %v5357_v5 = vpop.f32.mrf.mxu0  ;;  %5500 = vmatmul.mubr.msk.f32.gmra.mxu0 %vm418_vm1, %v205_v59  ;;  %v5651_v6 = vpop.f32.mrf.mxu1  ;;  %5794 = vmatmul.mubr.msk.f32.gmra.mxu1 %vm418_vm1, %v401_v60 }
 0x18a   :  { %4110 = vst.msk [vmem:[%s9401_s3 + $0x2e8] sm:$0xff] %vm4016_vm2, %v3717_v0  ;;  %4306 = vst.msk [vmem:[%s9401_s3 + $0x908] sm:$0xff] %vm4016_vm2, %v3913_v2  ;;  %v3716_v7 = vmax.f32 %v2126_v3, 0.0  ;;  %v3912_v8 = vmax.f32 %v3106_v4, 0.0  ;;  %v2141_v10 = vadd.f32 %v8181_v1, %v5357_v5  ;;  %v3121_v11 = vadd.f32 %v8181_v1, %v5651_v6  ;;  %5502 = vmatprep.mubr.msk.f32.mxu0 %vm418_vm1, %v206_v36 }
 0x18b   :  { %5796 = vmatprep.mubr.msk.f32.mxu1 %vm418_vm1, %v402_v63  ;;  %v2135_v14 = vpop.f32.mrf.mxu0  ;;  %v3115_v15 = vpop.f32.mrf.mxu1 }
 0x18c   :  { %4109 = vst.msk [vmem:[%s9401_s3 + $0x2e0] sm:$0xff] %vm4016_vm2, %v3716_v7  ;;  %4305 = vst.msk [vmem:[%s9401_s3 + $0x900] sm:$0xff] %vm4016_vm2, %v3912_v8  ;;  %v3719_v18 = vmax.f32 %v2141_v10, 0.0  ;;  %v3915_v19 = vmax.f32 %v3121_v11, 0.0  ;;  %v2136_v20 = vadd.f32 %v8181_v1, %v2135_v14  ;;  %v3116_v21 = vadd.f32 %v8181_v1, %v3115_v15 }
 0x18d   :  { %v5360_v22 = vpop.f32.mrf.mxu0  ;;  %5503 = vmatmul.mubr.msk.f32.gmra.mxu0 %vm418_vm1, %v207_v12  ;;  %v5654_v23 = vpop.f32.mrf.mxu1  ;;  %5797 = vmatmul.mubr.msk.f32.gmra.mxu1 %vm418_vm1, %v403_v13 }
 0x18e   :  { %4112 = vst.msk [vmem:[%s9401_s3 + $0x2f8] sm:$0xff] %vm4016_vm2, %v3719_v18  ;;  %4308 = vst.msk [vmem:[%s9401_s3 + $0x918] sm:$0xff] %vm4016_vm2, %v3915_v19  ;;  %v3718_v24 = vmax.f32 %v2136_v20, 0.0  ;;  %v3914_v25 = vmax.f32 %v3116_v21, 0.0  ;;  %v2151_v26 = vadd.f32 %v8181_v1, %v5360_v22  ;;  %v3131_v27 = vadd.f32 %v8181_v1, %v5654_v23  ;;  %5505 = vmatprep.mubr.msk.f32.mxu0 %vm418_vm1, %v208_v16 }
 0x18f   :  { %5799 = vmatprep.mubr.msk.f32.mxu1 %vm418_vm1, %v404_v17  ;;  %v2145_v30 = vpop.f32.mrf.mxu0  ;;  %v3125_v31 = vpop.f32.mrf.mxu1 }
 0x190   :  { %4111 = vst.msk [vmem:[%s9401_s3 + $0x2f0] sm:$0xff] %vm4016_vm2, %v3718_v24  ;;  %4307 = vst.msk [vmem:[%s9401_s3 + $0x910] sm:$0xff] %vm4016_vm2, %v3914_v25  ;;  %v3721_v32 = vmax.f32 %v2151_v26, 0.0  ;;  %v3917_v33 = vmax.f32 %v3131_v27, 0.0  ;;  %v2146_v34 = vadd.f32 %v8181_v1, %v2145_v30  ;;  %v3126_v35 = vadd.f32 %v8181_v1, %v3125_v31 }
 0x191   :  { %v5363_v37 = vpop.f32.mrf.mxu0  ;;  %5506 = vmatmul.mubr.msk.f32.gmra.mxu0 %vm418_vm1, %v209_v28  ;;  %v5657_v38 = vpop.f32.mrf.mxu1  ;;  %5800 = vmatmul.mubr.msk.f32.gmra.mxu1 %vm418_vm1, %v405_v29 }
 0x192   :  { %4114 = vst.msk [vmem:[%s9401_s3 + $0x308] sm:$0xff] %vm4016_vm2, %v3721_v32  ;;  %4310 = vst.msk [vmem:[%s9401_s3 + $0x928] sm:$0xff] %vm4016_vm2, %v3917_v33  ;;  %v3720_v39 = vmax.f32 %v2146_v34, 0.0  ;;  %v3916_v9 = vmax.f32 %v3126_v35, 0.0  ;;  %v2161_v40 = vadd.f32 %v8181_v1, %v5363_v37  ;;  %v3141_v41 = vadd.f32 %v8181_v1, %v5657_v38 }
 0x193   :  { %v2155_v42 = vpop.f32.mrf.mxu0  ;;  %v3135_v43 = vpop.f32.mrf.mxu1 }
 0x194   :  { %4113 = vst.msk [vmem:[%s9401_s3 + $0x300] sm:$0xff] %vm4016_vm2, %v3720_v39  ;;  %4309 = vst.msk [vmem:[%s9401_s3 + $0x920] sm:$0xff] %vm4016_vm2, %v3916_v9  ;;  %v3723_v44 = vmax.f32 %v2161_v40, 0.0  ;;  %v3919_v45 = vmax.f32 %v3141_v41, 0.0  ;;  %v2156_v46 = vadd.f32 %v8181_v1, %v2155_v42  ;;  %v3136_v47 = vadd.f32 %v8181_v1, %v3135_v43 }
 0x195   :  { %v5366_v48 = vpop.f32.mrf.mxu0  ;;  %v5660_v49 = vpop.f32.mrf.mxu1 }
 0x196   :  { %4116 = vst.msk [vmem:[%s9401_s3 + $0x318] sm:$0xff] %vm4016_vm2, %v3723_v44  ;;  %4312 = vst.msk [vmem:[%s9401_s3 + $0x938] sm:$0xff] %vm4016_vm2, %v3919_v45  ;;  %v3722_v50 = vmax.f32 %v2156_v46, 0.0  ;;  %v3918_v51 = vmax.f32 %v3136_v47, 0.0  ;;  %v2171_v52 = vadd.f32 %v8181_v1, %v5366_v48  ;;  %v3151_v53 = vadd.f32 %v8181_v1, %v5660_v49 }
 0x197   :  { %v2165_v54 = vpop.f32.mrf.mxu0  ;;  %v3145_v55 = vpop.f32.mrf.mxu1 }
 0x198   :  { %4115 = vst.msk [vmem:[%s9401_s3 + $0x310] sm:$0xff] %vm4016_vm2, %v3722_v50  ;;  %4311 = vst.msk [vmem:[%s9401_s3 + $0x930] sm:$0xff] %vm4016_vm2, %v3918_v51  ;;  %v3725_v56 = vmax.f32 %v2171_v52, 0.0  ;;  %v3921_v57 = vmax.f32 %v3151_v53, 0.0  ;;  %v2166_v58 = vadd.f32 %v8181_v1, %v2165_v54  ;;  %v3146_v59 = vadd.f32 %v8181_v1, %v3145_v55 }
 0x199   :  { %v5369_v60 = vpop.f32.mrf.mxu0  ;;  %v5663_v61 = vpop.f32.mrf.mxu1 }
 0x19a   :  { %4118 = vst.msk [vmem:[%s9401_s3 + $0x328] sm:$0xff] %vm4016_vm2, %v3725_v56  ;;  %4314 = vst.msk [vmem:[%s9401_s3 + $0x948] sm:$0xff] %vm4016_vm2, %v3921_v57  ;;  %v3724_v62 = vmax.f32 %v2166_v58, 0.0  ;;  %v3920_v36 = vmax.f32 %v3146_v59, 0.0  ;;  %v2181_v63 = vadd.f32 %v8181_v1, %v5369_v60  ;;  %v3161_v0 = vadd.f32 %v8181_v1, %v5663_v61 }
 0x19b   :  { %v2175_v2 = vpop.f32.mrf.mxu0  ;;  %v3155_v3 = vpop.f32.mrf.mxu1 }
 0x19c   :  { %4117 = vst.msk [vmem:[%s9401_s3 + $0x320] sm:$0xff] %vm4016_vm2, %v3724_v62  ;;  %4313 = vst.msk [vmem:[%s9401_s3 + $0x940] sm:$0xff] %vm4016_vm2, %v3920_v36  ;;  %v3727_v4 = vmax.f32 %v2181_v63, 0.0  ;;  %v3923_v5 = vmax.f32 %v3161_v0, 0.0  ;;  %v2176_v6 = vadd.f32 %v8181_v1, %v2175_v2  ;;  %v3156_v7 = vadd.f32 %v8181_v1, %v3155_v3 }
 0x19d   :  { %v5372_v8 = vpop.f32.mrf.mxu0  ;;  %v5666_v10 = vpop.f32.mrf.mxu1 }
 0x19e   :  { %4120 = vst.msk [vmem:[%s9401_s3 + $0x338] sm:$0xff] %vm4016_vm2, %v3727_v4  ;;  %4316 = vst.msk [vmem:[%s9401_s3 + $0x958] sm:$0xff] %vm4016_vm2, %v3923_v5  ;;  %v3726_v11 = vmax.f32 %v2176_v6, 0.0  ;;  %v3922_v12 = vmax.f32 %v3156_v7, 0.0  ;;  %v2191_v13 = vadd.f32 %v8181_v1, %v5372_v8  ;;  %v3171_v14 = vadd.f32 %v8181_v1, %v5666_v10 }
 0x19f   :  { %v2185_v15 = vpop.f32.mrf.mxu0  ;;  %v3165_v16 = vpop.f32.mrf.mxu1 }
 0x1a0   :  { %4119 = vst.msk [vmem:[%s9401_s3 + $0x330] sm:$0xff] %vm4016_vm2, %v3726_v11  ;;  %4315 = vst.msk [vmem:[%s9401_s3 + $0x950] sm:$0xff] %vm4016_vm2, %v3922_v12  ;;  %v3729_v17 = vmax.f32 %v2191_v13, 0.0  ;;  %v3925_v18 = vmax.f32 %v3171_v14, 0.0  ;;  %v2186_v19 = vadd.f32 %v8181_v1, %v2185_v15  ;;  %v3166_v20 = vadd.f32 %v8181_v1, %v3165_v16 }
 0x1a1   :  { %v5375_v21 = vpop.f32.mrf.mxu0  ;;  %v5669_v22 = vpop.f32.mrf.mxu1 }
 0x1a2   :  { %4122 = vst.msk [vmem:[%s9401_s3 + $0x348] sm:$0xff] %vm4016_vm2, %v3729_v17  ;;  %4318 = vst.msk [vmem:[%s9401_s3 + $0x968] sm:$0xff] %vm4016_vm2, %v3925_v18  ;;  %v3728_v23 = vmax.f32 %v2186_v19, 0.0  ;;  %v3924_v24 = vmax.f32 %v3166_v20, 0.0  ;;  %v2201_v25 = vadd.f32 %v8181_v1, %v5375_v21  ;;  %v3181_v26 = vadd.f32 %v8181_v1, %v5669_v22 }
 0x1a3   :  { %v2195_v27 = vpop.f32.mrf.mxu0  ;;  %v3175_v28 = vpop.f32.mrf.mxu1 }
 0x1a4   :  { %4121 = vst.msk [vmem:[%s9401_s3 + $0x340] sm:$0xff] %vm4016_vm2, %v3728_v23  ;;  %4317 = vst.msk [vmem:[%s9401_s3 + $0x960] sm:$0xff] %vm4016_vm2, %v3924_v24  ;;  %v3731_v29 = vmax.f32 %v2201_v25, 0.0  ;;  %v3927_v30 = vmax.f32 %v3181_v26, 0.0  ;;  %v2196_v31 = vadd.f32 %v8181_v1, %v2195_v27  ;;  %v3176_v32 = vadd.f32 %v8181_v1, %v3175_v28 }
 0x1a5   :  { %v5378_v33 = vpop.f32.mrf.mxu0  ;;  %v5672_v34 = vpop.f32.mrf.mxu1 }
 0x1a6   :  { %4124 = vst.msk [vmem:[%s9401_s3 + $0x358] sm:$0xff] %vm4016_vm2, %v3731_v29  ;;  %4320 = vst.msk [vmem:[%s9401_s3 + $0x978] sm:$0xff] %vm4016_vm2, %v3927_v30  ;;  %v3730_v35 = vmax.f32 %v2196_v31, 0.0  ;;  %v3926_v37 = vmax.f32 %v3176_v32, 0.0  ;;  %v2211_v38 = vadd.f32 %v8181_v1, %v5378_v33  ;;  %v3191_v39 = vadd.f32 %v8181_v1, %v5672_v34 }
 0x1a7   :  { %v2205_v9 = vpop.f32.mrf.mxu0  ;;  %v3185_v40 = vpop.f32.mrf.mxu1 }
 0x1a8   :  { %4123 = vst.msk [vmem:[%s9401_s3 + $0x350] sm:$0xff] %vm4016_vm2, %v3730_v35  ;;  %4319 = vst.msk [vmem:[%s9401_s3 + $0x970] sm:$0xff] %vm4016_vm2, %v3926_v37  ;;  %v3733_v41 = vmax.f32 %v2211_v38, 0.0  ;;  %v3929_v42 = vmax.f32 %v3191_v39, 0.0  ;;  %v2206_v43 = vadd.f32 %v8181_v1, %v2205_v9  ;;  %v3186_v44 = vadd.f32 %v8181_v1, %v3185_v40 }
 0x1a9   :  { %v5381_v45 = vpop.f32.mrf.mxu0  ;;  %v5675_v46 = vpop.f32.mrf.mxu1 }
 0x1aa   :  { %4126 = vst.msk [vmem:[%s9401_s3 + $0x368] sm:$0xff] %vm4016_vm2, %v3733_v41  ;;  %4322 = vst.msk [vmem:[%s9401_s3 + $0x988] sm:$0xff] %vm4016_vm2, %v3929_v42  ;;  %v3732_v47 = vmax.f32 %v2206_v43, 0.0  ;;  %v3928_v48 = vmax.f32 %v3186_v44, 0.0  ;;  %v2221_v49 = vadd.f32 %v8181_v1, %v5381_v45  ;;  %v3201_v50 = vadd.f32 %v8181_v1, %v5675_v46 }
 0x1ab   :  { %v2215_v51 = vpop.f32.mrf.mxu0  ;;  %v3195_v52 = vpop.f32.mrf.mxu1 }
 0x1ac   :  { %4125 = vst.msk [vmem:[%s9401_s3 + $0x360] sm:$0xff] %vm4016_vm2, %v3732_v47  ;;  %4321 = vst.msk [vmem:[%s9401_s3 + $0x980] sm:$0xff] %vm4016_vm2, %v3928_v48  ;;  %v3735_v53 = vmax.f32 %v2221_v49, 0.0  ;;  %v3931_v54 = vmax.f32 %v3201_v50, 0.0  ;;  %v2216_v55 = vadd.f32 %v8181_v1, %v2215_v51  ;;  %v3196_v56 = vadd.f32 %v8181_v1, %v3195_v52 }
 0x1ad   :  { %v5384_v57 = vpop.f32.mrf.mxu0  ;;  %v5678_v58 = vpop.f32.mrf.mxu1 }
 0x1ae   :  { %4128 = vst.msk [vmem:[%s9401_s3 + $0x378] sm:$0xff] %vm4016_vm2, %v3735_v53  ;;  %4324 = vst.msk [vmem:[%s9401_s3 + $0x998] sm:$0xff] %vm4016_vm2, %v3931_v54  ;;  %v3734_v59 = vmax.f32 %v2216_v55, 0.0  ;;  %v3930_v60 = vmax.f32 %v3196_v56, 0.0  ;;  %v2231_v61 = vadd.f32 %v8181_v1, %v5384_v57  ;;  %v3211_v62 = vadd.f32 %v8181_v1, %v5678_v58 }
 0x1af   :  { %v2225_v36 = vpop.f32.mrf.mxu0  ;;  %v3205_v63 = vpop.f32.mrf.mxu1 }
 0x1b0   :  { %4127 = vst.msk [vmem:[%s9401_s3 + $0x370] sm:$0xff] %vm4016_vm2, %v3734_v59  ;;  %4323 = vst.msk [vmem:[%s9401_s3 + $0x990] sm:$0xff] %vm4016_vm2, %v3930_v60  ;;  %v3737_v0 = vmax.f32 %v2231_v61, 0.0  ;;  %v3933_v2 = vmax.f32 %v3211_v62, 0.0  ;;  %v2226_v3 = vadd.f32 %v8181_v1, %v2225_v36  ;;  %v3206_v4 = vadd.f32 %v8181_v1, %v3205_v63 }
 0x1b1   :  { %v5387_v5 = vpop.f32.mrf.mxu0  ;;  %v5681_v6 = vpop.f32.mrf.mxu1 }
 0x1b2   :  { %4130 = vst.msk [vmem:[%s9401_s3 + $0x388] sm:$0xff] %vm4016_vm2, %v3737_v0  ;;  %4326 = vst.msk [vmem:[%s9401_s3 + $0x9a8] sm:$0xff] %vm4016_vm2, %v3933_v2  ;;  %v3736_v7 = vmax.f32 %v2226_v3, 0.0  ;;  %v3932_v8 = vmax.f32 %v3206_v4, 0.0  ;;  %v2241_v10 = vadd.f32 %v8181_v1, %v5387_v5  ;;  %v3221_v11 = vadd.f32 %v8181_v1, %v5681_v6 }
 0x1b3   :  { %v2235_v12 = vpop.f32.mrf.mxu0  ;;  %v3215_v13 = vpop.f32.mrf.mxu1 }
 0x1b4   :  { %4129 = vst.msk [vmem:[%s9401_s3 + $0x380] sm:$0xff] %vm4016_vm2, %v3736_v7  ;;  %4325 = vst.msk [vmem:[%s9401_s3 + $0x9a0] sm:$0xff] %vm4016_vm2, %v3932_v8  ;;  %v3739_v14 = vmax.f32 %v2241_v10, 0.0  ;;  %v3935_v15 = vmax.f32 %v3221_v11, 0.0  ;;  %v2236_v16 = vadd.f32 %v8181_v1, %v2235_v12  ;;  %v3216_v17 = vadd.f32 %v8181_v1, %v3215_v13 }
 0x1b5   :  { %v5390_v18 = vpop.f32.mrf.mxu0  ;;  %v5684_v19 = vpop.f32.mrf.mxu1 }
 0x1b6   :  { %4132 = vst.msk [vmem:[%s9401_s3 + $0x398] sm:$0xff] %vm4016_vm2, %v3739_v14  ;;  %4328 = vst.msk [vmem:[%s9401_s3 + $0x9b8] sm:$0xff] %vm4016_vm2, %v3935_v15  ;;  %v3738_v20 = vmax.f32 %v2236_v16, 0.0  ;;  %v3934_v21 = vmax.f32 %v3216_v17, 0.0  ;;  %v2251_v22 = vadd.f32 %v8181_v1, %v5390_v18  ;;  %v3231_v23 = vadd.f32 %v8181_v1, %v5684_v19 }
 0x1b7   :  { %v2245_v24 = vpop.f32.mrf.mxu0  ;;  %v3225_v25 = vpop.f32.mrf.mxu1 }
 0x1b8   :  { %4131 = vst.msk [vmem:[%s9401_s3 + $0x390] sm:$0xff] %vm4016_vm2, %v3738_v20  ;;  %4327 = vst.msk [vmem:[%s9401_s3 + $0x9b0] sm:$0xff] %vm4016_vm2, %v3934_v21  ;;  %v3741_v26 = vmax.f32 %v2251_v22, 0.0  ;;  %v3937_v27 = vmax.f32 %v3231_v23, 0.0  ;;  %v2246_v28 = vadd.f32 %v8181_v1, %v2245_v24  ;;  %v3226_v29 = vadd.f32 %v8181_v1, %v3225_v25 }
 0x1b9   :  { %v5393_v30 = vpop.f32.mrf.mxu0  ;;  %v5687_v31 = vpop.f32.mrf.mxu1 }
 0x1ba   :  { %4134 = vst.msk [vmem:[%s9401_s3 + $0x3a8] sm:$0xff] %vm4016_vm2, %v3741_v26  ;;  %4330 = vst.msk [vmem:[%s9401_s3 + $0x9c8] sm:$0xff] %vm4016_vm2, %v3937_v27  ;;  %v3740_v32 = vmax.f32 %v2246_v28, 0.0  ;;  %v3936_v33 = vmax.f32 %v3226_v29, 0.0  ;;  %v2261_v34 = vadd.f32 %v8181_v1, %v5393_v30  ;;  %v3241_v35 = vadd.f32 %v8181_v1, %v5687_v31 }
 0x1bb   :  { %v2255_v37 = vpop.f32.mrf.mxu0  ;;  %v3235_v38 = vpop.f32.mrf.mxu1 }
 0x1bc   :  { %4133 = vst.msk [vmem:[%s9401_s3 + $0x3a0] sm:$0xff] %vm4016_vm2, %v3740_v32  ;;  %4329 = vst.msk [vmem:[%s9401_s3 + $0x9c0] sm:$0xff] %vm4016_vm2, %v3936_v33  ;;  %v3743_v39 = vmax.f32 %v2261_v34, 0.0  ;;  %v3939_v9 = vmax.f32 %v3241_v35, 0.0  ;;  %v2256_v40 = vadd.f32 %v8181_v1, %v2255_v37  ;;  %v3236_v41 = vadd.f32 %v8181_v1, %v3235_v38 }
 0x1bd   :  { %v5396_v42 = vpop.f32.mrf.mxu0  ;;  %v5690_v43 = vpop.f32.mrf.mxu1 }
 0x1be   :  { %4136 = vst.msk [vmem:[%s9401_s3 + $0x3b8] sm:$0xff] %vm4016_vm2, %v3743_v39  ;;  %4332 = vst.msk [vmem:[%s9401_s3 + $0x9d8] sm:$0xff] %vm4016_vm2, %v3939_v9  ;;  %v3742_v44 = vmax.f32 %v2256_v40, 0.0  ;;  %v3938_v45 = vmax.f32 %v3236_v41, 0.0  ;;  %v2271_v46 = vadd.f32 %v8181_v1, %v5396_v42  ;;  %v3251_v47 = vadd.f32 %v8181_v1, %v5690_v43 }
 0x1bf   :  { %v2265_v48 = vpop.f32.mrf.mxu0  ;;  %v3245_v49 = vpop.f32.mrf.mxu1 }
 0x1c0   :  { %4135 = vst.msk [vmem:[%s9401_s3 + $0x3b0] sm:$0xff] %vm4016_vm2, %v3742_v44  ;;  %4331 = vst.msk [vmem:[%s9401_s3 + $0x9d0] sm:$0xff] %vm4016_vm2, %v3938_v45  ;;  %v3745_v50 = vmax.f32 %v2271_v46, 0.0  ;;  %v3941_v51 = vmax.f32 %v3251_v47, 0.0  ;;  %v2266_v52 = vadd.f32 %v8181_v1, %v2265_v48  ;;  %v3246_v53 = vadd.f32 %v8181_v1, %v3245_v49 }
 0x1c1   :  { %v5399_v54 = vpop.f32.mrf.mxu0  ;;  %v5693_v55 = vpop.f32.mrf.mxu1 }
 0x1c2   :  { %4138 = vst.msk [vmem:[%s9401_s3 + $0x3c8] sm:$0xff] %vm4016_vm2, %v3745_v50  ;;  %4334 = vst.msk [vmem:[%s9401_s3 + $0x9e8] sm:$0xff] %vm4016_vm2, %v3941_v51  ;;  %v3744_v56 = vmax.f32 %v2266_v52, 0.0  ;;  %v3940_v57 = vmax.f32 %v3246_v53, 0.0  ;;  %v2281_v58 = vadd.f32 %v8181_v1, %v5399_v54  ;;  %v3261_v59 = vadd.f32 %v8181_v1, %v5693_v55 }
 0x1c3   :  { %v2275_v60 = vpop.f32.mrf.mxu0  ;;  %v3255_v61 = vpop.f32.mrf.mxu1 }
 0x1c4   :  { %4137 = vst.msk [vmem:[%s9401_s3 + $0x3c0] sm:$0xff] %vm4016_vm2, %v3744_v56  ;;  %4333 = vst.msk [vmem:[%s9401_s3 + $0x9e0] sm:$0xff] %vm4016_vm2, %v3940_v57  ;;  %v3747_v62 = vmax.f32 %v2281_v58, 0.0  ;;  %v3943_v36 = vmax.f32 %v3261_v59, 0.0  ;;  %v2276_v63 = vadd.f32 %v8181_v1, %v2275_v60  ;;  %v3256_v0 = vadd.f32 %v8181_v1, %v3255_v61 }
 0x1c5   :  { %v5402_v2 = vpop.f32.mrf.mxu0  ;;  %v5696_v3 = vpop.f32.mrf.mxu1 }
 0x1c6   :  { %4140 = vst.msk [vmem:[%s9401_s3 + $0x3d8] sm:$0xff] %vm4016_vm2, %v3747_v62  ;;  %4336 = vst.msk [vmem:[%s9401_s3 + $0x9f8] sm:$0xff] %vm4016_vm2, %v3943_v36  ;;  %v3746_v4 = vmax.f32 %v2276_v63, 0.0  ;;  %v3942_v5 = vmax.f32 %v3256_v0, 0.0  ;;  %v2291_v6 = vadd.f32 %v8181_v1, %v5402_v2  ;;  %v3271_v7 = vadd.f32 %v8181_v1, %v5696_v3 }
 0x1c7   :  { %v2285_v8 = vpop.f32.mrf.mxu0  ;;  %v3265_v10 = vpop.f32.mrf.mxu1 }
 0x1c8   :  { %4139 = vst.msk [vmem:[%s9401_s3 + $0x3d0] sm:$0xff] %vm4016_vm2, %v3746_v4  ;;  %4335 = vst.msk [vmem:[%s9401_s3 + $0x9f0] sm:$0xff] %vm4016_vm2, %v3942_v5  ;;  %v3749_v11 = vmax.f32 %v2291_v6, 0.0  ;;  %v3945_v12 = vmax.f32 %v3271_v7, 0.0  ;;  %v2286_v13 = vadd.f32 %v8181_v1, %v2285_v8  ;;  %v3266_v14 = vadd.f32 %v8181_v1, %v3265_v10 }
 0x1c9   :  { %v5405_v15 = vpop.f32.mrf.mxu0  ;;  %v5699_v16 = vpop.f32.mrf.mxu1 }
 0x1ca   :  { %4142 = vst.msk [vmem:[%s9401_s3 + $0x3e8] sm:$0xff] %vm4016_vm2, %v3749_v11  ;;  %4338 = vst.msk [vmem:[%s9401_s3 + $0xa08] sm:$0xff] %vm4016_vm2, %v3945_v12  ;;  %v3748_v17 = vmax.f32 %v2286_v13, 0.0  ;;  %v3944_v18 = vmax.f32 %v3266_v14, 0.0  ;;  %v2301_v19 = vadd.f32 %v8181_v1, %v5405_v15  ;;  %v3281_v20 = vadd.f32 %v8181_v1, %v5699_v16 }
 0x1cb   :  { %v2295_v21 = vpop.f32.mrf.mxu0  ;;  %v3275_v22 = vpop.f32.mrf.mxu1 }
 0x1cc   :  { %4141 = vst.msk [vmem:[%s9401_s3 + $0x3e0] sm:$0xff] %vm4016_vm2, %v3748_v17  ;;  %4337 = vst.msk [vmem:[%s9401_s3 + $0xa00] sm:$0xff] %vm4016_vm2, %v3944_v18  ;;  %v3751_v23 = vmax.f32 %v2301_v19, 0.0  ;;  %v3947_v24 = vmax.f32 %v3281_v20, 0.0  ;;  %v2296_v25 = vadd.f32 %v8181_v1, %v2295_v21  ;;  %v3276_v26 = vadd.f32 %v8181_v1, %v3275_v22 }
 0x1cd   :  { %v5408_v27 = vpop.f32.mrf.mxu0  ;;  %v5702_v28 = vpop.f32.mrf.mxu1 }
 0x1ce   :  { %4144 = vst.msk [vmem:[%s9401_s3 + $0x3f8] sm:$0xff] %vm4016_vm2, %v3751_v23  ;;  %4340 = vst.msk [vmem:[%s9401_s3 + $0xa18] sm:$0xff] %vm4016_vm2, %v3947_v24  ;;  %v3750_v29 = vmax.f32 %v2296_v25, 0.0  ;;  %v3946_v30 = vmax.f32 %v3276_v26, 0.0  ;;  %v2311_v31 = vadd.f32 %v8181_v1, %v5408_v27  ;;  %v3291_v32 = vadd.f32 %v8181_v1, %v5702_v28 }
 0x1cf   :  { %v2305_v33 = vpop.f32.mrf.mxu0  ;;  %v3285_v34 = vpop.f32.mrf.mxu1 }
 0x1d0   :  { %4143 = vst.msk [vmem:[%s9401_s3 + $0x3f0] sm:$0xff] %vm4016_vm2, %v3750_v29  ;;  %4339 = vst.msk [vmem:[%s9401_s3 + $0xa10] sm:$0xff] %vm4016_vm2, %v3946_v30  ;;  %v3753_v35 = vmax.f32 %v2311_v31, 0.0  ;;  %v3949_v37 = vmax.f32 %v3291_v32, 0.0  ;;  %v2306_v38 = vadd.f32 %v8181_v1, %v2305_v33  ;;  %v3286_v39 = vadd.f32 %v8181_v1, %v3285_v34 }
 0x1d1   :  { %v5411_v9 = vpop.f32.mrf.mxu0  ;;  %v5705_v40 = vpop.f32.mrf.mxu1 }
 0x1d2   :  { %4146 = vst.msk [vmem:[%s9401_s3 + $0x408] sm:$0xff] %vm4016_vm2, %v3753_v35  ;;  %4342 = vst.msk [vmem:[%s9401_s3 + $0xa28] sm:$0xff] %vm4016_vm2, %v3949_v37  ;;  %v3752_v41 = vmax.f32 %v2306_v38, 0.0  ;;  %v3948_v42 = vmax.f32 %v3286_v39, 0.0  ;;  %v2321_v43 = vadd.f32 %v8181_v1, %v5411_v9  ;;  %v3301_v44 = vadd.f32 %v8181_v1, %v5705_v40 }
 0x1d3   :  { %v2315_v45 = vpop.f32.mrf.mxu0  ;;  %v3295_v46 = vpop.f32.mrf.mxu1 }
 0x1d4   :  { %4145 = vst.msk [vmem:[%s9401_s3 + $0x400] sm:$0xff] %vm4016_vm2, %v3752_v41  ;;  %4341 = vst.msk [vmem:[%s9401_s3 + $0xa20] sm:$0xff] %vm4016_vm2, %v3948_v42  ;;  %v3755_v47 = vmax.f32 %v2321_v43, 0.0  ;;  %v3951_v48 = vmax.f32 %v3301_v44, 0.0  ;;  %v2316_v49 = vadd.f32 %v8181_v1, %v2315_v45  ;;  %v3296_v50 = vadd.f32 %v8181_v1, %v3295_v46 }
 0x1d5   :  { %v5414_v51 = vpop.f32.mrf.mxu0  ;;  %v5708_v52 = vpop.f32.mrf.mxu1 }
 0x1d6   :  { %4148 = vst.msk [vmem:[%s9401_s3 + $0x418] sm:$0xff] %vm4016_vm2, %v3755_v47  ;;  %4344 = vst.msk [vmem:[%s9401_s3 + $0xa38] sm:$0xff] %vm4016_vm2, %v3951_v48  ;;  %v3754_v53 = vmax.f32 %v2316_v49, 0.0  ;;  %v3950_v54 = vmax.f32 %v3296_v50, 0.0  ;;  %v2331_v55 = vadd.f32 %v8181_v1, %v5414_v51  ;;  %v3311_v56 = vadd.f32 %v8181_v1, %v5708_v52 }
 0x1d7   :  { %v2325_v57 = vpop.f32.mrf.mxu0  ;;  %v3305_v58 = vpop.f32.mrf.mxu1 }
 0x1d8   :  { %4147 = vst.msk [vmem:[%s9401_s3 + $0x410] sm:$0xff] %vm4016_vm2, %v3754_v53  ;;  %4343 = vst.msk [vmem:[%s9401_s3 + $0xa30] sm:$0xff] %vm4016_vm2, %v3950_v54  ;;  %v3757_v59 = vmax.f32 %v2331_v55, 0.0  ;;  %v3953_v60 = vmax.f32 %v3311_v56, 0.0  ;;  %v2326_v61 = vadd.f32 %v8181_v1, %v2325_v57  ;;  %v3306_v62 = vadd.f32 %v8181_v1, %v3305_v58  ;;  %v8858_v58 = vld [vmem:[%s9400_s2] ss:$0 sm:$0xff] }
 0x1d9   :  { %v5417_v36 = vpop.f32.mrf.mxu0  ;;  %v5711_v63 = vpop.f32.mrf.mxu1 }
 0x1da   :  { %4150 = vst.msk [vmem:[%s9401_s3 + $0x428] sm:$0xff] %vm4016_vm2, %v3757_v59  ;;  %4346 = vst.msk [vmem:[%s9401_s3 + $0xa48] sm:$0xff] %vm4016_vm2, %v3953_v60  ;;  %v3756_v0 = vmax.f32 %v2326_v61, 0.0  ;;  %v3952_v2 = vmax.f32 %v3306_v62, 0.0  ;;  %v2341_v3 = vadd.f32 %v8181_v1, %v5417_v36  ;;  %v3321_v4 = vadd.f32 %v8181_v1, %v5711_v63 }
 0x1db   :  { %v2335_v5 = vpop.f32.mrf.mxu0  ;;  %v3315_v6 = vpop.f32.mrf.mxu1 }
 0x1dc   :  { %4149 = vst.msk [vmem:[%s9401_s3 + $0x420] sm:$0xff] %vm4016_vm2, %v3756_v0  ;;  %4345 = vst.msk [vmem:[%s9401_s3 + $0xa40] sm:$0xff] %vm4016_vm2, %v3952_v2  ;;  %v3759_v7 = vmax.f32 %v2341_v3, 0.0  ;;  %v3955_v8 = vmax.f32 %v3321_v4, 0.0  ;;  %v2336_v10 = vadd.f32 %v8181_v1, %v2335_v5  ;;  %v3316_v11 = vadd.f32 %v8181_v1, %v3315_v6 }
 0x1dd   :  { %v5420_v12 = vpop.f32.mrf.mxu0  ;;  %v5714_v13 = vpop.f32.mrf.mxu1 }
 0x1de   :  { %4152 = vst.msk [vmem:[%s9401_s3 + $0x438] sm:$0xff] %vm4016_vm2, %v3759_v7  ;;  %4348 = vst.msk [vmem:[%s9401_s3 + $0xa58] sm:$0xff] %vm4016_vm2, %v3955_v8  ;;  %v3758_v14 = vmax.f32 %v2336_v10, 0.0  ;;  %v3954_v15 = vmax.f32 %v3316_v11, 0.0  ;;  %v2351_v16 = vadd.f32 %v8181_v1, %v5420_v12  ;;  %v3331_v17 = vadd.f32 %v8181_v1, %v5714_v13 }
 0x1df   :  { %v2345_v18 = vpop.f32.mrf.mxu0  ;;  %v3325_v19 = vpop.f32.mrf.mxu1 }
 0x1e0   :  { %4151 = vst.msk [vmem:[%s9401_s3 + $0x430] sm:$0xff] %vm4016_vm2, %v3758_v14  ;;  %4347 = vst.msk [vmem:[%s9401_s3 + $0xa50] sm:$0xff] %vm4016_vm2, %v3954_v15  ;;  %v3761_v20 = vmax.f32 %v2351_v16, 0.0  ;;  %v3957_v21 = vmax.f32 %v3331_v17, 0.0  ;;  %v2346_v22 = vadd.f32 %v8181_v1, %v2345_v18  ;;  %v3326_v23 = vadd.f32 %v8181_v1, %v3325_v19 }
 0x1e1   :  { %v5423_v24 = vpop.f32.mrf.mxu0  ;;  %v5717_v25 = vpop.f32.mrf.mxu1 }
 0x1e2   :  { %4154 = vst.msk [vmem:[%s9401_s3 + $0x448] sm:$0xff] %vm4016_vm2, %v3761_v20  ;;  %4350 = vst.msk [vmem:[%s9401_s3 + $0xa68] sm:$0xff] %vm4016_vm2, %v3957_v21  ;;  %v3760_v26 = vmax.f32 %v2346_v22, 0.0  ;;  %v3956_v27 = vmax.f32 %v3326_v23, 0.0  ;;  %v2361_v28 = vadd.f32 %v8181_v1, %v5423_v24  ;;  %v3341_v29 = vadd.f32 %v8181_v1, %v5717_v25 }
 0x1e3   :  { %v2355_v30 = vpop.f32.mrf.mxu0  ;;  %v3335_v31 = vpop.f32.mrf.mxu1 }
 0x1e4   :  { %4153 = vst.msk [vmem:[%s9401_s3 + $0x440] sm:$0xff] %vm4016_vm2, %v3760_v26  ;;  %4349 = vst.msk [vmem:[%s9401_s3 + $0xa60] sm:$0xff] %vm4016_vm2, %v3956_v27  ;;  %v3763_v32 = vmax.f32 %v2361_v28, 0.0  ;;  %v3959_v33 = vmax.f32 %v3341_v29, 0.0  ;;  %v2356_v34 = vadd.f32 %v8181_v1, %v2355_v30  ;;  %v3336_v35 = vadd.f32 %v8181_v1, %v3335_v31 }
 0x1e5   :  { %v5426_v37 = vpop.f32.mrf.mxu0  ;;  %v5720_v38 = vpop.f32.mrf.mxu1 }
 0x1e6   :  { %4156 = vst.msk [vmem:[%s9401_s3 + $0x458] sm:$0xff] %vm4016_vm2, %v3763_v32  ;;  %4352 = vst.msk [vmem:[%s9401_s3 + $0xa78] sm:$0xff] %vm4016_vm2, %v3959_v33  ;;  %v3762_v39 = vmax.f32 %v2356_v34, 0.0  ;;  %v3958_v9 = vmax.f32 %v3336_v35, 0.0  ;;  %v2371_v40 = vadd.f32 %v8181_v1, %v5426_v37  ;;  %v3351_v41 = vadd.f32 %v8181_v1, %v5720_v38 }
 0x1e7   :  { %v2365_v42 = vpop.f32.mrf.mxu0  ;;  %v3345_v43 = vpop.f32.mrf.mxu1 }
 0x1e8   :  { %4155 = vst.msk [vmem:[%s9401_s3 + $0x450] sm:$0xff] %vm4016_vm2, %v3762_v39  ;;  %4351 = vst.msk [vmem:[%s9401_s3 + $0xa70] sm:$0xff] %vm4016_vm2, %v3958_v9  ;;  %v3765_v44 = vmax.f32 %v2371_v40, 0.0  ;;  %v3961_v45 = vmax.f32 %v3351_v41, 0.0  ;;  %v2366_v46 = vadd.f32 %v8181_v1, %v2365_v42  ;;  %v3346_v47 = vadd.f32 %v8181_v1, %v3345_v43 }
 0x1e9   :  { %v5429_v48 = vpop.f32.mrf.mxu0  ;;  %v5723_v49 = vpop.f32.mrf.mxu1 }
 0x1ea   :  { %4158 = vst.msk [vmem:[%s9401_s3 + $0x468] sm:$0xff] %vm4016_vm2, %v3765_v44  ;;  %4354 = vst.msk [vmem:[%s9401_s3 + $0xa88] sm:$0xff] %vm4016_vm2, %v3961_v45  ;;  %v3764_v50 = vmax.f32 %v2366_v46, 0.0  ;;  %v3960_v51 = vmax.f32 %v3346_v47, 0.0  ;;  %v2381_v52 = vadd.f32 %v8181_v1, %v5429_v48  ;;  %v3361_v53 = vadd.f32 %v8181_v1, %v5723_v49 }
 0x1eb   :  { %v2375_v54 = vpop.f32.mrf.mxu0  ;;  %v3355_v55 = vpop.f32.mrf.mxu1 }
 0x1ec   :  { %4157 = vst.msk [vmem:[%s9401_s3 + $0x460] sm:$0xff] %vm4016_vm2, %v3764_v50  ;;  %4353 = vst.msk [vmem:[%s9401_s3 + $0xa80] sm:$0xff] %vm4016_vm2, %v3960_v51  ;;  %v3767_v56 = vmax.f32 %v2381_v52, 0.0  ;;  %v3963_v57 = vmax.f32 %v3361_v53, 0.0  ;;  %v2376_v1 = vadd.f32 %v8858_v58, %v2375_v54  ;;  %v3356_v59 = vadd.f32 %v8858_v58, %v3355_v55 }
 0x1ed   :  { %v5432_v60 = vpop.f32.mrf.mxu0  ;;  %v5726_v61 = vpop.f32.mrf.mxu1 }
 0x1ee   :  { %4160 = vst.msk [vmem:[%s9401_s3 + $0x478] sm:$0xff] %vm4016_vm2, %v3767_v56  ;;  %4356 = vst.msk [vmem:[%s9401_s3 + $0xa98] sm:$0xff] %vm4016_vm2, %v3963_v57  ;;  %v3766_v62 = vmax.f32 %v2376_v1, 0.0  ;;  %v3962_v36 = vmax.f32 %v3356_v59, 0.0  ;;  %v2391_v63 = vadd.f32 %v8858_v58, %v5432_v60  ;;  %v3371_v0 = vadd.f32 %v8858_v58, %v5726_v61 }
 0x1ef   :  { %v2385_v2 = vpop.f32.mrf.mxu0  ;;  %v3365_v3 = vpop.f32.mrf.mxu1 }
 0x1f0   :  { %4159 = vst.msk [vmem:[%s9401_s3 + $0x470] sm:$0xff] %vm4016_vm2, %v3766_v62  ;;  %4355 = vst.msk [vmem:[%s9401_s3 + $0xa90] sm:$0xff] %vm4016_vm2, %v3962_v36  ;;  %v3769_v4 = vmax.f32 %v2391_v63, 0.0  ;;  %v3965_v5 = vmax.f32 %v3371_v0, 0.0  ;;  %v2386_v6 = vadd.f32 %v8858_v58, %v2385_v2  ;;  %v3366_v7 = vadd.f32 %v8858_v58, %v3365_v3 }
 0x1f1   :  { %v5435_v8 = vpop.f32.mrf.mxu0  ;;  %v5729_v10 = vpop.f32.mrf.mxu1 }
 0x1f2   :  { %4162 = vst.msk [vmem:[%s9401_s3 + $0x488] sm:$0xff] %vm4016_vm2, %v3769_v4  ;;  %4358 = vst.msk [vmem:[%s9401_s3 + $0xaa8] sm:$0xff] %vm4016_vm2, %v3965_v5  ;;  %v3768_v11 = vmax.f32 %v2386_v6, 0.0  ;;  %v3964_v12 = vmax.f32 %v3366_v7, 0.0  ;;  %v2401_v13 = vadd.f32 %v8858_v58, %v5435_v8  ;;  %v3381_v14 = vadd.f32 %v8858_v58, %v5729_v10 }
 0x1f3   :  { %v2395_v15 = vpop.f32.mrf.mxu0  ;;  %v3375_v16 = vpop.f32.mrf.mxu1 }
 0x1f4   :  { %4161 = vst.msk [vmem:[%s9401_s3 + $0x480] sm:$0xff] %vm4016_vm2, %v3768_v11  ;;  %4357 = vst.msk [vmem:[%s9401_s3 + $0xaa0] sm:$0xff] %vm4016_vm2, %v3964_v12  ;;  %v3771_v17 = vmax.f32 %v2401_v13, 0.0  ;;  %v3967_v18 = vmax.f32 %v3381_v14, 0.0  ;;  %v2396_v19 = vadd.f32 %v8858_v58, %v2395_v15  ;;  %v3376_v20 = vadd.f32 %v8858_v58, %v3375_v16 }
 0x1f5   :  { %v5438_v21 = vpop.f32.mrf.mxu0  ;;  %v5732_v22 = vpop.f32.mrf.mxu1 }
 0x1f6   :  { %4164 = vst.msk [vmem:[%s9401_s3 + $0x498] sm:$0xff] %vm4016_vm2, %v3771_v17  ;;  %4360 = vst.msk [vmem:[%s9401_s3 + $0xab8] sm:$0xff] %vm4016_vm2, %v3967_v18  ;;  %v3770_v23 = vmax.f32 %v2396_v19, 0.0  ;;  %v3966_v24 = vmax.f32 %v3376_v20, 0.0  ;;  %v2411_v25 = vadd.f32 %v8858_v58, %v5438_v21  ;;  %v3391_v26 = vadd.f32 %v8858_v58, %v5732_v22 }
 0x1f7   :  { %v2405_v27 = vpop.f32.mrf.mxu0  ;;  %v3385_v28 = vpop.f32.mrf.mxu1 }
 0x1f8   :  { %4163 = vst.msk [vmem:[%s9401_s3 + $0x490] sm:$0xff] %vm4016_vm2, %v3770_v23  ;;  %4359 = vst.msk [vmem:[%s9401_s3 + $0xab0] sm:$0xff] %vm4016_vm2, %v3966_v24  ;;  %v3773_v29 = vmax.f32 %v2411_v25, 0.0  ;;  %v3969_v30 = vmax.f32 %v3391_v26, 0.0  ;;  %v2406_v31 = vadd.f32 %v8858_v58, %v2405_v27  ;;  %v3386_v32 = vadd.f32 %v8858_v58, %v3385_v28 }
 0x1f9   :  { %v5441_v33 = vpop.f32.mrf.mxu0  ;;  %v5735_v34 = vpop.f32.mrf.mxu1 }
 0x1fa   :  { %4166 = vst.msk [vmem:[%s9401_s3 + $0x4a8] sm:$0xff] %vm4016_vm2, %v3773_v29  ;;  %4362 = vst.msk [vmem:[%s9401_s3 + $0xac8] sm:$0xff] %vm4016_vm2, %v3969_v30  ;;  %v3772_v35 = vmax.f32 %v2406_v31, 0.0  ;;  %v3968_v37 = vmax.f32 %v3386_v32, 0.0  ;;  %v2421_v38 = vadd.f32 %v8858_v58, %v5441_v33  ;;  %v3401_v39 = vadd.f32 %v8858_v58, %v5735_v34 }
 0x1fb   :  { %v2415_v9 = vpop.f32.mrf.mxu0  ;;  %v3395_v40 = vpop.f32.mrf.mxu1 }
 0x1fc   :  { %4165 = vst.msk [vmem:[%s9401_s3 + $0x4a0] sm:$0xff] %vm4016_vm2, %v3772_v35  ;;  %4361 = vst.msk [vmem:[%s9401_s3 + $0xac0] sm:$0xff] %vm4016_vm2, %v3968_v37  ;;  %v3775_v41 = vmax.f32 %v2421_v38, 0.0  ;;  %v3971_v42 = vmax.f32 %v3401_v39, 0.0  ;;  %v2416_v43 = vadd.f32 %v8858_v58, %v2415_v9  ;;  %v3396_v44 = vadd.f32 %v8858_v58, %v3395_v40 }
 0x1fd   :  { %v5444_v45 = vpop.f32.mrf.mxu0  ;;  %v5738_v46 = vpop.f32.mrf.mxu1 }
 0x1fe   :  { %4168 = vst.msk [vmem:[%s9401_s3 + $0x4b8] sm:$0xff] %vm4016_vm2, %v3775_v41  ;;  %4364 = vst.msk [vmem:[%s9401_s3 + $0xad8] sm:$0xff] %vm4016_vm2, %v3971_v42  ;;  %v3774_v47 = vmax.f32 %v2416_v43, 0.0  ;;  %v3970_v48 = vmax.f32 %v3396_v44, 0.0  ;;  %v2431_v49 = vadd.f32 %v8858_v58, %v5444_v45  ;;  %v3411_v50 = vadd.f32 %v8858_v58, %v5738_v46 }
 0x1ff   :  { %v2425_v51 = vpop.f32.mrf.mxu0  ;;  %v3405_v52 = vpop.f32.mrf.mxu1 }
 0x200   :  { %4167 = vst.msk [vmem:[%s9401_s3 + $0x4b0] sm:$0xff] %vm4016_vm2, %v3774_v47  ;;  %4363 = vst.msk [vmem:[%s9401_s3 + $0xad0] sm:$0xff] %vm4016_vm2, %v3970_v48  ;;  %v3777_v53 = vmax.f32 %v2431_v49, 0.0  ;;  %v3973_v54 = vmax.f32 %v3411_v50, 0.0  ;;  %v2426_v55 = vadd.f32 %v8858_v58, %v2425_v51  ;;  %v3406_v56 = vadd.f32 %v8858_v58, %v3405_v52 }
 0x201   :  { %v5447_v57 = vpop.f32.mrf.mxu0  ;;  %v5741_v1 = vpop.f32.mrf.mxu1 }
 0x202   :  { %4170 = vst.msk [vmem:[%s9401_s3 + $0x4c8] sm:$0xff] %vm4016_vm2, %v3777_v53  ;;  %4366 = vst.msk [vmem:[%s9401_s3 + $0xae8] sm:$0xff] %vm4016_vm2, %v3973_v54  ;;  %v3776_v59 = vmax.f32 %v2426_v55, 0.0  ;;  %v3972_v60 = vmax.f32 %v3406_v56, 0.0  ;;  %v2441_v61 = vadd.f32 %v8858_v58, %v5447_v57  ;;  %v3421_v62 = vadd.f32 %v8858_v58, %v5741_v1 }
 0x203   :  { %v2435_v36 = vpop.f32.mrf.mxu0  ;;  %v3415_v63 = vpop.f32.mrf.mxu1 }
 0x204   :  { %4169 = vst.msk [vmem:[%s9401_s3 + $0x4c0] sm:$0xff] %vm4016_vm2, %v3776_v59  ;;  %4365 = vst.msk [vmem:[%s9401_s3 + $0xae0] sm:$0xff] %vm4016_vm2, %v3972_v60  ;;  %v3779_v0 = vmax.f32 %v2441_v61, 0.0  ;;  %v3975_v2 = vmax.f32 %v3421_v62, 0.0  ;;  %v2436_v3 = vadd.f32 %v8858_v58, %v2435_v36  ;;  %v3416_v4 = vadd.f32 %v8858_v58, %v3415_v63 }
 0x205   :  { %v5450_v5 = vpop.f32.mrf.mxu0  ;;  %v5744_v6 = vpop.f32.mrf.mxu1 }
 0x206   :  { %4172 = vst.msk [vmem:[%s9401_s3 + $0x4d8] sm:$0xff] %vm4016_vm2, %v3779_v0  ;;  %4368 = vst.msk [vmem:[%s9401_s3 + $0xaf8] sm:$0xff] %vm4016_vm2, %v3975_v2  ;;  %v3778_v7 = vmax.f32 %v2436_v3, 0.0  ;;  %v3974_v8 = vmax.f32 %v3416_v4, 0.0  ;;  %v2451_v10 = vadd.f32 %v8858_v58, %v5450_v5  ;;  %v3431_v11 = vadd.f32 %v8858_v58, %v5744_v6 }
 0x207   :  { %v2445_v12 = vpop.f32.mrf.mxu0  ;;  %v3425_v13 = vpop.f32.mrf.mxu1 }
 0x208   :  { %4171 = vst.msk [vmem:[%s9401_s3 + $0x4d0] sm:$0xff] %vm4016_vm2, %v3778_v7  ;;  %4367 = vst.msk [vmem:[%s9401_s3 + $0xaf0] sm:$0xff] %vm4016_vm2, %v3974_v8  ;;  %v3781_v14 = vmax.f32 %v2451_v10, 0.0  ;;  %v3977_v15 = vmax.f32 %v3431_v11, 0.0  ;;  %v2446_v16 = vadd.f32 %v8858_v58, %v2445_v12  ;;  %v3426_v17 = vadd.f32 %v8858_v58, %v3425_v13 }
 0x209   :  { %v5453_v18 = vpop.f32.mrf.mxu0  ;;  %v5747_v19 = vpop.f32.mrf.mxu1 }
 0x20a   :  { %4174 = vst.msk [vmem:[%s9401_s3 + $0x4e8] sm:$0xff] %vm4016_vm2, %v3781_v14  ;;  %4370 = vst.msk [vmem:[%s9401_s3 + $0xb08] sm:$0xff] %vm4016_vm2, %v3977_v15  ;;  %v3780_v20 = vmax.f32 %v2446_v16, 0.0  ;;  %v3976_v21 = vmax.f32 %v3426_v17, 0.0  ;;  %v2461_v22 = vadd.f32 %v8858_v58, %v5453_v18  ;;  %v3441_v23 = vadd.f32 %v8858_v58, %v5747_v19 }
 0x20b   :  { %v2455_v24 = vpop.f32.mrf.mxu0  ;;  %v3435_v25 = vpop.f32.mrf.mxu1 }
 0x20c   :  { %4173 = vst.msk [vmem:[%s9401_s3 + $0x4e0] sm:$0xff] %vm4016_vm2, %v3780_v20  ;;  %4369 = vst.msk [vmem:[%s9401_s3 + $0xb00] sm:$0xff] %vm4016_vm2, %v3976_v21  ;;  %v3783_v26 = vmax.f32 %v2461_v22, 0.0  ;;  %v3979_v27 = vmax.f32 %v3441_v23, 0.0  ;;  %v2456_v28 = vadd.f32 %v8858_v58, %v2455_v24  ;;  %v3436_v29 = vadd.f32 %v8858_v58, %v3435_v25 }
 0x20d   :  { %v5456_v30 = vpop.f32.mrf.mxu0  ;;  %v5750_v31 = vpop.f32.mrf.mxu1 }
 0x20e   :  { %4176 = vst.msk [vmem:[%s9401_s3 + $0x4f8] sm:$0xff] %vm4016_vm2, %v3783_v26  ;;  %4372 = vst.msk [vmem:[%s9401_s3 + $0xb18] sm:$0xff] %vm4016_vm2, %v3979_v27  ;;  %v3782_v32 = vmax.f32 %v2456_v28, 0.0  ;;  %v3978_v33 = vmax.f32 %v3436_v29, 0.0  ;;  %v2471_v34 = vadd.f32 %v8858_v58, %v5456_v30  ;;  %v3451_v35 = vadd.f32 %v8858_v58, %v5750_v31 }
 0x20f   :  { %v2465_v37 = vpop.f32.mrf.mxu0  ;;  %v3445_v38 = vpop.f32.mrf.mxu1 }
 0x210   :  { %4175 = vst.msk [vmem:[%s9401_s3 + $0x4f0] sm:$0xff] %vm4016_vm2, %v3782_v32  ;;  %4371 = vst.msk [vmem:[%s9401_s3 + $0xb10] sm:$0xff] %vm4016_vm2, %v3978_v33  ;;  %v3785_v39 = vmax.f32 %v2471_v34, 0.0  ;;  %v3981_v9 = vmax.f32 %v3451_v35, 0.0  ;;  %v2466_v40 = vadd.f32 %v8858_v58, %v2465_v37  ;;  %v3446_v41 = vadd.f32 %v8858_v58, %v3445_v38 }
 0x211   :  { %v5459_v42 = vpop.f32.mrf.mxu0  ;;  %v5753_v43 = vpop.f32.mrf.mxu1 }
 0x212   :  { %4178 = vst.msk [vmem:[%s9401_s3 + $0x508] sm:$0xff] %vm4016_vm2, %v3785_v39  ;;  %4374 = vst.msk [vmem:[%s9401_s3 + $0xb28] sm:$0xff] %vm4016_vm2, %v3981_v9  ;;  %v3784_v44 = vmax.f32 %v2466_v40, 0.0  ;;  %v3980_v45 = vmax.f32 %v3446_v41, 0.0  ;;  %v2481_v46 = vadd.f32 %v8858_v58, %v5459_v42  ;;  %v3461_v47 = vadd.f32 %v8858_v58, %v5753_v43 }
 0x213   :  { %v2475_v48 = vpop.f32.mrf.mxu0  ;;  %v3455_v49 = vpop.f32.mrf.mxu1 }
 0x214   :  { %4177 = vst.msk [vmem:[%s9401_s3 + $0x500] sm:$0xff] %vm4016_vm2, %v3784_v44  ;;  %4373 = vst.msk [vmem:[%s9401_s3 + $0xb20] sm:$0xff] %vm4016_vm2, %v3980_v45  ;;  %v3787_v50 = vmax.f32 %v2481_v46, 0.0  ;;  %v3983_v51 = vmax.f32 %v3461_v47, 0.0  ;;  %v2476_v52 = vadd.f32 %v8858_v58, %v2475_v48  ;;  %v3456_v53 = vadd.f32 %v8858_v58, %v3455_v49 }
 0x215   :  { %v5462_v54 = vpop.f32.mrf.mxu0  ;;  %v5756_v55 = vpop.f32.mrf.mxu1 }
 0x216   :  { %4180 = vst.msk [vmem:[%s9401_s3 + $0x518] sm:$0xff] %vm4016_vm2, %v3787_v50  ;;  %4376 = vst.msk [vmem:[%s9401_s3 + $0xb38] sm:$0xff] %vm4016_vm2, %v3983_v51  ;;  %v3786_v56 = vmax.f32 %v2476_v52, 0.0  ;;  %v3982_v57 = vmax.f32 %v3456_v53, 0.0  ;;  %v2491_v1 = vadd.f32 %v8858_v58, %v5462_v54  ;;  %v3471_v59 = vadd.f32 %v8858_v58, %v5756_v55 }
 0x217   :  { %v2485_v60 = vpop.f32.mrf.mxu0  ;;  %v3465_v61 = vpop.f32.mrf.mxu1 }
 0x218   :  { %4179 = vst.msk [vmem:[%s9401_s3 + $0x510] sm:$0xff] %vm4016_vm2, %v3786_v56  ;;  %4375 = vst.msk [vmem:[%s9401_s3 + $0xb30] sm:$0xff] %vm4016_vm2, %v3982_v57  ;;  %v3789_v62 = vmax.f32 %v2491_v1, 0.0  ;;  %v3985_v36 = vmax.f32 %v3471_v59, 0.0  ;;  %v2486_v63 = vadd.f32 %v8858_v58, %v2485_v60  ;;  %v3466_v0 = vadd.f32 %v8858_v58, %v3465_v61 }
 0x219   :  { %v5465_v2 = vpop.f32.mrf.mxu0  ;;  %v5759_v3 = vpop.f32.mrf.mxu1 }
 0x21a   :  { %4182 = vst.msk [vmem:[%s9401_s3 + $0x528] sm:$0xff] %vm4016_vm2, %v3789_v62  ;;  %4378 = vst.msk [vmem:[%s9401_s3 + $0xb48] sm:$0xff] %vm4016_vm2, %v3985_v36  ;;  %v3788_v4 = vmax.f32 %v2486_v63, 0.0  ;;  %v3984_v5 = vmax.f32 %v3466_v0, 0.0  ;;  %v2501_v6 = vadd.f32 %v8858_v58, %v5465_v2  ;;  %v3481_v7 = vadd.f32 %v8858_v58, %v5759_v3 }
 0x21b   :  { %v2495_v8 = vpop.f32.mrf.mxu0  ;;  %v3475_v10 = vpop.f32.mrf.mxu1 }
 0x21c   :  { %4181 = vst.msk [vmem:[%s9401_s3 + $0x520] sm:$0xff] %vm4016_vm2, %v3788_v4  ;;  %4377 = vst.msk [vmem:[%s9401_s3 + $0xb40] sm:$0xff] %vm4016_vm2, %v3984_v5  ;;  %v3791_v11 = vmax.f32 %v2501_v6, 0.0  ;;  %v3987_v12 = vmax.f32 %v3481_v7, 0.0  ;;  %v2496_v13 = vadd.f32 %v8858_v58, %v2495_v8  ;;  %v3476_v14 = vadd.f32 %v8858_v58, %v3475_v10 }
 0x21d   :  { %v5468_v15 = vpop.f32.mrf.mxu0  ;;  %v5762_v16 = vpop.f32.mrf.mxu1 }
 0x21e   :  { %4184 = vst.msk [vmem:[%s9401_s3 + $0x538] sm:$0xff] %vm4016_vm2, %v3791_v11  ;;  %4380 = vst.msk [vmem:[%s9401_s3 + $0xb58] sm:$0xff] %vm4016_vm2, %v3987_v12  ;;  %v3790_v17 = vmax.f32 %v2496_v13, 0.0  ;;  %v3986_v18 = vmax.f32 %v3476_v14, 0.0  ;;  %v2511_v19 = vadd.f32 %v8858_v58, %v5468_v15  ;;  %v3491_v20 = vadd.f32 %v8858_v58, %v5762_v16 }
 0x21f   :  { %v2505_v21 = vpop.f32.mrf.mxu0  ;;  %v3485_v22 = vpop.f32.mrf.mxu1 }
 0x220   :  { %4183 = vst.msk [vmem:[%s9401_s3 + $0x530] sm:$0xff] %vm4016_vm2, %v3790_v17  ;;  %4379 = vst.msk [vmem:[%s9401_s3 + $0xb50] sm:$0xff] %vm4016_vm2, %v3986_v18  ;;  %v3793_v23 = vmax.f32 %v2511_v19, 0.0  ;;  %v3989_v24 = vmax.f32 %v3491_v20, 0.0  ;;  %v2506_v25 = vadd.f32 %v8858_v58, %v2505_v21  ;;  %v3486_v26 = vadd.f32 %v8858_v58, %v3485_v22 }
 0x221   :  { %v5471_v27 = vpop.f32.mrf.mxu0  ;;  %v5765_v28 = vpop.f32.mrf.mxu1 }
 0x222   :  { %4186 = vst.msk [vmem:[%s9401_s3 + $0x548] sm:$0xff] %vm4016_vm2, %v3793_v23  ;;  %4382 = vst.msk [vmem:[%s9401_s3 + $0xb68] sm:$0xff] %vm4016_vm2, %v3989_v24  ;;  %v3792_v29 = vmax.f32 %v2506_v25, 0.0  ;;  %v3988_v30 = vmax.f32 %v3486_v26, 0.0  ;;  %v2521_v31 = vadd.f32 %v8858_v58, %v5471_v27  ;;  %v3501_v32 = vadd.f32 %v8858_v58, %v5765_v28 }
 0x223   :  { %v2515_v33 = vpop.f32.mrf.mxu0  ;;  %v3495_v34 = vpop.f32.mrf.mxu1 }
 0x224   :  { %4185 = vst.msk [vmem:[%s9401_s3 + $0x540] sm:$0xff] %vm4016_vm2, %v3792_v29  ;;  %4381 = vst.msk [vmem:[%s9401_s3 + $0xb60] sm:$0xff] %vm4016_vm2, %v3988_v30  ;;  %v3795_v35 = vmax.f32 %v2521_v31, 0.0  ;;  %v3991_v37 = vmax.f32 %v3501_v32, 0.0  ;;  %v2516_v38 = vadd.f32 %v8858_v58, %v2515_v33  ;;  %v3496_v39 = vadd.f32 %v8858_v58, %v3495_v34 }
 0x225   :  { %v5474_v9 = vpop.f32.mrf.mxu0  ;;  %v5768_v40 = vpop.f32.mrf.mxu1 }
 0x226   :  { %4188 = vst.msk [vmem:[%s9401_s3 + $0x558] sm:$0xff] %vm4016_vm2, %v3795_v35  ;;  %4384 = vst.msk [vmem:[%s9401_s3 + $0xb78] sm:$0xff] %vm4016_vm2, %v3991_v37  ;;  %v3794_v41 = vmax.f32 %v2516_v38, 0.0  ;;  %v3990_v42 = vmax.f32 %v3496_v39, 0.0  ;;  %v2531_v43 = vadd.f32 %v8858_v58, %v5474_v9  ;;  %v3511_v44 = vadd.f32 %v8858_v58, %v5768_v40 }
 0x227   :  { %v2525_v45 = vpop.f32.mrf.mxu0  ;;  %v3505_v46 = vpop.f32.mrf.mxu1 }
 0x228   :  { %4187 = vst.msk [vmem:[%s9401_s3 + $0x550] sm:$0xff] %vm4016_vm2, %v3794_v41  ;;  %4383 = vst.msk [vmem:[%s9401_s3 + $0xb70] sm:$0xff] %vm4016_vm2, %v3990_v42  ;;  %v3797_v47 = vmax.f32 %v2531_v43, 0.0  ;;  %v3993_v48 = vmax.f32 %v3511_v44, 0.0  ;;  %v2526_v49 = vadd.f32 %v8858_v58, %v2525_v45  ;;  %v3506_v50 = vadd.f32 %v8858_v58, %v3505_v46 }
 0x229   :  { %v5477_v51 = vpop.f32.mrf.mxu0  ;;  %v5771_v52 = vpop.f32.mrf.mxu1 }
 0x22a   :  { %4190 = vst.msk [vmem:[%s9401_s3 + $0x568] sm:$0xff] %vm4016_vm2, %v3797_v47  ;;  %4386 = vst.msk [vmem:[%s9401_s3 + $0xb88] sm:$0xff] %vm4016_vm2, %v3993_v48  ;;  %v3796_v53 = vmax.f32 %v2526_v49, 0.0  ;;  %v3992_v54 = vmax.f32 %v3506_v50, 0.0  ;;  %v2541_v55 = vadd.f32 %v8858_v58, %v5477_v51  ;;  %v3521_v56 = vadd.f32 %v8858_v58, %v5771_v52 }
 0x22b   :  { %v2535_v57 = vpop.f32.mrf.mxu0  ;;  %v3515_v1 = vpop.f32.mrf.mxu1 }
 0x22c   :  { %4189 = vst.msk [vmem:[%s9401_s3 + $0x560] sm:$0xff] %vm4016_vm2, %v3796_v53  ;;  %4385 = vst.msk [vmem:[%s9401_s3 + $0xb80] sm:$0xff] %vm4016_vm2, %v3992_v54  ;;  %v3799_v59 = vmax.f32 %v2541_v55, 0.0  ;;  %v3995_v60 = vmax.f32 %v3521_v56, 0.0  ;;  %v2536_v61 = vadd.f32 %v8858_v58, %v2535_v57  ;;  %v3516_v62 = vadd.f32 %v8858_v58, %v3515_v1 }
 0x22d   :  { %v5480_v36 = vpop.f32.mrf.mxu0  ;;  %v5774_v63 = vpop.f32.mrf.mxu1 }
 0x22e   :  { %4192 = vst.msk [vmem:[%s9401_s3 + $0x578] sm:$0xff] %vm4016_vm2, %v3799_v59  ;;  %4388 = vst.msk [vmem:[%s9401_s3 + $0xb98] sm:$0xff] %vm4016_vm2, %v3995_v60  ;;  %v3798_v0 = vmax.f32 %v2536_v61, 0.0  ;;  %v3994_v2 = vmax.f32 %v3516_v62, 0.0  ;;  %v2551_v3 = vadd.f32 %v8858_v58, %v5480_v36  ;;  %v3531_v4 = vadd.f32 %v8858_v58, %v5774_v63 }
 0x22f   :  { %v2545_v5 = vpop.f32.mrf.mxu0  ;;  %v3525_v6 = vpop.f32.mrf.mxu1 }
 0x230   :  { %4191 = vst.msk [vmem:[%s9401_s3 + $0x570] sm:$0xff] %vm4016_vm2, %v3798_v0  ;;  %4387 = vst.msk [vmem:[%s9401_s3 + $0xb90] sm:$0xff] %vm4016_vm2, %v3994_v2  ;;  %v3801_v7 = vmax.f32 %v2551_v3, 0.0  ;;  %v3997_v8 = vmax.f32 %v3531_v4, 0.0  ;;  %v2546_v10 = vadd.f32 %v8858_v58, %v2545_v5  ;;  %v3526_v11 = vadd.f32 %v8858_v58, %v3525_v6 }
 0x231   :  { %v5483_v12 = vpop.f32.mrf.mxu0  ;;  %v5777_v13 = vpop.f32.mrf.mxu1 }
 0x232   :  { %4194 = vst.msk [vmem:[%s9401_s3 + $0x588] sm:$0xff] %vm4016_vm2, %v3801_v7  ;;  %4390 = vst.msk [vmem:[%s9401_s3 + $0xba8] sm:$0xff] %vm4016_vm2, %v3997_v8  ;;  %v3800_v14 = vmax.f32 %v2546_v10, 0.0  ;;  %v3996_v15 = vmax.f32 %v3526_v11, 0.0  ;;  %v2561_v16 = vadd.f32 %v8858_v58, %v5483_v12  ;;  %v3541_v17 = vadd.f32 %v8858_v58, %v5777_v13 }
 0x233   :  { %v2555_v18 = vpop.f32.mrf.mxu0  ;;  %v3535_v19 = vpop.f32.mrf.mxu1 }
 0x234   :  { %4193 = vst.msk [vmem:[%s9401_s3 + $0x580] sm:$0xff] %vm4016_vm2, %v3800_v14  ;;  %4389 = vst.msk [vmem:[%s9401_s3 + $0xba0] sm:$0xff] %vm4016_vm2, %v3996_v15  ;;  %v3803_v20 = vmax.f32 %v2561_v16, 0.0  ;;  %v3999_v21 = vmax.f32 %v3541_v17, 0.0  ;;  %v2556_v22 = vadd.f32 %v8858_v58, %v2555_v18  ;;  %v3536_v23 = vadd.f32 %v8858_v58, %v3535_v19 }
 0x235   :  { %v5486_v24 = vpop.f32.mrf.mxu0  ;;  %v5780_v25 = vpop.f32.mrf.mxu1 }
 0x236   :  { %4196 = vst.msk [vmem:[%s9401_s3 + $0x598] sm:$0xff] %vm4016_vm2, %v3803_v20  ;;  %4392 = vst.msk [vmem:[%s9401_s3 + $0xbb8] sm:$0xff] %vm4016_vm2, %v3999_v21  ;;  %v3802_v26 = vmax.f32 %v2556_v22, 0.0  ;;  %v3998_v27 = vmax.f32 %v3536_v23, 0.0  ;;  %v2571_v28 = vadd.f32 %v8858_v58, %v5486_v24  ;;  %v3551_v29 = vadd.f32 %v8858_v58, %v5780_v25 }
 0x237   :  { %v2565_v30 = vpop.f32.mrf.mxu0  ;;  %v3545_v31 = vpop.f32.mrf.mxu1 }
 0x238   :  { %4195 = vst.msk [vmem:[%s9401_s3 + $0x590] sm:$0xff] %vm4016_vm2, %v3802_v26  ;;  %4391 = vst.msk [vmem:[%s9401_s3 + $0xbb0] sm:$0xff] %vm4016_vm2, %v3998_v27  ;;  %v3805_v32 = vmax.f32 %v2571_v28, 0.0  ;;  %v4001_v33 = vmax.f32 %v3551_v29, 0.0  ;;  %v2566_v34 = vadd.f32 %v8858_v58, %v2565_v30  ;;  %v3546_v35 = vadd.f32 %v8858_v58, %v3545_v31 }
 0x239   :  { %v5489_v37 = vpop.f32.mrf.mxu0  ;;  %v5783_v38 = vpop.f32.mrf.mxu1 }
 0x23a   :  { %4198 = vst.msk [vmem:[%s9401_s3 + $0x5a8] sm:$0xff] %vm4016_vm2, %v3805_v32  ;;  %4394 = vst.msk [vmem:[%s9401_s3 + $0xbc8] sm:$0xff] %vm4016_vm2, %v4001_v33  ;;  %v3804_v39 = vmax.f32 %v2566_v34, 0.0  ;;  %v4000_v9 = vmax.f32 %v3546_v35, 0.0  ;;  %v2581_v40 = vadd.f32 %v8858_v58, %v5489_v37  ;;  %v3561_v41 = vadd.f32 %v8858_v58, %v5783_v38 }
 0x23b   :  { %v2575_v42 = vpop.f32.mrf.mxu0  ;;  %v3555_v43 = vpop.f32.mrf.mxu1 }
 0x23c   :  { %4197 = vst.msk [vmem:[%s9401_s3 + $0x5a0] sm:$0xff] %vm4016_vm2, %v3804_v39  ;;  %4393 = vst.msk [vmem:[%s9401_s3 + $0xbc0] sm:$0xff] %vm4016_vm2, %v4000_v9  ;;  %v3807_v44 = vmax.f32 %v2581_v40, 0.0  ;;  %v4003_v45 = vmax.f32 %v3561_v41, 0.0  ;;  %v2576_v46 = vadd.f32 %v8858_v58, %v2575_v42  ;;  %v3556_v47 = vadd.f32 %v8858_v58, %v3555_v43 }
 0x23d   :  { %v5492_v48 = vpop.f32.mrf.mxu0  ;;  %v5786_v49 = vpop.f32.mrf.mxu1 }
 0x23e   :  { %4200 = vst.msk [vmem:[%s9401_s3 + $0x5b8] sm:$0xff] %vm4016_vm2, %v3807_v44  ;;  %4396 = vst.msk [vmem:[%s9401_s3 + $0xbd8] sm:$0xff] %vm4016_vm2, %v4003_v45  ;;  %v3806_v50 = vmax.f32 %v2576_v46, 0.0  ;;  %v4002_v51 = vmax.f32 %v3556_v47, 0.0  ;;  %v2591_v52 = vadd.f32 %v8858_v58, %v5492_v48  ;;  %v3571_v53 = vadd.f32 %v8858_v58, %v5786_v49 }
 0x23f   :  { %v2585_v54 = vpop.f32.mrf.mxu0  ;;  %v3565_v55 = vpop.f32.mrf.mxu1 }
 0x240   :  { %4199 = vst.msk [vmem:[%s9401_s3 + $0x5b0] sm:$0xff] %vm4016_vm2, %v3806_v50  ;;  %4395 = vst.msk [vmem:[%s9401_s3 + $0xbd0] sm:$0xff] %vm4016_vm2, %v4002_v51  ;;  %v3809_v56 = vmax.f32 %v2591_v52, 0.0  ;;  %v4005_v57 = vmax.f32 %v3571_v53, 0.0  ;;  %v2586_v1 = vadd.f32 %v8858_v58, %v2585_v54  ;;  %v3566_v59 = vadd.f32 %v8858_v58, %v3565_v55 }
 0x241   :  { %v5495_v60 = vpop.f32.mrf.mxu0  ;;  %v5789_v61 = vpop.f32.mrf.mxu1 }
 0x242   :  { %4202 = vst.msk [vmem:[%s9401_s3 + $0x5c8] sm:$0xff] %vm4016_vm2, %v3809_v56  ;;  %4398 = vst.msk [vmem:[%s9401_s3 + $0xbe8] sm:$0xff] %vm4016_vm2, %v4005_v57  ;;  %v3808_v62 = vmax.f32 %v2586_v1, 0.0  ;;  %v4004_v36 = vmax.f32 %v3566_v59, 0.0  ;;  %v2601_v63 = vadd.f32 %v8858_v58, %v5495_v60  ;;  %v3581_v0 = vadd.f32 %v8858_v58, %v5789_v61 }
 0x243   :  { %v2595_v2 = vpop.f32.mrf.mxu0  ;;  %v3575_v3 = vpop.f32.mrf.mxu1 }
 0x244   :  { %4201 = vst.msk [vmem:[%s9401_s3 + $0x5c0] sm:$0xff] %vm4016_vm2, %v3808_v62  ;;  %4397 = vst.msk [vmem:[%s9401_s3 + $0xbe0] sm:$0xff] %vm4016_vm2, %v4004_v36  ;;  %v3811_v4 = vmax.f32 %v2601_v63, 0.0  ;;  %v4007_v5 = vmax.f32 %v3581_v0, 0.0  ;;  %v2596_v6 = vadd.f32 %v8858_v58, %v2595_v2  ;;  %v3576_v7 = vadd.f32 %v8858_v58, %v3575_v3 }
 0x245   :  { %v5498_v8 = vpop.f32.mrf.mxu0  ;;  %v5792_v10 = vpop.f32.mrf.mxu1 }
 0x246   :  { %4204 = vst.msk [vmem:[%s9401_s3 + $0x5d8] sm:$0xff] %vm4016_vm2, %v3811_v4  ;;  %4400 = vst.msk [vmem:[%s9401_s3 + $0xbf8] sm:$0xff] %vm4016_vm2, %v4007_v5  ;;  %v3810_v11 = vmax.f32 %v2596_v6, 0.0  ;;  %v4006_v12 = vmax.f32 %v3576_v7, 0.0  ;;  %v2611_v13 = vadd.f32 %v8858_v58, %v5498_v8  ;;  %v3591_v14 = vadd.f32 %v8858_v58, %v5792_v10 }
 0x247   :  { %v2605_v15 = vpop.f32.mrf.mxu0  ;;  %v3585_v16 = vpop.f32.mrf.mxu1 }
 0x248   :  { %4203 = vst.msk [vmem:[%s9401_s3 + $0x5d0] sm:$0xff] %vm4016_vm2, %v3810_v11  ;;  %4399 = vst.msk [vmem:[%s9401_s3 + $0xbf0] sm:$0xff] %vm4016_vm2, %v4006_v12  ;;  %v3813_v17 = vmax.f32 %v2611_v13, 0.0  ;;  %v4009_v18 = vmax.f32 %v3591_v14, 0.0  ;;  %v2606_v19 = vadd.f32 %v8858_v58, %v2605_v15  ;;  %v3586_v20 = vadd.f32 %v8858_v58, %v3585_v16 }
 0x249   :  { %v5501_v21 = vpop.f32.mrf.mxu0  ;;  %v5795_v22 = vpop.f32.mrf.mxu1 }
 0x24a   :  { %4206 = vst.msk [vmem:[%s9401_s3 + $0x5e8] sm:$0xff] %vm4016_vm2, %v3813_v17  ;;  %4402 = vst.msk [vmem:[%s9401_s3 + $0xc08] sm:$0xff] %vm4016_vm2, %v4009_v18  ;;  %v3812_v23 = vmax.f32 %v2606_v19, 0.0  ;;  %v4008_v24 = vmax.f32 %v3586_v20, 0.0  ;;  %v2621_v25 = vadd.f32 %v8858_v58, %v5501_v21  ;;  %v3601_v26 = vadd.f32 %v8858_v58, %v5795_v22 }
 0x24b   :  { %v2615_v27 = vpop.f32.mrf.mxu0  ;;  %v3595_v28 = vpop.f32.mrf.mxu1 }
 0x24c   :  { %4205 = vst.msk [vmem:[%s9401_s3 + $0x5e0] sm:$0xff] %vm4016_vm2, %v3812_v23  ;;  %4401 = vst.msk [vmem:[%s9401_s3 + $0xc00] sm:$0xff] %vm4016_vm2, %v4008_v24  ;;  %v3815_v29 = vmax.f32 %v2621_v25, 0.0  ;;  %v4011_v30 = vmax.f32 %v3601_v26, 0.0  ;;  %v2616_v31 = vadd.f32 %v8858_v58, %v2615_v27  ;;  %v3596_v32 = vadd.f32 %v8858_v58, %v3595_v28 }
 0x24d   :  { %v5504_v33 = vpop.f32.mrf.mxu0  ;;  %v5798_v34 = vpop.f32.mrf.mxu1 }
 0x24e   :  { %4208 = vst.msk [vmem:[%s9401_s3 + $0x5f8] sm:$0xff] %vm4016_vm2, %v3815_v29  ;;  %4404 = vst.msk [vmem:[%s9401_s3 + $0xc18] sm:$0xff] %vm4016_vm2, %v4011_v30  ;;  %v3814_v35 = vmax.f32 %v2616_v31, 0.0  ;;  %v4010_v37 = vmax.f32 %v3596_v32, 0.0  ;;  %v2631_v38 = vadd.f32 %v8858_v58, %v5504_v33  ;;  %v3611_v39 = vadd.f32 %v8858_v58, %v5798_v34 }
 0x24f   :  { %v2625_v9 = vpop.f32.mrf.mxu0  ;;  %v3605_v40 = vpop.f32.mrf.mxu1 }
 0x250   :  { %4207 = vst.msk [vmem:[%s9401_s3 + $0x5f0] sm:$0xff] %vm4016_vm2, %v3814_v35  ;;  %4403 = vst.msk [vmem:[%s9401_s3 + $0xc10] sm:$0xff] %vm4016_vm2, %v4010_v37  ;;  %v3817_v41 = vmax.f32 %v2631_v38, 0.0  ;;  %v4013_v42 = vmax.f32 %v3611_v39, 0.0  ;;  %v2626_v43 = vadd.f32 %v8858_v58, %v2625_v9  ;;  %v3606_v44 = vadd.f32 %v8858_v58, %v3605_v40 }
 0x251   :  { %v5507_v45 = vpop.f32.mrf.mxu0  ;;  %v5801_v46 = vpop.f32.mrf.mxu1 }
 0x252   :  { %4210 = vst.msk [vmem:[%s9401_s3 + $0x608] sm:$0xff] %vm4016_vm2, %v3817_v41  ;;  %4406 = vst.msk [vmem:[%s9401_s3 + $0xc28] sm:$0xff] %vm4016_vm2, %v4013_v42  ;;  %v3816_v47 = vmax.f32 %v2626_v43, 0.0  ;;  %v4012_v48 = vmax.f32 %v3606_v44, 0.0  ;;  %v2641_v49 = vadd.f32 %v8858_v58, %v5507_v45  ;;  %v3621_v50 = vadd.f32 %v8858_v58, %v5801_v46 }
 0x253   :  { %v2635_v51 = vpop.f32.mrf.mxu0  ;;  %v3615_v52 = vpop.f32.mrf.mxu1 }
 0x254   :  { %4209 = vst.msk [vmem:[%s9401_s3 + $0x600] sm:$0xff] %vm4016_vm2, %v3816_v47  ;;  %4405 = vst.msk [vmem:[%s9401_s3 + $0xc20] sm:$0xff] %vm4016_vm2, %v4012_v48  ;;  %v3819_v53 = vmax.f32 %v2641_v49, 0.0  ;;  %v4015_v54 = vmax.f32 %v3621_v50, 0.0  ;;  %v2636_v55 = vadd.f32 %v8858_v58, %v2635_v51  ;;  %v3616_v56 = vadd.f32 %v8858_v58, %v3615_v52 }
 0x256   :  { %4212 = vst.msk [vmem:[%s9401_s3 + $0x618] sm:$0xff] %vm4016_vm2, %v3819_v53  ;;  %4408 = vst.msk [vmem:[%s9401_s3 + $0xc38] sm:$0xff] %vm4016_vm2, %v4015_v54  ;;  %v3818_v57 = vmax.f32 %v2636_v55, 0.0  ;;  %v4014_v1 = vmax.f32 %v3616_v56, 0.0 }
 0x258   :  { %4211 = vst.msk [vmem:[%s9401_s3 + $0x610] sm:$0xff] %vm4016_vm2, %v3818_v57  ;;  %4407 = vst.msk [vmem:[%s9401_s3 + $0xc30] sm:$0xff] %vm4016_vm2, %v4014_v1 }

// kernel: categorical_dueling_drqn_forward.5
= control target key start
LH: loop header
LB: loop body
LE: loop exit
PB: predicated region body
PF: predicated region fallthrough
CT: control target
= control target key end

     0   :  { %v1084_v0 = vmov 0.0   ;;  %vm183_vm0 = vcmask 130048   ;;  %vm897_vm1 = vcmask 261120   ;;  %s2064_s1 = inlined_call_operand.vmem [shape: f32[144,32], index: 1, kind: input, shape index: {}]   ;;  %s2065_s0 = inlined_call_operand.vmem [shape: f32[576,144], index: 0, kind: input, shape index: {}]   ;;  %s2066_s2 = inlined_call_operand.vmem [shape: f32[1,32], index: 2, kind: input, shape index: {}]   ;;  %s2067_s3 = inlined_call_operand.vmem [shape: f32[576,32], index: 3, kind: output, shape index: {}]  }
   0x1   :  { %400 = vmatprep.subr.mxu0 %v1084_v0  ;;  %1047 = vmatprep.subr.mxu1 %v1084_v0  ;;  %v173_v1 = vld [vmem:[%s2064_s1 + $0x78] sm:$0xff]  ;;  %v172_v2 = vld [vmem:[%s2064_s1 + $0x70] sm:$0xff]  ;;  %v171_v3 = vld [vmem:[%s2064_s1 + $0x68] sm:$0xff] }
   0x2   :  { %401 = vmatpush1.msra.mxu0 %v173_v1  ;;  %1065 = vmatpush1.msra.mxu1 %v173_v1  ;;  %v170_v4 = vld [vmem:[%s2064_s1 + $0x60] sm:$0xff]  ;;  %v169_v5 = vld [vmem:[%s2064_s1 + $0x58] sm:$0xff]  ;;  %v168_v6 = vld [vmem:[%s2064_s1 + $0x50] sm:$0xff] }
   0x3   :  { %402 = vmatprep.subr.mxu0 %v1084_v0  ;;  %1048 = vmatprep.subr.mxu1 %v1084_v0  ;;  %v167_v7 = vld [vmem:[%s2064_s1 + $0x48] sm:$0xff]  ;;  %v166_v8 = vld [vmem:[%s2064_s1 + $0x40] sm:$0xff]  ;;  %v165_v9 = vld [vmem:[%s2064_s1 + $0x38] sm:$0xff] }
   0x4   :  { %403 = vmatpush1.msra.mxu0 %v172_v2  ;;  %1066 = vmatpush1.msra.mxu1 %v172_v2  ;;  %v164_v10 = vld [vmem:[%s2064_s1 + $0x30] sm:$0xff]  ;;  %v163_v11 = vld [vmem:[%s2064_s1 + $0x28] sm:$0xff]  ;;  %v162_v12 = vld [vmem:[%s2064_s1 + $0x20] sm:$0xff] }
   0x5   :  { %404 = vmatprep.subr.mxu0 %v1084_v0  ;;  %1049 = vmatprep.subr.mxu1 %v1084_v0  ;;  %v161_v13 = vld [vmem:[%s2064_s1 + $0x18] sm:$0xff]  ;;  %v160_v14 = vld [vmem:[%s2064_s1 + $0x10] sm:$0xff]  ;;  %v159_v15 = vld [vmem:[%s2064_s1 + $0x8] sm:$0xff] }
   0x6   :  { %405 = vmatpush1.msra.mxu0 %v171_v3  ;;  %1067 = vmatpush1.msra.mxu1 %v171_v3  ;;  %v158_v16 = vld [vmem:[%s2064_s1] sm:$0xff]  ;;  %v175_v17 = vld [vmem:[%s2064_s1 + $0x88] sm:$0xff]  ;;  %v17_v23 = vld [vmem:[%s2065_s0 + $0x18] sm:$0xff] }
   0x7   :  { %406 = vmatprep.subr.mxu0 %v1084_v0  ;;  %1050 = vmatprep.subr.mxu1 %v1084_v0  ;;  %v174_v18 = vld [vmem:[%s2064_s1 + $0x80] sm:$0xff]  ;;  %v15_v19 = vld [vmem:[%s2065_s0 + $0x8] sm:$0xff]  ;;  %v89_v24 = vld [vmem:[%s2065_s0 + $0x258] sm:$0xff] }
   0x8   :  { %407 = vmatpush1.msra.mxu0 %v170_v4  ;;  %1068 = vmatpush1.msra.mxu1 %v170_v4  ;;  %v87_v20 = vld [vmem:[%s2065_s0 + $0x248] sm:$0xff]  ;;  %v14_v21 = vld [vmem:[%s2065_s0] sm:$0xff]  ;;  %v16_v25 = vld [vmem:[%s2065_s0 + $0x10] sm:$0xff] }
   0x9   :  { %408 = vmatprep.subr.mxu0 %v1084_v0  ;;  %1051 = vmatprep.subr.mxu1 %v1084_v0  ;;  %v86_v22 = vld [vmem:[%s2065_s0 + $0x240] sm:$0xff]  ;;  %v88_v26 = vld [vmem:[%s2065_s0 + $0x250] sm:$0xff]  ;;  %v19_v27 = vld [vmem:[%s2065_s0 + $0x28] sm:$0xff] }
   0xa   :  { %409 = vmatpush1.msra.mxu0 %v169_v5  ;;  %1069 = vmatpush1.msra.mxu1 %v169_v5  ;;  %v91_v28 = vld [vmem:[%s2065_s0 + $0x268] sm:$0xff]  ;;  %v18_v29 = vld [vmem:[%s2065_s0 + $0x20] sm:$0xff]  ;;  %v21_v31 = vld [vmem:[%s2065_s0 + $0x38] sm:$0xff] }
   0xb   :  { %410 = vmatprep.subr.mxu0 %v1084_v0  ;;  %1052 = vmatprep.subr.mxu1 %v1084_v0  ;;  %v90_v30 = vld [vmem:[%s2065_s0 + $0x260] sm:$0xff]  ;;  %v93_v32 = vld [vmem:[%s2065_s0 + $0x278] sm:$0xff]  ;;  %v20_v33 = vld [vmem:[%s2065_s0 + $0x30] sm:$0xff] }
   0xc   :  { %411 = vmatpush1.msra.mxu0 %v168_v6  ;;  %1070 = vmatpush1.msra.mxu1 %v168_v6  ;;  %v92_v34 = vld [vmem:[%s2065_s0 + $0x270] sm:$0xff]  ;;  %v23_v35 = vld [vmem:[%s2065_s0 + $0x48] sm:$0xff]  ;;  %v22_v37 = vld [vmem:[%s2065_s0 + $0x40] sm:$0xff] }
   0xd   :  { %412 = vmatprep.subr.mxu0 %v1084_v0  ;;  %1053 = vmatprep.subr.mxu1 %v1084_v0  ;;  %v95_v36 = vld [vmem:[%s2065_s0 + $0x288] sm:$0xff]  ;;  %v94_v38 = vld [vmem:[%s2065_s0 + $0x280] sm:$0xff]  ;;  %v25_v39 = vld [vmem:[%s2065_s0 + $0x58] sm:$0xff] }
   0xe   :  { %413 = vmatpush1.msra.mxu0 %v167_v7  ;;  %1071 = vmatpush1.msra.mxu1 %v167_v7  ;;  %v97_v40 = vld [vmem:[%s2065_s0 + $0x298] sm:$0xff]  ;;  %v24_v41 = vld [vmem:[%s2065_s0 + $0x50] sm:$0xff]  ;;  %v27_v43 = vld [vmem:[%s2065_s0 + $0x68] sm:$0xff] }
   0xf   :  { %414 = vmatprep.subr.mxu0 %v1084_v0  ;;  %1054 = vmatprep.subr.mxu1 %v1084_v0  ;;  %v96_v42 = vld [vmem:[%s2065_s0 + $0x290] sm:$0xff]  ;;  %v99_v44 = vld [vmem:[%s2065_s0 + $0x2a8] sm:$0xff]  ;;  %v26_v45 = vld [vmem:[%s2065_s0 + $0x60] sm:$0xff] }
  0x10   :  { %415 = vmatpush1.msra.mxu0 %v166_v8  ;;  %1072 = vmatpush1.msra.mxu1 %v166_v8  ;;  %v98_v46 = vld [vmem:[%s2065_s0 + $0x2a0] sm:$0xff]  ;;  %v29_v47 = vld [vmem:[%s2065_s0 + $0x78] sm:$0xff]  ;;  %v28_v49 = vld [vmem:[%s2065_s0 + $0x70] sm:$0xff] }
  0x11   :  { %416 = vmatprep.subr.mxu0 %v1084_v0  ;;  %1055 = vmatprep.subr.mxu1 %v1084_v0  ;;  %v101_v48 = vld [vmem:[%s2065_s0 + $0x2b8] sm:$0xff]  ;;  %v100_v50 = vld [vmem:[%s2065_s0 + $0x2b0] sm:$0xff]  ;;  %v31_v51 = vld [vmem:[%s2065_s0 + $0x88] sm:$0xff] }
  0x12   :  { %417 = vmatpush1.msra.mxu0 %v165_v9  ;;  %1073 = vmatpush1.msra.mxu1 %v165_v9  ;;  %v103_v52 = vld [vmem:[%s2065_s0 + $0x2c8] sm:$0xff]  ;;  %v30_v53 = vld [vmem:[%s2065_s0 + $0x80] sm:$0xff]  ;;  %v33_v55 = vld [vmem:[%s2065_s0 + $0x98] sm:$0xff] }
  0x13   :  { %418 = vmatprep.subr.mxu0 %v1084_v0  ;;  %1056 = vmatprep.subr.mxu1 %v1084_v0  ;;  %v102_v54 = vld [vmem:[%s2065_s0 + $0x2c0] sm:$0xff]  ;;  %v105_v56 = vld [vmem:[%s2065_s0 + $0x2d8] sm:$0xff]  ;;  %v32_v57 = vld [vmem:[%s2065_s0 + $0x90] sm:$0xff] }
  0x14   :  { %419 = vmatpush1.msra.mxu0 %v164_v10  ;;  %1074 = vmatpush1.msra.mxu1 %v164_v10  ;;  %v104_v58 = vld [vmem:[%s2065_s0 + $0x2d0] sm:$0xff]  ;;  %v35_v59 = vld [vmem:[%s2065_s0 + $0xa8] sm:$0xff]  ;;  %v34_v61 = vld [vmem:[%s2065_s0 + $0xa0] sm:$0xff] }
  0x15   :  { %420 = vmatprep.subr.mxu0 %v1084_v0  ;;  %1057 = vmatprep.subr.mxu1 %v1084_v0  ;;  %v107_v60 = vld [vmem:[%s2065_s0 + $0x2e8] sm:$0xff]  ;;  %v106_v62 = vld [vmem:[%s2065_s0 + $0x2e0] sm:$0xff]  ;;  %v37_v63 = vld [vmem:[%s2065_s0 + $0xb8] sm:$0xff] }
  0x16   :  { %421 = vmatpush1.msra.mxu0 %v163_v11  ;;  %1075 = vmatpush1.msra.mxu1 %v163_v11  ;;  %v36_v1 = vld [vmem:[%s2065_s0 + $0xb0] sm:$0xff]  ;;  %v39_v3 = vld [vmem:[%s2065_s0 + $0xc8] sm:$0xff]  ;;  %v38_v5 = vld [vmem:[%s2065_s0 + $0xc0] sm:$0xff] }
  0x17   :  { %422 = vmatprep.subr.mxu0 %v1084_v0  ;;  %1058 = vmatprep.subr.mxu1 %v1084_v0  ;;  %v108_v2 = vld [vmem:[%s2065_s0 + $0x2f0] sm:$0xff]  ;;  %v111_v4 = vld [vmem:[%s2065_s0 + $0x308] sm:$0xff]  ;;  %v110_v6 = vld [vmem:[%s2065_s0 + $0x300] sm:$0xff] }
  0x18   :  { %423 = vmatpush1.msra.mxu0 %v162_v12  ;;  %1076 = vmatpush1.msra.mxu1 %v162_v12  ;;  %v41_v7 = vld [vmem:[%s2065_s0 + $0xd8] sm:$0xff]  ;;  %v40_v9 = vld [vmem:[%s2065_s0 + $0xd0] sm:$0xff]  ;;  %v43_v11 = vld [vmem:[%s2065_s0 + $0xe8] sm:$0xff] }
  0x19   :  { %424 = vmatprep.subr.mxu0 %v1084_v0  ;;  %1059 = vmatprep.subr.mxu1 %v1084_v0  ;;  %v113_v8 = vld [vmem:[%s2065_s0 + $0x318] sm:$0xff]  ;;  %v112_v10 = vld [vmem:[%s2065_s0 + $0x310] sm:$0xff]  ;;  %v115_v12 = vld [vmem:[%s2065_s0 + $0x328] sm:$0xff] }
  0x1a   :  { %425 = vmatpush1.msra.mxu0 %v161_v13  ;;  %1077 = vmatpush1.msra.mxu1 %v161_v13  ;;  %v42_v13 = vld [vmem:[%s2065_s0 + $0xe0] sm:$0xff] }
  0x1b   :  { %426 = vmatprep.subr.mxu0 %v1084_v0  ;;  %1060 = vmatprep.subr.mxu1 %v1084_v0 }
  0x1c   :  { %427 = vmatpush1.msra.mxu0 %v160_v14  ;;  %1078 = vmatpush1.msra.mxu1 %v160_v14  ;;  %v114_v14 = vld [vmem:[%s2065_s0 + $0x320] sm:$0xff] }
  0x1d   :  { %428 = vmatprep.subr.mxu0 %v1084_v0  ;;  %1061 = vmatprep.subr.mxu1 %v1084_v0 }
  0x1e   :  { %429 = vmatpush1.msra.mxu0 %v159_v15  ;;  %1079 = vmatpush1.msra.mxu1 %v159_v15  ;;  %v45_v15 = vld [vmem:[%s2065_s0 + $0xf8] sm:$0xff] }
  0x1f   :  { %430 = vmatprep.subr.mxu0 %v1084_v0  ;;  %1062 = vmatprep.subr.mxu1 %v1084_v0 }
  0x20   :  { %431 = vmatpush1.msra.mxu0 %v158_v16  ;;  %1080 = vmatpush1.msra.mxu1 %v158_v16  ;;  %v117_v16 = vld [vmem:[%s2065_s0 + $0x338] sm:$0xff] }
  0x21   :  { %460 = vmatprep.subr.mxu0 %v1084_v0  ;;  %1063 = vmatprep.subr.mxu1 %v1084_v0 }
  0x22   :  { %461 = vmatpush2.msra.mxu0 %v175_v17  ;;  %1081 = vmatpush2.msra.mxu1 %v175_v17  ;;  %v44_v17 = vld [vmem:[%s2065_s0 + $0xf0] sm:$0xff] }
  0x23   :  { %462 = vmatprep.subr.mxu0 %v1084_v0  ;;  %1064 = vmatprep.subr.mxu1 %v1084_v0  ;;  %v109_v0 = vld [vmem:[%s2065_s0 + $0x2f8] sm:$0xff] }
  0x24   :  { %463 = vmatpush2.msra.mxu0 %v174_v18  ;;  %1082 = vmatpush2.msra.mxu1 %v174_v18  ;;  %v116_v18 = vld [vmem:[%s2065_s0 + $0x330] sm:$0xff] }
  0x25   :  { %975 = vmatprep.mubr.msk.f32.mxu0 %vm183_vm0, %v15_v19  ;;  %1011 = vmatprep.mubr.msk.f32.mxu1 %vm183_vm0, %v87_v20  ;;  %v47_v19 = vld [vmem:[%s2065_s0 + $0x108] sm:$0xff] }
  0x26   :  { %465 = vmatmul.mubr.f32.vlgmr.msra.gmra.mxu0 %v14_v21  ;;  %645 = vmatmul.mubr.f32.vlgmr.msra.gmra.mxu1 %v86_v22  ;;  %v119_v20 = vld [vmem:[%s2065_s0 + $0x348] sm:$0xff]  ;;  %v46_v21 = vld [vmem:[%s2065_s0 + $0x100] sm:$0xff] }
  0x27   :  { %976 = vmatprep.mubr.msk.f32.mxu0 %vm183_vm0, %v17_v23  ;;  %1012 = vmatprep.mubr.msk.f32.mxu1 %vm183_vm0, %v89_v24  ;;  %v118_v22 = vld [vmem:[%s2065_s0 + $0x340] sm:$0xff]  ;;  %v49_v23 = vld [vmem:[%s2065_s0 + $0x118] sm:$0xff] }
  0x28   :  { %v121_v24 = vld [vmem:[%s2065_s0 + $0x358] sm:$0xff] }
  0x2a   :  { %470 = vmatmul.mubr.f32.gmra.mxu0 %v16_v25  ;;  %650 = vmatmul.mubr.f32.gmra.mxu1 %v88_v26  ;;  %v48_v25 = vld [vmem:[%s2065_s0 + $0x110] sm:$0xff] }
  0x2b   :  { %977 = vmatprep.mubr.msk.f32.mxu0 %vm183_vm0, %v19_v27  ;;  %1013 = vmatprep.mubr.msk.f32.mxu1 %vm183_vm0, %v91_v28  ;;  %v120_v26 = vld [vmem:[%s2065_s0 + $0x350] sm:$0xff]  ;;  %v51_v27 = vld [vmem:[%s2065_s0 + $0x128] sm:$0xff] }
  0x2c   :  { %v123_v28 = vld [vmem:[%s2065_s0 + $0x368] sm:$0xff] }
  0x2e   :  { %475 = vmatmul.mubr.f32.gmra.mxu0 %v18_v29  ;;  %655 = vmatmul.mubr.f32.gmra.mxu1 %v90_v30  ;;  %v50_v29 = vld [vmem:[%s2065_s0 + $0x120] sm:$0xff] }
  0x2f   :  { %978 = vmatprep.mubr.msk.f32.mxu0 %vm183_vm0, %v21_v31  ;;  %1014 = vmatprep.mubr.msk.f32.mxu1 %vm183_vm0, %v93_v32  ;;  %v122_v30 = vld [vmem:[%s2065_s0 + $0x360] sm:$0xff]  ;;  %v53_v31 = vld [vmem:[%s2065_s0 + $0x138] sm:$0xff] }
  0x30   :  { %v125_v32 = vld [vmem:[%s2065_s0 + $0x378] sm:$0xff] }
  0x32   :  { %480 = vmatmul.mubr.f32.gmra.mxu0 %v20_v33  ;;  %660 = vmatmul.mubr.f32.gmra.mxu1 %v92_v34  ;;  %v52_v33 = vld [vmem:[%s2065_s0 + $0x130] sm:$0xff] }
  0x33   :  { %979 = vmatprep.mubr.msk.f32.mxu0 %vm183_vm0, %v23_v35  ;;  %1015 = vmatprep.mubr.msk.f32.mxu1 %vm183_vm0, %v95_v36  ;;  %v124_v34 = vld [vmem:[%s2065_s0 + $0x370] sm:$0xff]  ;;  %v55_v35 = vld [vmem:[%s2065_s0 + $0x148] sm:$0xff] }
  0x34   :  { %v127_v36 = vld [vmem:[%s2065_s0 + $0x388] sm:$0xff] }
  0x36   :  { %485 = vmatmul.mubr.f32.gmra.mxu0 %v22_v37  ;;  %665 = vmatmul.mubr.f32.gmra.mxu1 %v94_v38  ;;  %v54_v37 = vld [vmem:[%s2065_s0 + $0x140] sm:$0xff] }
  0x37   :  { %980 = vmatprep.mubr.msk.f32.mxu0 %vm183_vm0, %v25_v39  ;;  %1016 = vmatprep.mubr.msk.f32.mxu1 %vm183_vm0, %v97_v40  ;;  %v126_v38 = vld [vmem:[%s2065_s0 + $0x380] sm:$0xff]  ;;  %v57_v39 = vld [vmem:[%s2065_s0 + $0x158] sm:$0xff] }
  0x38   :  { %v129_v40 = vld [vmem:[%s2065_s0 + $0x398] sm:$0xff] }
  0x3a   :  { %490 = vmatmul.mubr.f32.gmra.mxu0 %v24_v41  ;;  %670 = vmatmul.mubr.f32.gmra.mxu1 %v96_v42  ;;  %v56_v41 = vld [vmem:[%s2065_s0 + $0x150] sm:$0xff] }
  0x3b   :  { %981 = vmatprep.mubr.msk.f32.mxu0 %vm183_vm0, %v27_v43  ;;  %1017 = vmatprep.mubr.msk.f32.mxu1 %vm183_vm0, %v99_v44  ;;  %v128_v42 = vld [vmem:[%s2065_s0 + $0x390] sm:$0xff]  ;;  %v59_v43 = vld [vmem:[%s2065_s0 + $0x168] sm:$0xff] }
  0x3c   :  { %v131_v44 = vld [vmem:[%s2065_s0 + $0x3a8] sm:$0xff] }
  0x3e   :  { %495 = vmatmul.mubr.f32.gmra.mxu0 %v26_v45  ;;  %675 = vmatmul.mubr.f32.gmra.mxu1 %v98_v46  ;;  %v58_v45 = vld [vmem:[%s2065_s0 + $0x160] sm:$0xff] }
  0x3f   :  { %982 = vmatprep.mubr.msk.f32.mxu0 %vm183_vm0, %v29_v47  ;;  %1018 = vmatprep.mubr.msk.f32.mxu1 %vm183_vm0, %v101_v48  ;;  %v130_v46 = vld [vmem:[%s2065_s0 + $0x3a0] sm:$0xff]  ;;  %v61_v47 = vld [vmem:[%s2065_s0 + $0x178] sm:$0xff] }
  0x40   :  { %v133_v48 = vld [vmem:[%s2065_s0 + $0x3b8] sm:$0xff] }
  0x42   :  { %500 = vmatmul.mubr.f32.gmra.mxu0 %v28_v49  ;;  %680 = vmatmul.mubr.f32.gmra.mxu1 %v100_v50  ;;  %v60_v49 = vld [vmem:[%s2065_s0 + $0x170] sm:$0xff] }
  0x43   :  { %983 = vmatprep.mubr.msk.f32.mxu0 %vm183_vm0, %v31_v51  ;;  %1019 = vmatprep.mubr.msk.f32.mxu1 %vm183_vm0, %v103_v52  ;;  %v132_v50 = vld [vmem:[%s2065_s0 + $0x3b0] sm:$0xff]  ;;  %v63_v51 = vld [vmem:[%s2065_s0 + $0x188] sm:$0xff] }
  0x44   :  { %v135_v52 = vld [vmem:[%s2065_s0 + $0x3c8] sm:$0xff] }
  0x46   :  { %505 = vmatmul.mubr.f32.gmra.mxu0 %v30_v53  ;;  %685 = vmatmul.mubr.f32.gmra.mxu1 %v102_v54  ;;  %v62_v53 = vld [vmem:[%s2065_s0 + $0x180] sm:$0xff] }
  0x47   :  { %984 = vmatprep.mubr.msk.f32.mxu0 %vm183_vm0, %v33_v55  ;;  %1020 = vmatprep.mubr.msk.f32.mxu1 %vm183_vm0, %v105_v56  ;;  %v134_v54 = vld [vmem:[%s2065_s0 + $0x3c0] sm:$0xff]  ;;  %v65_v55 = vld [vmem:[%s2065_s0 + $0x198] sm:$0xff] }
  0x48   :  { %v137_v56 = vld [vmem:[%s2065_s0 + $0x3d8] sm:$0xff] }
  0x4a   :  { %510 = vmatmul.mubr.f32.gmra.mxu0 %v32_v57  ;;  %690 = vmatmul.mubr.f32.gmra.mxu1 %v104_v58  ;;  %v64_v57 = vld [vmem:[%s2065_s0 + $0x190] sm:$0xff] }
  0x4b   :  { %985 = vmatprep.mubr.msk.f32.mxu0 %vm183_vm0, %v35_v59  ;;  %1021 = vmatprep.mubr.msk.f32.mxu1 %vm183_vm0, %v107_v60  ;;  %v136_v58 = vld [vmem:[%s2065_s0 + $0x3d0] sm:$0xff]  ;;  %v67_v59 = vld [vmem:[%s2065_s0 + $0x1a8] sm:$0xff] }
  0x4c   :  { %v139_v60 = vld [vmem:[%s2065_s0 + $0x3e8] sm:$0xff] }
  0x4e   :  { %515 = vmatmul.mubr.f32.gmra.mxu0 %v34_v61  ;;  %695 = vmatmul.mubr.f32.gmra.mxu1 %v106_v62  ;;  %v66_v61 = vld [vmem:[%s2065_s0 + $0x1a0] sm:$0xff] }
  0x4f   :  { %986 = vmatprep.mubr.msk.f32.mxu0 %vm183_vm0, %v37_v63  ;;  %1022 = vmatprep.mubr.msk.f32.mxu1 %vm183_vm0, %v109_v0  ;;  %v138_v62 = vld [vmem:[%s2065_s0 + $0x3e0] sm:$0xff]  ;;  %v69_v63 = vld [vmem:[%s2065_s0 + $0x1b8] sm:$0xff] }
  0x50   :  { %v141_v0 = vld [vmem:[%s2065_s0 + $0x3f8] sm:$0xff] }
  0x52   :  { %520 = vmatmul.mubr.f32.gmra.mxu0 %v36_v1  ;;  %700 = vmatmul.mubr.f32.gmra.mxu1 %v108_v2  ;;  %v68_v1 = vld [vmem:[%s2065_s0 + $0x1b0] sm:$0xff] }
  0x53   :  { %987 = vmatprep.mubr.msk.f32.mxu0 %vm183_vm0, %v39_v3  ;;  %1023 = vmatprep.mubr.msk.f32.mxu1 %vm183_vm0, %v111_v4  ;;  %v140_v2 = vld [vmem:[%s2065_s0 + $0x3f0] sm:$0xff]  ;;  %v71_v3 = vld [vmem:[%s2065_s0 + $0x1c8] sm:$0xff] }
  0x54   :  { %v143_v4 = vld [vmem:[%s2065_s0 + $0x408] sm:$0xff] }
  0x56   :  { %525 = vmatmul.mubr.f32.gmra.mxu0 %v38_v5  ;;  %705 = vmatmul.mubr.f32.gmra.mxu1 %v110_v6  ;;  %v70_v5 = vld [vmem:[%s2065_s0 + $0x1c0] sm:$0xff] }
  0x57   :  { %988 = vmatprep.mubr.msk.f32.mxu0 %vm183_vm0, %v41_v7  ;;  %1024 = vmatprep.mubr.msk.f32.mxu1 %vm183_vm0, %v113_v8  ;;  %v142_v6 = vld [vmem:[%s2065_s0 + $0x400] sm:$0xff]  ;;  %v73_v7 = vld [vmem:[%s2065_s0 + $0x1d8] sm:$0xff] }
  0x58   :  { %v145_v8 = vld [vmem:[%s2065_s0 + $0x418] sm:$0xff] }
  0x5a   :  { %530 = vmatmul.mubr.f32.gmra.mxu0 %v40_v9  ;;  %710 = vmatmul.mubr.f32.gmra.mxu1 %v112_v10  ;;  %v72_v9 = vld [vmem:[%s2065_s0 + $0x1d0] sm:$0xff] }
  0x5b   :  { %989 = vmatprep.mubr.msk.f32.mxu0 %vm183_vm0, %v43_v11  ;;  %1025 = vmatprep.mubr.msk.f32.mxu1 %vm183_vm0, %v115_v12  ;;  %v144_v10 = vld [vmem:[%s2065_s0 + $0x410] sm:$0xff]  ;;  %v75_v11 = vld [vmem:[%s2065_s0 + $0x1e8] sm:$0xff] }
  0x5c   :  { %v147_v12 = vld [vmem:[%s2065_s0 + $0x428] sm:$0xff] }
  0x5e   :  { %535 = vmatmul.mubr.f32.gmra.mxu0 %v42_v13  ;;  %715 = vmatmul.mubr.f32.gmra.mxu1 %v114_v14  ;;  %v74_v13 = vld [vmem:[%s2065_s0 + $0x1e0] sm:$0xff] }
  0x5f   :  { %990 = vmatprep.mubr.msk.f32.mxu0 %vm183_vm0, %v45_v15  ;;  %1026 = vmatprep.mubr.msk.f32.mxu1 %vm183_vm0, %v117_v16  ;;  %v146_v14 = vld [vmem:[%s2065_s0 + $0x420] sm:$0xff]  ;;  %v77_v15 = vld [vmem:[%s2065_s0 + $0x1f8] sm:$0xff] }
  0x60   :  { %v149_v16 = vld [vmem:[%s2065_s0 + $0x438] sm:$0xff] }
  0x62   :  { %540 = vmatmul.mubr.f32.gmra.mxu0 %v44_v17  ;;  %720 = vmatmul.mubr.f32.gmra.mxu1 %v116_v18  ;;  %v76_v17 = vld [vmem:[%s2065_s0 + $0x1f0] sm:$0xff] }
  0x63   :  { %991 = vmatprep.mubr.msk.f32.mxu0 %vm183_vm0, %v47_v19  ;;  %1027 = vmatprep.mubr.msk.f32.mxu1 %vm183_vm0, %v119_v20  ;;  %v148_v18 = vld [vmem:[%s2065_s0 + $0x430] sm:$0xff]  ;;  %v79_v19 = vld [vmem:[%s2065_s0 + $0x208] sm:$0xff] }
  0x64   :  { %v151_v20 = vld [vmem:[%s2065_s0 + $0x448] sm:$0xff] }
  0x66   :  { %545 = vmatmul.mubr.f32.gmra.mxu0 %v46_v21  ;;  %725 = vmatmul.mubr.f32.gmra.mxu1 %v118_v22  ;;  %v78_v21 = vld [vmem:[%s2065_s0 + $0x200] sm:$0xff] }
  0x67   :  { %992 = vmatprep.mubr.msk.f32.mxu0 %vm183_vm0, %v49_v23  ;;  %1028 = vmatprep.mubr.msk.f32.mxu1 %vm183_vm0, %v121_v24  ;;  %v150_v22 = vld [vmem:[%s2065_s0 + $0x440] sm:$0xff]  ;;  %v81_v23 = vld [vmem:[%s2065_s0 + $0x218] sm:$0xff] }
  0x68   :  { %v153_v24 = vld [vmem:[%s2065_s0 + $0x458] sm:$0xff] }
  0x6a   :  { %550 = vmatmul.mubr.f32.gmra.mxu0 %v48_v25  ;;  %730 = vmatmul.mubr.f32.gmra.mxu1 %v120_v26  ;;  %v80_v25 = vld [vmem:[%s2065_s0 + $0x210] sm:$0xff] }
  0x6b   :  { %993 = vmatprep.mubr.msk.f32.mxu0 %vm183_vm0, %v51_v27  ;;  %1029 = vmatprep.mubr.msk.f32.mxu1 %vm183_vm0, %v123_v28  ;;  %v152_v26 = vld [vmem:[%s2065_s0 + $0x450] sm:$0xff]  ;;  %v83_v27 = vld [vmem:[%s2065_s0 + $0x228] sm:$0xff] }
  0x6c   :  { %v155_v28 = vld [vmem:[%s2065_s0 + $0x468] sm:$0xff] }
  0x6e   :  { %555 = vmatmul.mubr.f32.gmra.mxu0 %v50_v29  ;;  %735 = vmatmul.mubr.f32.gmra.mxu1 %v122_v30  ;;  %v82_v29 = vld [vmem:[%s2065_s0 + $0x220] sm:$0xff] }
  0x6f   :  { %994 = vmatprep.mubr.msk.f32.mxu0 %vm183_vm0, %v53_v31  ;;  %1030 = vmatprep.mubr.msk.f32.mxu1 %vm183_vm0, %v125_v32  ;;  %v154_v30 = vld [vmem:[%s2065_s0 + $0x460] sm:$0xff]  ;;  %v85_v31 = vld [vmem:[%s2065_s0 + $0x238] sm:$0xff] }
  0x70   :  { %v157_v32 = vld [vmem:[%s2065_s0 + $0x478] sm:$0xff] }
  0x72   :  { %560 = vmatmul.mubr.f32.gmra.mxu0 %v52_v33  ;;  %740 = vmatmul.mubr.f32.gmra.mxu1 %v124_v34  ;;  %v84_v33 = vld [vmem:[%s2065_s0 + $0x230] sm:$0xff] }
  0x73   :  { %995 = vmatprep.mubr.msk.f32.mxu0 %vm183_vm0, %v55_v35  ;;  %1031 = vmatprep.mubr.msk.f32.mxu1 %vm183_vm0, %v127_v36  ;;  %v156_v34 = vld [vmem:[%s2065_s0 + $0x470] sm:$0xff]  ;;  %v1702_v35 = vld [vmem:[%s2066_s2] ss:$0 sm:$0xff] }
  0x76   :  { %565 = vmatmul.mubr.f32.gmra.mxu0 %v54_v37  ;;  %745 = vmatmul.mubr.f32.gmra.mxu1 %v126_v38 }
  0x77   :  { %996 = vmatprep.mubr.msk.f32.mxu0 %vm183_vm0, %v57_v39  ;;  %1032 = vmatprep.mubr.msk.f32.mxu1 %vm183_vm0, %v129_v40 }
  0x7a   :  { %570 = vmatmul.mubr.f32.gmra.mxu0 %v56_v41  ;;  %750 = vmatmul.mubr.f32.gmra.mxu1 %v128_v42 }
  0x7b   :  { %997 = vmatprep.mubr.msk.f32.mxu0 %vm183_vm0, %v59_v43  ;;  %1033 = vmatprep.mubr.msk.f32.mxu1 %vm183_vm0, %v131_v44 }
  0x7e   :  { %575 = vmatmul.mubr.f32.gmra.mxu0 %v58_v45  ;;  %755 = vmatmul.mubr.f32.gmra.mxu1 %v130_v46 }
  0x7f   :  { %998 = vmatprep.mubr.msk.f32.mxu0 %vm183_vm0, %v61_v47  ;;  %1034 = vmatprep.mubr.msk.f32.mxu1 %vm183_vm0, %v133_v48 }
  0x82   :  { %580 = vmatmul.mubr.f32.gmra.mxu0 %v60_v49  ;;  %760 = vmatmul.mubr.f32.gmra.mxu1 %v132_v50 }
  0x83   :  { %999 = vmatprep.mubr.msk.f32.mxu0 %vm183_vm0, %v63_v51  ;;  %1035 = vmatprep.mubr.msk.f32.mxu1 %vm183_vm0, %v135_v52 }
  0x86   :  { %585 = vmatmul.mubr.f32.gmra.mxu0 %v62_v53  ;;  %765 = vmatmul.mubr.f32.gmra.mxu1 %v134_v54 }
  0x87   :  { %1000 = vmatprep.mubr.msk.f32.mxu0 %vm183_vm0, %v65_v55  ;;  %1036 = vmatprep.mubr.msk.f32.mxu1 %vm183_vm0, %v137_v56 }
  0x8a   :  { %590 = vmatmul.mubr.f32.gmra.mxu0 %v64_v57  ;;  %770 = vmatmul.mubr.f32.gmra.mxu1 %v136_v58 }
  0x8b   :  { %1001 = vmatprep.mubr.msk.f32.mxu0 %vm183_vm0, %v67_v59  ;;  %1037 = vmatprep.mubr.msk.f32.mxu1 %vm183_vm0, %v139_v60 }
  0x8e   :  { %595 = vmatmul.mubr.f32.gmra.mxu0 %v66_v61  ;;  %775 = vmatmul.mubr.f32.gmra.mxu1 %v138_v62 }
  0x8f   :  { %1002 = vmatprep.mubr.msk.f32.mxu0 %vm183_vm0, %v69_v63  ;;  %1038 = vmatprep.mubr.msk.f32.mxu1 %vm183_vm0, %v141_v0 }
  0x92   :  { %600 = vmatmul.mubr.f32.gmra.mxu0 %v68_v1  ;;  %780 = vmatmul.mubr.f32.gmra.mxu1 %v140_v2 }
  0x93   :  { %1003 = vmatprep.mubr.msk.f32.mxu0 %vm183_vm0, %v71_v3  ;;  %1039 = vmatprep.mubr.msk.f32.mxu1 %vm183_vm0, %v143_v4 }
  0x96   :  { %605 = vmatmul.mubr.f32.gmra.mxu0 %v70_v5  ;;  %785 = vmatmul.mubr.f32.gmra.mxu1 %v142_v6 }
  0x97   :  { %1004 = vmatprep.mubr.msk.f32.mxu0 %vm183_vm0, %v73_v7  ;;  %1040 = vmatprep.mubr.msk.f32.mxu1 %vm183_vm0, %v145_v8 }
  0x9a   :  { %610 = vmatmul.mubr.f32.gmra.mxu0 %v72_v9  ;;  %790 = vmatmul.mubr.f32.gmra.mxu1 %v144_v10 }
  0x9b   :  { %1005 = vmatprep.mubr.msk.f32.mxu0 %vm183_vm0, %v75_v11  ;;  %1041 = vmatprep.mubr.msk.f32.mxu1 %vm183_vm0, %v147_v12 }
  0x9e   :  { %615 = vmatmul.mubr.f32.gmra.mxu0 %v74_v13  ;;  %795 = vmatmul.mubr.f32.gmra.mxu1 %v146_v14 }
  0x9f   :  { %1006 = vmatprep.mubr.msk.f32.mxu0 %vm183_vm0, %v77_v15  ;;  %1042 = vmatprep.mubr.msk.f32.mxu1 %vm183_vm0, %v149_v16 }
  0xa2   :  { %620 = vmatmul.mubr.f32.gmra.mxu0 %v76_v17  ;;  %800 = vmatmul.mubr.f32.gmra.mxu1 %v148_v18 }
  0xa3   :  { %1007 = vmatprep.mubr.msk.f32.mxu0 %vm183_vm0, %v79_v19  ;;  %1043 = vmatprep.mubr.msk.f32.mxu1 %vm183_vm0, %v151_v20 }
  0xa6   :  { %625 = vmatmul.mubr.f32.gmra.mxu0 %v78_v21  ;;  %805 = vmatmul.mubr.f32.gmra.mxu1 %v150_v22 }
  0xa7   :  { %1008 = vmatprep.mubr.msk.f32.mxu0 %vm183_vm0, %v81_v23  ;;  %1044 = vmatprep.mubr.msk.f32.mxu1 %vm183_vm0, %v153_v24 }
  0xaa   :  { %630 = vmatmul.mubr.f32.gmra.mxu0 %v80_v25  ;;  %810 = vmatmul.mubr.f32.gmra.mxu1 %v152_v26 }
  0xab   :  { %1009 = vmatprep.mubr.msk.f32.mxu0 %vm183_vm0, %v83_v27  ;;  %1045 = vmatprep.mubr.msk.f32.mxu1 %vm183_vm0, %v155_v28 }
  0xae   :  { %635 = vmatmul.mubr.f32.gmra.mxu0 %v82_v29  ;;  %815 = vmatmul.mubr.f32.gmra.mxu1 %v154_v30 }
  0xaf   :  { %1010 = vmatprep.mubr.msk.f32.mxu0 %vm183_vm0, %v85_v31  ;;  %1046 = vmatprep.mubr.msk.f32.mxu1 %vm183_vm0, %v157_v32 }
  0xb2   :  { %640 = vmatmul.mubr.f32.gmra.mxu0 %v84_v33  ;;  %820 = vmatmul.mubr.f32.gmra.mxu1 %v156_v34 }
  0xe6   :  { %v466_v36 = vpop.f32.mrf.mxu0  ;;  %v646_v37 = vpop.f32.mrf.mxu1 }
  0xe7   :  { %v467_v38 = vadd.f32 %v1702_v35, %v466_v36  ;;  %v647_v39 = vadd.f32 %v1702_v35, %v646_v37 }
  0xe8   :  { %v468_v40 = vpop.f32.mrf.mxu0  ;;  %v648_v41 = vpop.f32.mrf.mxu1 }
  0xe9   :  { %v825_v42 = vmax.f32 %v467_v38, 0.0  ;;  %v861_v43 = vmax.f32 %v647_v39, 0.0 }
  0xea   :  { %v471_v44 = vpop.f32.mrf.mxu0  ;;  %v651_v45 = vpop.f32.mrf.mxu1 }
  0xeb   :  { %898 = vst.msk [vmem:[%s2067_s3] sm:$0xff] %vm897_vm1, %v825_v42  ;;  %934 = vst.msk [vmem:[%s2067_s3 + $0x120] sm:$0xff] %vm897_vm1, %v861_v43  ;;  %v472_v46 = vadd.f32 %v1702_v35, %v471_v44  ;;  %v652_v47 = vadd.f32 %v1702_v35, %v651_v45 }
  0xec   :  { %v473_v48 = vpop.f32.mrf.mxu0  ;;  %v653_v49 = vpop.f32.mrf.mxu1 }
  0xed   :  { %v826_v50 = vmax.f32 %v472_v46, 0.0  ;;  %v862_v51 = vmax.f32 %v652_v47, 0.0 }
  0xee   :  { %v476_v52 = vpop.f32.mrf.mxu0  ;;  %v656_v53 = vpop.f32.mrf.mxu1 }
  0xef   :  { %899 = vst.msk [vmem:[%s2067_s3 + $0x8] sm:$0xff] %vm897_vm1, %v826_v50  ;;  %935 = vst.msk [vmem:[%s2067_s3 + $0x128] sm:$0xff] %vm897_vm1, %v862_v51  ;;  %v477_v54 = vadd.f32 %v1702_v35, %v476_v52  ;;  %v657_v55 = vadd.f32 %v1702_v35, %v656_v53 }
  0xf0   :  { %v478_v56 = vpop.f32.mrf.mxu0  ;;  %v658_v57 = vpop.f32.mrf.mxu1 }
  0xf1   :  { %v827_v58 = vmax.f32 %v477_v54, 0.0  ;;  %v863_v59 = vmax.f32 %v657_v55, 0.0 }
  0xf2   :  { %v481_v60 = vpop.f32.mrf.mxu0  ;;  %v661_v61 = vpop.f32.mrf.mxu1 }
  0xf3   :  { %900 = vst.msk [vmem:[%s2067_s3 + $0x10] sm:$0xff] %vm897_vm1, %v827_v58  ;;  %936 = vst.msk [vmem:[%s2067_s3 + $0x130] sm:$0xff] %vm897_vm1, %v863_v59  ;;  %v482_v62 = vadd.f32 %v1702_v35, %v481_v60  ;;  %v662_v63 = vadd.f32 %v1702_v35, %v661_v61 }
  0xf4   :  { %v483_v0 = vpop.f32.mrf.mxu0  ;;  %v663_v1 = vpop.f32.mrf.mxu1 }
  0xf5   :  { %v828_v2 = vmax.f32 %v482_v62, 0.0  ;;  %v864_v3 = vmax.f32 %v662_v63, 0.0 }
  0xf6   :  { %v486_v4 = vpop.f32.mrf.mxu0  ;;  %v666_v5 = vpop.f32.mrf.mxu1 }
  0xf7   :  { %901 = vst.msk [vmem:[%s2067_s3 + $0x18] sm:$0xff] %vm897_vm1, %v828_v2  ;;  %937 = vst.msk [vmem:[%s2067_s3 + $0x138] sm:$0xff] %vm897_vm1, %v864_v3  ;;  %v487_v6 = vadd.f32 %v1702_v35, %v486_v4  ;;  %v667_v7 = vadd.f32 %v1702_v35, %v666_v5 }
  0xf8   :  { %v488_v8 = vpop.f32.mrf.mxu0  ;;  %v668_v9 = vpop.f32.mrf.mxu1 }
  0xf9   :  { %v829_v10 = vmax.f32 %v487_v6, 0.0  ;;  %v865_v11 = vmax.f32 %v667_v7, 0.0 }
  0xfa   :  { %v491_v12 = vpop.f32.mrf.mxu0  ;;  %v671_v13 = vpop.f32.mrf.mxu1 }
  0xfb   :  { %902 = vst.msk [vmem:[%s2067_s3 + $0x20] sm:$0xff] %vm897_vm1, %v829_v10  ;;  %938 = vst.msk [vmem:[%s2067_s3 + $0x140] sm:$0xff] %vm897_vm1, %v865_v11  ;;  %v492_v14 = vadd.f32 %v1702_v35, %v491_v12  ;;  %v672_v15 = vadd.f32 %v1702_v35, %v671_v13 }
  0xfc   :  { %v493_v16 = vpop.f32.mrf.mxu0  ;;  %v673_v17 = vpop.f32.mrf.mxu1 }
  0xfd   :  { %v830_v18 = vmax.f32 %v492_v14, 0.0  ;;  %v866_v19 = vmax.f32 %v672_v15, 0.0 }
  0xfe   :  { %v496_v20 = vpop.f32.mrf.mxu0  ;;  %v676_v21 = vpop.f32.mrf.mxu1 }
  0xff   :  { %903 = vst.msk [vmem:[%s2067_s3 + $0x28] sm:$0xff] %vm897_vm1, %v830_v18  ;;  %939 = vst.msk [vmem:[%s2067_s3 + $0x148] sm:$0xff] %vm897_vm1, %v866_v19  ;;  %v497_v22 = vadd.f32 %v1702_v35, %v496_v20  ;;  %v677_v23 = vadd.f32 %v1702_v35, %v676_v21 }
 0x100   :  { %v498_v24 = vpop.f32.mrf.mxu0  ;;  %v678_v25 = vpop.f32.mrf.mxu1 }
 0x101   :  { %v831_v26 = vmax.f32 %v497_v22, 0.0  ;;  %v867_v27 = vmax.f32 %v677_v23, 0.0 }
 0x102   :  { %v501_v28 = vpop.f32.mrf.mxu0  ;;  %v681_v29 = vpop.f32.mrf.mxu1 }
 0x103   :  { %904 = vst.msk [vmem:[%s2067_s3 + $0x30] sm:$0xff] %vm897_vm1, %v831_v26  ;;  %940 = vst.msk [vmem:[%s2067_s3 + $0x150] sm:$0xff] %vm897_vm1, %v867_v27  ;;  %v502_v30 = vadd.f32 %v1702_v35, %v501_v28  ;;  %v682_v31 = vadd.f32 %v1702_v35, %v681_v29 }
 0x104   :  { %v503_v32 = vpop.f32.mrf.mxu0  ;;  %v683_v33 = vpop.f32.mrf.mxu1 }
 0x105   :  { %v832_v34 = vmax.f32 %v502_v30, 0.0  ;;  %v868_v36 = vmax.f32 %v682_v31, 0.0 }
 0x106   :  { %v506_v37 = vpop.f32.mrf.mxu0  ;;  %v686_v38 = vpop.f32.mrf.mxu1 }
 0x107   :  { %905 = vst.msk [vmem:[%s2067_s3 + $0x38] sm:$0xff] %vm897_vm1, %v832_v34  ;;  %941 = vst.msk [vmem:[%s2067_s3 + $0x158] sm:$0xff] %vm897_vm1, %v868_v36  ;;  %v507_v39 = vadd.f32 %v1702_v35, %v506_v37  ;;  %v687_v40 = vadd.f32 %v1702_v35, %v686_v38 }
 0x108   :  { %v508_v41 = vpop.f32.mrf.mxu0  ;;  %v688_v42 = vpop.f32.mrf.mxu1 }
 0x109   :  { %v833_v43 = vmax.f32 %v507_v39, 0.0  ;;  %v869_v44 = vmax.f32 %v687_v40, 0.0 }
 0x10a   :  { %v511_v45 = vpop.f32.mrf.mxu0  ;;  %v691_v46 = vpop.f32.mrf.mxu1 }
 0x10b   :  { %906 = vst.msk [vmem:[%s2067_s3 + $0x40] sm:$0xff] %vm897_vm1, %v833_v43  ;;  %942 = vst.msk [vmem:[%s2067_s3 + $0x160] sm:$0xff] %vm897_vm1, %v869_v44  ;;  %v512_v47 = vadd.f32 %v1702_v35, %v511_v45  ;;  %v692_v48 = vadd.f32 %v1702_v35, %v691_v46 }
 0x10c   :  { %v513_v49 = vpop.f32.mrf.mxu0  ;;  %v693_v50 = vpop.f32.mrf.mxu1 }
 0x10d   :  { %v834_v51 = vmax.f32 %v512_v47, 0.0  ;;  %v870_v52 = vmax.f32 %v692_v48, 0.0 }
 0x10e   :  { %v516_v53 = vpop.f32.mrf.mxu0  ;;  %v696_v54 = vpop.f32.mrf.mxu1 }
 0x10f   :  { %907 = vst.msk [vmem:[%s2067_s3 + $0x48] sm:$0xff] %vm897_vm1, %v834_v51  ;;  %943 = vst.msk [vmem:[%s2067_s3 + $0x168] sm:$0xff] %vm897_vm1, %v870_v52  ;;  %v517_v55 = vadd.f32 %v1702_v35, %v516_v53  ;;  %v697_v56 = vadd.f32 %v1702_v35, %v696_v54 }
 0x110   :  { %v518_v57 = vpop.f32.mrf.mxu0  ;;  %v698_v58 = vpop.f32.mrf.mxu1 }
 0x111   :  { %v835_v59 = vmax.f32 %v517_v55, 0.0  ;;  %v871_v60 = vmax.f32 %v697_v56, 0.0 }
 0x112   :  { %v521_v61 = vpop.f32.mrf.mxu0  ;;  %v701_v62 = vpop.f32.mrf.mxu1 }
 0x113   :  { %908 = vst.msk [vmem:[%s2067_s3 + $0x50] sm:$0xff] %vm897_vm1, %v835_v59  ;;  %944 = vst.msk [vmem:[%s2067_s3 + $0x170] sm:$0xff] %vm897_vm1, %v871_v60  ;;  %v522_v63 = vadd.f32 %v1702_v35, %v521_v61  ;;  %v702_v0 = vadd.f32 %v1702_v35, %v701_v62 }
 0x114   :  { %v523_v1 = vpop.f32.mrf.mxu0  ;;  %v703_v2 = vpop.f32.mrf.mxu1 }
 0x115   :  { %v836_v3 = vmax.f32 %v522_v63, 0.0  ;;  %v872_v4 = vmax.f32 %v702_v0, 0.0 }
 0x116   :  { %v526_v5 = vpop.f32.mrf.mxu0  ;;  %v706_v6 = vpop.f32.mrf.mxu1 }
 0x117   :  { %909 = vst.msk [vmem:[%s2067_s3 + $0x58] sm:$0xff] %vm897_vm1, %v836_v3  ;;  %945 = vst.msk [vmem:[%s2067_s3 + $0x178] sm:$0xff] %vm897_vm1, %v872_v4  ;;  %v527_v7 = vadd.f32 %v1702_v35, %v526_v5  ;;  %v707_v8 = vadd.f32 %v1702_v35, %v706_v6 }
 0x118   :  { %v528_v9 = vpop.f32.mrf.mxu0  ;;  %v708_v10 = vpop.f32.mrf.mxu1 }
 0x119   :  { %v837_v11 = vmax.f32 %v527_v7, 0.0  ;;  %v873_v12 = vmax.f32 %v707_v8, 0.0 }
 0x11a   :  { %v531_v13 = vpop.f32.mrf.mxu0  ;;  %v711_v14 = vpop.f32.mrf.mxu1 }
 0x11b   :  { %910 = vst.msk [vmem:[%s2067_s3 + $0x60] sm:$0xff] %vm897_vm1, %v837_v11  ;;  %946 = vst.msk [vmem:[%s2067_s3 + $0x180] sm:$0xff] %vm897_vm1, %v873_v12  ;;  %v532_v15 = vadd.f32 %v1702_v35, %v531_v13  ;;  %v712_v16 = vadd.f32 %v1702_v35, %v711_v14 }
 0x11c   :  { %v533_v17 = vpop.f32.mrf.mxu0  ;;  %v713_v18 = vpop.f32.mrf.mxu1 }
 0x11d   :  { %v838_v19 = vmax.f32 %v532_v15, 0.0  ;;  %v874_v20 = vmax.f32 %v712_v16, 0.0 }
 0x11e   :  { %v536_v21 = vpop.f32.mrf.mxu0  ;;  %v716_v22 = vpop.f32.mrf.mxu1 }
 0x11f   :  { %911 = vst.msk [vmem:[%s2067_s3 + $0x68] sm:$0xff] %vm897_vm1, %v838_v19  ;;  %947 = vst.msk [vmem:[%s2067_s3 + $0x188] sm:$0xff] %vm897_vm1, %v874_v20  ;;  %v537_v23 = vadd.f32 %v1702_v35, %v536_v21  ;;  %v717_v24 = vadd.f32 %v1702_v35, %v716_v22 }
 0x120   :  { %v538_v25 = vpop.f32.mrf.mxu0  ;;  %v718_v26 = vpop.f32.mrf.mxu1 }
 0x121   :  { %v839_v27 = vmax.f32 %v537_v23, 0.0  ;;  %v875_v28 = vmax.f32 %v717_v24, 0.0 }
 0x122   :  { %v541_v29 = vpop.f32.mrf.mxu0  ;;  %v721_v30 = vpop.f32.mrf.mxu1 }
 0x123   :  { %912 = vst.msk [vmem:[%s2067_s3 + $0x70] sm:$0xff] %vm897_vm1, %v839_v27  ;;  %948 = vst.msk [vmem:[%s2067_s3 + $0x190] sm:$0xff] %vm897_vm1, %v875_v28  ;;  %v542_v31 = vadd.f32 %v1702_v35, %v541_v29  ;;  %v722_v32 = vadd.f32 %v1702_v35, %v721_v30 }
 0x124   :  { %v543_v33 = vpop.f32.mrf.mxu0  ;;  %v723_v34 = vpop.f32.mrf.mxu1 }
 0x125   :  { %v840_v36 = vmax.f32 %v542_v31, 0.0  ;;  %v876_v37 = vmax.f32 %v722_v32, 0.0 }
 0x126   :  { %v546_v38 = vpop.f32.mrf.mxu0  ;;  %v726_v39 = vpop.f32.mrf.mxu1 }
 0x127   :  { %913 = vst.msk [vmem:[%s2067_s3 + $0x78] sm:$0xff] %vm897_vm1, %v840_v36  ;;  %949 = vst.msk [vmem:[%s2067_s3 + $0x198] sm:$0xff] %vm897_vm1, %v876_v37  ;;  %v547_v40 = vadd.f32 %v1702_v35, %v546_v38  ;;  %v727_v41 = vadd.f32 %v1702_v35, %v726_v39 }
 0x128   :  { %v548_v42 = vpop.f32.mrf.mxu0  ;;  %v728_v43 = vpop.f32.mrf.mxu1 }
 0x129   :  { %v841_v44 = vmax.f32 %v547_v40, 0.0  ;;  %v877_v45 = vmax.f32 %v727_v41, 0.0 }
 0x12a   :  { %v551_v46 = vpop.f32.mrf.mxu0  ;;  %v731_v47 = vpop.f32.mrf.mxu1 }
 0x12b   :  { %914 = vst.msk [vmem:[%s2067_s3 + $0x80] sm:$0xff] %vm897_vm1, %v841_v44  ;;  %950 = vst.msk [vmem:[%s2067_s3 + $0x1a0] sm:$0xff] %vm897_vm1, %v877_v45  ;;  %v552_v48 = vadd.f32 %v1702_v35, %v551_v46  ;;  %v732_v49 = vadd.f32 %v1702_v35, %v731_v47 }
 0x12c   :  { %v553_v50 = vpop.f32.mrf.mxu0  ;;  %v733_v51 = vpop.f32.mrf.mxu1 }
 0x12d   :  { %v842_v52 = vmax.f32 %v552_v48, 0.0  ;;  %v878_v53 = vmax.f32 %v732_v49, 0.0 }
 0x12e   :  { %v556_v54 = vpop.f32.mrf.mxu0  ;;  %v736_v55 = vpop.f32.mrf.mxu1 }
 0x12f   :  { %915 = vst.msk [vmem:[%s2067_s3 + $0x88] sm:$0xff] %vm897_vm1, %v842_v52  ;;  %951 = vst.msk [vmem:[%s2067_s3 + $0x1a8] sm:$0xff] %vm897_vm1, %v878_v53  ;;  %v557_v56 = vadd.f32 %v1702_v35, %v556_v54  ;;  %v737_v57 = vadd.f32 %v1702_v35, %v736_v55 }
 0x130   :  { %v558_v58 = vpop.f32.mrf.mxu0  ;;  %v738_v59 = vpop.f32.mrf.mxu1 }
 0x131   :  { %v843_v60 = vmax.f32 %v557_v56, 0.0  ;;  %v879_v61 = vmax.f32 %v737_v57, 0.0 }
 0x132   :  { %v561_v62 = vpop.f32.mrf.mxu0  ;;  %v741_v63 = vpop.f32.mrf.mxu1 }
 0x133   :  { %916 = vst.msk [vmem:[%s2067_s3 + $0x90] sm:$0xff] %vm897_vm1, %v843_v60  ;;  %952 = vst.msk [vmem:[%s2067_s3 + $0x1b0] sm:$0xff] %vm897_vm1, %v879_v61  ;;  %v562_v0 = vadd.f32 %v1702_v35, %v561_v62  ;;  %v742_v1 = vadd.f32 %v1702_v35, %v741_v63 }
 0x134   :  { %v563_v2 = vpop.f32.mrf.mxu0  ;;  %v743_v3 = vpop.f32.mrf.mxu1 }
 0x135   :  { %v844_v4 = vmax.f32 %v562_v0, 0.0  ;;  %v880_v5 = vmax.f32 %v742_v1, 0.0 }
 0x136   :  { %v566_v6 = vpop.f32.mrf.mxu0  ;;  %v746_v7 = vpop.f32.mrf.mxu1 }
 0x137   :  { %917 = vst.msk [vmem:[%s2067_s3 + $0x98] sm:$0xff] %vm897_vm1, %v844_v4  ;;  %953 = vst.msk [vmem:[%s2067_s3 + $0x1b8] sm:$0xff] %vm897_vm1, %v880_v5  ;;  %v567_v8 = vadd.f32 %v1702_v35, %v566_v6  ;;  %v747_v9 = vadd.f32 %v1702_v35, %v746_v7 }
 0x138   :  { %v568_v10 = vpop.f32.mrf.mxu0  ;;  %v748_v11 = vpop.f32.mrf.mxu1 }
 0x139   :  { %v845_v12 = vmax.f32 %v567_v8, 0.0  ;;  %v881_v13 = vmax.f32 %v747_v9, 0.0 }
 0x13a   :  { %v571_v14 = vpop.f32.mrf.mxu0  ;;  %v751_v15 = vpop.f32.mrf.mxu1 }
 0x13b   :  { %918 = vst.msk [vmem:[%s2067_s3 + $0xa0] sm:$0xff] %vm897_vm1, %v845_v12  ;;  %954 = vst.msk [vmem:[%s2067_s3 + $0x1c0] sm:$0xff] %vm897_vm1, %v881_v13  ;;  %v572_v16 = vadd.f32 %v1702_v35, %v571_v14  ;;  %v752_v17 = vadd.f32 %v1702_v35, %v751_v15 }
 0x13c   :  { %v573_v18 = vpop.f32.mrf.mxu0  ;;  %v753_v19 = vpop.f32.mrf.mxu1 }
 0x13d   :  { %v846_v20 = vmax.f32 %v572_v16, 0.0  ;;  %v882_v21 = vmax.f32 %v752_v17, 0.0 }
 0x13e   :  { %v576_v22 = vpop.f32.mrf.mxu0  ;;  %v756_v23 = vpop.f32.mrf.mxu1 }
 0x13f   :  { %919 = vst.msk [vmem:[%s2067_s3 + $0xa8] sm:$0xff] %vm897_vm1, %v846_v20  ;;  %955 = vst.msk [vmem:[%s2067_s3 + $0x1c8] sm:$0xff] %vm897_vm1, %v882_v21  ;;  %v577_v24 = vadd.f32 %v1702_v35, %v576_v22  ;;  %v757_v25 = vadd.f32 %v1702_v35, %v756_v23 }
 0x140   :  { %v578_v26 = vpop.f32.mrf.mxu0  ;;  %v758_v27 = vpop.f32.mrf.mxu1 }
 0x141   :  { %v847_v28 = vmax.f32 %v577_v24, 0.0  ;;  %v883_v29 = vmax.f32 %v757_v25, 0.0 }
 0x142   :  { %v581_v30 = vpop.f32.mrf.mxu0  ;;  %v761_v31 = vpop.f32.mrf.mxu1 }
 0x143   :  { %920 = vst.msk [vmem:[%s2067_s3 + $0xb0] sm:$0xff] %vm897_vm1, %v847_v28  ;;  %956 = vst.msk [vmem:[%s2067_s3 + $0x1d0] sm:$0xff] %vm897_vm1, %v883_v29  ;;  %v582_v32 = vadd.f32 %v1702_v35, %v581_v30  ;;  %v762_v33 = vadd.f32 %v1702_v35, %v761_v31 }
 0x144   :  { %v583_v34 = vpop.f32.mrf.mxu0  ;;  %v763_v36 = vpop.f32.mrf.mxu1 }
 0x145   :  { %v848_v37 = vmax.f32 %v582_v32, 0.0  ;;  %v884_v38 = vmax.f32 %v762_v33, 0.0 }
 0x146   :  { %v586_v39 = vpop.f32.mrf.mxu0  ;;  %v766_v40 = vpop.f32.mrf.mxu1 }
 0x147   :  { %921 = vst.msk [vmem:[%s2067_s3 + $0xb8] sm:$0xff] %vm897_vm1, %v848_v37  ;;  %957 = vst.msk [vmem:[%s2067_s3 + $0x1d8] sm:$0xff] %vm897_vm1, %v884_v38  ;;  %v587_v41 = vadd.f32 %v1702_v35, %v586_v39  ;;  %v767_v42 = vadd.f32 %v1702_v35, %v766_v40 }
 0x148   :  { %v588_v43 = vpop.f32.mrf.mxu0  ;;  %v768_v44 = vpop.f32.mrf.mxu1 }
 0x149   :  { %v849_v45 = vmax.f32 %v587_v41, 0.0  ;;  %v885_v46 = vmax.f32 %v767_v42, 0.0 }
 0x14a   :  { %v591_v47 = vpop.f32.mrf.mxu0  ;;  %v771_v48 = vpop.f32.mrf.mxu1 }
 0x14b   :  { %922 = vst.msk [vmem:[%s2067_s3 + $0xc0] sm:$0xff] %vm897_vm1, %v849_v45  ;;  %958 = vst.msk [vmem:[%s2067_s3 + $0x1e0] sm:$0xff] %vm897_vm1, %v885_v46  ;;  %v592_v49 = vadd.f32 %v1702_v35, %v591_v47  ;;  %v772_v50 = vadd.f32 %v1702_v35, %v771_v48 }
 0x14c   :  { %v593_v51 = vpop.f32.mrf.mxu0  ;;  %v773_v52 = vpop.f32.mrf.mxu1 }
 0x14d   :  { %v850_v53 = vmax.f32 %v592_v49, 0.0  ;;  %v886_v54 = vmax.f32 %v772_v50, 0.0 }
 0x14e   :  { %v596_v55 = vpop.f32.mrf.mxu0  ;;  %v776_v56 = vpop.f32.mrf.mxu1 }
 0x14f   :  { %923 = vst.msk [vmem:[%s2067_s3 + $0xc8] sm:$0xff] %vm897_vm1, %v850_v53  ;;  %959 = vst.msk [vmem:[%s2067_s3 + $0x1e8] sm:$0xff] %vm897_vm1, %v886_v54  ;;  %v597_v57 = vadd.f32 %v1702_v35, %v596_v55  ;;  %v777_v58 = vadd.f32 %v1702_v35, %v776_v56 }
 0x150   :  { %v598_v59 = vpop.f32.mrf.mxu0  ;;  %v778_v60 = vpop.f32.mrf.mxu1 }
 0x151   :  { %v851_v61 = vmax.f32 %v597_v57, 0.0  ;;  %v887_v62 = vmax.f32 %v777_v58, 0.0 }
 0x152   :  { %v601_v63 = vpop.f32.mrf.mxu0  ;;  %v781_v0 = vpop.f32.mrf.mxu1 }
 0x153   :  { %924 = vst.msk [vmem:[%s2067_s3 + $0xd0] sm:$0xff] %vm897_vm1, %v851_v61  ;;  %960 = vst.msk [vmem:[%s2067_s3 + $0x1f0] sm:$0xff] %vm897_vm1, %v887_v62  ;;  %v602_v1 = vadd.f32 %v1702_v35, %v601_v63  ;;  %v782_v2 = vadd.f32 %v1702_v35, %v781_v0 }
 0x154   :  { %v603_v3 = vpop.f32.mrf.mxu0  ;;  %v783_v4 = vpop.f32.mrf.mxu1 }
 0x155   :  { %v852_v5 = vmax.f32 %v602_v1, 0.0  ;;  %v888_v6 = vmax.f32 %v782_v2, 0.0 }
 0x156   :  { %v606_v7 = vpop.f32.mrf.mxu0  ;;  %v786_v8 = vpop.f32.mrf.mxu1 }
 0x157   :  { %925 = vst.msk [vmem:[%s2067_s3 + $0xd8] sm:$0xff] %vm897_vm1, %v852_v5  ;;  %961 = vst.msk [vmem:[%s2067_s3 + $0x1f8] sm:$0xff] %vm897_vm1, %v888_v6  ;;  %v607_v9 = vadd.f32 %v1702_v35, %v606_v7  ;;  %v787_v10 = vadd.f32 %v1702_v35, %v786_v8 }
 0x158   :  { %v608_v11 = vpop.f32.mrf.mxu0  ;;  %v788_v12 = vpop.f32.mrf.mxu1 }
 0x159   :  { %v853_v13 = vmax.f32 %v607_v9, 0.0  ;;  %v889_v14 = vmax.f32 %v787_v10, 0.0 }
 0x15a   :  { %v611_v15 = vpop.f32.mrf.mxu0  ;;  %v791_v16 = vpop.f32.mrf.mxu1 }
 0x15b   :  { %926 = vst.msk [vmem:[%s2067_s3 + $0xe0] sm:$0xff] %vm897_vm1, %v853_v13  ;;  %962 = vst.msk [vmem:[%s2067_s3 + $0x200] sm:$0xff] %vm897_vm1, %v889_v14  ;;  %v612_v17 = vadd.f32 %v1702_v35, %v611_v15  ;;  %v792_v18 = vadd.f32 %v1702_v35, %v791_v16 }
 0x15c   :  { %v613_v19 = vpop.f32.mrf.mxu0  ;;  %v793_v20 = vpop.f32.mrf.mxu1 }
 0x15d   :  { %v854_v21 = vmax.f32 %v612_v17, 0.0  ;;  %v890_v22 = vmax.f32 %v792_v18, 0.0 }
 0x15e   :  { %v616_v23 = vpop.f32.mrf.mxu0  ;;  %v796_v24 = vpop.f32.mrf.mxu1 }
 0x15f   :  { %927 = vst.msk [vmem:[%s2067_s3 + $0xe8] sm:$0xff] %vm897_vm1, %v854_v21  ;;  %963 = vst.msk [vmem:[%s2067_s3 + $0x208] sm:$0xff] %vm897_vm1, %v890_v22  ;;  %v617_v25 = vadd.f32 %v1702_v35, %v616_v23  ;;  %v797_v26 = vadd.f32 %v1702_v35, %v796_v24 }
 0x160   :  { %v618_v27 = vpop.f32.mrf.mxu0  ;;  %v798_v28 = vpop.f32.mrf.mxu1 }
 0x161   :  { %v855_v29 = vmax.f32 %v617_v25, 0.0  ;;  %v891_v30 = vmax.f32 %v797_v26, 0.0 }
 0x162   :  { %v621_v31 = vpop.f32.mrf.mxu0  ;;  %v801_v32 = vpop.f32.mrf.mxu1 }
 0x163   :  { %928 = vst.msk [vmem:[%s2067_s3 + $0xf0] sm:$0xff] %vm897_vm1, %v855_v29  ;;  %964 = vst.msk [vmem:[%s2067_s3 + $0x210] sm:$0xff] %vm897_vm1, %v891_v30  ;;  %v622_v33 = vadd.f32 %v1702_v35, %v621_v31  ;;  %v802_v34 = vadd.f32 %v1702_v35, %v801_v32 }
 0x164   :  { %v623_v36 = vpop.f32.mrf.mxu0  ;;  %v803_v37 = vpop.f32.mrf.mxu1 }
 0x165   :  { %v856_v38 = vmax.f32 %v622_v33, 0.0  ;;  %v892_v39 = vmax.f32 %v802_v34, 0.0 }
 0x166   :  { %v626_v40 = vpop.f32.mrf.mxu0  ;;  %v806_v41 = vpop.f32.mrf.mxu1 }
 0x167   :  { %929 = vst.msk [vmem:[%s2067_s3 + $0xf8] sm:$0xff] %vm897_vm1, %v856_v38  ;;  %965 = vst.msk [vmem:[%s2067_s3 + $0x218] sm:$0xff] %vm897_vm1, %v892_v39  ;;  %v627_v42 = vadd.f32 %v1702_v35, %v626_v40  ;;  %v807_v43 = vadd.f32 %v1702_v35, %v806_v41 }
 0x168   :  { %v628_v44 = vpop.f32.mrf.mxu0  ;;  %v808_v45 = vpop.f32.mrf.mxu1 }
 0x169   :  { %v857_v46 = vmax.f32 %v627_v42, 0.0  ;;  %v893_v47 = vmax.f32 %v807_v43, 0.0 }
 0x16a   :  { %v631_v48 = vpop.f32.mrf.mxu0  ;;  %v811_v49 = vpop.f32.mrf.mxu1 }
 0x16b   :  { %930 = vst.msk [vmem:[%s2067_s3 + $0x100] sm:$0xff] %vm897_vm1, %v857_v46  ;;  %966 = vst.msk [vmem:[%s2067_s3 + $0x220] sm:$0xff] %vm897_vm1, %v893_v47  ;;  %v632_v50 = vadd.f32 %v1702_v35, %v631_v48  ;;  %v812_v51 = vadd.f32 %v1702_v35, %v811_v49 }
 0x16c   :  { %v633_v52 = vpop.f32.mrf.mxu0  ;;  %v813_v53 = vpop.f32.mrf.mxu1 }
 0x16d   :  { %v858_v54 = vmax.f32 %v632_v50, 0.0  ;;  %v894_v55 = vmax.f32 %v812_v51, 0.0 }
 0x16e   :  { %v636_v56 = vpop.f32.mrf.mxu0  ;;  %v816_v57 = vpop.f32.mrf.mxu1 }
 0x16f   :  { %931 = vst.msk [vmem:[%s2067_s3 + $0x108] sm:$0xff] %vm897_vm1, %v858_v54  ;;  %967 = vst.msk [vmem:[%s2067_s3 + $0x228] sm:$0xff] %vm897_vm1, %v894_v55  ;;  %v637_v58 = vadd.f32 %v1702_v35, %v636_v56  ;;  %v817_v59 = vadd.f32 %v1702_v35, %v816_v57 }
 0x170   :  { %v638_v60 = vpop.f32.mrf.mxu0  ;;  %v818_v61 = vpop.f32.mrf.mxu1 }
 0x171   :  { %v859_v62 = vmax.f32 %v637_v58, 0.0  ;;  %v895_v63 = vmax.f32 %v817_v59, 0.0 }
 0x172   :  { %v641_v0 = vpop.f32.mrf.mxu0  ;;  %v821_v1 = vpop.f32.mrf.mxu1 }
 0x173   :  { %932 = vst.msk [vmem:[%s2067_s3 + $0x110] sm:$0xff] %vm897_vm1, %v859_v62  ;;  %968 = vst.msk [vmem:[%s2067_s3 + $0x230] sm:$0xff] %vm897_vm1, %v895_v63  ;;  %v642_v2 = vadd.f32 %v1702_v35, %v641_v0  ;;  %v822_v3 = vadd.f32 %v1702_v35, %v821_v1 }
 0x174   :  { %v643_v4 = vpop.f32.mrf.mxu0  ;;  %v823_v5 = vpop.f32.mrf.mxu1 }
 0x175   :  { %v860_v6 = vmax.f32 %v642_v2, 0.0  ;;  %v896_v7 = vmax.f32 %v822_v3, 0.0 }
 0x177   :  { %933 = vst.msk [vmem:[%s2067_s3 + $0x118] sm:$0xff] %vm897_vm1, %v860_v6  ;;  %969 = vst.msk [vmem:[%s2067_s3 + $0x238] sm:$0xff] %vm897_vm1, %v896_v7 }

// kernel: categorical_dueling_drqn_forward.6
= control target key start
LH: loop header
LB: loop body
LE: loop exit
PB: predicated region body
PF: predicated region fallthrough
CT: control target
= control target key end

     0   :  { %vm81_vm0 = vcmask 261120   ;;  %s708_s1 = inlined_call_operand.vmem [shape: f32[288,32], index: 1, kind: input, shape index: {}]   ;;  %s709_s0 = inlined_call_operand.vmem [shape: f32[64,288], index: 0, kind: input, shape index: {}]   ;;  %s710_s2 = inlined_call_operand.vmem [shape: f32[1,32], index: 2, kind: input, shape index: {}]   ;;  %s711_s3 = inlined_call_operand.vmem [shape: f32[64,32], index: 3, kind: output, shape index: {}]  }
   0x1   :  { %v69_v0 = vld [vmem:[%s708_s1 + $0xf8] sm:$0xff]  ;;  %v68_v2 = vld [vmem:[%s708_s1 + $0xf0] sm:$0xff]  ;;  %v67_v4 = vld [vmem:[%s708_s1 + $0xe8] sm:$0xff] }
   0x2   :  { %v53_v1 = vld [vmem:[%s708_s1 + $0x78] sm:$0xff]  ;;  %345 = vmatprep.subr.mxu0 %v69_v0  ;;  %433 = vmatprep.subr.mxu1 %v69_v0  ;;  %v52_v3 = vld [vmem:[%s708_s1 + $0x70] sm:$0xff]  ;;  %v51_v5 = vld [vmem:[%s708_s1 + $0x68] sm:$0xff] }
   0x3   :  { %346 = vmatpush3.msra.mxu0 %v53_v1  ;;  %449 = vmatpush3.msra.mxu1 %v53_v1  ;;  %v66_v6 = vld [vmem:[%s708_s1 + $0xe0] sm:$0xff]  ;;  %v65_v8 = vld [vmem:[%s708_s1 + $0xd8] sm:$0xff]  ;;  %v64_v10 = vld [vmem:[%s708_s1 + $0xd0] sm:$0xff] }
   0x4   :  { %347 = vmatprep.subr.mxu0 %v68_v2  ;;  %434 = vmatprep.subr.mxu1 %v68_v2  ;;  %v50_v7 = vld [vmem:[%s708_s1 + $0x60] sm:$0xff]  ;;  %v49_v9 = vld [vmem:[%s708_s1 + $0x58] sm:$0xff]  ;;  %v48_v11 = vld [vmem:[%s708_s1 + $0x50] sm:$0xff] }
   0x5   :  { %348 = vmatpush3.msra.mxu0 %v52_v3  ;;  %450 = vmatpush3.msra.mxu1 %v52_v3  ;;  %v63_v12 = vld [vmem:[%s708_s1 + $0xc8] sm:$0xff]  ;;  %v62_v14 = vld [vmem:[%s708_s1 + $0xc0] sm:$0xff]  ;;  %v61_v16 = vld [vmem:[%s708_s1 + $0xb8] sm:$0xff] }
   0x6   :  { %349 = vmatprep.subr.mxu0 %v67_v4  ;;  %435 = vmatprep.subr.mxu1 %v67_v4  ;;  %v47_v13 = vld [vmem:[%s708_s1 + $0x48] sm:$0xff]  ;;  %v46_v15 = vld [vmem:[%s708_s1 + $0x40] sm:$0xff]  ;;  %v45_v17 = vld [vmem:[%s708_s1 + $0x38] sm:$0xff] }
   0x7   :  { %350 = vmatpush3.msra.mxu0 %v51_v5  ;;  %451 = vmatpush3.msra.mxu1 %v51_v5  ;;  %v60_v18 = vld [vmem:[%s708_s1 + $0xb0] sm:$0xff]  ;;  %v59_v20 = vld [vmem:[%s708_s1 + $0xa8] sm:$0xff]  ;;  %v58_v22 = vld [vmem:[%s708_s1 + $0xa0] sm:$0xff] }
   0x8   :  { %351 = vmatprep.subr.mxu0 %v66_v6  ;;  %436 = vmatprep.subr.mxu1 %v66_v6  ;;  %v44_v19 = vld [vmem:[%s708_s1 + $0x30] sm:$0xff]  ;;  %v43_v21 = vld [vmem:[%s708_s1 + $0x28] sm:$0xff]  ;;  %v42_v23 = vld [vmem:[%s708_s1 + $0x20] sm:$0xff] }
   0x9   :  { %352 = vmatpush3.msra.mxu0 %v50_v7  ;;  %452 = vmatpush3.msra.mxu1 %v50_v7  ;;  %v57_v24 = vld [vmem:[%s708_s1 + $0x98] sm:$0xff]  ;;  %v56_v26 = vld [vmem:[%s708_s1 + $0x90] sm:$0xff]  ;;  %v55_v28 = vld [vmem:[%s708_s1 + $0x88] sm:$0xff] }
   0xa   :  { %353 = vmatprep.subr.mxu0 %v65_v8  ;;  %437 = vmatprep.subr.mxu1 %v65_v8  ;;  %v41_v25 = vld [vmem:[%s708_s1 + $0x18] sm:$0xff]  ;;  %v40_v27 = vld [vmem:[%s708_s1 + $0x10] sm:$0xff]  ;;  %v39_v29 = vld [vmem:[%s708_s1 + $0x8] sm:$0xff] }
   0xb   :  { %354 = vmatpush3.msra.mxu0 %v49_v9  ;;  %453 = vmatpush3.msra.mxu1 %v49_v9  ;;  %v54_v30 = vld [vmem:[%s708_s1 + $0x80] sm:$0xff]  ;;  %v15_v32 = vld [vmem:[%s709_s0 + $0x8] sm:$0xff]  ;;  %v33_v33 = vld [vmem:[%s709_s0 + $0x98] sm:$0xff] }
   0xc   :  { %355 = vmatprep.subr.mxu0 %v64_v10  ;;  %438 = vmatprep.subr.mxu1 %v64_v10  ;;  %v38_v31 = vld [vmem:[%s708_s1] sm:$0xff]  ;;  %v32_v35 = vld [vmem:[%s709_s0 + $0x90] sm:$0xff]  ;;  %v73_v36 = vld [vmem:[%s708_s1 + $0x118] sm:$0xff] }
   0xd   :  { %356 = vmatpush3.msra.mxu0 %v48_v11  ;;  %454 = vmatpush3.msra.mxu1 %v48_v11  ;;  %v14_v34 = vld [vmem:[%s709_s0] sm:$0xff]  ;;  %v36_v38 = vld [vmem:[%s709_s0 + $0xb0] sm:$0xff]  ;;  %v17_v40 = vld [vmem:[%s709_s0 + $0x18] sm:$0xff] }
   0xe   :  { %357 = vmatprep.subr.mxu0 %v63_v12  ;;  %439 = vmatprep.subr.mxu1 %v63_v12  ;;  %v18_v37 = vld [vmem:[%s709_s0 + $0x20] sm:$0xff]  ;;  %v72_v39 = vld [vmem:[%s708_s1 + $0x110] sm:$0xff]  ;;  %v35_v41 = vld [vmem:[%s709_s0 + $0xa8] sm:$0xff] }
   0xf   :  { %358 = vmatpush3.msra.mxu0 %v47_v13  ;;  %455 = vmatpush3.msra.mxu1 %v47_v13  ;;  %v71_v42 = vld [vmem:[%s708_s1 + $0x108] sm:$0xff]  ;;  %v21_v43 = vld [vmem:[%s709_s0 + $0x38] sm:$0xff]  ;;  %v70_v44 = vld [vmem:[%s708_s1 + $0x100] sm:$0xff] }
  0x10   :  { %359 = vmatprep.subr.mxu0 %v62_v14  ;;  %440 = vmatprep.subr.mxu1 %v62_v14  ;;  %v16_v45 = vld [vmem:[%s709_s0 + $0x10] sm:$0xff]  ;;  %v19_v47 = vld [vmem:[%s709_s0 + $0x28] sm:$0xff]  ;;  %v22_v49 = vld [vmem:[%s709_s0 + $0x40] sm:$0xff] }
  0x11   :  { %360 = vmatpush3.msra.mxu0 %v46_v15  ;;  %456 = vmatpush3.msra.mxu1 %v46_v15  ;;  %v20_v46 = vld [vmem:[%s709_s0 + $0x30] sm:$0xff]  ;;  %v23_v50 = vld [vmem:[%s709_s0 + $0x48] sm:$0xff]  ;;  %v25_v51 = vld [vmem:[%s709_s0 + $0x58] sm:$0xff] }
  0x12   :  { %361 = vmatprep.subr.mxu0 %v61_v16  ;;  %441 = vmatprep.subr.mxu1 %v61_v16  ;;  %v24_v48 = vld [vmem:[%s709_s0 + $0x50] sm:$0xff]  ;;  %v27_v52 = vld [vmem:[%s709_s0 + $0x68] sm:$0xff]  ;;  %v26_v54 = vld [vmem:[%s709_s0 + $0x60] sm:$0xff] }
  0x13   :  { %362 = vmatpush3.msra.mxu0 %v45_v17  ;;  %457 = vmatpush3.msra.mxu1 %v45_v17  ;;  %v28_v53 = vld [vmem:[%s709_s0 + $0x70] sm:$0xff]  ;;  %v31_v55 = vld [vmem:[%s709_s0 + $0x88] sm:$0xff]  ;;  %v30_v56 = vld [vmem:[%s709_s0 + $0x80] sm:$0xff] }
  0x14   :  { %363 = vmatprep.subr.mxu0 %v60_v18  ;;  %442 = vmatprep.subr.mxu1 %v60_v18  ;;  %v34_v57 = vld [vmem:[%s709_s0 + $0xa0] sm:$0xff]  ;;  %v29_v58 = vld [vmem:[%s709_s0 + $0x78] sm:$0xff] }
  0x15   :  { %364 = vmatpush3.msra.mxu0 %v44_v19  ;;  %458 = vmatpush3.msra.mxu1 %v44_v19  ;;  %v37_v59 = vld [vmem:[%s709_s0 + $0xb8] sm:$0xff]  ;;  %v336_v6 = vld [vmem:[%s710_s2] ss:$0 sm:$0xff] }
  0x16   :  { %365 = vmatprep.subr.mxu0 %v59_v20  ;;  %443 = vmatprep.subr.mxu1 %v59_v20 }
  0x17   :  { %366 = vmatpush3.msra.mxu0 %v43_v21  ;;  %459 = vmatpush3.msra.mxu1 %v43_v21 }
  0x18   :  { %367 = vmatprep.subr.mxu0 %v58_v22  ;;  %444 = vmatprep.subr.mxu1 %v58_v22 }
  0x19   :  { %368 = vmatpush3.msra.mxu0 %v42_v23  ;;  %460 = vmatpush3.msra.mxu1 %v42_v23 }
  0x1a   :  { %369 = vmatprep.subr.mxu0 %v57_v24  ;;  %445 = vmatprep.subr.mxu1 %v57_v24 }
  0x1b   :  { %370 = vmatpush3.msra.mxu0 %v41_v25  ;;  %461 = vmatpush3.msra.mxu1 %v41_v25 }
  0x1c   :  { %371 = vmatprep.subr.mxu0 %v56_v26  ;;  %446 = vmatprep.subr.mxu1 %v56_v26 }
  0x1d   :  { %372 = vmatpush3.msra.mxu0 %v40_v27  ;;  %462 = vmatpush3.msra.mxu1 %v40_v27 }
  0x1e   :  { %373 = vmatprep.subr.mxu0 %v55_v28  ;;  %447 = vmatprep.subr.mxu1 %v55_v28 }
  0x1f   :  { %374 = vmatpush3.msra.mxu0 %v39_v29  ;;  %463 = vmatpush3.msra.mxu1 %v39_v29 }
  0x20   :  { %375 = vmatprep.subr.mxu0 %v54_v30  ;;  %448 = vmatprep.subr.mxu1 %v54_v30 }
  0x21   :  { %376 = vmatpush3.msra.mxu0 %v38_v31  ;;  %464 = vmatpush3.msra.mxu1 %v38_v31 }
  0x22   :  { %170 = vmatprep.mubr.f32.mxu0 %v15_v32  ;;  %200 = vmatprep.mubr.f32.mxu1 %v33_v33 }
  0x23   :  { %171 = vmatmul.mubr.f32.vlgmr.msra.gmra.mxu0 %v14_v34  ;;  %201 = vmatmul.mubr.f32.vlgmr.msra.gmra.mxu1 %v32_v35 }
  0x24   :  { %413 = vmatprep.subr.mxu1 %v73_v36  ;;  %175 = vmatprep.mubr.f32.mxu0 %v18_v37 }
  0x25   :  { %414 = vmatpush3.msra.mxu1 %v73_v36  ;;  %205 = vmatprep.mubr.f32.mxu1 %v36_v38 }
  0x26   :  { %415 = vmatprep.subr.mxu1 %v72_v39 }
  0x27   :  { %416 = vmatpush3.msra.mxu1 %v72_v39  ;;  %176 = vmatmul.mubr.f32.gmra.mxu0 %v17_v40 }
  0x28   :  { %206 = vmatmul.mubr.f32.gmra.mxu1 %v35_v41  ;;  %417 = vmatprep.subr.mxu1 %v71_v42 }
  0x29   :  { %418 = vmatpush3.msra.mxu1 %v71_v42  ;;  %180 = vmatprep.mubr.f32.mxu0 %v21_v43 }
  0x2a   :  { %419 = vmatprep.subr.mxu1 %v70_v44  ;;  %421 = vmatprep.mubr.msk.f32.mxu1 %vm81_vm0, %v16_v45 }
  0x2b   :  { %420 = vmatpush3.msra.mxu1 %v70_v44  ;;  %181 = vmatmul.mubr.f32.gmra.mxu0 %v20_v46 }
  0x2c   :  { %422 = vmatmul.mubr.msk.f32.vlgmr.msra.gmra.mxu1 %vm81_vm0, %v19_v47  ;;  %185 = vmatprep.mubr.f32.mxu0 %v24_v48 }
  0x2d   :  { %424 = vmatprep.mubr.msk.f32.mxu1 %vm81_vm0, %v22_v49 }
  0x2f   :  { %186 = vmatmul.mubr.f32.gmra.mxu0 %v23_v50 }
  0x30   :  { %425 = vmatmul.mubr.msk.f32.gmra.mxu1 %vm81_vm0, %v25_v51  ;;  %190 = vmatprep.mubr.f32.mxu0 %v27_v52 }
  0x31   :  { %427 = vmatprep.mubr.msk.f32.mxu1 %vm81_vm0, %v28_v53 }
  0x33   :  { %191 = vmatmul.mubr.f32.gmra.mxu0 %v26_v54 }
  0x34   :  { %428 = vmatmul.mubr.msk.f32.gmra.mxu1 %vm81_vm0, %v31_v55  ;;  %195 = vmatprep.mubr.f32.mxu0 %v30_v56 }
  0x35   :  { %430 = vmatprep.mubr.msk.f32.mxu1 %vm81_vm0, %v34_v57 }
  0x37   :  { %196 = vmatmul.mubr.f32.gmra.mxu0 %v29_v58 }
  0x38   :  { %431 = vmatmul.mubr.msk.f32.gmra.mxu1 %vm81_vm0, %v37_v59 }
  0xe3   :  { %v377_v60 = vpop.f32.mrf.mxu0  ;;  %v395_v61 = vpop.f32.mrf.mxu1 }
  0xe5   :  { %v378_v62 = vpop.f32.mrf.mxu0  ;;  %v396_v63 = vpop.f32.mrf.mxu1 }
  0xe6   :  { %v379_v2 = vadd.f32 %v378_v62, %v377_v60  ;;  %v397_v29 = vadd.f32 %v396_v63, %v395_v61 }
  0xe7   :  { %v380_v0 = vpop.f32.mrf.mxu0 }
  0xe8   :  { %v398_v1 = vpop.f32.mrf.mxu1  ;;  %v173_v11 = vadd.f32 %v379_v2, %v336_v6  ;;  %v203_v42 = vadd.f32 %v397_v29, %v336_v6 }
  0xe9   :  { %v381_v3 = vpop.f32.mrf.mxu0 }
  0xea   :  { %v382_v4 = vadd.f32 %v381_v3, %v380_v0  ;;  %v399_v5 = vpop.f32.mrf.mxu1 }
  0xeb   :  { %v383_v7 = vpop.f32.mrf.mxu0  ;;  %v400_v24 = vadd.f32 %v399_v5, %v398_v1 }
  0xec   :  { %v178_v8 = vadd.f32 %v382_v4, %v336_v6  ;;  %v423_v9 = vpop.f32.mrf.mxu1 }
  0xed   :  { %v384_v10 = vpop.f32.mrf.mxu0  ;;  %v208_v36 = vadd.f32 %v400_v24, %v336_v6 }
  0xee   :  { %v283_v12 = vadd.f32 %v423_v9, %v178_v8  ;;  %v385_v13 = vadd.f32 %v384_v10, %v383_v7  ;;  %v277_v14 = vpop.f32.mrf.mxu1 }
  0xef   :  { %v278_v15 = vadd.f32 %v277_v14, %v173_v11  ;;  %v386_v16 = vpop.f32.mrf.mxu0 }
  0xf0   :  { %v317_v17 = vmax.f32 %v283_v12, 0.0  ;;  %v426_v18 = vpop.f32.mrf.mxu1  ;;  %v183_v19 = vadd.f32 %v385_v13, %v336_v6 }
  0xf1   :  { %v316_v20 = vmax.f32 %v278_v15, 0.0  ;;  %v387_v21 = vpop.f32.mrf.mxu0 }
  0xf2   :  { %325 = vst.msk [vmem:[%s711_s3 + $0x8] sm:$0xff] %vm81_vm0, %v317_v17  ;;  %v388_v22 = vadd.f32 %v387_v21, %v386_v16  ;;  %v287_v23 = vpop.f32.mrf.mxu1 }
  0xf3   :  { %324 = vst.msk [vmem:[%s711_s3] sm:$0xff] %vm81_vm0, %v316_v20  ;;  %v288_v25 = vadd.f32 %v287_v23, %v183_v19  ;;  %v389_v26 = vpop.f32.mrf.mxu0 }
  0xf4   :  { %v188_v27 = vadd.f32 %v388_v22, %v336_v6  ;;  %v429_v28 = vpop.f32.mrf.mxu1 }
  0xf5   :  { %v318_v30 = vmax.f32 %v288_v25, 0.0  ;;  %v390_v31 = vpop.f32.mrf.mxu0 }
  0xf6   :  { %v293_v32 = vadd.f32 %v426_v18, %v188_v27  ;;  %v391_v33 = vadd.f32 %v390_v31, %v389_v26  ;;  %v297_v34 = vpop.f32.mrf.mxu1 }
  0xf7   :  { %326 = vst.msk [vmem:[%s711_s3 + $0x10] sm:$0xff] %vm81_vm0, %v318_v30  ;;  %v392_v35 = vpop.f32.mrf.mxu0 }
  0xf8   :  { %v319_v37 = vmax.f32 %v293_v32, 0.0  ;;  %v193_v38 = vadd.f32 %v391_v33, %v336_v6  ;;  %v432_v39 = vpop.f32.mrf.mxu1 }
  0xf9   :  { %v313_v40 = vadd.f32 %v432_v39, %v208_v36  ;;  %v393_v41 = vpop.f32.mrf.mxu0 }
  0xfa   :  { %327 = vst.msk [vmem:[%s711_s3 + $0x18] sm:$0xff] %vm81_vm0, %v319_v37  ;;  %v298_v43 = vadd.f32 %v297_v34, %v193_v38  ;;  %v394_v44 = vadd.f32 %v393_v41, %v392_v35  ;;  %v307_v45 = vpop.f32.mrf.mxu1 }
  0xfb   :  { %v323_v46 = vmax.f32 %v313_v40, 0.0  ;;  %v308_v47 = vadd.f32 %v307_v45, %v203_v42 }
  0xfc   :  { %v320_v48 = vmax.f32 %v298_v43, 0.0  ;;  %v198_v49 = vadd.f32 %v394_v44, %v336_v6 }
  0xfd   :  { %331 = vst.msk [vmem:[%s711_s3 + $0x38] sm:$0xff] %vm81_vm0, %v323_v46  ;;  %v322_v50 = vmax.f32 %v308_v47, 0.0 }
  0xfe   :  { %328 = vst.msk [vmem:[%s711_s3 + $0x20] sm:$0xff] %vm81_vm0, %v320_v48  ;;  %v303_v51 = vadd.f32 %v429_v28, %v198_v49 }
  0xff   :  { %330 = vst.msk [vmem:[%s711_s3 + $0x30] sm:$0xff] %vm81_vm0, %v322_v50 }
 0x100   :  { %v321_v52 = vmax.f32 %v303_v51, 0.0 }
 0x102   :  { %329 = vst.msk [vmem:[%s711_s3 + $0x28] sm:$0xff] %vm81_vm0, %v321_v52 }

// kernel: categorical_dueling_drqn_forward.7
= control target key start
LH: loop header
LB: loop body
LE: loop exit
PB: predicated region body
PF: predicated region fallthrough
CT: control target
= control target key end

     0   :  { %v5700_v3 = vmov 0.0   ;;  %vm3428_vm0 = vmmov 0   ;;  %s3429_s23 = smov 96   ;;  %vm2029_vm1 = vcmask 130048   ;;  %s3433_s16 = smov 16   ;;  %vm2262_vm2 = vcmask 261248   ;;  %s5690_s2 = inlined_call_operand.vmem [shape: f32[128,384], index: 2, kind: input, shape index: {}]   ;;  %s5691_s4 = inlined_call_operand.vmem [shape: f32[128,384], index: 4, kind: input, shape index: {}]   ;;  %s5692_s0 = inlined_call_operand.vmem [shape: f32[64,128], index: 0, kind: input, shape index: {}]   ;;  %s5693_s1 = inlined_call_operand.vmem [shape: f32[1,8,128], index: 1, kind: input, shape index: {}]   ;;  %s5694_s3 = inlined_call_operand.vmem [shape: f32[1,384], index: 3, kind: input, shape index: {}]   ;;  %s5695_s5 = inlined_call_operand.vmem [shape: f32[1,384], index: 5, kind: input, shape index: {}]   ;;  %s5696_s6 = inlined_call_operand.vmem [shape: f32[128,80], index: 6, kind: input, shape index: {}]   ;;  %s5697_s7 = inlined_call_operand.vmem [shape: f32[1,80], index: 7, kind: input, shape index: {}]   ;;  %s5698_s9 = inlined_call_operand.vmem [shape: f32[1,8,128], index: 9, kind: output, shape index: {1}]   ;;  %s5699_s8 = inlined_call_operand.vmem [shape: f32[64,64], index: 8, kind: output, shape index: {0}]  }
   0x1   :  { %v85_v0 = vld [vmem:[%s5690_s2 + $0x170] sm:$0xff]  ;;  %v84_v2 = vld [vmem:[%s5690_s2 + $0x168] sm:$0xff]  ;;  %168 = vmatprep.mubr.f32.mxu1 %v5700_v3  ;;  %479 = vmatprep.mubr.f32.mxu0 %v5700_v3  ;;  %v82_v5 = vld [vmem:[%s5690_s2 + $0x158] sm:$0xff]  ;;  %s3435_s17 = smov 48   ;;  %vm2407_vm3 = vcmask 392448   ;;  %vm2576_vm4 = vcmask 523648  }
   0x2   :  { %v3492_v1 = vld [vmem:[%s5691_s4 + $0x170] sm:$0xff]  ;;  %104 = vmatprep.subr.mxu1 %v85_v0  ;;  %v3503_v4 = vld [vmem:[%s5691_s4 + $0x168] sm:$0xff]  ;;  %v3511_v6 = vld [vmem:[%s5691_s4 + $0x158] sm:$0xff] }
   0x3   :  { %5748 = vst [vmem:[#allocation4_spill] sm:$0xff] %v3492_v1  ;;  %415 = vmatprep.subr.mxu0 %v3492_v1  ;;  %105 = vmatpush1.msra.mxu1 %v84_v2  ;;  %v81_v7 = vld [vmem:[%s5690_s2 + $0x150] sm:$0xff]  ;;  %v79_v9 = vld [vmem:[%s5690_s2 + $0x140] sm:$0xff]  ;;  %v78_v11 = vld [vmem:[%s5690_s2 + $0x138] sm:$0xff] }
   0x4   :  { %416 = vmatpush1.msra.mxu0 %v3503_v4  ;;  %v3520_v8 = vld [vmem:[%s5691_s4 + $0x150] sm:$0xff]  ;;  %106 = vmatprep.subr.mxu1 %v82_v5  ;;  %v3529_v10 = vld [vmem:[%s5691_s4 + $0x140] sm:$0xff]  ;;  %v3537_v12 = vld [vmem:[%s5691_s4 + $0x138] sm:$0xff] }
   0x5   :  { %417 = vmatprep.subr.mxu0 %v3511_v6  ;;  %107 = vmatpush1.msra.mxu1 %v81_v7  ;;  %v76_v13 = vld [vmem:[%s5690_s2 + $0x128] sm:$0xff]  ;;  %v75_v15 = vld [vmem:[%s5690_s2 + $0x120] sm:$0xff]  ;;  %v73_v17 = vld [vmem:[%s5690_s2 + $0x110] sm:$0xff] }
   0x6   :  { %418 = vmatpush1.msra.mxu0 %v3520_v8  ;;  %v3546_v14 = vld [vmem:[%s5691_s4 + $0x128] sm:$0xff]  ;;  %108 = vmatprep.subr.mxu1 %v79_v9  ;;  %v3555_v16 = vld [vmem:[%s5691_s4 + $0x120] sm:$0xff]  ;;  %v3564_v18 = vld [vmem:[%s5691_s4 + $0x110] sm:$0xff] }
   0x7   :  { %419 = vmatprep.subr.mxu0 %v3529_v10  ;;  %109 = vmatpush1.msra.mxu1 %v78_v11  ;;  %v72_v19 = vld [vmem:[%s5690_s2 + $0x108] sm:$0xff]  ;;  %v70_v21 = vld [vmem:[%s5690_s2 + $0xf8] sm:$0xff]  ;;  %v69_v23 = vld [vmem:[%s5690_s2 + $0xf0] sm:$0xff] }
   0x8   :  { %420 = vmatpush1.msra.mxu0 %v3537_v12  ;;  %110 = vmatprep.subr.mxu1 %v76_v13  ;;  %v3573_v20 = vld [vmem:[%s5691_s4 + $0x108] sm:$0xff]  ;;  %v3582_v22 = vld [vmem:[%s5691_s4 + $0xf8] sm:$0xff]  ;;  %v3591_v24 = vld [vmem:[%s5691_s4 + $0xf0] sm:$0xff] }
   0x9   :  { %421 = vmatprep.subr.mxu0 %v3546_v14  ;;  %111 = vmatpush1.msra.mxu1 %v75_v15  ;;  %v67_v25 = vld [vmem:[%s5690_s2 + $0xe0] sm:$0xff]  ;;  %v66_v27 = vld [vmem:[%s5690_s2 + $0xd8] sm:$0xff]  ;;  %v64_v29 = vld [vmem:[%s5690_s2 + $0xc8] sm:$0xff] }
   0xa   :  { %422 = vmatpush1.msra.mxu0 %v3555_v16  ;;  %112 = vmatprep.subr.mxu1 %v73_v17  ;;  %v3600_v26 = vld [vmem:[%s5691_s4 + $0xe0] sm:$0xff]  ;;  %v3609_v28 = vld [vmem:[%s5691_s4 + $0xd8] sm:$0xff]  ;;  %v3618_v30 = vld [vmem:[%s5691_s4 + $0xc8] sm:$0xff] }
   0xb   :  { %423 = vmatprep.subr.mxu0 %v3564_v18  ;;  %113 = vmatpush1.msra.mxu1 %v72_v19  ;;  %v63_v31 = vld [vmem:[%s5690_s2 + $0xc0] sm:$0xff]  ;;  %v61_v33 = vld [vmem:[%s5690_s2 + $0xb0] sm:$0xff]  ;;  %v60_v35 = vld [vmem:[%s5690_s2 + $0xa8] sm:$0xff] }
   0xc   :  { %424 = vmatpush1.msra.mxu0 %v3573_v20  ;;  %114 = vmatprep.subr.mxu1 %v70_v21  ;;  %v3627_v32 = vld [vmem:[%s5691_s4 + $0xc0] sm:$0xff]  ;;  %v3636_v34 = vld [vmem:[%s5691_s4 + $0xb0] sm:$0xff]  ;;  %v3645_v36 = vld [vmem:[%s5691_s4 + $0xa8] sm:$0xff] }
   0xd   :  { %425 = vmatprep.subr.mxu0 %v3582_v22  ;;  %115 = vmatpush1.msra.mxu1 %v69_v23  ;;  %v58_v37 = vld [vmem:[%s5690_s2 + $0x98] sm:$0xff]  ;;  %v57_v39 = vld [vmem:[%s5690_s2 + $0x90] sm:$0xff]  ;;  %v55_v41 = vld [vmem:[%s5690_s2 + $0x80] sm:$0xff] }
   0xe   :  { %426 = vmatpush1.msra.mxu0 %v3591_v24  ;;  %116 = vmatprep.subr.mxu1 %v67_v25  ;;  %v3654_v38 = vld [vmem:[%s5691_s4 + $0x98] sm:$0xff]  ;;  %v3663_v40 = vld [vmem:[%s5691_s4 + $0x90] sm:$0xff]  ;;  %v3672_v42 = vld [vmem:[%s5691_s4 + $0x80] sm:$0xff] }
   0xf   :  { %427 = vmatprep.subr.mxu0 %v3600_v26  ;;  %117 = vmatpush1.msra.mxu1 %v66_v27  ;;  %v54_v43 = vld [vmem:[%s5690_s2 + $0x78] sm:$0xff]  ;;  %v52_v45 = vld [vmem:[%s5690_s2 + $0x68] sm:$0xff]  ;;  %v51_v47 = vld [vmem:[%s5690_s2 + $0x60] sm:$0xff] }
  0x10   :  { %428 = vmatpush1.msra.mxu0 %v3609_v28  ;;  %118 = vmatprep.subr.mxu1 %v64_v29  ;;  %v3681_v44 = vld [vmem:[%s5691_s4 + $0x78] sm:$0xff]  ;;  %v3690_v46 = vld [vmem:[%s5691_s4 + $0x68] sm:$0xff]  ;;  %v3699_v48 = vld [vmem:[%s5691_s4 + $0x60] sm:$0xff] }
  0x11   :  { %429 = vmatprep.subr.mxu0 %v3618_v30  ;;  %119 = vmatpush1.msra.mxu1 %v63_v31  ;;  %v49_v49 = vld [vmem:[%s5690_s2 + $0x50] sm:$0xff]  ;;  %v48_v51 = vld [vmem:[%s5690_s2 + $0x48] sm:$0xff]  ;;  %v46_v53 = vld [vmem:[%s5690_s2 + $0x38] sm:$0xff] }
  0x12   :  { %430 = vmatpush1.msra.mxu0 %v3627_v32  ;;  %120 = vmatprep.subr.mxu1 %v61_v33  ;;  %v3708_v50 = vld [vmem:[%s5691_s4 + $0x50] sm:$0xff]  ;;  %v3717_v52 = vld [vmem:[%s5691_s4 + $0x48] sm:$0xff]  ;;  %v3726_v54 = vld [vmem:[%s5691_s4 + $0x38] sm:$0xff] }
  0x13   :  { %431 = vmatprep.subr.mxu0 %v3636_v34  ;;  %121 = vmatpush1.msra.mxu1 %v60_v35  ;;  %5749 = vst [vmem:[#allocation5_spill] sm:$0xff] %v3726_v54  ;;  %v45_v55 = vld [vmem:[%s5690_s2 + $0x30] sm:$0xff]  ;;  %v43_v57 = vld [vmem:[%s5690_s2 + $0x20] sm:$0xff]  ;;  %v42_v59 = vld [vmem:[%s5690_s2 + $0x18] sm:$0xff] }
  0x14   :  { %432 = vmatpush1.msra.mxu0 %v3645_v36  ;;  %122 = vmatprep.subr.mxu1 %v58_v37  ;;  %v3735_v56 = vld [vmem:[%s5691_s4 + $0x30] sm:$0xff]  ;;  %v3744_v58 = vld [vmem:[%s5691_s4 + $0x20] sm:$0xff]  ;;  %v3753_v60 = vld [vmem:[%s5691_s4 + $0x18] sm:$0xff] }
  0x15   :  { %433 = vmatprep.subr.mxu0 %v3654_v38  ;;  %123 = vmatpush1.msra.mxu1 %v57_v39  ;;  %5750 = vst [vmem:[#allocation6_spill] sm:$0xff] %v3735_v56  ;;  %5751 = vst [vmem:[#allocation7_spill] sm:$0xff] %v3744_v58  ;;  %v40_v61 = vld [vmem:[%s5690_s2 + $0x8] sm:$0xff]  ;;  %v39_v63 = vld [vmem:[%s5690_s2] sm:$0xff] }
  0x16   :  { %434 = vmatpush1.msra.mxu0 %v3663_v40  ;;  %124 = vmatprep.subr.mxu1 %v55_v41  ;;  %5752 = vst [vmem:[#allocation8_spill] sm:$0xff] %v3753_v60  ;;  %v3762_v62 = vld [vmem:[%s5691_s4 + $0x8] sm:$0xff]  ;;  %v3771_v0 = vld [vmem:[%s5691_s4] sm:$0xff]  ;;  %v86_v5 = vld [vmem:[%s5690_s2 + $0x178] sm:$0xff] }
  0x17   :  { %435 = vmatprep.subr.mxu0 %v3672_v42  ;;  %125 = vmatpush1.msra.mxu1 %v54_v43  ;;  %5753 = vst [vmem:[#allocation9_spill] sm:$0xff] %v3762_v62  ;;  %5754 = vst [vmem:[#allocation10_spill] sm:$0xff] %v3771_v0  ;;  %v3777_v2 = vld [vmem:[%s5692_s0] sm:$0xff]  ;;  %v3797_v11 = vld [vmem:[%s5692_s0 + $0x8] sm:$0xff] }
  0x18   :  { %436 = vmatpush1.msra.mxu0 %v3681_v44  ;;  %126 = vmatprep.subr.mxu1 %v52_v45  ;;  %v3786_v7 = vld [vmem:[%s5693_s1] sm:$0xff]  ;;  %v80_v13 = vld [vmem:[%s5690_s2 + $0x148] sm:$0xff]  ;;  %v77_v15 = vld [vmem:[%s5690_s2 + $0x130] sm:$0xff] }
  0x19   :  { %437 = vmatprep.subr.mxu0 %v3690_v46  ;;  %127 = vmatpush1.msra.mxu1 %v51_v47  ;;  %v83_v9 = vld [vmem:[%s5690_s2 + $0x160] sm:$0xff]  ;;  %v3812_v17 = vld [vmem:[%s5692_s0 + $0x10] sm:$0xff]  ;;  %v74_v19 = vld [vmem:[%s5690_s2 + $0x118] sm:$0xff] }
  0x1a   :  { %438 = vmatpush1.msra.mxu0 %v3699_v48  ;;  %128 = vmatprep.subr.mxu1 %v49_v49  ;;  %v71_v21 = vld [vmem:[%s5690_s2 + $0x100] sm:$0xff]  ;;  %v3827_v23 = vld [vmem:[%s5692_s0 + $0x18] sm:$0xff]  ;;  %v68_v25 = vld [vmem:[%s5690_s2 + $0xe8] sm:$0xff] }
  0x1b   :  { %439 = vmatprep.subr.mxu0 %v3708_v50  ;;  %129 = vmatpush1.msra.mxu1 %v48_v51  ;;  %v65_v27 = vld [vmem:[%s5690_s2 + $0xd0] sm:$0xff]  ;;  %v35_v29 = vld [vmem:[%s5692_s0 + $0x20] sm:$0xff]  ;;  %v62_v31 = vld [vmem:[%s5690_s2 + $0xb8] sm:$0xff] }
  0x1c   :  { %440 = vmatpush1.msra.mxu0 %v3717_v52  ;;  %130 = vmatprep.subr.mxu1 %v46_v53  ;;  %v59_v33 = vld [vmem:[%s5690_s2 + $0xa0] sm:$0xff]  ;;  %v36_v35 = vld [vmem:[%s5692_s0 + $0x28] sm:$0xff]  ;;  %v53_v39 = vld [vmem:[%s5690_s2 + $0x70] sm:$0xff] }
  0x1d   :  { %441 = vmatprep.subr.mxu0 %v3726_v54  ;;  %131 = vmatpush1.msra.mxu1 %v45_v55  ;;  %v56_v37 = vld [vmem:[%s5690_s2 + $0x88] sm:$0xff]  ;;  %v37_v41 = vld [vmem:[%s5692_s0 + $0x30] sm:$0xff]  ;;  %v50_v43 = vld [vmem:[%s5690_s2 + $0x58] sm:$0xff] }
  0x1e   :  { %442 = vmatpush1.msra.mxu0 %v3735_v56  ;;  %132 = vmatprep.subr.mxu1 %v43_v57  ;;  %v47_v45 = vld [vmem:[%s5690_s2 + $0x40] sm:$0xff]  ;;  %v38_v47 = vld [vmem:[%s5692_s0 + $0x38] sm:$0xff]  ;;  %v44_v49 = vld [vmem:[%s5690_s2 + $0x28] sm:$0xff]  ;;  %s3434_s0 = smov 32  }
  0x1f   :  { %443 = vmatprep.subr.mxu0 %v3744_v58  ;;  %133 = vmatpush1.msra.mxu1 %v42_v59  ;;  %v41_v51 = vld [vmem:[%s5690_s2 + $0x10] sm:$0xff]  ;;  %v3890_v53 = vld [vmem:[%s5691_s4 + $0x178] sm:$0xff]  ;;  %v3899_v55 = vld [vmem:[%s5691_s4 + $0x160] sm:$0xff] }
  0x20   :  { %444 = vmatpush1.msra.mxu0 %v3753_v60  ;;  %134 = vmatprep.subr.mxu1 %v40_v61  ;;  %v3907_v57 = vld [vmem:[%s5691_s4 + $0x148] sm:$0xff]  ;;  %v3916_v59 = vld [vmem:[%s5691_s4 + $0x130] sm:$0xff]  ;;  %v3924_v61 = vld [vmem:[%s5691_s4 + $0x118] sm:$0xff] }
  0x21   :  { %445 = vmatprep.subr.mxu0 %v3762_v62  ;;  %135 = vmatpush1.msra.mxu1 %v39_v63  ;;  %v3933_v63 = vld [vmem:[%s5691_s4 + $0x100] sm:$0xff] }
  0x22   :  { %446 = vmatpush1.msra.mxu0 %v3771_v0  ;;  %169 = vmatmul.mubr.f32.vlgmr.msra.gmra.mxu1 %v3777_v2 }
  0x23   :  { %2794 = vmatprep.subr.mxu1 %v86_v5  ;;  %480 = vmatmul.mubr.f32.vlgmr.msra.gmra.mxu0 %v3786_v7 }
  0x24   :  { %2795 = vmatpush3.msra.mxu1 %v86_v5  ;;  %174 = vmatprep.mubr.f32.mxu1 %v5700_v3  ;;  %v3949_v5 = vld [vmem:[%s5691_s4 + $0xd0] sm:$0xff] }
  0x25   :  { %2796 = vmatprep.subr.mxu1 %v83_v9  ;;  %581 = vmatprep.subr.mxu0 %v3492_v1 }
  0x26   :  { %2797 = vmatpush3.msra.mxu1 %v83_v9  ;;  %582 = vmatpush1.msra.mxu0 %v3503_v4  ;;  %v3958_v9 = vld [vmem:[%s5691_s4 + $0xb8] sm:$0xff] }
  0x27   :  { %175 = vmatmul.mubr.f32.gmra.mxu1 %v3797_v11  ;;  %2798 = vmatprep.subr.mxu1 %v80_v13 }
  0x28   :  { %2799 = vmatpush3.msra.mxu1 %v80_v13  ;;  %180 = vmatprep.mubr.f32.mxu1 %v5700_v3  ;;  %v3976_v13 = vld [vmem:[%s5691_s4 + $0x88] sm:$0xff] }
  0x29   :  { %2800 = vmatprep.subr.mxu1 %v77_v15  ;;  %583 = vmatprep.subr.mxu0 %v3511_v6 }
  0x2a   :  { %2801 = vmatpush3.msra.mxu1 %v77_v15  ;;  %584 = vmatpush1.msra.mxu0 %v3520_v8  ;;  %v3985_v15 = vld [vmem:[%s5691_s4 + $0x70] sm:$0xff] }
  0x2b   :  { %181 = vmatmul.mubr.f32.gmra.mxu1 %v3812_v17  ;;  %2802 = vmatprep.subr.mxu1 %v74_v19 }
  0x2c   :  { %2803 = vmatpush3.msra.mxu1 %v74_v19  ;;  %186 = vmatprep.mubr.f32.mxu1 %v5700_v3  ;;  %v4003_v19 = vld [vmem:[%s5691_s4 + $0x40] sm:$0xff] }
  0x2d   :  { %2804 = vmatprep.subr.mxu1 %v71_v21  ;;  %585 = vmatprep.subr.mxu0 %v3529_v10  ;;  %5755 = vst [vmem:[#allocation11_spill] sm:$0xff] %v4003_v19 }
  0x2e   :  { %2805 = vmatpush3.msra.mxu1 %v71_v21  ;;  %586 = vmatpush1.msra.mxu0 %v3537_v12  ;;  %v4012_v21 = vld [vmem:[%s5691_s4 + $0x28] sm:$0xff] }
  0x2f   :  { %187 = vmatmul.mubr.f32.gmra.mxu1 %v3827_v23  ;;  %2806 = vmatprep.subr.mxu1 %v68_v25  ;;  %5756 = vst [vmem:[#allocation12_spill] sm:$0xff] %v4012_v21 }
  0x30   :  { %2807 = vmatpush3.msra.mxu1 %v68_v25  ;;  %192 = vmatprep.mubr.f32.mxu1 %v5700_v3  ;;  %v89_v25 = vlaneseq }
  0x31   :  { %2808 = vmatprep.subr.mxu1 %v65_v27  ;;  %587 = vmatprep.subr.mxu0 %v3546_v14 }
  0x32   :  { %2809 = vmatpush3.msra.mxu1 %v65_v27  ;;  %588 = vmatpush1.msra.mxu0 %v3555_v16  ;;  %v4061_v27 = vshrl.u32 %v89_v25, 7 }
  0x33   :  { %193 = vmatmul.mubr.f32.gmra.mxu1 %v35_v29  ;;  %2810 = vmatprep.subr.mxu1 %v62_v31 }
  0x34   :  { %2811 = vmatpush3.msra.mxu1 %v62_v31  ;;  %198 = vmatprep.mubr.f32.mxu1 %v5700_v3  ;;  %v87_v31 = vld [vmem:[%s5694_s3] sm:$0x7]  ;;  %s3430_s3 = smov 112  }
  0x35   :  { %2812 = vmatprep.subr.mxu1 %v59_v33  ;;  %589 = vmatprep.subr.mxu0 %v3564_v18 }
  0x36   :  { %2813 = vmatpush3.msra.mxu1 %v59_v33  ;;  %590 = vmatpush1.msra.mxu0 %v3573_v20 }
  0x37   :  { %199 = vmatmul.mubr.f32.gmra.mxu1 %v36_v35  ;;  %2814 = vmatprep.subr.mxu1 %v56_v37 }
  0x38   :  { %2815 = vmatpush3.msra.mxu1 %v56_v37  ;;  %204 = vmatprep.mubr.f32.mxu1 %v5700_v3 }
  0x39   :  { %2816 = vmatprep.subr.mxu1 %v53_v39  ;;  %591 = vmatprep.subr.mxu0 %v3582_v22 }
  0x3a   :  { %2817 = vmatpush3.msra.mxu1 %v53_v39  ;;  %592 = vmatpush1.msra.mxu0 %v3591_v24 }
  0x3b   :  { %205 = vmatmul.mubr.f32.gmra.mxu1 %v37_v41  ;;  %2818 = vmatprep.subr.mxu1 %v50_v43 }
  0x3c   :  { %2819 = vmatpush3.msra.mxu1 %v50_v43  ;;  %210 = vmatprep.mubr.f32.mxu1 %v5700_v3 }
  0x3d   :  { %2820 = vmatprep.subr.mxu1 %v47_v45  ;;  %593 = vmatprep.subr.mxu0 %v3600_v26 }
  0x3e   :  { %2821 = vmatpush3.msra.mxu1 %v47_v45  ;;  %594 = vmatpush1.msra.mxu0 %v3609_v28 }
  0x3f   :  { %211 = vmatmul.mubr.f32.gmra.mxu1 %v38_v47  ;;  %2822 = vmatprep.subr.mxu1 %v44_v49 }
  0x40   :  { %2823 = vmatpush3.msra.mxu1 %v44_v49  ;;  %2826 = vmatprep.mubr.f32.mxu1 %v3777_v2  ;;  %v3940_v2 = vld [vmem:[%s5691_s4 + $0xe8] sm:$0xff] }
  0x41   :  { %2824 = vmatprep.subr.mxu1 %v41_v51  ;;  %595 = vmatprep.subr.mxu0 %v3618_v30 }
  0x42   :  { %2825 = vmatpush3.msra.mxu1 %v41_v51  ;;  %596 = vmatpush1.msra.mxu0 %v3627_v32 }
  0x43   :  { %2827 = vmatmul.mubr.f32.vlgmr.msra.gmra.mxu1 %v3797_v11  ;;  %2838 = vmatprep.subr.mxu1 %v5700_v3  ;;  %v3967_v11 = vld [vmem:[%s5691_s4 + $0xa0] sm:$0xff] }
  0x44   :  { %2839 = vmatpush3.msra.mxu1 %v3890_v53  ;;  %2829 = vmatprep.mubr.f32.mxu1 %v3812_v17  ;;  %v3994_v17 = vld [vmem:[%s5691_s4 + $0x58] sm:$0xff] }
  0x45   :  { %2840 = vmatprep.subr.mxu1 %v5700_v3  ;;  %597 = vmatprep.subr.mxu0 %v3636_v34 }
  0x46   :  { %2841 = vmatpush3.msra.mxu1 %v3899_v55  ;;  %598 = vmatpush1.msra.mxu0 %v3645_v36 }
  0x47   :  { %2842 = vmatprep.subr.mxu1 %v5700_v3  ;;  %2830 = vmatmul.mubr.f32.gmra.mxu1 %v3827_v23  ;;  %v4020_v23 = vld [vmem:[%s5691_s4 + $0x10] sm:$0xff] }
  0x48   :  { %2843 = vmatpush3.msra.mxu1 %v3907_v57  ;;  %2832 = vmatprep.mubr.f32.mxu1 %v35_v29  ;;  %5757 = vst [vmem:[#allocation13_spill] sm:$0xff] %v4020_v23  ;;  %v91_v29 = vsub.s32 0, %v4061_v27 }
  0x49   :  { %2844 = vmatprep.subr.mxu1 %v5700_v3  ;;  %599 = vmatprep.subr.mxu0 %v3654_v38 }
  0x4a   :  { %2845 = vmatpush3.msra.mxu1 %v3916_v59  ;;  %600 = vmatpush1.msra.mxu0 %v3663_v40  ;;  %v92_v39 = vrot.slane %v87_v31, %v91_v29 }
  0x4b   :  { %2846 = vmatprep.subr.mxu1 %v5700_v3  ;;  %2833 = vmatmul.mubr.f32.gmra.mxu1 %v36_v35  ;;  %v95_v35 = vsub.s32 1, %v4061_v27 }
  0x4c   :  { %2847 = vmatpush3.msra.mxu1 %v3924_v61  ;;  %2835 = vmatprep.mubr.f32.mxu1 %v37_v41 }
  0x4d   :  { %2848 = vmatprep.subr.mxu1 %v5700_v3  ;;  %601 = vmatprep.subr.mxu0 %v3672_v42  ;;  %v96_v43 = vrot.slane %v87_v31, %v95_v35 }
  0x4e   :  { %2849 = vmatpush3.msra.mxu1 %v3933_v63  ;;  %602 = vmatpush1.msra.mxu0 %v3681_v44 }
  0x4f   :  { %2850 = vmatprep.subr.mxu1 %v5700_v3  ;;  %2836 = vmatmul.mubr.f32.gmra.mxu1 %v38_v47 }
  0x50   :  { %2851 = vmatpush3.msra.mxu1 %v3940_v2  ;;  %2870 = vmatprep.mubr.msk.f32.mxu1 %vm3428_vm0, %v5700_v3 }
  0x51   :  { %2852 = vmatprep.subr.mxu1 %v5700_v3  ;;  %603 = vmatprep.subr.mxu0 %v3690_v46 }
  0x52   :  { %2853 = vmatpush3.msra.mxu1 %v3949_v5  ;;  %604 = vmatpush1.msra.mxu0 %v3699_v48 }
  0x53   :  { %2854 = vmatprep.subr.mxu1 %v5700_v3  ;;  %605 = vmatprep.subr.mxu0 %v3708_v50 }
  0x54   :  { %2855 = vmatpush3.msra.mxu1 %v3958_v9  ;;  %606 = vmatpush1.msra.mxu0 %v3717_v52 }
  0x55   :  { %2856 = vmatprep.subr.mxu1 %v5700_v3  ;;  %607 = vmatprep.subr.mxu0 %v3726_v54 }
  0x56   :  { %2857 = vmatpush3.msra.mxu1 %v3967_v11  ;;  %608 = vmatpush1.msra.mxu0 %v3735_v56 }
  0x57   :  { %2858 = vmatprep.subr.mxu1 %v5700_v3  ;;  %609 = vmatprep.subr.mxu0 %v3744_v58 }
  0x58   :  { %2859 = vmatpush3.msra.mxu1 %v3976_v13  ;;  %610 = vmatpush1.msra.mxu0 %v3753_v60 }
  0x59   :  { %2860 = vmatprep.subr.mxu1 %v5700_v3  ;;  %611 = vmatprep.subr.mxu0 %v3762_v62  ;;  %v394_v62 = vld [vmem:[%s5695_s5] sm:$0x7] }
  0x5a   :  { %2861 = vmatpush3.msra.mxu1 %v3985_v15  ;;  %612 = vmatpush1.msra.mxu0 %v3771_v0 }
  0x5b   :  { %2862 = vmatprep.subr.mxu1 %v5700_v3  ;;  %645 = vmatprep.mubr.f32.mxu0 %v5700_v3 }
  0x5c   :  { %2863 = vmatpush3.msra.mxu1 %v3994_v17  ;;  %747 = vmatprep.subr.mxu0 %v3492_v1 }
  0x5d   :  { %2864 = vmatprep.subr.mxu1 %v5700_v3 }
  0x5e   :  { %2865 = vmatpush3.msra.mxu1 %v4003_v19 }
  0x5f   :  { %2866 = vmatprep.subr.mxu1 %v5700_v3 }
  0x60   :  { %2867 = vmatpush3.msra.mxu1 %v4012_v21 }
  0x61   :  { %2868 = vmatprep.subr.mxu1 %v5700_v3 }
  0x62   :  { %2869 = vmatpush3.msra.mxu1 %v4020_v23 }
  0x63   :  { %2871 = vmatmul.mubr.f32.vlgmr.msra.gmra.mxu1 %v3786_v7  ;;  %2873 = vmatprep.subr.mxu1 %v5700_v3 }
  0x64   :  { %2874 = vmatpush3.msra.mxu1 %v3890_v53  ;;  %2905 = vmatprep.mubr.msk.f32.mxu1 %vm3428_vm0, %v5700_v3 }
  0x65   :  { %2875 = vmatprep.subr.mxu1 %v5700_v3 }
  0x66   :  { %2876 = vmatpush3.msra.mxu1 %v3899_v55 }
  0x67   :  { %2877 = vmatprep.subr.mxu1 %v5700_v3 }
  0x68   :  { %2878 = vmatpush3.msra.mxu1 %v3907_v57 }
  0x69   :  { %2879 = vmatprep.subr.mxu1 %v5700_v3 }
  0x6a   :  { %2880 = vmatpush3.msra.mxu1 %v3916_v59 }
  0x6b   :  { %2881 = vmatprep.subr.mxu1 %v5700_v3 }
  0x6c   :  { %2882 = vmatpush3.msra.mxu1 %v3924_v61 }
  0x6d   :  { %2883 = vmatprep.subr.mxu1 %v5700_v3 }
  0x6e   :  { %2884 = vmatpush3.msra.mxu1 %v3933_v63 }
  0x6f   :  { %2885 = vmatprep.subr.mxu1 %v5700_v3 }
  0x70   :  { %2886 = vmatpush3.msra.mxu1 %v3940_v2 }
  0x71   :  { %2887 = vmatprep.subr.mxu1 %v5700_v3 }
  0x72   :  { %2888 = vmatpush3.msra.mxu1 %v3949_v5 }
  0x73   :  { %2889 = vmatprep.subr.mxu1 %v5700_v3 }
  0x74   :  { %2890 = vmatpush3.msra.mxu1 %v3958_v9 }
  0x75   :  { %2891 = vmatprep.subr.mxu1 %v5700_v3 }
  0x76   :  { %2892 = vmatpush3.msra.mxu1 %v3967_v11 }
  0x77   :  { %2893 = vmatprep.subr.mxu1 %v5700_v3 }
  0x78   :  { %2894 = vmatpush3.msra.mxu1 %v3976_v13 }
  0x79   :  { %2895 = vmatprep.subr.mxu1 %v5700_v3 }
  0x7a   :  { %2896 = vmatpush3.msra.mxu1 %v3985_v15 }
  0x7b   :  { %2897 = vmatprep.subr.mxu1 %v5700_v3 }
  0x7c   :  { %2898 = vmatpush3.msra.mxu1 %v3994_v17 }
  0x7d   :  { %2899 = vmatprep.subr.mxu1 %v5700_v3 }
  0x7e   :  { %2900 = vmatpush3.msra.mxu1 %v4003_v19 }
  0x7f   :  { %2901 = vmatprep.subr.mxu1 %v5700_v3 }
  0x80   :  { %2902 = vmatpush3.msra.mxu1 %v4012_v21 }
  0x81   :  { %2903 = vmatprep.subr.mxu1 %v5700_v3 }
  0x82   :  { %2904 = vmatpush3.msra.mxu1 %v4020_v23 }
  0x83   :  { %2908 = vmatprep.subr.mxu1 %v5700_v3 }
  0xe2   :  { %v170_v33 = vpop.f32.mrf.mxu1 }
  0xe4   :  { %v172_v37 = vpop.f32.mrf.mxu1 }
  0xe7   :  { %v176_v41 = vpop.f32.mrf.mxu1 }
  0xe8   :  { %v4068_v45 = vadd.f32 %v176_v41, %v92_v39 }
  0xe9   :  { %v178_v47 = vpop.f32.mrf.mxu1 }
  0xea   :  { %5758 = vst [vmem:[#allocation14_spill] sm:$0xff] %v4068_v45  ;;  %v4070_v49 = vadd.f32 %v178_v47, %v96_v43  ;;  %v4083_v45 = vrot.slane %v394_v62, %v91_v29  ;;  %v99_v29 = vsub.s32 2, %v4061_v27  ;;  %v173_v27 = vadd.f32 %v172_v37, %v96_v43 }
  0xeb   :  { %v182_v51 = vpop.f32.mrf.mxu1 }
  0xec   :  { %5759 = vst [vmem:[#allocation15_spill] sm:$0xff] %v4070_v49  ;;  %v4072_v25 = vadd.f32 %v182_v51, %v92_v39  ;;  %5764 = vst [vmem:[#allocation20_spill] sm:$0xff] %v4083_v45  ;;  %v481_v51 = vpop.f32.mrf.mxu0 }
  0xed   :  { %v184_v3 = vpop.f32.mrf.mxu1 }
  0xee   :  { %5760 = vst [vmem:[#allocation16_spill] sm:$0xff] %v4072_v25  ;;  %v4074_v1 = vadd.f32 %v184_v3, %v96_v43 }
  0xef   :  { %v188_v23 = vpop.f32.mrf.mxu1 }
  0xf0   :  { %5761 = vst [vmem:[#allocation17_spill] sm:$0xff] %v4074_v1  ;;  %v4076_v0 = vadd.f32 %v188_v23, %v92_v39  ;;  %v171_v1 = vadd.f32 %v170_v33, %v92_v39  ;;  %v482_v23 = vadd.f32 %v481_v51, %v4083_v45  ;;  %v100_v33 = vrot.slane %v87_v31, %v99_v29 }
  0xf1   :  { %v190_v21 = vpop.f32.mrf.mxu1 }
  0xf2   :  { %5762 = vst [vmem:[#allocation18_spill] sm:$0xff] %v4076_v0  ;;  %v4081_v60 = vadd.f32 %v190_v21, %v96_v43 }
  0xf3   :  { %v194_v41 = vpop.f32.mrf.mxu1 }
  0xf4   :  { %5763 = vst [vmem:[#allocation19_spill] sm:$0xff] %v4081_v60  ;;  %v4085_v47 = vadd.f32 %v194_v41, %v92_v39  ;;  %v556_v60 = vadd.f32 %v482_v23, %v171_v1 }
  0xf5   :  { %v196_v25 = vpop.f32.mrf.mxu1 }
  0xf6   :  { %5765 = vst [vmem:[#allocation21_spill] sm:$0xff] %v4085_v47  ;;  %v4087_v49 = vadd.f32 %v196_v25, %v96_v43 }
  0xf7   :  { %v200_v3 = vpop.f32.mrf.mxu1 }
  0xf8   :  { %5766 = vst [vmem:[#allocation22_spill] sm:$0xff] %v4087_v49  ;;  %v4090_v0 = vadd.f32 %v200_v3, %v92_v39  ;;  %v2593_v49 = vmul.f32 -1.442695, %v556_v60  ;;  %v4101_v3 = vrot.slane %v394_v62, %v95_v35 }
  0xf9   :  { %v202_v58 = vpop.f32.mrf.mxu1 }
  0xfa   :  { %5767 = vst [vmem:[#allocation23_spill] sm:$0xff] %v4090_v0  ;;  %v4092_v19 = vadd.f32 %v202_v58, %v96_v43  ;;  %v483_v58 = vpop.f32.mrf.mxu0  ;;  %3171 = vpow2.f32 %v2593_v49 }
  0xfb   :  { %v206_v21 = vpop.f32.mrf.mxu1 }
  0xfc   :  { %5768 = vst [vmem:[#allocation24_spill] sm:$0xff] %v4092_v19  ;;  %v4094_v56 = vadd.f32 %v206_v21, %v92_v39  ;;  %v484_v21 = vadd.f32 %v483_v58, %v4101_v3 }
  0xfd   :  { %v208_v41 = vpop.f32.mrf.mxu1 }
  0xfe   :  { %5769 = vst [vmem:[#allocation25_spill] sm:$0xff] %v4094_v56  ;;  %v4097_v47 = vadd.f32 %v208_v41, %v96_v43 }
  0xff   :  { %v212_v25 = vpop.f32.mrf.mxu1 }
 0x100   :  { %5770 = vst [vmem:[#allocation26_spill] sm:$0xff] %v4097_v47  ;;  %v4099_v54 = vadd.f32 %v212_v25, %v92_v39  ;;  %v563_v39 = vadd.f32 %v484_v21, %v173_v27  ;;  %v4120_v21 = vrot.slane %v394_v62, %v99_v29  ;;  %v5787_v62 = vld [vmem:[#allocation9_spill] sm:$0xff] }
 0x101   :  { %v214_v51 = vpop.f32.mrf.mxu1  ;;  %v5789_v29 = vld [vmem:[#allocation13_spill] sm:$0xff] }
 0x102   :  { %5771 = vst [vmem:[#allocation27_spill] sm:$0xff] %v4099_v54  ;;  %v4103_v0 = vadd.f32 %v214_v51, %v96_v43 }
 0x103   :  { %v2828_v19 = vpop.f32.mrf.mxu1 }
 0x104   :  { %5772 = vst [vmem:[#allocation28_spill] sm:$0xff] %v4103_v0  ;;  %v4105_v1 = vadd.f32 %v2828_v19, %v100_v33  ;;  %v2594_v0 = vmul.f32 -1.442695, %v563_v39 }
 0x105   :  { %v283_v23 = vpop.f32.mrf.mxu1 }
 0x106   :  { %3173 = vpow2.f32 %v2594_v0 }
 0x107   :  { %v2831_v41 = vpop.f32.mrf.mxu1  ;;  %v3172_v37 = vpop.eup %3171 }
 0x108   :  { %v4108_v47 = vadd.f32 %v2831_v41, %v100_v33  ;;  %v560_v41 = vadd.f32 1.0, %v3172_v37 }
 0x109   :  { %v293_v60 = vpop.f32.mrf.mxu1 }
 0x10a   :  { %5773 = vst [vmem:[#allocation29_spill] sm:$0xff] %v4108_v47  ;;  %v4110_v31 = vadd.f32 %v293_v60, %v100_v33  ;;  %3175 = vrcp.f32 %v560_v41 }
 0x10b   :  { %v2834_v35 = vpop.f32.mrf.mxu1 }
 0x10c   :  { %5774 = vst [vmem:[#allocation30_spill] sm:$0xff] %v4110_v31  ;;  %v4112_v25 = vadd.f32 %v2834_v35, %v100_v33 }
 0x10d   :  { %v303_v51 = vpop.f32.mrf.mxu1 }
 0x10e   :  { %5775 = vst [vmem:[#allocation31_spill] sm:$0xff] %v4112_v25  ;;  %v4114_v54 = vadd.f32 %v303_v51, %v100_v33  ;;  %v284_v25 = vadd.f32 %v283_v23, %v100_v33 }
 0x10f   :  { %v2837_v19 = vpop.f32.mrf.mxu1 }
 0x110   :  { %5776 = vst [vmem:[#allocation32_spill] sm:$0xff] %v4114_v54  ;;  %v4116_v49 = vadd.f32 %v2837_v19, %v100_v33 }
 0x111   :  { %v313_v43 = vpop.f32.mrf.mxu1 }
 0x112   :  { %5777 = vst [vmem:[#allocation33_spill] sm:$0xff] %v4116_v49  ;;  %v4118_v58 = vadd.f32 %v313_v43, %v100_v33  ;;  %v5790_v33 = vld [vmem:[#allocation4_spill] sm:$0xff] }
 0x113   :  { %v3174_v27 = vpop.eup %3173 }
 0x114   :  { %5778 = vst [vmem:[#allocation34_spill] sm:$0xff] %v4118_v58  ;;  %v567_v60 = vadd.f32 1.0, %v3174_v27 }
 0x116   :  { %3177 = vrcp.f32 %v567_v60  ;;  %v5791_v60 = vld [vmem:[#allocation14_spill] sm:$0xff] }
 0x117   :  { %v3176_v39 = vpop.eup %3175 }
 0x123   :  { %v552_v35 = vpop.f32.mrf.mxu1  ;;  %v3178_v54 = vpop.eup %3177 }
 0x124   :  { %v553_v56 = vadd.f32 %v552_v35, %v4120_v21  ;;  %v573_v0 = vsub.f32 1.0, %v3178_v54  ;;  %v575_v37 = vmul.f32 %v3178_v54, %v3786_v7  ;;  %v5786_v54 = vld [vmem:[#allocation12_spill] sm:$0xff]  ;;  %v5788_v7 = vld [vmem:[#allocation10_spill] sm:$0xff] }
 0x125   :  { %v2872_v51 = vpop.f32.mrf.mxu1 }
 0x126   :  { %v570_v19 = vmul.f32 %v3176_v39, %v553_v56  ;;  %v5780_v56 = vmov 0.0  }
 0x128   :  { %v571_v49 = vadd.f32 %v570_v19, %v284_v25  ;;  %v5792_v19 = vld [vmem:[#allocation15_spill] sm:$0xff] }
 0x12a   :  { %3179 = vtanh.f32 %v571_v49 }
 0x137   :  { %v3180_v43 = vpop.eup %3179 }
 0x138   :  { %v574_v58 = vmul.f32 %v3180_v43, %v573_v0 }
 0x13a   :  { %v4124_v41 = vadd.f32 %v575_v37, %v574_v58 }
 0x13c   :  { %5779 = vst [vmem:[#allocation35_spill] sm:$0xff] %v4124_v41  ;;  %646 = vmatmul.mubr.f32.vlgmr.msra.gmra.mxu0 %v4124_v41  ;;  %2906 = vmatmul.mubr.f32.vlgmr.msra.gmra.mxu1 %v4124_v41 }
 0x13d   :  { %748 = vmatpush1.msra.mxu0 %v3503_v4  ;;  %2909 = vmatpush3.msra.mxu1 %v3890_v53  ;;  %v5781_v4 = vld [vmem:[#allocation5_spill] sm:$0xff] }
 0x13e   :  { %749 = vmatprep.subr.mxu0 %v3511_v6  ;;  %2910 = vmatprep.subr.mxu1 %v5780_v56  ;;  %v5782_v6 = vld [vmem:[#allocation6_spill] sm:$0xff] }
 0x13f   :  { %750 = vmatpush1.msra.mxu0 %v3520_v8  ;;  %2911 = vmatpush3.msra.mxu1 %v3899_v55  ;;  %v5783_v8 = vld [vmem:[#allocation11_spill] sm:$0xff] }
 0x140   :  { %751 = vmatprep.subr.mxu0 %v3529_v10  ;;  %2912 = vmatprep.subr.mxu1 %v5780_v56  ;;  %v5784_v10 = vld [vmem:[#allocation7_spill] sm:$0xff] }
 0x141   :  { %752 = vmatpush1.msra.mxu0 %v3537_v12  ;;  %2913 = vmatpush3.msra.mxu1 %v3907_v57  ;;  %v5785_v12 = vld [vmem:[#allocation8_spill] sm:$0xff] }
 0x142   :  { %753 = vmatprep.subr.mxu0 %v3546_v14  ;;  %2914 = vmatprep.subr.mxu1 %v5780_v56 }
 0x143   :  { %754 = vmatpush1.msra.mxu0 %v3555_v16  ;;  %2915 = vmatpush3.msra.mxu1 %v3916_v59 }
 0x144   :  { %755 = vmatprep.subr.mxu0 %v3564_v18  ;;  %2916 = vmatprep.subr.mxu1 %v5780_v56 }
 0x145   :  { %756 = vmatpush1.msra.mxu0 %v3573_v20  ;;  %2917 = vmatpush3.msra.mxu1 %v3924_v61 }
 0x146   :  { %757 = vmatprep.subr.mxu0 %v3582_v22  ;;  %2918 = vmatprep.subr.mxu1 %v5780_v56 }
 0x147   :  { %758 = vmatpush1.msra.mxu0 %v3591_v24  ;;  %2919 = vmatpush3.msra.mxu1 %v3933_v63 }
 0x148   :  { %759 = vmatprep.subr.mxu0 %v3600_v26  ;;  %2920 = vmatprep.subr.mxu1 %v5780_v56 }
 0x149   :  { %760 = vmatpush1.msra.mxu0 %v3609_v28  ;;  %2921 = vmatpush3.msra.mxu1 %v3940_v2 }
 0x14a   :  { %761 = vmatprep.subr.mxu0 %v3618_v30  ;;  %2922 = vmatprep.subr.mxu1 %v5780_v56 }
 0x14b   :  { %762 = vmatpush1.msra.mxu0 %v3627_v32  ;;  %2923 = vmatpush3.msra.mxu1 %v3949_v5 }
 0x14c   :  { %763 = vmatprep.subr.mxu0 %v3636_v34  ;;  %2924 = vmatprep.subr.mxu1 %v5780_v56 }
 0x14d   :  { %764 = vmatpush1.msra.mxu0 %v3645_v36  ;;  %2925 = vmatpush3.msra.mxu1 %v3958_v9 }
 0x14e   :  { %765 = vmatprep.subr.mxu0 %v3654_v38  ;;  %2926 = vmatprep.subr.mxu1 %v5780_v56 }
 0x14f   :  { %766 = vmatpush1.msra.mxu0 %v3663_v40  ;;  %2927 = vmatpush3.msra.mxu1 %v3967_v11 }
 0x150   :  { %767 = vmatprep.subr.mxu0 %v3672_v42  ;;  %2928 = vmatprep.subr.mxu1 %v5780_v56 }
 0x151   :  { %768 = vmatpush1.msra.mxu0 %v3681_v44  ;;  %2929 = vmatpush3.msra.mxu1 %v3976_v13 }
 0x152   :  { %769 = vmatprep.subr.mxu0 %v3690_v46  ;;  %2930 = vmatprep.subr.mxu1 %v5780_v56 }
 0x153   :  { %770 = vmatpush1.msra.mxu0 %v3699_v48  ;;  %2931 = vmatpush3.msra.mxu1 %v3985_v15 }
 0x154   :  { %771 = vmatprep.subr.mxu0 %v3708_v50  ;;  %2932 = vmatprep.subr.mxu1 %v5780_v56 }
 0x155   :  { %772 = vmatpush1.msra.mxu0 %v3717_v52  ;;  %2933 = vmatpush3.msra.mxu1 %v3994_v17 }
 0x156   :  { %773 = vmatprep.subr.mxu0 %v5781_v4  ;;  %2934 = vmatprep.subr.mxu1 %v5780_v56 }
 0x157   :  { %774 = vmatpush1.msra.mxu0 %v5782_v6  ;;  %2935 = vmatpush3.msra.mxu1 %v5783_v8 }
 0x158   :  { %775 = vmatprep.subr.mxu0 %v5784_v10  ;;  %2936 = vmatprep.subr.mxu1 %v5780_v56 }
 0x159   :  { %776 = vmatpush1.msra.mxu0 %v5785_v12  ;;  %2937 = vmatpush3.msra.mxu1 %v5786_v54 }
 0x15a   :  { %777 = vmatprep.subr.mxu0 %v5787_v62  ;;  %2938 = vmatprep.subr.mxu1 %v5780_v56 }
 0x15b   :  { %778 = vmatpush1.msra.mxu0 %v5788_v7  ;;  %811 = vmatprep.mubr.f32.mxu0 %v5780_v56 }
 0x15c   :  { %2939 = vmatpush3.msra.mxu1 %v5789_v29  ;;  %2940 = vmatprep.mubr.msk.f32.mxu1 %vm3428_vm0, %v5780_v56 }
 0x15d   :  { %913 = vmatprep.subr.mxu0 %v5790_v33  ;;  %2943 = vmatprep.subr.mxu1 %v5780_v56 }
 0x1fc   :  { %v647_v23 = vpop.f32.mrf.mxu0  ;;  %v718_v25 = vpop.f32.mrf.mxu1 }
 0x1fd   :  { %v648_v49 = vadd.f32 %v647_v23, %v4083_v45  ;;  %v719_v29 = vadd.f32 %v718_v25, %v4120_v21 }
 0x1fe   :  { %v649_v58 = vpop.f32.mrf.mxu0  ;;  %v2907_v27 = vpop.f32.mrf.mxu1 }
 0x1ff   :  { %v722_v35 = vadd.f32 %v648_v49, %v5791_v60  ;;  %v650_v51 = vadd.f32 %v649_v58, %v4101_v3 }
 0x201   :  { %v2595_v39 = vmul.f32 -1.442695, %v722_v35  ;;  %v729_v0 = vadd.f32 %v650_v51, %v5792_v19 }
 0x203   :  { %3181 = vpow2.f32 %v2595_v39  ;;  %v2596_v43 = vmul.f32 -1.442695, %v729_v0 }
 0x205   :  { %3183 = vpow2.f32 %v2596_v43 }
 0x210   :  { %v3182_v37 = vpop.eup %3181 }
 0x211   :  { %v726_v33 = vadd.f32 1.0, %v3182_v37  ;;  %v4327_v37 = vld [vmem:[%s5691_s4 + $0x128] sm:$0xff] }
 0x212   :  { %v3184_v47 = vpop.eup %3183 }
 0x213   :  { %3185 = vrcp.f32 %v726_v33  ;;  %v733_v31 = vadd.f32 1.0, %v3184_v47  ;;  %v4209_v47 = vld [vmem:[%s5691_s4 + $0x168] sm:$0xff]  ;;  %v4334_v33 = vld [vmem:[%s5691_s4 + $0x120] sm:$0xff] }
 0x215   :  { %3187 = vrcp.f32 %v733_v31  ;;  %v4230_v31 = vld [vmem:[%s5691_s4 + $0x140] sm:$0xff] }
 0x220   :  { %v3186_v23 = vpop.eup %3185 }
 0x221   :  { %v736_v45 = vmul.f32 %v3186_v23, %v719_v29  ;;  %v4237_v29 = vld [vmem:[%s5691_s4 + $0x138] sm:$0xff]  ;;  %v4341_v23 = vld [vmem:[%s5691_s4 + $0x110] sm:$0xff] }
 0x222   :  { %v3188_v27 = vpop.eup %3187 }
 0x223   :  { %v737_v49 = vadd.f32 %v736_v45, %v4105_v1  ;;  %v739_v58 = vsub.f32 1.0, %v3188_v27  ;;  %v741_v39 = vmul.f32 %v3188_v27, %v4124_v41  ;;  %v4216_v45 = vld [vmem:[%s5691_s4 + $0x158] sm:$0xff]  ;;  %v4223_v1 = vld [vmem:[%s5691_s4 + $0x150] sm:$0xff] }
 0x224   :  { %v4355_v27 = vld [vmem:[%s5691_s4 + $0xf8] sm:$0xff] }
 0x225   :  { %3189 = vtanh.f32 %v737_v49  ;;  %v4348_v49 = vld [vmem:[%s5691_s4 + $0x108] sm:$0xff] }
 0x232   :  { %v3190_v60 = vpop.eup %3189 }
 0x233   :  { %v740_v35 = vmul.f32 %v3190_v60, %v739_v58  ;;  %v4362_v58 = vld [vmem:[%s5691_s4 + $0xf0] sm:$0xff]  ;;  %v4369_v60 = vld [vmem:[%s5691_s4 + $0xe0] sm:$0xff] }
 0x235   :  { %v4202_v51 = vadd.f32 %v741_v39, %v740_v35  ;;  %v4376_v35 = vld [vmem:[%s5691_s4 + $0xd8] sm:$0xff]  ;;  %v4383_v39 = vld [vmem:[%s5691_s4 + $0xc8] sm:$0xff] }
 0x237   :  { %5793 = vst [vmem:[#allocation5_spill] sm:$0xff] %v4202_v51  ;;  %812 = vmatmul.mubr.f32.vlgmr.msra.gmra.mxu0 %v4202_v51  ;;  %2941 = vmatmul.mubr.f32.vlgmr.msra.gmra.mxu1 %v4202_v51 }
 0x238   :  { %914 = vmatpush1.msra.mxu0 %v4209_v47  ;;  %2944 = vmatpush3.msra.mxu1 %v3890_v53 }
 0x239   :  { %915 = vmatprep.subr.mxu0 %v4216_v45  ;;  %2945 = vmatprep.subr.mxu1 %v5780_v56 }
 0x23a   :  { %916 = vmatpush1.msra.mxu0 %v4223_v1  ;;  %2946 = vmatpush3.msra.mxu1 %v3899_v55 }
 0x23b   :  { %917 = vmatprep.subr.mxu0 %v4230_v31  ;;  %2947 = vmatprep.subr.mxu1 %v5780_v56 }
 0x23c   :  { %918 = vmatpush1.msra.mxu0 %v4237_v29  ;;  %2948 = vmatpush3.msra.mxu1 %v3907_v57 }
 0x23d   :  { %919 = vmatprep.subr.mxu0 %v3546_v14  ;;  %2949 = vmatprep.subr.mxu1 %v5780_v56  ;;  %v5794_v14 = vld [vmem:[#allocation13_spill] sm:$0xff] }
 0x23e   :  { %920 = vmatpush1.msra.mxu0 %v3555_v16  ;;  %2950 = vmatpush3.msra.mxu1 %v3916_v59  ;;  %v4299_v16 = vld [vmem:[%s5691_s4 + $0x170] sm:$0xff] }
 0x23f   :  { %921 = vmatprep.subr.mxu0 %v3564_v18  ;;  %2951 = vmatprep.subr.mxu1 %v5780_v56  ;;  %5795 = vst [vmem:[#allocation6_spill] sm:$0xff] %v4299_v16 }
 0x240   :  { %922 = vmatpush1.msra.mxu0 %v3573_v20  ;;  %2952 = vmatpush3.msra.mxu1 %v3924_v61 }
 0x241   :  { %923 = vmatprep.subr.mxu0 %v3582_v22  ;;  %2953 = vmatprep.subr.mxu1 %v5780_v56  ;;  %v5796_v22 = vld [vmem:[#allocation20_spill] sm:$0xff] }
 0x242   :  { %924 = vmatpush1.msra.mxu0 %v3591_v24  ;;  %2954 = vmatpush3.msra.mxu1 %v3933_v63 }
 0x243   :  { %925 = vmatprep.subr.mxu0 %v3600_v26  ;;  %2955 = vmatprep.subr.mxu1 %v5780_v56 }
 0x244   :  { %926 = vmatpush1.msra.mxu0 %v3609_v28  ;;  %2956 = vmatpush3.msra.mxu1 %v3940_v2 }
 0x245   :  { %927 = vmatprep.subr.mxu0 %v3618_v30  ;;  %2957 = vmatprep.subr.mxu1 %v5780_v56  ;;  %v5797_v30 = vld [vmem:[#allocation16_spill] sm:$0xff] }
 0x246   :  { %928 = vmatpush1.msra.mxu0 %v3627_v32  ;;  %2958 = vmatpush3.msra.mxu1 %v3949_v5 }
 0x247   :  { %929 = vmatprep.subr.mxu0 %v3636_v34  ;;  %2959 = vmatprep.subr.mxu1 %v5780_v56 }
 0x248   :  { %930 = vmatpush1.msra.mxu0 %v3645_v36  ;;  %2960 = vmatpush3.msra.mxu1 %v3958_v9 }
 0x249   :  { %931 = vmatprep.subr.mxu0 %v3654_v38  ;;  %2961 = vmatprep.subr.mxu1 %v5780_v56  ;;  %v5798_v38 = vld [vmem:[#allocation17_spill] sm:$0xff] }
 0x24a   :  { %932 = vmatpush1.msra.mxu0 %v3663_v40  ;;  %2962 = vmatpush3.msra.mxu1 %v3967_v11 }
 0x24b   :  { %933 = vmatprep.subr.mxu0 %v3672_v42  ;;  %2963 = vmatprep.subr.mxu1 %v5780_v56 }
 0x24c   :  { %934 = vmatpush1.msra.mxu0 %v3681_v44  ;;  %2964 = vmatpush3.msra.mxu1 %v3976_v13 }
 0x24d   :  { %935 = vmatprep.subr.mxu0 %v3690_v46  ;;  %2965 = vmatprep.subr.mxu1 %v5780_v56 }
 0x24e   :  { %936 = vmatpush1.msra.mxu0 %v3699_v48  ;;  %2966 = vmatpush3.msra.mxu1 %v3985_v15 }
 0x24f   :  { %937 = vmatprep.subr.mxu0 %v3708_v50  ;;  %2967 = vmatprep.subr.mxu1 %v5780_v56 }
 0x250   :  { %938 = vmatpush1.msra.mxu0 %v3717_v52  ;;  %2968 = vmatpush3.msra.mxu1 %v3994_v17 }
 0x251   :  { %939 = vmatprep.subr.mxu0 %v5781_v4  ;;  %2969 = vmatprep.subr.mxu1 %v5780_v56 }
 0x252   :  { %940 = vmatpush1.msra.mxu0 %v5782_v6  ;;  %2970 = vmatpush3.msra.mxu1 %v5783_v8 }
 0x253   :  { %941 = vmatprep.subr.mxu0 %v5784_v10  ;;  %2971 = vmatprep.subr.mxu1 %v5780_v56  ;;  %v5799_v10 = vld [vmem:[#allocation30_spill] sm:$0xff] }
 0x254   :  { %942 = vmatpush1.msra.mxu0 %v5785_v12  ;;  %2972 = vmatpush3.msra.mxu1 %v5786_v54 }
 0x255   :  { %943 = vmatprep.subr.mxu0 %v5787_v62  ;;  %2973 = vmatprep.subr.mxu1 %v5780_v56 }
 0x256   :  { %944 = vmatpush1.msra.mxu0 %v5788_v7  ;;  %977 = vmatprep.mubr.f32.mxu0 %v5780_v56 }
 0x257   :  { %2974 = vmatpush3.msra.mxu1 %v5794_v14  ;;  %2975 = vmatprep.mubr.msk.f32.mxu1 %vm3428_vm0, %v5780_v56 }
 0x258   :  { %1079 = vmatprep.subr.mxu0 %v4299_v16  ;;  %2978 = vmatprep.subr.mxu1 %v5780_v56 }
 0x2f7   :  { %v813_v18 = vpop.f32.mrf.mxu0  ;;  %v884_v20 = vpop.f32.mrf.mxu1 }
 0x2f8   :  { %v814_v24 = vadd.f32 %v813_v18, %v5796_v22  ;;  %v885_v52 = vadd.f32 %v884_v20, %v4120_v21  ;;  %v4390_v18 = vld [vmem:[%s5691_s4 + $0xc0] sm:$0xff]  ;;  %v4397_v20 = vld [vmem:[%s5691_s4 + $0xb0] sm:$0xff] }
 0x2f9   :  { %v815_v26 = vpop.f32.mrf.mxu0  ;;  %v2942_v28 = vpop.f32.mrf.mxu1 }
 0x2fa   :  { %v888_v32 = vadd.f32 %v814_v24, %v5797_v30  ;;  %v816_v36 = vadd.f32 %v815_v26, %v4101_v3  ;;  %v4404_v24 = vld [vmem:[%s5691_s4 + $0xa8] sm:$0xff]  ;;  %v4411_v26 = vld [vmem:[%s5691_s4 + $0x98] sm:$0xff]  ;;  %v4418_v28 = vld [vmem:[%s5691_s4 + $0x90] sm:$0xff] }
 0x2fb   :  { %v4425_v30 = vld [vmem:[%s5691_s4 + $0x80] sm:$0xff] }
 0x2fc   :  { %v2597_v34 = vmul.f32 -1.442695, %v888_v32  ;;  %v895_v40 = vadd.f32 %v816_v36, %v5798_v38  ;;  %v4432_v32 = vld [vmem:[%s5691_s4 + $0x78] sm:$0xff]  ;;  %v4446_v36 = vld [vmem:[%s5691_s4 + $0x60] sm:$0xff]  ;;  %v4453_v38 = vld [vmem:[%s5691_s4 + $0x50] sm:$0xff] }
 0x2fe   :  { %3191 = vpow2.f32 %v2597_v34  ;;  %v2598_v42 = vmul.f32 -1.442695, %v895_v40  ;;  %v4439_v34 = vld [vmem:[%s5691_s4 + $0x68] sm:$0xff] }
 0x2ff   :  { %v4460_v40 = vld [vmem:[%s5691_s4 + $0x48] sm:$0xff] }
 0x300   :  { %3193 = vpow2.f32 %v2598_v42  ;;  %v4467_v42 = vld [vmem:[%s5691_s4 + $0x38] sm:$0xff] }
 0x30b   :  { %v3192_v44 = vpop.eup %3191 }
 0x30c   :  { %v892_v46 = vadd.f32 1.0, %v3192_v44  ;;  %v4474_v44 = vld [vmem:[%s5691_s4 + $0x30] sm:$0xff] }
 0x30d   :  { %v3194_v48 = vpop.eup %3193 }
 0x30e   :  { %3195 = vrcp.f32 %v892_v46  ;;  %v899_v50 = vadd.f32 1.0, %v3194_v48  ;;  %v4481_v46 = vld [vmem:[%s5691_s4 + $0x20] sm:$0xff]  ;;  %v4488_v48 = vld [vmem:[%s5691_s4 + $0x18] sm:$0xff] }
 0x30f   :  { %5801 = vst [vmem:[#allocation7_spill] sm:$0xff] %v4488_v48 }
 0x310   :  { %3197 = vrcp.f32 %v899_v50  ;;  %v4495_v50 = vld [vmem:[%s5691_s4 + $0x8] sm:$0xff] }
 0x311   :  { %5802 = vst [vmem:[#allocation8_spill] sm:$0xff] %v4495_v50 }
 0x31b   :  { %v3196_v4 = vpop.eup %3195 }
 0x31c   :  { %v902_v6 = vmul.f32 %v3196_v4, %v885_v52  ;;  %v4502_v52 = vld [vmem:[%s5691_s4] sm:$0xff] }
 0x31d   :  { %v3198_v62 = vpop.eup %3197  ;;  %5803 = vst [vmem:[#allocation9_spill] sm:$0xff] %v4502_v52 }
 0x31e   :  { %v903_v12 = vadd.f32 %v902_v6, %v5799_v10  ;;  %v905_v7 = vsub.f32 1.0, %v3198_v62  ;;  %v907_v0 = vmul.f32 %v3198_v62, %v4202_v51  ;;  %v5805_v51 = vld [vmem:[#allocation19_spill] sm:$0xff] }
 0x320   :  { %3199 = vtanh.f32 %v903_v12 }
 0x32d   :  { %v3200_v25 = vpop.eup %3199 }
 0x32e   :  { %v906_v19 = vmul.f32 %v3200_v25, %v905_v7  ;;  %v5804_v7 = vld [vmem:[#allocation18_spill] sm:$0xff] }
 0x330   :  { %v4310_v43 = vadd.f32 %v907_v0, %v906_v19 }
 0x332   :  { %5800 = vst [vmem:[#allocation11_spill] sm:$0xff] %v4310_v43  ;;  %978 = vmatmul.mubr.f32.vlgmr.msra.gmra.mxu0 %v4310_v43  ;;  %2976 = vmatmul.mubr.f32.vlgmr.msra.gmra.mxu1 %v4310_v43 }
 0x333   :  { %1080 = vmatpush1.msra.mxu0 %v4209_v47  ;;  %2979 = vmatpush3.msra.mxu1 %v3890_v53 }
 0x334   :  { %1081 = vmatprep.subr.mxu0 %v4216_v45  ;;  %2980 = vmatprep.subr.mxu1 %v5780_v56 }
 0x335   :  { %1082 = vmatpush1.msra.mxu0 %v4223_v1  ;;  %2981 = vmatpush3.msra.mxu1 %v3899_v55 }
 0x336   :  { %1083 = vmatprep.subr.mxu0 %v4230_v31  ;;  %2982 = vmatprep.subr.mxu1 %v5780_v56 }
 0x337   :  { %1084 = vmatpush1.msra.mxu0 %v4237_v29  ;;  %2983 = vmatpush3.msra.mxu1 %v3907_v57 }
 0x338   :  { %1085 = vmatprep.subr.mxu0 %v4327_v37  ;;  %2984 = vmatprep.subr.mxu1 %v5780_v56 }
 0x339   :  { %1086 = vmatpush1.msra.mxu0 %v4334_v33  ;;  %2985 = vmatpush3.msra.mxu1 %v3916_v59 }
 0x33a   :  { %1087 = vmatprep.subr.mxu0 %v4341_v23  ;;  %2986 = vmatprep.subr.mxu1 %v5780_v56 }
 0x33b   :  { %1088 = vmatpush1.msra.mxu0 %v4348_v49  ;;  %2987 = vmatpush3.msra.mxu1 %v3924_v61 }
 0x33c   :  { %1089 = vmatprep.subr.mxu0 %v4355_v27  ;;  %2988 = vmatprep.subr.mxu1 %v5780_v56 }
 0x33d   :  { %1090 = vmatpush1.msra.mxu0 %v4362_v58  ;;  %2989 = vmatpush3.msra.mxu1 %v3933_v63 }
 0x33e   :  { %1091 = vmatprep.subr.mxu0 %v4369_v60  ;;  %2990 = vmatprep.subr.mxu1 %v5780_v56 }
 0x33f   :  { %1092 = vmatpush1.msra.mxu0 %v4376_v35  ;;  %2991 = vmatpush3.msra.mxu1 %v3940_v2 }
 0x340   :  { %1093 = vmatprep.subr.mxu0 %v4383_v39  ;;  %2992 = vmatprep.subr.mxu1 %v5780_v56 }
 0x341   :  { %1094 = vmatpush1.msra.mxu0 %v4390_v18  ;;  %2993 = vmatpush3.msra.mxu1 %v3949_v5 }
 0x342   :  { %1095 = vmatprep.subr.mxu0 %v4397_v20  ;;  %2994 = vmatprep.subr.mxu1 %v5780_v56 }
 0x343   :  { %1096 = vmatpush1.msra.mxu0 %v4404_v24  ;;  %2995 = vmatpush3.msra.mxu1 %v3958_v9 }
 0x344   :  { %1097 = vmatprep.subr.mxu0 %v4411_v26  ;;  %2996 = vmatprep.subr.mxu1 %v5780_v56 }
 0x345   :  { %1098 = vmatpush1.msra.mxu0 %v4418_v28  ;;  %2997 = vmatpush3.msra.mxu1 %v3967_v11 }
 0x346   :  { %1099 = vmatprep.subr.mxu0 %v4425_v30  ;;  %2998 = vmatprep.subr.mxu1 %v5780_v56 }
 0x347   :  { %1100 = vmatpush1.msra.mxu0 %v4432_v32  ;;  %2999 = vmatpush3.msra.mxu1 %v3976_v13 }
 0x348   :  { %1101 = vmatprep.subr.mxu0 %v4439_v34  ;;  %3000 = vmatprep.subr.mxu1 %v5780_v56 }
 0x349   :  { %1102 = vmatpush1.msra.mxu0 %v4446_v36  ;;  %3001 = vmatpush3.msra.mxu1 %v3985_v15 }
 0x34a   :  { %1103 = vmatprep.subr.mxu0 %v4453_v38  ;;  %3002 = vmatprep.subr.mxu1 %v5780_v56 }
 0x34b   :  { %1104 = vmatpush1.msra.mxu0 %v4460_v40  ;;  %3003 = vmatpush3.msra.mxu1 %v3994_v17 }
 0x34c   :  { %1105 = vmatprep.subr.mxu0 %v4467_v42  ;;  %3004 = vmatprep.subr.mxu1 %v5780_v56 }
 0x34d   :  { %1106 = vmatpush1.msra.mxu0 %v4474_v44  ;;  %3005 = vmatpush3.msra.mxu1 %v5783_v8 }
 0x34e   :  { %1107 = vmatprep.subr.mxu0 %v4481_v46  ;;  %3006 = vmatprep.subr.mxu1 %v5780_v56 }
 0x34f   :  { %1108 = vmatpush1.msra.mxu0 %v4488_v48  ;;  %3007 = vmatpush3.msra.mxu1 %v5786_v54 }
 0x350   :  { %1109 = vmatprep.subr.mxu0 %v4495_v50  ;;  %3008 = vmatprep.subr.mxu1 %v5780_v56 }
 0x351   :  { %1110 = vmatpush1.msra.mxu0 %v4502_v52  ;;  %1143 = vmatprep.mubr.f32.mxu0 %v5780_v56 }
 0x352   :  { %3009 = vmatpush3.msra.mxu1 %v5794_v14  ;;  %3010 = vmatprep.mubr.msk.f32.mxu1 %vm3428_vm0, %v5780_v56 }
 0x353   :  { %1245 = vmatprep.subr.mxu0 %v4299_v16  ;;  %3013 = vmatprep.subr.mxu1 %v5780_v56 }
 0x3f2   :  { %v979_v4 = vpop.f32.mrf.mxu0  ;;  %v1050_v6 = vpop.f32.mrf.mxu1 }
 0x3f3   :  { %v980_v10 = vadd.f32 %v979_v4, %v5796_v22  ;;  %v1051_v48 = vadd.f32 %v1050_v6, %v4120_v21 }
 0x3f4   :  { %v981_v12 = vpop.f32.mrf.mxu0  ;;  %v2977_v62 = vpop.f32.mrf.mxu1 }
 0x3f5   :  { %v1054_v25 = vadd.f32 %v980_v10, %v5804_v7  ;;  %v982_v0 = vadd.f32 %v981_v12, %v4101_v3  ;;  %v5806_v62 = vld [vmem:[#allocation29_spill] sm:$0xff] }
 0x3f7   :  { %v2599_v19 = vmul.f32 -1.442695, %v1054_v25  ;;  %v1061_v41 = vadd.f32 %v982_v0, %v5805_v51 }
 0x3f9   :  { %3201 = vpow2.f32 %v2599_v19  ;;  %v2600_v14 = vmul.f32 -1.442695, %v1061_v41 }
 0x3fb   :  { %3203 = vpow2.f32 %v2600_v14 }
 0x406   :  { %v3202_v52 = vpop.eup %3201 }
 0x407   :  { %v1058_v16 = vadd.f32 1.0, %v3202_v52 }
 0x408   :  { %v3204_v50 = vpop.eup %3203 }
 0x409   :  { %3205 = vrcp.f32 %v1058_v16  ;;  %v1065_v54 = vadd.f32 1.0, %v3204_v50  ;;  %v5816_v16 = vld [vmem:[#allocation22_spill] sm:$0xff] }
 0x40b   :  { %3207 = vrcp.f32 %v1065_v54 }
 0x416   :  { %v3206_v4 = vpop.eup %3205 }
 0x417   :  { %v1068_v22 = vmul.f32 %v3206_v4, %v1051_v48 }
 0x418   :  { %v3208_v7 = vpop.eup %3207 }
 0x419   :  { %v1069_v10 = vadd.f32 %v1068_v22, %v5806_v62  ;;  %v1071_v12 = vsub.f32 1.0, %v3208_v7  ;;  %v1073_v41 = vmul.f32 %v3208_v7, %v4310_v43  ;;  %v5817_v7 = vld [vmem:[#allocation32_spill] sm:$0xff] }
 0x41b   :  { %3209 = vtanh.f32 %v1069_v10 }
 0x428   :  { %v3210_v25 = vpop.eup %3209 }
 0x429   :  { %v1072_v19 = vmul.f32 %v3210_v25, %v1071_v12 }
 0x42b   :  { %v4518_v51 = vadd.f32 %v1073_v41, %v1072_v19 }
 0x42d   :  { %5807 = vst [vmem:[#allocation10_spill] sm:$0xff] %v4518_v51  ;;  %1144 = vmatmul.mubr.f32.vlgmr.msra.gmra.mxu0 %v4518_v51  ;;  %3011 = vmatmul.mubr.f32.vlgmr.msra.gmra.mxu1 %v4518_v51 }
 0x42e   :  { %1246 = vmatpush1.msra.mxu0 %v4209_v47  ;;  %3014 = vmatpush3.msra.mxu1 %v3890_v53  ;;  %v5808_v53 = vld [vmem:[#allocation7_spill] sm:$0xff] }
 0x42f   :  { %1247 = vmatprep.subr.mxu0 %v4216_v45  ;;  %3015 = vmatprep.subr.mxu1 %v5780_v56 }
 0x430   :  { %1248 = vmatpush1.msra.mxu0 %v4223_v1  ;;  %3016 = vmatpush3.msra.mxu1 %v3899_v55  ;;  %v5809_v55 = vld [vmem:[#allocation12_spill] sm:$0xff] }
 0x431   :  { %1249 = vmatprep.subr.mxu0 %v4230_v31  ;;  %3017 = vmatprep.subr.mxu1 %v5780_v56 }
 0x432   :  { %1250 = vmatpush1.msra.mxu0 %v4237_v29  ;;  %3018 = vmatpush3.msra.mxu1 %v3907_v57  ;;  %v5810_v57 = vld [vmem:[#allocation8_spill] sm:$0xff] }
 0x433   :  { %1251 = vmatprep.subr.mxu0 %v4327_v37  ;;  %3019 = vmatprep.subr.mxu1 %v5780_v56 }
 0x434   :  { %1252 = vmatpush1.msra.mxu0 %v4334_v33  ;;  %3020 = vmatpush3.msra.mxu1 %v3916_v59  ;;  %v5811_v59 = vld [vmem:[#allocation9_spill] sm:$0xff] }
 0x435   :  { %1253 = vmatprep.subr.mxu0 %v4341_v23  ;;  %3021 = vmatprep.subr.mxu1 %v5780_v56 }
 0x436   :  { %1254 = vmatpush1.msra.mxu0 %v4348_v49  ;;  %3022 = vmatpush3.msra.mxu1 %v3924_v61  ;;  %v5812_v61 = vld [vmem:[#allocation13_spill] sm:$0xff] }
 0x437   :  { %1255 = vmatprep.subr.mxu0 %v4355_v27  ;;  %3023 = vmatprep.subr.mxu1 %v5780_v56 }
 0x438   :  { %1256 = vmatpush1.msra.mxu0 %v4362_v58  ;;  %3024 = vmatpush3.msra.mxu1 %v3933_v63  ;;  %v5813_v63 = vld [vmem:[#allocation6_spill] sm:$0xff] }
 0x439   :  { %1257 = vmatprep.subr.mxu0 %v4369_v60  ;;  %3025 = vmatprep.subr.mxu1 %v5780_v56 }
 0x43a   :  { %1258 = vmatpush1.msra.mxu0 %v4376_v35  ;;  %3026 = vmatpush3.msra.mxu1 %v3940_v2 }
 0x43b   :  { %1259 = vmatprep.subr.mxu0 %v4383_v39  ;;  %3027 = vmatprep.subr.mxu1 %v5780_v56 }
 0x43c   :  { %1260 = vmatpush1.msra.mxu0 %v4390_v18  ;;  %3028 = vmatpush3.msra.mxu1 %v3949_v5 }
 0x43d   :  { %1261 = vmatprep.subr.mxu0 %v4397_v20  ;;  %3029 = vmatprep.subr.mxu1 %v5780_v56 }
 0x43e   :  { %1262 = vmatpush1.msra.mxu0 %v4404_v24  ;;  %3030 = vmatpush3.msra.mxu1 %v3958_v9  ;;  %v5814_v9 = vld [vmem:[#allocation20_spill] sm:$0xff] }
 0x43f   :  { %1263 = vmatprep.subr.mxu0 %v4411_v26  ;;  %3031 = vmatprep.subr.mxu1 %v5780_v56 }
 0x440   :  { %1264 = vmatpush1.msra.mxu0 %v4418_v28  ;;  %3032 = vmatpush3.msra.mxu1 %v3967_v11 }
 0x441   :  { %1265 = vmatprep.subr.mxu0 %v4425_v30  ;;  %3033 = vmatprep.subr.mxu1 %v5780_v56 }
 0x442   :  { %1266 = vmatpush1.msra.mxu0 %v4432_v32  ;;  %3034 = vmatpush3.msra.mxu1 %v3976_v13 }
 0x443   :  { %1267 = vmatprep.subr.mxu0 %v4439_v34  ;;  %3035 = vmatprep.subr.mxu1 %v5780_v56 }
 0x444   :  { %1268 = vmatpush1.msra.mxu0 %v4446_v36  ;;  %3036 = vmatpush3.msra.mxu1 %v3985_v15 }
 0x445   :  { %1269 = vmatprep.subr.mxu0 %v4453_v38  ;;  %3037 = vmatprep.subr.mxu1 %v5780_v56 }
 0x446   :  { %1270 = vmatpush1.msra.mxu0 %v4460_v40  ;;  %3038 = vmatpush3.msra.mxu1 %v3994_v17  ;;  %v5815_v17 = vld [vmem:[#allocation21_spill] sm:$0xff] }
 0x447   :  { %1271 = vmatprep.subr.mxu0 %v4467_v42  ;;  %3039 = vmatprep.subr.mxu1 %v5780_v56 }
 0x448   :  { %1272 = vmatpush1.msra.mxu0 %v4474_v44  ;;  %3040 = vmatpush3.msra.mxu1 %v5783_v8 }
 0x449   :  { %1273 = vmatprep.subr.mxu0 %v4481_v46  ;;  %3041 = vmatprep.subr.mxu1 %v5780_v56 }
 0x44a   :  { %1274 = vmatpush1.msra.mxu0 %v5808_v53  ;;  %3042 = vmatpush3.msra.mxu1 %v5809_v55 }
 0x44b   :  { %1275 = vmatprep.subr.mxu0 %v5810_v57  ;;  %3043 = vmatprep.subr.mxu1 %v5780_v56 }
 0x44c   :  { %1276 = vmatpush1.msra.mxu0 %v5811_v59  ;;  %1309 = vmatprep.mubr.f32.mxu0 %v5780_v56 }
 0x44d   :  { %3044 = vmatpush3.msra.mxu1 %v5812_v61  ;;  %3045 = vmatprep.mubr.msk.f32.mxu1 %vm3428_vm0, %v5780_v56 }
 0x44e   :  { %1411 = vmatprep.subr.mxu0 %v5813_v63  ;;  %3048 = vmatprep.subr.mxu1 %v5780_v56 }
 0x4ed   :  { %v1145_v2 = vpop.f32.mrf.mxu0  ;;  %v1216_v5 = vpop.f32.mrf.mxu1 }
 0x4ee   :  { %v1146_v11 = vadd.f32 %v1145_v2, %v5814_v9  ;;  %v1217_v4 = vadd.f32 %v1216_v5, %v4120_v21  ;;  %v4604_v5 = vld [vmem:[%s5691_s4 + $0x178] sm:$0xff] }
 0x4ef   :  { %v1147_v13 = vpop.f32.mrf.mxu0  ;;  %v3012_v15 = vpop.f32.mrf.mxu1 }
 0x4f0   :  { %v1220_v8 = vadd.f32 %v1146_v11, %v5815_v17  ;;  %v1148_v14 = vadd.f32 %v1147_v13, %v4101_v3  ;;  %v4613_v11 = vld [vmem:[%s5691_s4 + $0x160] sm:$0xff]  ;;  %v4622_v13 = vld [vmem:[%s5691_s4 + $0x148] sm:$0xff]  ;;  %v4631_v15 = vld [vmem:[%s5691_s4 + $0x130] sm:$0xff] }
 0x4f1   :  { %v4640_v17 = vld [vmem:[%s5691_s4 + $0x118] sm:$0xff] }
 0x4f2   :  { %v2601_v54 = vmul.f32 -1.442695, %v1220_v8  ;;  %v1227_v22 = vadd.f32 %v1148_v14, %v5816_v16  ;;  %v4649_v8 = vld [vmem:[%s5691_s4 + $0x100] sm:$0xff]  ;;  %v4667_v14 = vld [vmem:[%s5691_s4 + $0xd0] sm:$0xff]  ;;  %v4676_v16 = vld [vmem:[%s5691_s4 + $0xb8] sm:$0xff] }
 0x4f4   :  { %3211 = vpow2.f32 %v2601_v54  ;;  %v2602_v48 = vmul.f32 -1.442695, %v1227_v22  ;;  %v4658_v54 = vld [vmem:[%s5691_s4 + $0xe8] sm:$0xff]  ;;  %v4685_v22 = vld [vmem:[%s5691_s4 + $0xa0] sm:$0xff] }
 0x4f6   :  { %3213 = vpow2.f32 %v2602_v48  ;;  %v4694_v48 = vld [vmem:[%s5691_s4 + $0x88] sm:$0xff] }
 0x501   :  { %v3212_v50 = vpop.eup %3211 }
 0x502   :  { %v1224_v52 = vadd.f32 1.0, %v3212_v50  ;;  %v4703_v50 = vld [vmem:[%s5691_s4 + $0x70] sm:$0xff] }
 0x503   :  { %v3214_v6 = vpop.eup %3213 }
 0x504   :  { %3215 = vrcp.f32 %v1224_v52  ;;  %v1231_v0 = vadd.f32 1.0, %v3214_v6  ;;  %v4712_v52 = vld [vmem:[%s5691_s4 + $0x58] sm:$0xff]  ;;  %v4721_v6 = vld [vmem:[%s5691_s4 + $0x40] sm:$0xff] }
 0x506   :  { %3217 = vrcp.f32 %v1231_v0  ;;  %v4730_v0 = vld [vmem:[%s5691_s4 + $0x28] sm:$0xff] }
 0x507   :  { %5818 = vst [vmem:[#allocation4_spill] sm:$0xff] %v4730_v0 }
 0x511   :  { %v3216_v62 = vpop.eup %3215 }
 0x512   :  { %v1234_v10 = vmul.f32 %v3216_v62, %v1217_v4  ;;  %v4740_v4 = vld [vmem:[%s5691_s4 + $0x10] sm:$0xff] }
 0x513   :  { %v3218_v25 = vpop.eup %3217  ;;  %5819 = vst [vmem:[#allocation14_spill] sm:$0xff] %v4740_v4 }
 0x514   :  { %v1235_v12 = vadd.f32 %v1234_v10, %v5817_v7  ;;  %v1237_v19 = vsub.f32 1.0, %v3218_v25  ;;  %v1239_v61 = vmul.f32 %v3218_v25, %v4518_v51  ;;  %v5821_v51 = vld [vmem:[#allocation24_spill] sm:$0xff] }
 0x516   :  { %3219 = vtanh.f32 %v1235_v12 }
 0x523   :  { %v3220_v41 = vpop.eup %3219 }
 0x524   :  { %v1238_v55 = vmul.f32 %v3220_v41, %v1237_v19  ;;  %v5820_v19 = vld [vmem:[#allocation23_spill] sm:$0xff] }
 0x526   :  { %v4596_v2 = vadd.f32 %v1239_v61, %v1238_v55 }
 0x528   :  { %1310 = vmatmul.mubr.f32.vlgmr.msra.gmra.mxu0 %v4596_v2  ;;  %3046 = vmatmul.mubr.f32.vlgmr.msra.gmra.mxu1 %v4596_v2 }
 0x529   :  { %1412 = vmatpush1.msra.mxu0 %v4209_v47  ;;  %3049 = vmatpush3.msra.mxu1 %v4604_v5 }
 0x52a   :  { %1413 = vmatprep.subr.mxu0 %v4216_v45  ;;  %3050 = vmatprep.subr.mxu1 %v5780_v56 }
 0x52b   :  { %1414 = vmatpush1.msra.mxu0 %v4223_v1  ;;  %3051 = vmatpush3.msra.mxu1 %v4613_v11 }
 0x52c   :  { %1415 = vmatprep.subr.mxu0 %v4230_v31  ;;  %3052 = vmatprep.subr.mxu1 %v5780_v56 }
 0x52d   :  { %1416 = vmatpush1.msra.mxu0 %v4237_v29  ;;  %3053 = vmatpush3.msra.mxu1 %v4622_v13 }
 0x52e   :  { %1417 = vmatprep.subr.mxu0 %v4327_v37  ;;  %3054 = vmatprep.subr.mxu1 %v5780_v56 }
 0x52f   :  { %1418 = vmatpush1.msra.mxu0 %v4334_v33  ;;  %3055 = vmatpush3.msra.mxu1 %v4631_v15 }
 0x530   :  { %1419 = vmatprep.subr.mxu0 %v4341_v23  ;;  %3056 = vmatprep.subr.mxu1 %v5780_v56 }
 0x531   :  { %1420 = vmatpush1.msra.mxu0 %v4348_v49  ;;  %3057 = vmatpush3.msra.mxu1 %v4640_v17 }
 0x532   :  { %1421 = vmatprep.subr.mxu0 %v4355_v27  ;;  %3058 = vmatprep.subr.mxu1 %v5780_v56 }
 0x533   :  { %1422 = vmatpush1.msra.mxu0 %v4362_v58  ;;  %3059 = vmatpush3.msra.mxu1 %v4649_v8 }
 0x534   :  { %1423 = vmatprep.subr.mxu0 %v4369_v60  ;;  %3060 = vmatprep.subr.mxu1 %v5780_v56 }
 0x535   :  { %1424 = vmatpush1.msra.mxu0 %v4376_v35  ;;  %3061 = vmatpush3.msra.mxu1 %v4658_v54 }
 0x536   :  { %1425 = vmatprep.subr.mxu0 %v4383_v39  ;;  %3062 = vmatprep.subr.mxu1 %v5780_v56 }
 0x537   :  { %1426 = vmatpush1.msra.mxu0 %v4390_v18  ;;  %3063 = vmatpush3.msra.mxu1 %v4667_v14 }
 0x538   :  { %1427 = vmatprep.subr.mxu0 %v4397_v20  ;;  %3064 = vmatprep.subr.mxu1 %v5780_v56 }
 0x539   :  { %1428 = vmatpush1.msra.mxu0 %v4404_v24  ;;  %3065 = vmatpush3.msra.mxu1 %v4676_v16 }
 0x53a   :  { %1429 = vmatprep.subr.mxu0 %v4411_v26  ;;  %3066 = vmatprep.subr.mxu1 %v5780_v56 }
 0x53b   :  { %1430 = vmatpush1.msra.mxu0 %v4418_v28  ;;  %3067 = vmatpush3.msra.mxu1 %v4685_v22 }
 0x53c   :  { %1431 = vmatprep.subr.mxu0 %v4425_v30  ;;  %3068 = vmatprep.subr.mxu1 %v5780_v56 }
 0x53d   :  { %1432 = vmatpush1.msra.mxu0 %v4432_v32  ;;  %3069 = vmatpush3.msra.mxu1 %v4694_v48 }
 0x53e   :  { %1433 = vmatprep.subr.mxu0 %v4439_v34  ;;  %3070 = vmatprep.subr.mxu1 %v5780_v56 }
 0x53f   :  { %1434 = vmatpush1.msra.mxu0 %v4446_v36  ;;  %3071 = vmatpush3.msra.mxu1 %v4703_v50 }
 0x540   :  { %1435 = vmatprep.subr.mxu0 %v4453_v38  ;;  %3072 = vmatprep.subr.mxu1 %v5780_v56 }
 0x541   :  { %1436 = vmatpush1.msra.mxu0 %v4460_v40  ;;  %3073 = vmatpush3.msra.mxu1 %v4712_v52 }
 0x542   :  { %1437 = vmatprep.subr.mxu0 %v4467_v42  ;;  %3074 = vmatprep.subr.mxu1 %v5780_v56 }
 0x543   :  { %1438 = vmatpush1.msra.mxu0 %v4474_v44  ;;  %3075 = vmatpush3.msra.mxu1 %v4721_v6 }
 0x544   :  { %1439 = vmatprep.subr.mxu0 %v4481_v46  ;;  %3076 = vmatprep.subr.mxu1 %v5780_v56 }
 0x545   :  { %1440 = vmatpush1.msra.mxu0 %v5808_v53  ;;  %3077 = vmatpush3.msra.mxu1 %v4730_v0 }
 0x546   :  { %1441 = vmatprep.subr.mxu0 %v5810_v57  ;;  %3078 = vmatprep.subr.mxu1 %v5780_v56 }
 0x547   :  { %1442 = vmatpush1.msra.mxu0 %v5811_v59  ;;  %1475 = vmatprep.mubr.f32.mxu0 %v5780_v56 }
 0x548   :  { %3079 = vmatpush3.msra.mxu1 %v4740_v4  ;;  %3080 = vmatprep.mubr.msk.f32.mxu1 %vm3428_vm0, %v5780_v56 }
 0x549   :  { %1577 = vmatprep.subr.mxu0 %v5813_v63  ;;  %3083 = vmatprep.subr.mxu1 %v5780_v56 }
 0x5e8   :  { %v1311_v62 = vpop.f32.mrf.mxu0  ;;  %v1382_v10 = vpop.f32.mrf.mxu1 }
 0x5e9   :  { %v1312_v7 = vadd.f32 %v1311_v62, %v5814_v9  ;;  %v1383_v53 = vadd.f32 %v1382_v10, %v4120_v21  ;;  %v1749_v10 = vld [vmem:[%s5696_s6] sm:$0xff] }
 0x5ea   :  { %v1313_v12 = vpop.f32.mrf.mxu0  ;;  %v3047_v25 = vpop.f32.mrf.mxu1 }
 0x5eb   :  { %v1386_v41 = vadd.f32 %v1312_v7, %v5820_v19  ;;  %v1314_v61 = vadd.f32 %v1313_v12, %v4101_v3  ;;  %v5822_v25 = vld [vmem:[#allocation31_spill] sm:$0xff] }
 0x5ed   :  { %v2603_v55 = vmul.f32 -1.442695, %v1386_v41  ;;  %v1393_v43 = vadd.f32 %v1314_v61, %v5821_v51  ;;  %v5833_v61 = vld [vmem:[#allocation5_spill] sm:$0xff] }
 0x5ef   :  { %3221 = vpow2.f32 %v2603_v55  ;;  %v2604_v4 = vmul.f32 -1.442695, %v1393_v43 }
 0x5f1   :  { %3223 = vpow2.f32 %v2604_v4  ;;  %v1750_v4 = vld [vmem:[%s5696_s6 + $0x8] sm:$0xff] }
 0x5fc   :  { %v3222_v59 = vpop.eup %3221 }
 0x5fd   :  { %v1390_v63 = vadd.f32 1.0, %v3222_v59 }
 0x5fe   :  { %v3224_v57 = vpop.eup %3223 }
 0x5ff   :  { %3225 = vrcp.f32 %v1390_v63  ;;  %v1397_v0 = vadd.f32 1.0, %v3224_v57  ;;  %v5834_v63 = vld [vmem:[#allocation11_spill] sm:$0xff] }
 0x601   :  { %3227 = vrcp.f32 %v1397_v0  ;;  %v1751_v0 = vld [vmem:[%s5696_s6 + $0x10] sm:$0xff] }
 0x60c   :  { %v3226_v62 = vpop.eup %3225 }
 0x60d   :  { %v1400_v9 = vmul.f32 %v3226_v62, %v1383_v53  ;;  %v5835_v62 = vld [vmem:[#allocation10_spill] sm:$0xff] }
 0x60e   :  { %v3228_v19 = vpop.eup %3227 }
 0x60f   :  { %v1401_v7 = vadd.f32 %v1400_v9, %v5822_v25  ;;  %v1403_v12 = vsub.f32 1.0, %v3228_v19  ;;  %v1405_v43 = vmul.f32 %v3228_v19, %v4596_v2 }
 0x611   :  { %3229 = vtanh.f32 %v1401_v7 }
 0x61e   :  { %v3230_v41 = vpop.eup %3229 }
 0x61f   :  { %v1404_v55 = vmul.f32 %v3230_v41, %v1403_v12 }
 0x621   :  { %v4754_v51 = vadd.f32 %v1405_v43, %v1404_v55  ;;  %v5836_v55 = vld [vmem:[#allocation27_spill] sm:$0xff] }
 0x623   :  { %1476 = vmatmul.mubr.f32.vlgmr.msra.gmra.mxu0 %v4754_v51  ;;  %3081 = vmatmul.mubr.f32.vlgmr.msra.gmra.mxu1 %v4754_v51 }
 0x624   :  { %1578 = vmatpush1.msra.mxu0 %v4209_v47  ;;  %3084 = vmatpush3.msra.mxu1 %v4604_v5  ;;  %v5823_v47 = vld [vmem:[#allocation7_spill] sm:$0xff] }
 0x625   :  { %1579 = vmatprep.subr.mxu0 %v4216_v45  ;;  %3085 = vmatprep.subr.mxu1 %v5780_v56  ;;  %v5824_v45 = vld [vmem:[#allocation4_spill] sm:$0xff] }
 0x626   :  { %1580 = vmatpush1.msra.mxu0 %v4223_v1  ;;  %3086 = vmatpush3.msra.mxu1 %v4613_v11  ;;  %v5825_v1 = vld [vmem:[#allocation8_spill] sm:$0xff]  ;;  %v1763_v11 = vld [vmem:[%s5696_s6 + $0x70] sm:$0xff] }
 0x627   :  { %1581 = vmatprep.subr.mxu0 %v4230_v31  ;;  %3087 = vmatprep.subr.mxu1 %v5780_v56  ;;  %v5826_v31 = vld [vmem:[#allocation9_spill] sm:$0xff] }
 0x628   :  { %1582 = vmatpush1.msra.mxu0 %v4237_v29  ;;  %3088 = vmatpush3.msra.mxu1 %v4622_v13  ;;  %v5827_v29 = vld [vmem:[#allocation14_spill] sm:$0xff]  ;;  %v5832_v13 = vld [vmem:[#allocation35_spill] sm:$0xff] }
 0x629   :  { %1583 = vmatprep.subr.mxu0 %v4327_v37  ;;  %3089 = vmatprep.subr.mxu1 %v5780_v56  ;;  %v1764_v37 = vld [vmem:[%s5696_s6 + $0x78] sm:$0xff] }
 0x62a   :  { %1584 = vmatpush1.msra.mxu0 %v4334_v33  ;;  %3090 = vmatpush3.msra.mxu1 %v4631_v15  ;;  %v1762_v15 = vld [vmem:[%s5696_s6 + $0x68] sm:$0xff] }
 0x62b   :  { %1585 = vmatprep.subr.mxu0 %v4341_v23  ;;  %3091 = vmatprep.subr.mxu1 %v5780_v56 }
 0x62c   :  { %1586 = vmatpush1.msra.mxu0 %v4348_v49  ;;  %3092 = vmatpush3.msra.mxu1 %v4640_v17  ;;  %v5828_v49 = vld [vmem:[#allocation20_spill] sm:$0xff] }
 0x62d   :  { %1587 = vmatprep.subr.mxu0 %v4355_v27  ;;  %3093 = vmatprep.subr.mxu1 %v5780_v56  ;;  %v1761_v17 = vld [vmem:[%s5696_s6 + $0x60] sm:$0xff] }
 0x62e   :  { %1588 = vmatpush1.msra.mxu0 %v4362_v58  ;;  %3094 = vmatpush3.msra.mxu1 %v4649_v8  ;;  %v1760_v8 = vld [vmem:[%s5696_s6 + $0x58] sm:$0xff] }
 0x62f   :  { %1589 = vmatprep.subr.mxu0 %v4369_v60  ;;  %3095 = vmatprep.subr.mxu1 %v5780_v56 }
 0x630   :  { %1590 = vmatpush1.msra.mxu0 %v4376_v35  ;;  %3096 = vmatpush3.msra.mxu1 %v4658_v54  ;;  %v5829_v35 = vld [vmem:[#allocation25_spill] sm:$0xff]  ;;  %v1759_v54 = vld [vmem:[%s5696_s6 + $0x50] sm:$0xff] }
 0x631   :  { %1591 = vmatprep.subr.mxu0 %v4383_v39  ;;  %3097 = vmatprep.subr.mxu1 %v5780_v56 }
 0x632   :  { %1592 = vmatpush1.msra.mxu0 %v4390_v18  ;;  %3098 = vmatpush3.msra.mxu1 %v4667_v14  ;;  %v1758_v14 = vld [vmem:[%s5696_s6 + $0x48] sm:$0xff] }
 0x633   :  { %1593 = vmatprep.subr.mxu0 %v4397_v20  ;;  %3099 = vmatprep.subr.mxu1 %v5780_v56 }
 0x634   :  { %1594 = vmatpush1.msra.mxu0 %v4404_v24  ;;  %3100 = vmatpush3.msra.mxu1 %v4676_v16  ;;  %v5830_v24 = vld [vmem:[#allocation26_spill] sm:$0xff]  ;;  %v1757_v16 = vld [vmem:[%s5696_s6 + $0x40] sm:$0xff] }
 0x635   :  { %1595 = vmatprep.subr.mxu0 %v4411_v26  ;;  %3101 = vmatprep.subr.mxu1 %v5780_v56 }
 0x636   :  { %1596 = vmatpush1.msra.mxu0 %v4418_v28  ;;  %3102 = vmatpush3.msra.mxu1 %v4685_v22  ;;  %v1756_v22 = vld [vmem:[%s5696_s6 + $0x38] sm:$0xff] }
 0x637   :  { %1597 = vmatprep.subr.mxu0 %v4425_v30  ;;  %3103 = vmatprep.subr.mxu1 %v5780_v56 }
 0x638   :  { %1598 = vmatpush1.msra.mxu0 %v4432_v32  ;;  %3104 = vmatpush3.msra.mxu1 %v4694_v48  ;;  %v1755_v48 = vld [vmem:[%s5696_s6 + $0x30] sm:$0xff] }
 0x639   :  { %1599 = vmatprep.subr.mxu0 %v4439_v34  ;;  %3105 = vmatprep.subr.mxu1 %v5780_v56 }
 0x63a   :  { %1600 = vmatpush1.msra.mxu0 %v4446_v36  ;;  %3106 = vmatpush3.msra.mxu1 %v4703_v50  ;;  %v1754_v50 = vld [vmem:[%s5696_s6 + $0x28] sm:$0xff] }
 0x63b   :  { %1601 = vmatprep.subr.mxu0 %v4453_v38  ;;  %3107 = vmatprep.subr.mxu1 %v5780_v56 }
 0x63c   :  { %1602 = vmatpush1.msra.mxu0 %v4460_v40  ;;  %3108 = vmatpush3.msra.mxu1 %v4712_v52  ;;  %v1753_v52 = vld [vmem:[%s5696_s6 + $0x20] sm:$0xff] }
 0x63d   :  { %1603 = vmatprep.subr.mxu0 %v4467_v42  ;;  %3109 = vmatprep.subr.mxu1 %v5780_v56  ;;  %v5831_v42 = vld [vmem:[#allocation34_spill] sm:$0xff] }
 0x63e   :  { %1604 = vmatpush1.msra.mxu0 %v4474_v44  ;;  %3110 = vmatpush3.msra.mxu1 %v4721_v6  ;;  %v1752_v6 = vld [vmem:[%s5696_s6 + $0x18] sm:$0xff] }
 0x63f   :  { %1605 = vmatprep.subr.mxu0 %v4481_v46  ;;  %3111 = vmatprep.subr.mxu1 %v5780_v56 }
 0x640   :  { %1606 = vmatpush1.msra.mxu0 %v5823_v47  ;;  %3112 = vmatpush3.msra.mxu1 %v5824_v45 }
 0x641   :  { %1607 = vmatprep.subr.mxu0 %v5825_v1  ;;  %3113 = vmatprep.subr.mxu1 %v5780_v56  ;;  %v5837_v1 = vld [vmem:[#allocation28_spill] sm:$0xff] }
 0x642   :  { %1608 = vmatpush1.msra.mxu0 %v5826_v31  ;;  %1641 = vmatprep.mubr.f32.mxu0 %v5780_v56 }
 0x643   :  { %3114 = vmatpush3.msra.mxu1 %v5827_v29  ;;  %3115 = vmatprep.mubr.msk.f32.mxu1 %vm3428_vm0, %v5780_v56 }
 0x644   :  { %3118 = vmatprep.subr.mxu0 %v1764_v37 }
 0x6e3   :  { %v1477_v33 = vpop.f32.mrf.mxu0  ;;  %v1548_v23 = vpop.f32.mrf.mxu1 }
 0x6e4   :  { %v1478_v27 = vadd.f32 %v1477_v33, %v5828_v49  ;;  %v1549_v36 = vadd.f32 %v1548_v23, %v4120_v21  ;;  %v4896_v33 = vld [vmem:[%s5697_s7] ss:$0 sm:$0xff]  ;;  %s3431_s7 = smov 80  }
 0x6e5   :  { %v1479_v58 = vpop.f32.mrf.mxu0  ;;  %v3082_v60 = vpop.f32.mrf.mxu1 }
 0x6e6   :  { %v1552_v39 = vadd.f32 %v1478_v27, %v5829_v35  ;;  %v1480_v20 = vadd.f32 %v1479_v58, %v4101_v3 }
 0x6e8   :  { %v2605_v18 = vmul.f32 -1.442695, %v1552_v39  ;;  %v1559_v26 = vadd.f32 %v1480_v20, %v5830_v24  ;;  %v5838_v20 = vld [vmem:[#allocation33_spill] sm:$0xff] }
 0x6ea   :  { %3231 = vpow2.f32 %v2605_v18  ;;  %v2606_v56 = vmul.f32 -1.442695, %v1559_v26 }
 0x6ec   :  { %3233 = vpow2.f32 %v2606_v56 }
 0x6f7   :  { %v3232_v28 = vpop.eup %3231 }
 0x6f8   :  { %v1556_v30 = vadd.f32 1.0, %v3232_v28 }
 0x6f9   :  { %v3234_v32 = vpop.eup %3233 }
 0x6fa   :  { %3235 = vrcp.f32 %v1556_v30  ;;  %v1563_v34 = vadd.f32 1.0, %v3234_v32 }
 0x6fc   :  { %3237 = vrcp.f32 %v1563_v34 }
 0x707   :  { %v3236_v38 = vpop.eup %3235 }
 0x708   :  { %v1566_v40 = vmul.f32 %v3236_v38, %v1549_v36 }
 0x709   :  { %v3238_v46 = vpop.eup %3237 }
 0x70a   :  { %v1567_v44 = vadd.f32 %v1566_v40, %v5831_v42  ;;  %v1569_v53 = vsub.f32 1.0, %v3238_v46  ;;  %v1571_v9 = vmul.f32 %v3238_v46, %v4754_v51 }
 0x70c   :  { %3239 = vtanh.f32 %v1567_v44 }
 0x719   :  { %v3240_v57 = vpop.eup %3239 }
 0x71a   :  { %v1570_v59 = vmul.f32 %v3240_v57, %v1569_v53 }
 0x71c   :  { %v4833_v5 = vadd.f32 %v1571_v9, %v1570_v59 }
 0x71e   :  { %1642 = vmatmul.mubr.f32.vlgmr.msra.gmra.mxu0 %v4833_v5  ;;  %3116 = vmatmul.mubr.f32.vlgmr.msra.gmra.mxu1 %v4833_v5 }
 0x71f   :  { %3119 = vmatpush3.msra.mxu0 %v1764_v37  ;;  %3150 = vmatprep.mubr.f32.mxu0 %v5832_v13 }
 0x720   :  { %3120 = vmatprep.subr.mxu0 %v1763_v11 }
 0x721   :  { %3121 = vmatpush3.msra.mxu0 %v1763_v11 }
 0x722   :  { %3122 = vmatprep.subr.mxu0 %v1762_v15 }
 0x723   :  { %3123 = vmatpush3.msra.mxu0 %v1762_v15 }
 0x724   :  { %3124 = vmatprep.subr.mxu0 %v1761_v17 }
 0x725   :  { %3125 = vmatpush3.msra.mxu0 %v1761_v17 }
 0x726   :  { %3126 = vmatprep.subr.mxu0 %v1760_v8 }
 0x727   :  { %3127 = vmatpush3.msra.mxu0 %v1760_v8 }
 0x728   :  { %3128 = vmatprep.subr.mxu0 %v1759_v54 }
 0x729   :  { %3129 = vmatpush3.msra.mxu0 %v1759_v54 }
 0x72a   :  { %3130 = vmatprep.subr.mxu0 %v1758_v14 }
 0x72b   :  { %3131 = vmatpush3.msra.mxu0 %v1758_v14 }
 0x72c   :  { %3132 = vmatprep.subr.mxu0 %v1757_v16 }
 0x72d   :  { %3133 = vmatpush3.msra.mxu0 %v1757_v16 }
 0x72e   :  { %3134 = vmatprep.subr.mxu0 %v1756_v22 }
 0x72f   :  { %3135 = vmatpush3.msra.mxu0 %v1756_v22 }
 0x730   :  { %3136 = vmatprep.subr.mxu0 %v1755_v48 }
 0x731   :  { %3137 = vmatpush3.msra.mxu0 %v1755_v48 }
 0x732   :  { %3138 = vmatprep.subr.mxu0 %v1754_v50 }
 0x733   :  { %3139 = vmatpush3.msra.mxu0 %v1754_v50 }
 0x734   :  { %3140 = vmatprep.subr.mxu0 %v1753_v52 }
 0x735   :  { %3141 = vmatpush3.msra.mxu0 %v1753_v52 }
 0x736   :  { %3142 = vmatprep.subr.mxu0 %v1752_v6 }
 0x737   :  { %3143 = vmatpush3.msra.mxu0 %v1752_v6 }
 0x738   :  { %3144 = vmatprep.subr.mxu0 %v1751_v0 }
 0x739   :  { %3145 = vmatpush3.msra.mxu0 %v1751_v0 }
 0x73a   :  { %3146 = vmatprep.subr.mxu0 %v1750_v4 }
 0x73b   :  { %3147 = vmatpush3.msra.mxu0 %v1750_v4 }
 0x73c   :  { %3148 = vmatprep.subr.mxu0 %v1749_v10 }
 0x73d   :  { %3149 = vmatpush3.msra.mxu0 %v1749_v10 }
 0x73e   :  { %3151 = vmatmul.mubr.f32.vlgmr.msra.gmra.mxu0 %v5833_v61 }
 0x73f   :  { %3153 = vmatprep.mubr.f32.mxu0 %v5834_v63 }
 0x742   :  { %3154 = vmatmul.mubr.f32.gmra.mxu0 %v5835_v62 }
 0x743   :  { %3156 = vmatprep.mubr.f32.mxu0 %v4596_v2 }
 0x746   :  { %3157 = vmatmul.mubr.f32.gmra.mxu0 %v4754_v51 }
 0x747   :  { %3159 = vmatprep.mubr.f32.mxu0 %v4833_v5 }
 0x7de   :  { %v1643_v25 = vpop.f32.mrf.mxu0  ;;  %v1714_v7 = vpop.f32.mrf.mxu1 }
 0x7df   :  { %v1644_v19 = vadd.f32 %v1643_v25, %v5828_v49  ;;  %v1715_v58 = vadd.f32 %v1714_v7, %v4120_v21 }
 0x7e0   :  { %v1645_v12 = vpop.f32.mrf.mxu0  ;;  %v3117_v41 = vpop.f32.mrf.mxu1 }
 0x7e1   :  { %v1718_v43 = vadd.f32 %v1644_v19, %v5836_v55  ;;  %v1646_v45 = vadd.f32 %v1645_v12, %v4101_v3 }
 0x7e3   :  { %v2607_v47 = vmul.f32 -1.442695, %v1718_v43  ;;  %v1725_v31 = vadd.f32 %v1646_v45, %v5837_v1 }
 0x7e5   :  { %3241 = vpow2.f32 %v2607_v47  ;;  %v2608_v29 = vmul.f32 -1.442695, %v1725_v31 }
 0x7e7   :  { %3243 = vpow2.f32 %v2608_v29 }
 0x7f2   :  { %v3242_v2 = vpop.eup %3241 }
 0x7f3   :  { %v1722_v51 = vadd.f32 1.0, %v3242_v2 }
 0x7f4   :  { %v3244_v37 = vpop.eup %3243 }
 0x7f5   :  { %3245 = vrcp.f32 %v1722_v51  ;;  %v1729_v49 = vadd.f32 1.0, %v3244_v37 }
 0x7f7   :  { %3247 = vrcp.f32 %v1729_v49 }
 0x7fe   :  { %v3152_v23 = vpop.f32.mrf.mxu0 }
 0x7ff   :  { %v4899_v27 = vadd.f32 %v3152_v23, %v4896_v33 }
 0x800   :  { %v1838_v3 = vpop.f32.mrf.mxu0 }
 0x801   :  { %1919 = vrot.lane.b32.xlu1 %v4899_v27, %s3429_s23  ;;  %1887 = vrot.lane.b32.xlu0 %v4899_v27, %s3430_s3  ;;  %v4907_v39 = vadd.f32 %v4896_v33, %v1838_v3 }
 0x802   :  { %v3246_v60 = vpop.eup %3245  ;;  %v3155_v18 = vpop.f32.mrf.mxu0 }
 0x803   :  { %v1732_v35 = vmul.f32 %v3246_v60, %v1715_v58  ;;  %v4915_v21 = vadd.f32 %v3155_v18, %v4896_v33 }
 0x804   :  { %v1848_v26 = vpop.f32.mrf.mxu0  ;;  %v3248_v28 = vpop.eup %3247 }
 0x805   :  { %v1733_v24 = vadd.f32 %v1732_v35, %v5838_v20  ;;  %1951 = vrot.lane.b32.xlu1 %v4899_v27, %s3431_s7  ;;  %1885 = vrot.lane.b32.xlu0 %v4907_v39, %s3430_s3  ;;  %v4926_v56 = vadd.f32 %v4896_v33, %v1848_v26  ;;  %v1735_v32 = vsub.f32 1.0, %v3248_v28  ;;  %v1737_v40 = vmul.f32 %v3248_v28, %v4833_v5 }
 0x806   :  { %v3158_v30 = vpop.f32.mrf.mxu0 }
 0x807   :  { %3249 = vtanh.f32 %v1733_v24  ;;  %v4938_v42 = vadd.f32 %v3158_v30, %v4896_v33 }
 0x808   :  { %v1858_v36 = vpop.f32.mrf.mxu0 }
 0x809   :  { %1891 = vrot.lane.b32.xlu1 %v4915_v21, %s3430_s3  ;;  %1917 = vrot.lane.b32.xlu0 %v4907_v39, %s3429_s23  ;;  %v4941_v44 = vadd.f32 %v4896_v33, %v1858_v36 }
 0x80d   :  { %1923 = vrot.lane.b32.xlu1 %v4915_v21, %s3429_s23  ;;  %1949 = vrot.lane.b32.xlu0 %v4907_v39, %s3431_s7 }
 0x811   :  { %1955 = vrot.lane.b32.xlu1 %v4915_v21, %s3431_s7  ;;  %1921 = vrot.lane.b32.xlu0 %v4926_v56, %s3429_s23 }
 0x814   :  { %v3250_v34 = vpop.eup %3249 }
 0x815   :  { %1889 = vrot.lane.b32.xlu1 %v4926_v56, %s3430_s3  ;;  %1953 = vrot.lane.b32.xlu0 %v4926_v56, %s3431_s7  ;;  %v1736_v38 = vmul.f32 %v3250_v34, %v1735_v32 }
 0x817   :  { %v1738_v46 = vadd.f32 %v1737_v40, %v1736_v38 }
 0x819   :  { %1895 = vrot.lane.b32.xlu1 %v4938_v42, %s3430_s3  ;;  %1893 = vrot.lane.b32.xlu0 %v4941_v44, %s3430_s3  ;;  %1740 = vst [vmem:[%s5698_s9] sm:$0xff] %v1738_v46  ;;  %s3432_s9 = smov 64  }
 0x81a   :  { %3160 = vmatmul.mubr.f32.gmra.mxu0 %v1738_v46 }
 0x81d   :  { %1927 = vrot.lane.b32.xlu1 %v4938_v42, %s3429_s23  ;;  %1925 = vrot.lane.b32.xlu0 %v4941_v44, %s3429_s23 }
 0x821   :  { %1959 = vrot.lane.b32.xlu1 %v4938_v42, %s3431_s7  ;;  %1957 = vrot.lane.b32.xlu0 %v4941_v44, %s3431_s7 }
 0x873   :  { %v4958_v53 = vpop.permute.xlu1 %1919  ;;  %v1888_v57 = vpop.permute.xlu0 %1887 }
 0x874   :  { %v5001_v41 = vadd.f32 %v1888_v57, %v4899_v27 }
 0x876   :  { %v1942_v1 = vadd.f32 %v4958_v53, %v5001_v41 }
 0x877   :  { %v4960_v59 = vpop.permute.xlu1 %1951  ;;  %v1886_v9 = vpop.permute.xlu0 %1885 }
 0x878   :  { %v1909_v13 = vadd.f32 %v1886_v9, %v4907_v39  ;;  %v1974_v29 = vadd.f32 %v4960_v59, %v1942_v1 }
 0x87a   :  { %v1982_v23 = vmul.f32 0.25, %v1974_v29 }
 0x87b   :  { %v1892_v5 = vpop.permute.xlu1 %1891  ;;  %v4962_v11 = vpop.permute.xlu0 %1917 }
 0x87c   :  { %v1941_v15 = vadd.f32 %v4962_v11, %v1909_v13  ;;  %v5021_v2 = vadd.f32 %v1892_v5, %v4915_v21 }
 0x87f   :  { %v4966_v17 = vpop.permute.xlu1 %1923  ;;  %v4968_v8 = vpop.permute.xlu0 %1949 }
 0x880   :  { %v1973_v54 = vadd.f32 %v4968_v8, %v1941_v15  ;;  %v1944_v51 = vadd.f32 %v4966_v17, %v5021_v2  ;;  %v2129_v29 = vadd.f32 %v4966_v17, %v4915_v21 }
 0x882   :  { %v1981_v14 = vmul.f32 0.25, %v1973_v54 }
 0x883   :  { %v4971_v16 = vpop.permute.xlu1 %1955  ;;  %v4973_v22 = vpop.permute.xlu0 %1921 }
 0x884   :  { %1997 = vrot.lane.b32.xlu0 %v1981_v14, %s3430_s3  ;;  %v1976_v37 = vadd.f32 %v4971_v16, %v1944_v51 }
 0x886   :  { %v1984_v60 = vmul.f32 0.25, %v1976_v37 }
 0x887   :  { %v1890_v48 = vpop.permute.xlu1 %1889  ;;  %v4976_v50 = vpop.permute.xlu0 %1953 }
 0x888   :  { %v4979_v52 = vadd.f32 %v1890_v48, %v4926_v56 }
 0x88a   :  { %v1943_v6 = vadd.f32 %v4973_v22, %v4979_v52 }
 0x88b   :  { %v1894_v0 = vpop.permute.xlu0 %1893  ;;  %v1896_v43 = vpop.permute.xlu1 %1895 }
 0x88c   :  { %v1975_v4 = vadd.f32 %v4976_v50, %v1943_v6  ;;  %v4987_v63 = vadd.f32 %v1894_v0, %v4941_v44 }
 0x88e   :  { %v1983_v10 = vmul.f32 0.25, %v1975_v4  ;;  %v2127_v4 = vadd.f32 %v4958_v53, %v4899_v27 }
 0x88f   :  { %v4984_v61 = vpop.permute.xlu0 %1925  ;;  %v5017_v31 = vpop.permute.xlu1 %1927 }
 0x890   :  { %2001 = vrot.lane.b32.xlu0 %v1983_v10, %s3430_s3  ;;  %v1945_v62 = vadd.f32 %v4984_v61, %v4987_v63  ;;  %v2131_v17 = vadd.f32 %v5017_v31, %v4938_v42 }
 0x893   :  { %v4992_v25 = vpop.permute.xlu0 %1957  ;;  %v5035_v49 = vpop.permute.xlu1 %1959 }
 0x894   :  { %v1977_v7 = vadd.f32 %v4992_v25, %v1945_v62  ;;  %v2128_v62 = vadd.f32 %v4973_v22, %v4926_v56 }
 0x896   :  { %v1985_v19 = vmul.f32 0.25, %v1977_v7 }
 0x898   :  { %2005 = vrot.lane.b32.xlu0 %v1985_v19, %s3430_s3 }
 0x89c   :  { %2416 = vrot.lane.b32.xlu0 %v4907_v39, %s3432_s9 }
 0x8a0   :  { %2420 = vrot.lane.b32.xlu0 %v4926_v56, %s3432_s9 }
 0x8da   :  { %v3161_v12 = vpop.f32.mrf.mxu0 }
 0x8db   :  { %v5004_v55 = vadd.f32 %v3161_v12, %v4896_v33  ;;  %v2126_v12 = vadd.f32 %v4962_v11, %v4907_v39  ;;  %v2271_v11 = vadd.f32 %v4968_v8, %v4907_v39  ;;  %v2273_v8 = vadd.f32 %v4976_v50, %v4926_v56 }
 0x8dc   :  { %v1868_v47 = vpop.f32.mrf.mxu0  ;;  %v2275_v50 = vadd.f32 %v4992_v25, %v4941_v44 }
 0x8dd   :  { %v5007_v45 = vadd.f32 %v4896_v33, %v1868_v47  ;;  %1899 = vrot.lane.b32.xlu1 %v5004_v55, %s3430_s3  ;;  %v5031_v33 = vadd.f32 %v1896_v43, %v4938_v42  ;;  %v2130_v43 = vadd.f32 %v4984_v61, %v4941_v44 }
 0x8df   :  { %1897 = vrot.lane.b32.xlu0 %v5007_v45, %s3430_s3  ;;  %v1946_v3 = vadd.f32 %v5017_v31, %v5031_v33  ;;  %v2272_v31 = vadd.f32 %v4960_v59, %v4899_v27  ;;  %v2274_v59 = vadd.f32 %v4971_v16, %v4915_v21 }
 0x8e1   :  { %1931 = vrot.lane.b32.xlu1 %v5004_v55, %s3429_s23  ;;  %v1978_v58 = vadd.f32 %v5035_v49, %v1946_v3 }
 0x8e3   :  { %1929 = vrot.lane.b32.xlu0 %v5007_v45, %s3429_s23  ;;  %v1986_v35 = vmul.f32 0.25, %v1978_v58 }
 0x8e5   :  { %1963 = vrot.lane.b32.xlu1 %v5004_v55, %s3431_s7 }
 0x8e7   :  { %1961 = vrot.lane.b32.xlu0 %v5007_v45, %s3431_s7 }
 0x8e9   :  { %1999 = vrot.lane.b32.xlu1 %v1982_v23, %s3430_s3 }
 0x8eb   :  { %2424 = vrot.lane.b32.xlu0 %v4941_v44, %s3432_s9 }
 0x8ed   :  { %2003 = vrot.lane.b32.xlu1 %v1984_v60, %s3430_s3 }
 0x8ef   :  { %2428 = vrot.lane.b32.xlu0 %v5007_v45, %s3432_s9 }
 0x8f1   :  { %2007 = vrot.lane.b32.xlu1 %v1986_v35, %s3430_s3 }
 0x8f5   :  { %2418 = vrot.lane.b32.xlu1 %v4899_v27, %s3432_s9 }
 0x8f6   :  { %v5053_v18 = vpop.permute.xlu0 %1997 }
 0x8f7   :  { %v5056_v20 = vsub.f32 %v1909_v13, %v5053_v18  ;;  %v5109_v47 = vsub.f32 %v2126_v12, %v5053_v18  ;;  %v5130_v3 = vsub.f32 %v2271_v11, %v5053_v18 }
 0x8f9   :  { %2422 = vrot.lane.b32.xlu1 %v4915_v21, %s3432_s9  ;;  %v2030_v24 = vsel %vm2029_vm1, %v5056_v20, -inf  ;;  %v2142_v61 = vsel %vm2029_vm1, %v5109_v47, -inf  ;;  %v2287_v35 = vsel %vm2029_vm1, %v5130_v3, -inf }
 0x8fd   :  { %2426 = vrot.lane.b32.xlu1 %v4938_v42, %s3432_s9 }
 0x902   :  { %v5060_v26 = vpop.permute.xlu0 %2001 }
 0x903   :  { %v5100_v19 = vsub.f32 %v2128_v62, %v5060_v26 }
 0x905   :  { %v2148_v22 = vsel %vm2029_vm1, %v5100_v19, -inf }
 0x90a   :  { %v5062_v28 = vpop.permute.xlu0 %2005 }
 0x90b   :  { %v5114_v1 = vsub.f32 %v2130_v43, %v5062_v28 }
 0x90d   :  { %v2154_v23 = vsel %vm2029_vm1, %v5114_v1, -inf }
 0x90e   :  { %2031 = vmax.xlane.f32.xlu0 %v2030_v24  ;;  %v2417_v30 = vpop.permute.xlu0 %2416  ;;  %v5144_v24 = vsub.f32 %v2273_v8, %v5060_v26 }
 0x912   :  { %v2421_v32 = vpop.permute.xlu0 %2420 }
 0x94f   :  { %v1900_v34 = vpop.permute.xlu1 %1899 }
 0x950   :  { %v5067_v40 = vadd.f32 %v1900_v34, %v5004_v55 }
 0x951   :  { %v1898_v36 = vpop.permute.xlu0 %1897 }
 0x952   :  { %v5072_v57 = vadd.f32 %v1898_v36, %v5007_v45 }
 0x953   :  { %v5064_v38 = vpop.permute.xlu1 %1931 }
 0x954   :  { %v1948_v9 = vadd.f32 %v5064_v38, %v5067_v40 }
 0x955   :  { %v5069_v46 = vpop.permute.xlu0 %1929 }
 0x956   :  { %v1947_v13 = vadd.f32 %v5069_v46, %v5072_v57 }
 0x957   :  { %v5076_v5 = vpop.permute.xlu1 %1963 }
 0x958   :  { %v1980_v15 = vadd.f32 %v5076_v5, %v1948_v9  ;;  %v2440_v9 = vadd.f32 %v2417_v30, %v4907_v39  ;;  %v2442_v39 = vadd.f32 %v2421_v32, %v4926_v56 }
 0x959   :  { %v5081_v54 = vpop.permute.xlu0 %1961 }
 0x95a   :  { %v1979_v14 = vadd.f32 %v5081_v54, %v1947_v13  ;;  %v1988_v48 = vmul.f32 0.25, %v1980_v15  ;;  %v2293_v15 = vsel %vm2029_vm1, %v5144_v24, -inf  ;;  %v5186_v43 = vsub.f32 %v2442_v39, %v5060_v26 }
 0x95b   :  { %v5088_v0 = vpop.permute.xlu1 %1999 }
 0x95c   :  { %v1987_v6 = vmul.f32 0.25, %v1979_v14  ;;  %2011 = vrot.lane.b32.xlu1 %v1988_v48, %s3430_s3  ;;  %v5093_v10 = vsub.f32 %v2127_v4, %v5088_v0  ;;  %v5153_v36 = vsub.f32 %v2272_v31, %v5088_v0  ;;  %v5159_v14 = vsub.f32 %v2275_v50, %v5062_v28 }
 0x95d   :  { %v2276_v4 = vadd.f32 %v5035_v49, %v4938_v42  ;;  %v2425_v16 = vpop.permute.xlu0 %2424  ;;  %v2133_v50 = vadd.f32 %v5064_v38, %v5004_v55 }
 0x95e   :  { %2009 = vrot.lane.b32.xlu0 %v1987_v6, %s3430_s3  ;;  %v2145_v7 = vsel %vm2029_vm1, %v5093_v10, -inf  ;;  %v2290_v25 = vsel %vm2029_vm1, %v5153_v36, -inf  ;;  %v2299_v30 = vsel %vm2029_vm1, %v5159_v14, -inf  ;;  %v5172_v6 = vsub.f32 %v2440_v9, %v5053_v18 }
 0x95f   :  { %v5106_v53 = vpop.permute.xlu1 %2003  ;;  %v2444_v32 = vadd.f32 %v2425_v16, %v4941_v44  ;;  %v2462_v44 = vsel %vm2029_vm1, %v5186_v43, -inf }
 0x960   :  { %2430 = vrot.lane.b32.xlu1 %v5004_v55, %s3432_s9  ;;  %v5123_v51 = vsub.f32 %v2129_v29, %v5106_v53  ;;  %v5166_v48 = vsub.f32 %v2274_v59, %v5106_v53  ;;  %v2456_v18 = vsel %vm2029_vm1, %v5172_v6, -inf }
 0x961   :  { %v5197_v11 = vsub.f32 %v2444_v32, %v5062_v28 }
 0x962   :  { %v2151_v58 = vsel %vm2029_vm1, %v5123_v51, -inf  ;;  %v2296_v12 = vsel %vm2029_vm1, %v5166_v48, -inf }
 0x963   :  { %v5125_v37 = vpop.permute.xlu1 %2007 }
 0x964   :  { %v5139_v60 = vsub.f32 %v2131_v17, %v5125_v37  ;;  %v5180_v56 = vsub.f32 %v2276_v4, %v5125_v37  ;;  %v2468_v17 = vsel %vm2029_vm1, %v5197_v11, -inf }
 0x966   :  { %v2157_v34 = vsel %vm2029_vm1, %v5139_v60, -inf }
 0x967   :  { %v2419_v13 = vpop.permute.xlu1 %2418 }
 0x96b   :  { %v2423_v62 = vpop.permute.xlu1 %2422 }
 0x96c   :  { %v2443_v49 = vadd.f32 %v2423_v62, %v4915_v21 }
 0x96f   :  { %v2427_v29 = vpop.permute.xlu1 %2426 }
 0x97d   :  { %2146 = vmax.xlane.f32.xlu0 %v2145_v7  ;;  %v2441_v7 = vadd.f32 %v2419_v13, %v4899_v27  ;;  %v2302_v27 = vsel %vm2029_vm1, %v5180_v56, -inf  ;;  %v2132_v13 = vadd.f32 %v5069_v46, %v5007_v45 }
 0x981   :  { %2149 = vmax.xlane.f32.xlu0 %v2148_v22  ;;  %v5192_v22 = vsub.f32 %v2441_v7, %v5088_v0 }
 0x983   :  { %v2459_v21 = vsel %vm2029_vm1, %v5192_v22, -inf }
 0x984   :  { %2143 = vmax.xlane.f32.xlu1 %v2142_v61  ;;  %v2445_v61 = vadd.f32 %v2427_v29, %v4938_v42 }
 0x985   :  { %2155 = vmax.xlane.f32.xlu0 %v2154_v23  ;;  %v5203_v23 = vsub.f32 %v2443_v49, %v5106_v53 }
 0x987   :  { %v2465_v8 = vsel %vm2029_vm1, %v5203_v23, -inf }
 0x988   :  { %2152 = vmax.xlane.f32.xlu1 %v2151_v58  ;;  %v5210_v58 = vsub.f32 %v2445_v61, %v5125_v37 }
 0x989   :  { %2288 = vmax.xlane.f32.xlu0 %v2287_v35  ;;  %v2429_v35 = vpop.permute.xlu0 %2428 }
 0x98a   :  { %v2471_v42 = vsel %vm2029_vm1, %v5210_v58, -inf  ;;  %v2446_v62 = vadd.f32 %v2429_v35, %v5007_v45 }
 0x98c   :  { %2158 = vmax.xlane.f32.xlu1 %v2157_v34 }
 0x98d   :  { %2294 = vmax.xlane.f32.xlu0 %v2293_v15  ;;  %v2278_v15 = vadd.f32 %v5076_v5, %v5004_v55 }
 0x990   :  { %2291 = vmax.xlane.f32.xlu1 %v2290_v25  ;;  %v2277_v25 = vadd.f32 %v5081_v54, %v5007_v45  ;;  %v2023_v45 = vsub.f32 %v4979_v52, %v5060_v26 }
 0x991   :  { %2300 = vmax.xlane.f32.xlu0 %v2299_v30 }
 0x992   :  { %v2036_v29 = vsel %vm2029_vm1, %v2023_v45, -inf }
 0x994   :  { %2297 = vmax.xlane.f32.xlu1 %v2296_v12 }
 0x995   :  { %2457 = vmax.xlane.f32.xlu0 %v2456_v18 }
 0x997   :  { %v2032_v31 = vpop.xlane.xlu0 %2031 }
 0x998   :  { %2303 = vmax.xlane.f32.xlu1 %v2302_v27  ;;  %v2054_v34 = vsub.f32 %v5056_v20, %v2032_v31  ;;  %v2022_v27 = vsub.f32 %v5001_v41, %v5088_v0  ;;  %v2026_v0 = vsub.f32 %v5031_v33, %v5125_v37 }
 0x999   :  { %2463 = vmax.xlane.f32.xlu0 %v2462_v44  ;;  %v2025_v44 = vsub.f32 %v4987_v63, %v5062_v28 }
 0x99a   :  { %v2062_v30 = vmul.f32 1.442695, %v2054_v34  ;;  %v2033_v61 = vsel %vm2029_vm1, %v2022_v27, -inf  ;;  %v2045_v28 = vsel %vm2029_vm1, %v2026_v0, -inf }
 0x99b   :  { %v2042_v52 = vsel %vm2029_vm1, %v2025_v44, -inf }
 0x99c   :  { %2460 = vmax.xlane.f32.xlu1 %v2459_v21  ;;  %3251 = vpow2.f32 %v2062_v30  ;;  %v2024_v21 = vsub.f32 %v5021_v2, %v5106_v53 }
 0x99d   :  { %2469 = vmax.xlane.f32.xlu0 %v2468_v17 }
 0x99e   :  { %v2039_v41 = vsel %vm2029_vm1, %v2024_v21, -inf }
 0x9a0   :  { %2466 = vmax.xlane.f32.xlu1 %v2465_v8 }
 0x9a4   :  { %2472 = vmax.xlane.f32.xlu1 %v2471_v42 }
 0x9a9   :  { %v5265_v26 = vpop.eup %3251 }
 0x9aa   :  { %v2078_v63 = vsel %vm2029_vm1, %v5265_v26, 0.0 }
 0x9ce   :  { %v2012_v9 = vpop.permute.xlu1 %2011 }
 0x9cf   :  { %v5221_v59 = vsub.f32 %v2133_v50, %v2012_v9  ;;  %v5232_v4 = vsub.f32 %v2278_v15, %v2012_v9  ;;  %v5274_v2 = vsub.f32 %v5067_v40, %v2012_v9 }
 0x9d0   :  { %v5225_v39 = vpop.permute.xlu0 %2009 }
 0x9d1   :  { %v2163_v38 = vsel %vm2029_vm1, %v5221_v59, -inf  ;;  %v5230_v20 = vsub.f32 %v2132_v13, %v5225_v39  ;;  %v5238_v54 = vsub.f32 %v2277_v25, %v5225_v39  ;;  %v2308_v7 = vsel %vm2029_vm1, %v5232_v4, -inf }
 0x9d2   :  { %2164 = vmax.xlane.f32.xlu1 %v2163_v38  ;;  %v2431_v46 = vpop.permute.xlu1 %2430  ;;  %v2051_v53 = vsel %vm2029_vm1, %v5274_v2, -inf }
 0x9d3   :  { %5839 = vst [vmem:[#allocation15_spill] sm:$0xff] %v5230_v20  ;;  %v2447_v5 = vadd.f32 %v2431_v46, %v5004_v55  ;;  %v2160_v16 = vsel %vm2029_vm1, %v5230_v20, -inf  ;;  %5840 = vst [vmem:[#allocation16_spill] sm:$0xff] %v5238_v54  ;;  %v2305_v32 = vsel %vm2029_vm1, %v5238_v54, -inf  ;;  %v5248_v55 = vsub.f32 %v2446_v62, %v5225_v39 }
 0x9d4   :  { %2161 = vmax.xlane.f32.xlu0 %v2160_v16 }
 0x9d5   :  { %v5243_v12 = vsub.f32 %v2447_v5, %v2012_v9  ;;  %5842 = vst [vmem:[#allocation30_spill] sm:$0xff] %v5248_v55  ;;  %v2474_v49 = vsel %vm2029_vm1, %v5248_v55, -inf }
 0x9d6   :  { %2309 = vmax.xlane.f32.xlu1 %v2308_v7 }
 0x9d7   :  { %5841 = vst [vmem:[#allocation17_spill] sm:$0xff] %v5243_v12  ;;  %v2477_v18 = vsel %vm2029_vm1, %v5243_v12, -inf }
 0x9d8   :  { %2306 = vmax.xlane.f32.xlu0 %v2305_v32 }
 0x9da   :  { %2478 = vmax.xlane.f32.xlu1 %v2477_v18 }
 0x9dc   :  { %2475 = vmax.xlane.f32.xlu0 %v2474_v49 }
 0x9de   :  { %2037 = vmax.xlane.f32.xlu1 %v2036_v29 }
 0x9e0   :  { %2034 = vmax.xlane.f32.xlu0 %v2033_v61 }
 0x9e2   :  { %2043 = vmax.xlane.f32.xlu1 %v2042_v52 }
 0x9e4   :  { %2040 = vmax.xlane.f32.xlu0 %v2039_v41 }
 0x9e6   :  { %2079 = vadd.xlane.f32.xlu1 %v2078_v63 }
 0x9e8   :  { %2046 = vmax.xlane.f32.xlu0 %v2045_v28 }
 0x9ec   :  { %2052 = vmax.xlane.f32.xlu0 %v2051_v53 }
 0xa06   :  { %v2147_v8 = vpop.xlane.xlu0 %2146 }
 0xa0a   :  { %v2150_v35 = vpop.xlane.xlu0 %2149 }
 0xa0d   :  { %v2144_v17 = vpop.xlane.xlu1 %2143 }
 0xa0e   :  { %v2156_v37 = vpop.xlane.xlu0 %2155  ;;  %v2166_v29 = vsub.f32 %v5109_v47, %v2144_v17  ;;  %v2167_v47 = vsub.f32 %v5093_v10, %v2147_v8 }
 0xa10   :  { %v2174_v53 = vmul.f32 1.442695, %v2166_v29  ;;  %v2170_v29 = vsub.f32 %v5114_v1, %v2156_v37 }
 0xa11   :  { %v2153_v42 = vpop.xlane.xlu1 %2152 }
 0xa12   :  { %v2289_v50 = vpop.xlane.xlu0 %2288 }
 0xa15   :  { %v5278_v33 = vpop.xlane.xlu1 %2158 }
 0xa16   :  { %v5284_v13 = vpop.xlane.xlu0 %2294 }
 0xa17   :  { %v2313_v37 = vsub.f32 %v5144_v24, %v5284_v13 }
 0xa19   :  { %v5280_v31 = vpop.xlane.xlu1 %2291  ;;  %v2323_v13 = vmul.f32 1.442695, %v2313_v37 }
 0xa1a   :  { %v5288_v9 = vpop.xlane.xlu0 %2300 }
 0xa1d   :  { %v5282_v34 = vpop.xlane.xlu1 %2297 }
 0xa1e   :  { %v5292_v25 = vpop.xlane.xlu0 %2457 }
 0xa21   :  { %v5286_v40 = vpop.xlane.xlu1 %2303 }
 0xa22   :  { %v5296_v38 = vpop.xlane.xlu0 %2463 }
 0xa25   :  { %v5290_v15 = vpop.xlane.xlu1 %2460 }
 0xa26   :  { %v5300_v5 = vpop.xlane.xlu0 %2469 }
 0xa29   :  { %v5294_v30 = vpop.xlane.xlu1 %2466 }
 0xa2d   :  { %v5298_v46 = vpop.xlane.xlu1 %2472 }
 0xa5b   :  { %v5302_v16 = vpop.xlane.xlu1 %2164 }
 0xa5d   :  { %v5304_v62 = vpop.xlane.xlu0 %2161 }
 0xa5e   :  { %5843 = vst [vmem:[#allocation18_spill] sm:$0xff] %v5304_v62  ;;  %v2168_v62 = vsub.f32 %v5100_v19, %v2150_v35  ;;  %v2169_v19 = vsub.f32 %v5123_v51, %v2153_v42  ;;  %v2312_v42 = vsub.f32 %v5153_v36, %v5280_v31  ;;  %v2314_v31 = vsub.f32 %v5166_v48, %v5282_v34 }
 0xa5f   :  { %v5306_v7 = vpop.xlane.xlu1 %2309  ;;  %v2316_v34 = vsub.f32 %v5180_v56, %v5286_v40  ;;  %v2481_v56 = vsub.f32 %v5192_v22, %v5290_v15  ;;  %v2483_v22 = vsub.f32 %v5203_v23, %v5294_v30  ;;  %v2485_v30 = vsub.f32 %v5210_v58, %v5298_v46 }
 0xa60   :  { %v2178_v17 = vmul.f32 1.442695, %v2168_v62  ;;  %v2180_v10 = vmul.f32 1.442695, %v2169_v19  ;;  %v2321_v36 = vmul.f32 1.442695, %v2312_v42 }
 0xa61   :  { %v5308_v32 = vpop.xlane.xlu0 %2306  ;;  %v2325_v48 = vmul.f32 1.442695, %v2314_v31  ;;  %v2494_v23 = vmul.f32 1.442695, %v2483_v22 }
 0xa62   :  { %5844 = vst [vmem:[#allocation19_spill] sm:$0xff] %v5308_v32 }
 0xa63   :  { %v5310_v18 = vpop.xlane.xlu1 %2478 }
 0xa64   :  { %5845 = vst [vmem:[#allocation29_spill] sm:$0xff] %v5310_v18 }
 0xa65   :  { %v5312_v49 = vpop.xlane.xlu0 %2475 }
 0xa66   :  { %5846 = vst [vmem:[#allocation12_spill] sm:$0xff] %v5312_v49 }
 0xa67   :  { %v2038_v61 = vpop.xlane.xlu1 %2037 }
 0xa68   :  { %v2056_v52 = vsub.f32 %v2023_v45, %v2038_v61 }
 0xa69   :  { %v2035_v41 = vpop.xlane.xlu0 %2034 }
 0xa6a   :  { %v2066_v63 = vmul.f32 1.442695, %v2056_v52  ;;  %v2055_v28 = vsub.f32 %v2022_v27, %v2035_v41 }
 0xa6b   :  { %v2044_v55 = vpop.xlane.xlu1 %2043 }
 0xa6c   :  { %3253 = vpow2.f32 %v2066_v63  ;;  %v2064_v54 = vmul.f32 1.442695, %v2055_v28  ;;  %v2058_v20 = vsub.f32 %v2025_v44, %v2044_v55  ;;  %v2176_v55 = vmul.f32 1.442695, %v2167_v47 }
 0xa6d   :  { %v2041_v12 = vpop.xlane.xlu0 %2040  ;;  %v2329_v47 = vmul.f32 1.442695, %v2316_v34 }
 0xa6e   :  { %3255 = vpow2.f32 %v2064_v54  ;;  %v2070_v32 = vmul.f32 1.442695, %v2058_v20  ;;  %v2057_v18 = vsub.f32 %v2024_v21, %v2041_v12  ;;  %v2182_v20 = vmul.f32 1.442695, %v2170_v29 }
 0xa6f   :  { %3257 = vpow2.f32 %v2174_v53  ;;  %v2080_v49 = vpop.xlane.xlu1 %2079  ;;  %v2311_v54 = vsub.f32 %v5130_v3, %v2289_v50  ;;  %v2171_v12 = vsub.f32 %v5139_v60, %v5278_v33  ;;  %v2490_v29 = vmul.f32 1.442695, %v2481_v56 }
 0xa70   :  { %3259 = vpow2.f32 %v2070_v32  ;;  %v2068_v45 = vmul.f32 1.442695, %v2057_v18 }
 0xa71   :  { %3261 = vrcp.f32 %v2080_v49  ;;  %v2047_v27 = vpop.xlane.xlu0 %2046  ;;  %v2319_v1 = vmul.f32 1.442695, %v2311_v54  ;;  %v2184_v3 = vmul.f32 1.442695, %v2171_v12  ;;  %v2498_v54 = vmul.f32 1.442695, %v2485_v30 }
 0xa72   :  { %3263 = vpow2.f32 %v2068_v45  ;;  %v2059_v61 = vsub.f32 %v2026_v0, %v2047_v27 }
 0xa73   :  { %3265 = vpow2.f32 %v2178_v17 }
 0xa74   :  { %v2072_v44 = vmul.f32 1.442695, %v2059_v61 }
 0xa76   :  { %3267 = vpow2.f32 %v2072_v44 }
 0xa77   :  { %3269 = vpow2.f32 %v2176_v55  ;;  %v2484_v55 = vsub.f32 %v5197_v11, %v5300_v5 }
 0xa78   :  { %3271 = vpow2.f32 %v2182_v20 }
 0xa79   :  { %v5322_v21 = vpop.eup %3253  ;;  %3273 = vpow2.f32 %v2180_v10 }
 0xa7a   :  { %v2084_v0 = vsel %vm2029_vm1, %v5322_v21, 0.0  ;;  %3275 = vpow2.f32 %v2319_v1 }
 0xa7b   :  { %v5326_v8 = vpop.eup %3255  ;;  %2085 = vadd.xlane.f32.xlu1 %v2084_v0  ;;  %3277 = vpow2.f32 %v2184_v3  ;;  %v2173_v0 = vsub.f32 %v5221_v59, %v5302_v16 }
 0xa7c   :  { %v5328_v51 = vpop.eup %3257  ;;  %v2081_v60 = vsel %vm2029_vm1, %v5326_v8, 0.0  ;;  %3279 = vpow2.f32 %v2321_v36 }
 0xa7d   :  { %v5334_v35 = vpop.eup %3259  ;;  %2082 = vadd.xlane.f32.xlu0 %v2081_v60  ;;  %v2190_v49 = vsel %vm2029_vm1, %v5328_v51, 0.0  ;;  %3281 = vpow2.f32 %v2323_v13  ;;  %v2188_v37 = vmul.f32 1.442695, %v2173_v0  ;;  %v5848_v13 = vld [vmem:[#allocation17_spill] sm:$0xff] }
 0xa7e   :  { %v3262_v33 = vpop.eup %3261  ;;  %v2090_v50 = vsel %vm2029_vm1, %v5334_v35, 0.0  ;;  %3283 = vpow2.f32 %v2325_v48 }
 0xa7f   :  { %v5340_v62 = vpop.eup %3263  ;;  %2091 = vadd.xlane.f32.xlu1 %v2090_v50  ;;  %v2110_v32 = vmul.f32 %v3262_v33, %v5265_v26  ;;  %v2315_v26 = vsub.f32 %v5159_v14, %v5288_v9  ;;  %v2480_v14 = vsub.f32 %v5172_v6, %v5292_v25  ;;  %v2482_v6 = vsub.f32 %v5186_v43, %v5296_v38 }
 0xa80   :  { %v2087_v18 = vsel %vm2029_vm1, %v5340_v62, 0.0  ;;  %v5351_v24 = vpop.eup %3265  ;;  %v5391_v43 = vsub.f32 %v5072_v57, %v5225_v39  ;;  %v2053_v57 = vpop.xlane.xlu0 %2052  ;;  %v2496_v39 = vmul.f32 1.442695, %v2484_v55  ;;  %v2318_v50 = vsub.f32 %v5232_v4, %v5306_v7 }
 0xa81   :  { %2088 = vadd.xlane.f32.xlu0 %v2087_v18  ;;  %2118 = vst.msk [vmem:[%s5699_s8] sm:$0xff] %vm2029_vm1, %v2110_v32  ;;  %v2327_v28 = vmul.f32 1.442695, %v2315_v26  ;;  %v2196_v9 = vsel %vm2029_vm1, %v5351_v24, 0.0  ;;  %v2488_v17 = vmul.f32 1.442695, %v2480_v14  ;;  %v2061_v10 = vsub.f32 %v5274_v2, %v2053_v57 }
 0xa82   :  { %v2492_v38 = vmul.f32 1.442695, %v2482_v6  ;;  %v2048_v11 = vsel %vm2029_vm1, %v5391_v43, -inf  ;;  %v2333_v31 = vmul.f32 1.442695, %v2318_v50  ;;  %v5847_v18 = vld [vmem:[#allocation29_spill] sm:$0xff] }
 0xa83   :  { %v5357_v52 = vpop.eup %3267  ;;  %2191 = vadd.xlane.f32.xlu1 %v2190_v49  ;;  %3285 = vpow2.f32 %v2327_v28  ;;  %v2076_v3 = vmul.f32 1.442695, %v2061_v10  ;;  %v2487_v26 = vsub.f32 %v5848_v13, %v5847_v18  ;;  %v5850_v50 = vld [vmem:[#allocation15_spill] sm:$0xff] }
 0xa84   :  { %v2093_v41 = vsel %vm2029_vm1, %v5357_v52, 0.0  ;;  %v5363_v63 = vpop.eup %3269  ;;  %3287 = vpow2.f32 %v2329_v47 }
 0xa85   :  { %2094 = vadd.xlane.f32.xlu0 %v2093_v41  ;;  %v5369_v53 = vpop.eup %3271  ;;  %v2193_v40 = vsel %vm2029_vm1, %v5363_v63, 0.0  ;;  %3289 = vpow2.f32 %v2488_v17  ;;  %v2502_v34 = vmul.f32 1.442695, %v2487_v26 }
 0xa86   :  { %v5375_v45 = vpop.eup %3273  ;;  %v2202_v25 = vsel %vm2029_vm1, %v5369_v53, 0.0  ;;  %3291 = vpow2.f32 %v2490_v29 }
 0xa87   :  { %2197 = vadd.xlane.f32.xlu1 %v2196_v9  ;;  %v5381_v27 = vpop.eup %3275  ;;  %v2199_v15 = vsel %vm2029_vm1, %v5375_v45, 0.0  ;;  %3293 = vpow2.f32 %v2492_v38 }
 0xa88   :  { %v5387_v61 = vpop.eup %3277  ;;  %v2335_v19 = vsel %vm2029_vm1, %v5381_v27, 0.0  ;;  %3295 = vpow2.f32 %v2494_v23 }
 0xa89   :  { %2194 = vadd.xlane.f32.xlu0 %v2193_v40  ;;  %v2205_v44 = vsel %vm2029_vm1, %v5387_v61, 0.0  ;;  %v5401_v20 = vpop.eup %3279  ;;  %3297 = vpow2.f32 %v2496_v39 }
 0xa8a   :  { %v5405_v5 = vpop.eup %3281  ;;  %v2338_v58 = vsel %vm2029_vm1, %v5401_v20, 0.0  ;;  %3299 = vpow2.f32 %v2498_v54 }
 0xa8b   :  { %2203 = vadd.xlane.f32.xlu1 %v2202_v25  ;;  %v5410_v46 = vpop.eup %3283  ;;  %v2341_v12 = vsel %vm2029_vm1, %v5405_v5, 0.0  ;;  %3301 = vpow2.f32 %v2076_v3 }
 0xa8c   :  { %v2344_v2 = vsel %vm2029_vm1, %v5410_v46, 0.0  ;;  %3303 = vpow2.f32 %v2188_v37  ;;  %v5849_v37 = vld [vmem:[#allocation18_spill] sm:$0xff] }
 0xa8d   :  { %2200 = vadd.xlane.f32.xlu0 %v2199_v15  ;;  %3305 = vpow2.f32 %v2333_v31 }
 0xa8e   :  { %3307 = vpow2.f32 %v2502_v34 }
 0xa8f   :  { %2336 = vadd.xlane.f32.xlu1 %v2335_v19 }
 0xa90   :  { %v5414_v1 = vpop.eup %3285 }
 0xa91   :  { %2206 = vadd.xlane.f32.xlu0 %v2205_v44  ;;  %v5420_v42 = vpop.eup %3287  ;;  %v2347_v60 = vsel %vm2029_vm1, %v5414_v1, 0.0 }
 0xa92   :  { %v5424_v33 = vpop.eup %3289  ;;  %v2350_v59 = vsel %vm2029_vm1, %v5420_v42, 0.0 }
 0xa93   :  { %2049 = vmax.xlane.f32.xlu1 %v2048_v11  ;;  %v5430_v16 = vpop.eup %3291  ;;  %v2504_v32 = vsel %vm2029_vm1, %v5424_v33, 0.0 }
 0xa94   :  { %v5434_v36 = vpop.eup %3293  ;;  %v2507_v4 = vsel %vm2029_vm1, %v5430_v16, 0.0 }
 0xa95   :  { %2339 = vadd.xlane.f32.xlu0 %v2338_v58  ;;  %v5440_v7 = vpop.eup %3295  ;;  %v2510_v49 = vsel %vm2029_vm1, %v5434_v36, 0.0 }
 0xa96   :  { %v5444_v48 = vpop.eup %3297  ;;  %v2513_v41 = vsel %vm2029_vm1, %v5440_v7, 0.0 }
 0xa97   :  { %2342 = vadd.xlane.f32.xlu1 %v2341_v12  ;;  %v5448_v28 = vpop.eup %3299  ;;  %v2516_v14 = vsel %vm2029_vm1, %v5444_v48, 0.0 }
 0xa98   :  { %v2519_v9 = vsel %vm2029_vm1, %v5448_v28, 0.0  ;;  %v5454_v47 = vpop.eup %3301 }
 0xa99   :  { %2345 = vadd.xlane.f32.xlu0 %v2344_v2  ;;  %v2099_v56 = vsel %vm2029_vm1, %v5454_v47, 0.0  ;;  %v5458_v40 = vpop.eup %3303 }
 0xa9a   :  { %v2211_v17 = vsel %vm2029_vm1, %v5458_v40, 0.0  ;;  %v5462_v6 = vpop.eup %3305 }
 0xa9b   :  { %2348 = vadd.xlane.f32.xlu1 %v2347_v60  ;;  %v2356_v25 = vsel %vm2029_vm1, %v5462_v6, 0.0  ;;  %v5466_v29 = vpop.eup %3307 }
 0xa9c   :  { %v2525_v22 = vsel %vm2029_vm1, %v5466_v29, 0.0 }
 0xa9d   :  { %2351 = vadd.xlane.f32.xlu0 %v2350_v59  ;;  %v2172_v59 = vsub.f32 %v5850_v50, %v5849_v37 }
 0xa9f   :  { %2505 = vadd.xlane.f32.xlu1 %v2504_v32  ;;  %v2186_v26 = vmul.f32 1.442695, %v2172_v59 }
 0xaa1   :  { %2508 = vadd.xlane.f32.xlu0 %v2507_v4  ;;  %v5852_v4 = vld [vmem:[#allocation16_spill] sm:$0xff] }
 0xaa3   :  { %2511 = vadd.xlane.f32.xlu1 %v2510_v49 }
 0xaa5   :  { %2514 = vadd.xlane.f32.xlu0 %v2513_v41 }
 0xaa7   :  { %2517 = vadd.xlane.f32.xlu1 %v2516_v14 }
 0xaa9   :  { %2520 = vadd.xlane.f32.xlu0 %v2519_v9 }
 0xaad   :  { %2100 = vadd.xlane.f32.xlu0 %v2099_v56 }
 0xab1   :  { %2212 = vadd.xlane.f32.xlu0 %v2211_v17  ;;  %v5853_v17 = vld [vmem:[#allocation12_spill] sm:$0xff] }
 0xab5   :  { %2357 = vadd.xlane.f32.xlu0 %v2356_v25  ;;  %v5854_v25 = vld [vmem:[#allocation30_spill] sm:$0xff] }
 0xab9   :  { %2526 = vadd.xlane.f32.xlu0 %v2525_v22  ;;  %v2486_v22 = vsub.f32 %v5854_v25, %v5853_v17 }
 0xb04   :  { %v2086_v15 = vpop.xlane.xlu1 %2085 }
 0xb05   :  { %3309 = vrcp.f32 %v2086_v15 }
 0xb06   :  { %v2083_v38 = vpop.xlane.xlu0 %2082 }
 0xb07   :  { %3311 = vrcp.f32 %v2083_v38 }
 0xb08   :  { %v2092_v55 = vpop.xlane.xlu1 %2091 }
 0xb09   :  { %3313 = vrcp.f32 %v2092_v55 }
 0xb0a   :  { %v2089_v19 = vpop.xlane.xlu0 %2088 }
 0xb0b   :  { %3315 = vrcp.f32 %v2089_v19 }
 0xb0c   :  { %v5470_v23 = vpop.xlane.xlu1 %2191 }
 0xb0e   :  { %v2095_v30 = vpop.xlane.xlu0 %2094 }
 0xb0f   :  { %3317 = vrcp.f32 %v2095_v30 }
 0xb10   :  { %v5472_v44 = vpop.xlane.xlu1 %2197 }
 0xb12   :  { %v3310_v57 = vpop.eup %3309  ;;  %v2195_v39 = vpop.xlane.xlu0 %2194 }
 0xb13   :  { %3319 = vrcp.f32 %v2195_v39  ;;  %v2112_v11 = vmul.f32 %v3310_v57, %v5322_v21 }
 0xb14   :  { %v3312_v54 = vpop.eup %3311  ;;  %v2204_v10 = vpop.xlane.xlu1 %2203 }
 0xb15   :  { %3321 = vrcp.f32 %v2204_v10  ;;  %v2111_v58 = vmul.f32 %v3312_v54, %v5326_v8  ;;  %2120 = vst.msk [vmem:[%s5699_s8 + $0x10] sm:$0xff] %vm2029_vm1, %v2112_v11 }
 0xb16   :  { %v3314_v12 = vpop.eup %3313  ;;  %v5480_v0 = vpop.xlane.xlu0 %2200 }
 0xb17   :  { %2119 = vst.msk [vmem:[%s5699_s8 + $0x8] sm:$0xff] %vm2029_vm1, %v2111_v58  ;;  %v2114_v21 = vmul.f32 %v3314_v12, %v5334_v35 }
 0xb18   :  { %v3316_v3 = vpop.eup %3315  ;;  %v2337_v2 = vpop.xlane.xlu1 %2336 }
 0xb19   :  { %3323 = vrcp.f32 %v2337_v2  ;;  %2122 = vst.msk [vmem:[%s5699_s8 + $0x20] sm:$0xff] %vm2029_vm1, %v2114_v21  ;;  %v2113_v8 = vmul.f32 %v3316_v3, %v5340_v62  ;;  %v5851_v62 = vld [vmem:[#allocation19_spill] sm:$0xff] }
 0xb1a   :  { %v5492_v60 = vpop.xlane.xlu0 %2206  ;;  %v2317_v49 = vsub.f32 %v5852_v4, %v5851_v62 }
 0xb1b   :  { %2121 = vst.msk [vmem:[%s5699_s8 + $0x18] sm:$0xff] %vm2029_vm1, %v2113_v8 }
 0xb1c   :  { %v3318_v35 = vpop.eup %3317  ;;  %v2050_v32 = vpop.xlane.xlu1 %2049  ;;  %v2331_v56 = vmul.f32 1.442695, %v2317_v49 }
 0xb1d   :  { %v2060_v31 = vsub.f32 %v5391_v43, %v2050_v32  ;;  %v2115_v18 = vmul.f32 %v3318_v35, %v5357_v52 }
 0xb1e   :  { %v5502_v13 = vpop.xlane.xlu0 %2339 }
 0xb1f   :  { %v2074_v34 = vmul.f32 1.442695, %v2060_v31  ;;  %2123 = vst.msk [vmem:[%s5699_s8 + $0x28] sm:$0xff] %vm2029_vm1, %v2115_v18 }
 0xb20   :  { %v3320_v41 = vpop.eup %3319  ;;  %v2343_v14 = vpop.xlane.xlu1 %2342 }
 0xb21   :  { %3325 = vpow2.f32 %v2074_v34  ;;  %v2223_v9 = vmul.f32 %v3320_v41, %v5363_v63  ;;  %v2500_v63 = vmul.f32 1.442695, %v2486_v22 }
 0xb22   :  { %v3322_v43 = vpop.eup %3321  ;;  %3327 = vrcp.f32 %v2343_v14  ;;  %v5511_v52 = vpop.xlane.xlu0 %2345 }
 0xb23   :  { %3329 = vpow2.f32 %v2186_v26  ;;  %2240 = vrot.lane.b32.xlu0 %v2223_v9, %s3433_s16  ;;  %v2226_v38 = vmul.f32 %v3322_v43, %v5369_v53 }
 0xb24   :  { %v2349_v15 = vpop.xlane.xlu1 %2348 }
 0xb25   :  { %3331 = vrcp.f32 %v2349_v15 }
 0xb26   :  { %v3324_v55 = vpop.eup %3323  ;;  %v2352_v19 = vpop.xlane.xlu0 %2351  ;;  %3333 = vpow2.f32 %v2331_v56 }
 0xb27   :  { %2246 = vrot.lane.b32.xlu0 %v2226_v38, %s3433_s16  ;;  %v2367_v57 = vmul.f32 %v3324_v55, %v5381_v27 }
 0xb28   :  { %v2506_v30 = vpop.xlane.xlu1 %2505 }
 0xb29   :  { %3335 = vrcp.f32 %v2506_v30 }
 0xb2a   :  { %v2509_v39 = vpop.xlane.xlu0 %2508  ;;  %3337 = vpow2.f32 %v2500_v63 }
 0xb2b   :  { %2383 = vrot.lane.b32.xlu0 %v2367_v57, %s3434_s0 }
 0xb2c   :  { %v2512_v11 = vpop.xlane.xlu1 %2511 }
 0xb2d   :  { %3339 = vrcp.f32 %v2512_v11 }
 0xb2e   :  { %v5520_v54 = vpop.eup %3325  ;;  %v2515_v53 = vpop.xlane.xlu0 %2514 }
 0xb2f   :  { %v3328_v10 = vpop.eup %3327  ;;  %v2096_v58 = vsel %vm2029_vm1, %v5520_v54, 0.0 }
 0xb30   :  { %v5524_v12 = vpop.eup %3329  ;;  %2097 = vadd.xlane.f32.xlu1 %v2096_v58  ;;  %v2518_v21 = vpop.xlane.xlu1 %2517  ;;  %v2369_v27 = vmul.f32 %v3328_v10, %v5405_v5 }
 0xb31   :  { %3341 = vrcp.f32 %v2518_v21  ;;  %v2208_v8 = vsel %vm2029_vm1, %v5524_v12, 0.0 }
 0xb32   :  { %v3332_v3 = vpop.eup %3331  ;;  %2387 = vrot.lane.b32.xlu0 %v2369_v27, %s3434_s0  ;;  %v2521_v2 = vpop.xlane.xlu0 %2520 }
 0xb33   :  { %v2371_v37 = vmul.f32 %v3332_v3, %v5414_v1  ;;  %v5531_v50 = vpop.eup %3333 }
 0xb34   :  { %2209 = vadd.xlane.f32.xlu1 %v2208_v8  ;;  %v2353_v5 = vsel %vm2029_vm1, %v5531_v50, 0.0 }
 0xb36   :  { %v3336_v59 = vpop.eup %3335  ;;  %2391 = vrot.lane.b32.xlu0 %v2371_v37, %s3434_s0  ;;  %v2101_v35 = vpop.xlane.xlu0 %2100 }
 0xb37   :  { %3343 = vrcp.f32 %v2101_v35  ;;  %v2536_v32 = vmul.f32 %v3336_v59, %v5424_v33  ;;  %v5537_v31 = vpop.eup %3337 }
 0xb38   :  { %2354 = vadd.xlane.f32.xlu1 %v2353_v5  ;;  %3345 = vrcp.f32 %v5470_v23  ;;  %v2522_v1 = vsel %vm2029_vm1, %v5537_v31, 0.0 }
 0xb39   :  { %3347 = vrcp.f32 %v5472_v44 }
 0xb3a   :  { %v3340_v18 = vpop.eup %3339  ;;  %2552 = vrot.lane.b32.xlu0 %v2536_v32, %s3435_s17  ;;  %3349 = vrcp.f32 %v5480_v0 }
 0xb3b   :  { %v2538_v26 = vmul.f32 %v3340_v18, %v5434_v36  ;;  %3351 = vrcp.f32 %v5492_v60 }
 0xb3c   :  { %2523 = vadd.xlane.f32.xlu1 %v2522_v1  ;;  %3353 = vrcp.f32 %v5502_v13 }
 0xb3d   :  { %3355 = vrcp.f32 %v5511_v52 }
 0xb3e   :  { %v3342_v62 = vpop.eup %3341  ;;  %2556 = vrot.lane.b32.xlu0 %v2538_v26, %s3435_s17  ;;  %3357 = vrcp.f32 %v2352_v19 }
 0xb3f   :  { %v2540_v33 = vmul.f32 %v3342_v62, %v5444_v48  ;;  %3359 = vrcp.f32 %v2509_v39 }
 0xb40   :  { %3361 = vrcp.f32 %v2515_v53 }
 0xb41   :  { %3363 = vrcp.f32 %v2521_v2 }
 0xb42   :  { %2560 = vrot.lane.b32.xlu0 %v2540_v33, %s3435_s17 }
 0xb44   :  { %v3344_v4 = vpop.eup %3343 }
 0xb45   :  { %v2117_v23 = vmul.f32 %v3344_v4, %v5454_v47  ;;  %v3346_v36 = vpop.eup %3345 }
 0xb46   :  { %v2222_v44 = vmul.f32 %v3346_v36, %v5328_v51  ;;  %v3348_v48 = vpop.eup %3347 }
 0xb47   :  { %2125 = vst.msk [vmem:[%s5699_s8 + $0x38] sm:$0xff] %vm2029_vm1, %v2117_v23  ;;  %v2224_v0 = vmul.f32 %v3348_v48, %v5351_v24  ;;  %v3350_v47 = vpop.eup %3349  ;;  %v2213_v24 = vpop.xlane.xlu0 %2212 }
 0xb48   :  { %v2225_v60 = vmul.f32 %v3350_v47, %v5375_v45  ;;  %v3352_v49 = vpop.eup %3351  ;;  %3365 = vrcp.f32 %v2213_v24 }
 0xb49   :  { %v2227_v13 = vmul.f32 %v3352_v49, %v5387_v61  ;;  %v3354_v51 = vpop.eup %3353 }
 0xb4a   :  { %v2368_v34 = vmul.f32 %v3354_v51, %v5401_v20  ;;  %v3356_v41 = vpop.eup %3355 }
 0xb4b   :  { %v2370_v14 = vmul.f32 %v3356_v41, %v5410_v46  ;;  %v3358_v45 = vpop.eup %3357  ;;  %v2358_v9 = vpop.xlane.xlu0 %2357 }
 0xb4c   :  { %v2372_v61 = vmul.f32 %v3358_v45, %v5420_v42  ;;  %v3360_v43 = vpop.eup %3359  ;;  %3367 = vrcp.f32 %v2358_v9 }
 0xb4d   :  { %2238 = vrot.lane.b32.xlu1 %v2222_v44, %s3433_s16  ;;  %v2537_v20 = vmul.f32 %v3360_v43, %v5430_v16  ;;  %v3362_v52 = vpop.eup %3361 }
 0xb4e   :  { %v2539_v46 = vmul.f32 %v3362_v52, %v5440_v7  ;;  %v3364_v17 = vpop.eup %3363 }
 0xb4f   :  { %v2527_v56 = vpop.xlane.xlu0 %2526  ;;  %v2541_v25 = vmul.f32 %v3364_v17, %v5448_v28 }
 0xb50   :  { %3369 = vrcp.f32 %v2527_v56 }
 0xb51   :  { %2242 = vrot.lane.b32.xlu1 %v2224_v0, %s3433_s16 }
 0xb55   :  { %2244 = vrot.lane.b32.xlu1 %v2225_v60, %s3433_s16  ;;  %v3366_v22 = vpop.eup %3365 }
 0xb56   :  { %v2229_v42 = vmul.f32 %v3366_v22, %v5458_v40 }
 0xb59   :  { %2248 = vrot.lane.b32.xlu1 %v2227_v13, %s3433_s16  ;;  %v3368_v15 = vpop.eup %3367 }
 0xb5a   :  { %v2374_v16 = vmul.f32 %v3368_v15, %v5462_v6 }
 0xb5d   :  { %2385 = vrot.lane.b32.xlu1 %v2368_v34, %s3434_s0  ;;  %v3370_v38 = vpop.eup %3369 }
 0xb5e   :  { %v2543_v7 = vmul.f32 %v3370_v38, %v5466_v29 }
 0xb61   :  { %2389 = vrot.lane.b32.xlu1 %v2370_v14, %s3434_s0 }
 0xb65   :  { %2393 = vrot.lane.b32.xlu1 %v2372_v61, %s3434_s0 }
 0xb69   :  { %2554 = vrot.lane.b32.xlu1 %v2537_v20, %s3435_s17 }
 0xb6d   :  { %2558 = vrot.lane.b32.xlu1 %v2539_v46, %s3435_s17 }
 0xb71   :  { %2562 = vrot.lane.b32.xlu1 %v2541_v25, %s3435_s17 }
 0xb75   :  { %2252 = vrot.lane.b32.xlu1 %v2229_v42, %s3433_s16 }
 0xb79   :  { %2397 = vrot.lane.b32.xlu1 %v2374_v16, %s3434_s0 }
 0xb7d   :  { %2566 = vrot.lane.b32.xlu1 %v2543_v7, %s3435_s17 }
 0xb95   :  { %v2241_v55 = vpop.permute.xlu0 %2240 }
 0xb96   :  { %2264 = vst.msk [vmem:[%s5699_s8 + $0x8] sm:$0xff] %vm2262_vm2, %v2241_v55 }
 0xb99   :  { %v2247_v28 = vpop.permute.xlu0 %2246 }
 0xb9a   :  { %2267 = vst.msk [vmem:[%s5699_s8 + $0x20] sm:$0xff] %vm2262_vm2, %v2247_v28 }
 0xb9d   :  { %v2384_v40 = vpop.permute.xlu0 %2383 }
 0xba4   :  { %v2388_v6 = vpop.permute.xlu0 %2387 }
 0xba8   :  { %v2392_v19 = vpop.permute.xlu0 %2391 }
 0xba9   :  { %2412 = vst.msk [vmem:[%s5699_s8 + $0x20] sm:$0xff] %vm2407_vm3, %v2392_v19 }
 0xbac   :  { %v2553_v29 = vpop.permute.xlu0 %2552 }
 0xbb0   :  { %v2557_v63 = vpop.permute.xlu0 %2556 }
 0xbb4   :  { %v2561_v30 = vpop.permute.xlu0 %2560 }
 0xbb5   :  { %2581 = vst.msk [vmem:[%s5699_s8 + $0x20] sm:$0xff] %vm2576_vm4, %v2561_v30 }
 0xbb9   :  { %v2098_v57 = vpop.xlane.xlu1 %2097 }
 0xbba   :  { %3371 = vrcp.f32 %v2098_v57 }
 0xbbd   :  { %v2210_v39 = vpop.xlane.xlu1 %2209 }
 0xbbe   :  { %3373 = vrcp.f32 %v2210_v39 }
 0xbc1   :  { %v2355_v11 = vpop.xlane.xlu1 %2354 }
 0xbc2   :  { %3375 = vrcp.f32 %v2355_v11 }
 0xbc5   :  { %v2524_v53 = vpop.xlane.xlu1 %2523 }
 0xbc6   :  { %3377 = vrcp.f32 %v2524_v53 }
 0xbc7   :  { %v3372_v10 = vpop.eup %3371 }
 0xbc8   :  { %v2116_v58 = vmul.f32 %v3372_v10, %v5520_v54 }
 0xbc9   :  { %v2239_v21 = vpop.permute.xlu1 %2238 }
 0xbca   :  { %2263 = vst.msk [vmem:[%s5699_s8] sm:$0xff] %vm2262_vm2, %v2239_v21 }
 0xbcb   :  { %2124 = vst.msk [vmem:[%s5699_s8 + $0x30] sm:$0xff] %vm2029_vm1, %v2116_v58  ;;  %v3374_v27 = vpop.eup %3373 }
 0xbcc   :  { %2408 = vst.msk [vmem:[%s5699_s8] sm:$0xff] %vm2407_vm3, %v2384_v40  ;;  %v2228_v54 = vmul.f32 %v3374_v27, %v5524_v12 }
 0xbcd   :  { %2577 = vst.msk [vmem:[%s5699_s8] sm:$0xff] %vm2576_vm4, %v2553_v29  ;;  %v2243_v3 = vpop.permute.xlu1 %2242 }
 0xbce   :  { %2265 = vst.msk [vmem:[%s5699_s8 + $0x10] sm:$0xff] %vm2262_vm2, %v2243_v3  ;;  %2250 = vrot.lane.b32.xlu0 %v2228_v54, %s3433_s16 }
 0xbcf   :  { %v3376_v2 = vpop.eup %3375  ;;  %2410 = vst.msk [vmem:[%s5699_s8 + $0x10] sm:$0xff] %vm2407_vm3, %v2388_v6 }
 0xbd0   :  { %2579 = vst.msk [vmem:[%s5699_s8 + $0x10] sm:$0xff] %vm2576_vm4, %v2557_v63  ;;  %v2373_v12 = vmul.f32 %v3376_v2, %v5531_v50 }
 0xbd1   :  { %v2245_v8 = vpop.permute.xlu1 %2244 }
 0xbd2   :  { %2266 = vst.msk [vmem:[%s5699_s8 + $0x18] sm:$0xff] %vm2262_vm2, %v2245_v8  ;;  %2395 = vrot.lane.b32.xlu0 %v2373_v12, %s3434_s0 }
 0xbd3   :  { %v3378_v37 = vpop.eup %3377 }
 0xbd4   :  { %v2542_v59 = vmul.f32 %v3378_v37, %v5537_v31 }
 0xbd5   :  { %v2249_v35 = vpop.permute.xlu1 %2248 }
 0xbd6   :  { %2268 = vst.msk [vmem:[%s5699_s8 + $0x28] sm:$0xff] %vm2262_vm2, %v2249_v35  ;;  %2564 = vrot.lane.b32.xlu0 %v2542_v59, %s3435_s17 }
 0xbd9   :  { %v2386_v50 = vpop.permute.xlu1 %2385 }
 0xbda   :  { %2409 = vst.msk [vmem:[%s5699_s8 + $0x8] sm:$0xff] %vm2407_vm3, %v2386_v50 }
 0xbdd   :  { %v2390_v5 = vpop.permute.xlu1 %2389 }
 0xbde   :  { %2411 = vst.msk [vmem:[%s5699_s8 + $0x18] sm:$0xff] %vm2407_vm3, %v2390_v5 }
 0xbe1   :  { %v2394_v32 = vpop.permute.xlu1 %2393 }
 0xbe2   :  { %2413 = vst.msk [vmem:[%s5699_s8 + $0x28] sm:$0xff] %vm2407_vm3, %v2394_v32 }
 0xbe5   :  { %v2555_v31 = vpop.permute.xlu1 %2554 }
 0xbe6   :  { %2578 = vst.msk [vmem:[%s5699_s8 + $0x8] sm:$0xff] %vm2576_vm4, %v2555_v31 }
 0xbe9   :  { %v2559_v18 = vpop.permute.xlu1 %2558 }
 0xbea   :  { %2580 = vst.msk [vmem:[%s5699_s8 + $0x18] sm:$0xff] %vm2576_vm4, %v2559_v18 }
 0xbed   :  { %v2563_v1 = vpop.permute.xlu1 %2562 }
 0xbee   :  { %2582 = vst.msk [vmem:[%s5699_s8 + $0x28] sm:$0xff] %vm2576_vm4, %v2563_v1 }
 0xbf1   :  { %v2253_v26 = vpop.permute.xlu1 %2252 }
 0xbf2   :  { %2270 = vst.msk [vmem:[%s5699_s8 + $0x38] sm:$0xff] %vm2262_vm2, %v2253_v26 }
 0xbf5   :  { %v2398_v62 = vpop.permute.xlu1 %2397 }
 0xbf6   :  { %2415 = vst.msk [vmem:[%s5699_s8 + $0x38] sm:$0xff] %vm2407_vm3, %v2398_v62 }
 0xbf9   :  { %v2567_v33 = vpop.permute.xlu1 %2566 }
 0xbfa   :  { %2584 = vst.msk [vmem:[%s5699_s8 + $0x38] sm:$0xff] %vm2576_vm4, %v2567_v33 }
 0xc40   :  { %v2251_v4 = vpop.permute.xlu0 %2250 }
 0xc41   :  { %2269 = vst.msk [vmem:[%s5699_s8 + $0x30] sm:$0xff] %vm2262_vm2, %v2251_v4 }
 0xc44   :  { %v2396_v23 = vpop.permute.xlu0 %2395 }
 0xc45   :  { %2414 = vst.msk [vmem:[%s5699_s8 + $0x30] sm:$0xff] %vm2407_vm3, %v2396_v23 }
 0xc48   :  { %v2565_v36 = vpop.permute.xlu0 %2564 }
 0xc49   :  { %2583 = vst.msk [vmem:[%s5699_s8 + $0x30] sm:$0xff] %vm2576_vm4, %v2565_v36 }

</bundles_post_ra>
